<compile_context>
chip_gen: v5e
topology: v5e:2x2
jax: 0.10.0
libtpu: 0.0.40
codegen_flags: <defaults>
</compile_context>

<pallas_src>
import functools

import jax
import jax.numpy as jnp
from jax import lax
from jax.experimental import pallas as pl
from jax.experimental.pallas import tpu as pltpu

_SENTINEL = 1e18  # padded / ignored points (squared dist ~3e36, finite in f32)


def _round_up(x, m):
    return ((x + m - 1) // m) * m


def _vmem_limit_bytes(tq, tm, n_chunks):
    """Derive the scoped-VMEM request from the actual block sizes."""
    f32 = 4
    q_blk = tq * 128 * f32             # (tq, 3): 3 lanes padded to 128
    s_blk = n_chunks * 8 * tm * f32    # (n_chunks, 3, tm): 3 sublanes -> 8
    d1_blk = tq * 128 * f32            # (tq, 1): 1 lane padded to 128
    d2_blk = n_chunks * 8 * tm * f32   # (n_chunks, 1, tm): 1 sublane -> 8
    blocks = 2 * (q_blk + s_blk + d1_blk + d2_blk)   # pipeline double-buffers
    temps = 12 * tq * tm * f32         # hoisted splats + per-chunk dx/dy/dz/d
    est = blocks + temps
    # Generous headroom; stays under v7x's 64 MiB physical VMEM.
    return int(min(max(2 * est, 32 * 1024 * 1024), 60 * 1024 * 1024))


def _fused_chamfer_kernel(q_ref, s_ref, d1_ref, d2_ref, *, unroll):
    """One query tile vs. the full (resident, chunked) search cloud.

    q_ref  : (tq, 3)            query tile (points on sublanes, coords on lanes)
    s_ref  : (n_chunks, 3, tm)  full search cloud; coords on sublanes,
                                points on lanes (lane-dense, small VMEM)
    d1_ref : (tq, 1)            per-query-point min squared distance
    d2_ref : (n_chunks, 1, tm)  per-search-point running min, accumulated
                                across the "arbitrary" query-tile grid axis
    """
    i = pl.program_id(2)
    n_chunks, _, tm = s_ref.shape
    tq = q_ref.shape[0]

    q = q_ref[...]                                   # f32 already, no astype
    # Lane-splat the query coordinates ONCE per grid step (hoisted out of the
    # chunk loop; JAX does not CSE broadcast_in_dim).
    qx = jnp.broadcast_to(q[:, 0:1], (tq, tm))
    qy = jnp.broadcast_to(q[:, 1:2], (tq, tm))
    qz = jnp.broadcast_to(q[:, 2:3], (tq, tm))

    # First query tile of this (batch, split): init the resident dist2 block.
    @pl.when(i == 0)
    def _():
        d2_ref[...] = jnp.full(d2_ref.shape, jnp.inf, dtype=d2_ref.dtype)

    def body(c, run1):
        s = s_ref[c]                                 # (3, tm) chunk, lane-major
        dx = qx - s[0:1, :]                          # exact per-coordinate diffs
        dy = qy - s[1:2, :]
        dz = qz - s[2:3, :]
        d = dx * dx + dy * dy + dz * dz              # (tq, tm) squared L2, f32
        # dist1: min over the search (lane) axis for each query point.
        run1 = jnp.minimum(run1, jnp.min(d, axis=1, keepdims=True))   # (tq, 1)
        # dist2: min over the query (sublane) axis, accumulated into the
        # resident output block shared across the arbitrary i axis.
        col = jnp.min(d, axis=0, keepdims=True)                        # (1, tm)
        d2_ref[c] = jnp.minimum(d2_ref[c], col)
        return run1

    init = jnp.full((tq, 1), jnp.inf, dtype=jnp.float32)
    d1_ref[...] = lax.fori_loop(0, n_chunks, body, init, unroll=unroll)


def _fused_min_sqdist(query, search, *, query_mask=None, search_mask=None,
                      tq=512, tm=512):
    """Returns (dist1 (B, Nq), dist2 (B, M)) — both directed squared-L2 mins."""
    B, Nq, C = query.shape
    B2, M, C2 = search.shape
    assert C == 3 and C2 == 3 and B == B2

    query = query.astype(jnp.float32)
    search = search.astype(jnp.float32)

    # ignore_zeros: masked points must never win either min.
    if query_mask is not None:
        query = jnp.where(query_mask[..., None], query, _SENTINEL)
    if search_mask is not None:
        search = jnp.where(search_mask[..., None], search, _SENTINEL)

    # Query points on sublanes (mult of 8), search points on lanes (mult 128).
    tq = max(8, min(tq, _round_up(Nq, 8)))
    tm = max(128, min(tm, _round_up(M, 128)))

    n_q_tiles = pl.cdiv(Nq, tq)
    # >= 2 "parallel" grid steps even at B == 1 so both v7x TensorCores work.
    P = 2 if n_q_tiles >= 2 else 1
    I = pl.cdiv(n_q_tiles, P)
    Np = P * I * tq
    n_chunks = pl.cdiv(M, tm)
    Mp = n_chunks * tm

    # Padded points get the sentinel: they never win either min, and their own
    # (huge) distances are sliced off / masked out of the means.
    if Np != Nq:
        query = jnp.pad(query, ((0, 0), (0, Np - Nq), (0, 0)),
                        constant_values=_SENTINEL)
    if Mp != M:
        search = jnp.pad(search, ((0, 0), (0, Mp - M), (0, 0)),
                         constant_values=_SENTINEL)

    # Search cloud: (B, Mp, 3) -> (B, n_chunks, 3, tm).  Coords on sublanes,
    # points on lanes: resident block costs ~32 B/point instead of 512 B/point.
    s4 = jnp.transpose(search.reshape(B, n_chunks, tm, 3), (0, 1, 3, 2))

    unroll = n_chunks if n_chunks <= 8 else 2
    kernel = functools.partial(_fused_chamfer_kernel, unroll=unroll)

    d1, d2 = pl.pallas_call(
        kernel,
        out_shape=(jax.ShapeDtypeStruct((B, Np, 1), jnp.float32),
                   jax.ShapeDtypeStruct((B, P, n_chunks, 1, tm), jnp.float32)),
        grid_spec=pltpu.PrefetchScalarGridSpec(
            num_scalar_prefetch=0,
            grid=(B, P, I),
            in_specs=[
                # query tile: points x coords
                pl.BlockSpec((None, tq, 3),
                             lambda b, p, i, I=I: (b, p * I + i, 0)),
                # search cloud: full-extent, constant index -> resident per batch
                pl.BlockSpec((None, n_chunks, 3, tm),
                             lambda b, p, i: (b, 0, 0, 0)),
            ],
            out_specs=[
                # dist1: written once per grid step
                pl.BlockSpec((None, tq, 1),
                             lambda b, p, i, I=I: (b, p * I + i, 0)),
                # dist2: resident accumulator across the arbitrary i axis
                pl.BlockSpec((None, None, n_chunks, 1, tm),
                             lambda b, p, i: (b, p, 0, 0, 0)),
            ],
        ),
        compiler_params=pltpu.CompilerParams(
            dimension_semantics=("parallel", "parallel", "arbitrary"),
            vmem_limit_bytes=_vmem_limit_bytes(tq, tm, n_chunks)),
    )(query, s4)

    dist1 = d1[:, :Nq, 0]                                   # (B, Nq)
    dist2 = jnp.min(d2.reshape(B, P, Mp), axis=1)[:, :M]    # (B, M)
    return dist1, dist2


def _masked_mean(x, mask):
    if mask is None:
        return jnp.mean(x)
    m = mask.astype(x.dtype)
    return jnp.sum(x * m) / jnp.maximum(jnp.sum(m), 1.0)


def chamfer_distance_l2_split(xyz1, xyz2, *, ignore_zeros=False, tq=512, tm=512):
    """Equivalent of ChamferDistanceL2_split.forward -> (mean(dist1), mean(dist2))."""
    B = xyz1.shape[0]
    mask1 = mask2 = None
    if ignore_zeros and B == 1:
        mask1 = jnp.sum(xyz1, axis=2) != 0     # (1, N)
        mask2 = jnp.sum(xyz2, axis=2) != 0     # (1, M)

    d1, d2 = _fused_min_sqdist(xyz1, xyz2, query_mask=mask1, search_mask=mask2,
                               tq=tq, tm=tm)
    return _masked_mean(d1, mask1), _masked_mean(d2, mask2)
    # TODO(synk): custom backward (chamfer.backward) is not implemented; forward only.


# ----------------------------- reference ------------------------------------

def _reference(xyz1, xyz2):
    diff = xyz1[:, :, None, :] - xyz2[:, None, :, :]      # (B, N, M, 3)
    sq = jnp.sum(diff * diff, axis=-1)                    # (B, N, M)
    d1 = jnp.min(sq, axis=2)                              # (B, N)
    d2 = jnp.min(sq, axis=1)                              # (B, M)
    return jnp.mean(d1), jnp.mean(d2)


def _reference_ignore_zeros(xyz1, xyz2):
    m1 = jnp.sum(xyz1[0], axis=1) != 0
    m2 = jnp.sum(xyz2[0], axis=1) != 0
    return _reference(xyz1[0][m1][None], xyz2[0][m2][None])


if __name__ == "__main__":
    key = jax.random.PRNGKey(0)
    k1, k2, k3, k4 = jax.random.split(key, 4)

    # Check 1: batched clouds.  Exercises the query split (P=2), dist2
    # accumulation across the arbitrary query-tile axis, sentinel padding on
    # both clouds, and the multi-chunk search loop.
    B, N, M = 2, 2000, 1000
    xyz1 = jax.random.normal(k1, (B, N, 3), dtype=jnp.float32)
    xyz2 = jax.random.normal(k2, (B, M, 3), dtype=jnp.float32)

    fn = jax.jit(chamfer_distance_l2_split)
    out1, out2 = fn(xyz1, xyz2)
    out1, out2 = jax.block_until_ready((out1, out2))

    ref1, ref2 = _reference(xyz1, xyz2)
    assert out1.shape == () and out2.shape == ()
    assert jnp.allclose(out1, ref1, atol=1e-5, rtol=1e-5), (out1, ref1)
    assert jnp.allclose(out2, ref2, atol=1e-5, rtol=1e-5), (out2, ref2)

    # Check 2: ignore_zeros path (batch_size == 1 with explicit zero points).
    xyz1b = jax.random.normal(k3, (1, 128, 3), dtype=jnp.float32)
    xyz2b = jax.random.normal(k4, (1, 200, 3), dtype=jnp.float32)
    xyz1b = xyz1b.at[0, 5:20, :].set(0.0)
    xyz2b = xyz2b.at[0, 50:90, :].set(0.0)

    o1, o2 = chamfer_distance_l2_split(xyz1b, xyz2b, ignore_zeros=True)
    o1, o2 = jax.block_until_ready((o1, o2))
    r1, r2 = _reference_ignore_zeros(xyz1b, xyz2b)
    assert jnp.allclose(o1, r1, atol=1e-5, rtol=1e-5), (o1, r1)
    assert jnp.allclose(o2, r2, atol=1e-5, rtol=1e-5), (o2, r2)

    print("KERNEL_OK")
</pallas_src>

<mosaic_0001>
module attributes {stable_mosaic.version = 11 : i64} {
  func.func @_fused_chamfer_kernel(%arg0: i32, %arg1: i32, %arg2: i32, %arg3: memref<1x512x3xf32, #tpu.memory_space<vmem>>, %arg4: memref<1x2x3x512xf32, #tpu.memory_space<vmem>>, %arg5: memref<1x512x1xf32, #tpu.memory_space<vmem>>, %arg6: memref<1x1x2x1x512xf32, #tpu.memory_space<vmem>>) attributes {dimension_semantics = [#tpu.dimension_semantics<parallel>, #tpu.dimension_semantics<parallel>, #tpu.dimension_semantics<arbitrary>], iteration_bounds = array<i64: 2, 2, 2>, scalar_prefetch = 0 : i64, scratch_operands = 0 : i64, tpu.core_type = #tpu.core_type<tc>, window_params = [{transform_indices = @transform_0, window_bounds = array<i64: 1, 512, 3>}, {transform_indices = @transform_1, window_bounds = array<i64: 1, 2, 3, 512>}, {transform_indices = @transform_2, window_bounds = array<i64: 1, 512, 1>}, {transform_indices = @transform_3, window_bounds = array<i64: 1, 1, 2, 1, 512>}]} {
    %c0 = arith.constant 0 : index
    %c0_0 = arith.constant 0 : index
    %c0_1 = arith.constant 0 : index
    %0 = vector.load %arg3[%c0, %c0_0, %c0_1] : memref<1x512x3xf32, #tpu.memory_space<vmem>>, vector<1x512x3xf32>
    %1 = vector.shape_cast %0 : vector<1x512x3xf32> to vector<512x3xf32>
    %2 = vector.extract_strided_slice %1 {offsets = [0, 0], sizes = [512, 1], strides = [1, 1]} : vector<512x3xf32> to vector<512x1xf32>
    %3 = vector.shape_cast %2 : vector<512x1xf32> to vector<512x1xf32>
    %4 = vector.broadcast %3 : vector<512x1xf32> to vector<512x512xf32>
    %5 = vector.extract_strided_slice %1 {offsets = [0, 1], sizes = [512, 1], strides = [1, 1]} : vector<512x3xf32> to vector<512x1xf32>
    %6 = vector.shape_cast %5 : vector<512x1xf32> to vector<512x1xf32>
    %7 = vector.broadcast %6 : vector<512x1xf32> to vector<512x512xf32>
    %8 = vector.extract_strided_slice %1 {offsets = [0, 2], sizes = [512, 1], strides = [1, 1]} : vector<512x3xf32> to vector<512x1xf32>
    %9 = vector.shape_cast %8 : vector<512x1xf32> to vector<512x1xf32>
    %10 = vector.broadcast %9 : vector<512x1xf32> to vector<512x512xf32>
    %c0_i32 = arith.constant 0 : i32
    %11 = arith.cmpi eq, %arg2, %c0_i32 : i32
    %12 = arith.extui %11 : i1 to i32
    %c0_i32_2 = arith.constant 0 : i32
    %13 = arith.cmpi ne, %12, %c0_i32_2 : i32
    scf.if %13 {
      %cst_33 = arith.constant 0x7F800000 : f32
      %78 = vector.broadcast %cst_33 : f32 to vector<2x1x512xf32>
      %c0_34 = arith.constant 0 : index
      %c0_35 = arith.constant 0 : index
      %c0_36 = arith.constant 0 : index
      %c0_37 = arith.constant 0 : index
      %c0_38 = arith.constant 0 : index
      %79 = vector.load %arg6[%c0_34, %c0_35, %c0_36, %c0_37, %c0_38] : memref<1x1x2x1x512xf32, #tpu.memory_space<vmem>>, vector<1x1x2x1x512xf32>
      %80 = vector.shape_cast %79 : vector<1x1x2x1x512xf32> to vector<2x1x512xf32>
      %81 = vector.shape_cast %78 : vector<2x1x512xf32> to vector<1x1x2x1x512xf32>
      tpu.vector_store %arg6[%c0_34, %c0_35, %c0_36, %c0_37, %c0_38], %81 {strides = array<i32>} : memref<1x1x2x1x512xf32, #tpu.memory_space<vmem>>, vector<1x1x2x1x512xf32>,
    } else {
    }
    %cst = arith.constant 0x7F800000 : f32
    %14 = vector.broadcast %cst : f32 to vector<512x1xf32>
    %c0_i32_3 = arith.constant 0 : i32
    %c0_4 = arith.constant 0 : index
    %15 = arith.index_cast %c0_i32_3 : i32 to index
    %c0_5 = arith.constant 0 : index
    %c0_6 = arith.constant 0 : index
    %16 = vector.load %arg4[%c0_4, %15, %c0_5, %c0_6] : memref<1x2x3x512xf32, #tpu.memory_space<vmem>>, vector<1x1x3x512xf32>
    %17 = vector.shape_cast %16 : vector<1x1x3x512xf32> to vector<3x512xf32>
    %18 = vector.extract_strided_slice %17 {offsets = [0, 0], sizes = [1, 512], strides = [1, 1]} : vector<3x512xf32> to vector<1x512xf32>
    %19 = vector.broadcast %18 : vector<1x512xf32> to vector<512x512xf32>
    %20 = arith.subf %4, %19 : vector<512x512xf32>
    %21 = vector.extract_strided_slice %17 {offsets = [1, 0], sizes = [1, 512], strides = [1, 1]} : vector<3x512xf32> to vector<1x512xf32>
    %22 = vector.broadcast %21 : vector<1x512xf32> to vector<512x512xf32>
    %23 = arith.subf %7, %22 : vector<512x512xf32>
    %24 = vector.extract_strided_slice %17 {offsets = [2, 0], sizes = [1, 512], strides = [1, 1]} : vector<3x512xf32> to vector<1x512xf32>
    %25 = vector.broadcast %24 : vector<1x512xf32> to vector<512x512xf32>
    %26 = arith.subf %10, %25 : vector<512x512xf32>
    %27 = arith.mulf %20, %20 : vector<512x512xf32>
    %28 = arith.mulf %23, %23 : vector<512x512xf32>
    %29 = arith.addf %27, %28 : vector<512x512xf32>
    %30 = arith.mulf %26, %26 : vector<512x512xf32>
    %31 = arith.addf %29, %30 : vector<512x512xf32>
    %cst_7 = arith.constant dense<0x7F800000> : vector<512xf32>
    %32 = vector.multi_reduction <minimumf>, %31, %cst_7 [1] : vector<512x512xf32> to vector<512xf32>
    %33 = vector.shape_cast %32 : vector<512xf32> to vector<512x1xf32>
    %34 = arith.minimumf %14, %33 : vector<512x1xf32>
    %cst_8 = arith.constant dense<0x7F800000> : vector<512xf32>
    %35 = vector.multi_reduction <minimumf>, %31, %cst_8 [0] : vector<512x512xf32> to vector<512xf32>
    %36 = vector.shape_cast %35 : vector<512xf32> to vector<1x512xf32>
    %c0_9 = arith.constant 0 : index
    %c0_10 = arith.constant 0 : index
    %37 = arith.index_cast %c0_i32_3 : i32 to index
    %c0_11 = arith.constant 0 : index
    %c0_12 = arith.constant 0 : index
    %38 = vector.load %arg6[%c0_9, %c0_10, %37, %c0_11, %c0_12] : memref<1x1x2x1x512xf32, #tpu.memory_space<vmem>>, vector<1x1x1x1x512xf32>
    %39 = vector.shape_cast %38 : vector<1x1x1x1x512xf32> to vector<1x512xf32>
    %40 = arith.minimumf %39, %36 : vector<1x512xf32>
    %c0_13 = arith.constant 0 : index
    %c0_14 = arith.constant 0 : index
    %41 = arith.index_cast %c0_i32_3 : i32 to index
    %c0_15 = arith.constant 0 : index
    %c0_16 = arith.constant 0 : index
    %42 = vector.load %arg6[%c0_13, %c0_14, %41, %c0_15, %c0_16] : memref<1x1x2x1x512xf32, #tpu.memory_space<vmem>>, vector<1x1x1x1x512xf32>
    %43 = vector.shape_cast %42 : vector<1x1x1x1x512xf32> to vector<1x512xf32>
    %44 = vector.shape_cast %40 : vector<1x512xf32> to vector<1x1x1x1x512xf32>
    tpu.vector_store %arg6[%c0_13, %c0_14, %41, %c0_15, %c0_16], %44 {strides = array<i32>} : memref<1x1x2x1x512xf32, #tpu.memory_space<vmem>>, vector<1x1x1x1x512xf32>,
    %c1_i32 = arith.constant 1 : i32
    %c0_17 = arith.constant 0 : index
    %45 = arith.index_cast %c1_i32 : i32 to index
    %c0_18 = arith.constant 0 : index
    %c0_19 = arith.constant 0 : index
    %46 = vector.load %arg4[%c0_17, %45, %c0_18, %c0_19] : memref<1x2x3x512xf32, #tpu.memory_space<vmem>>, vector<1x1x3x512xf32>
    %47 = vector.shape_cast %46 : vector<1x1x3x512xf32> to vector<3x512xf32>
    %48 = vector.extract_strided_slice %47 {offsets = [0, 0], sizes = [1, 512], strides = [1, 1]} : vector<3x512xf32> to vector<1x512xf32>
    %49 = vector.broadcast %48 : vector<1x512xf32> to vector<512x512xf32>
    %50 = arith.subf %4, %49 : vector<512x512xf32>
    %51 = vector.extract_strided_slice %47 {offsets = [1, 0], sizes = [1, 512], strides = [1, 1]} : vector<3x512xf32> to vector<1x512xf32>
    %52 = vector.broadcast %51 : vector<1x512xf32> to vector<512x512xf32>
    %53 = arith.subf %7, %52 : vector<512x512xf32>
    %54 = vector.extract_strided_slice %47 {offsets = [2, 0], sizes = [1, 512], strides = [1, 1]} : vector<3x512xf32> to vector<1x512xf32>
    %55 = vector.broadcast %54 : vector<1x512xf32> to vector<512x512xf32>
    %56 = arith.subf %10, %55 : vector<512x512xf32>
    %57 = arith.mulf %50, %50 : vector<512x512xf32>
    %58 = arith.mulf %53, %53 : vector<512x512xf32>
    %59 = arith.addf %57, %58 : vector<512x512xf32>
    %60 = arith.mulf %56, %56 : vector<512x512xf32>
    %61 = arith.addf %59, %60 : vector<512x512xf32>
    %cst_20 = arith.constant dense<0x7F800000> : vector<512xf32>
    %62 = vector.multi_reduction <minimumf>, %61, %cst_20 [1] : vector<512x512xf32> to vector<512xf32>
    %63 = vector.shape_cast %62 : vector<512xf32> to vector<512x1xf32>
    %64 = arith.minimumf %34, %63 : vector<512x1xf32>
    %cst_21 = arith.constant dense<0x7F800000> : vector<512xf32>
    %65 = vector.multi_reduction <minimumf>, %61, %cst_21 [0] : vector<512x512xf32> to vector<512xf32>
    %66 = vector.shape_cast %65 : vector<512xf32> to vector<1x512xf32>
    %c0_22 = arith.constant 0 : index
    %c0_23 = arith.constant 0 : index
    %67 = arith.index_cast %c1_i32 : i32 to index
    %c0_24 = arith.constant 0 : index
    %c0_25 = arith.constant 0 : index
    %68 = vector.load %arg6[%c0_22, %c0_23, %67, %c0_24, %c0_25] : memref<1x1x2x1x512xf32, #tpu.memory_space<vmem>>, vector<1x1x1x1x512xf32>
    %69 = vector.shape_cast %68 : vector<1x1x1x1x512xf32> to vector<1x512xf32>
    %70 = arith.minimumf %69, %66 : vector<1x512xf32>
    %c0_26 = arith.constant 0 : index
    %c0_27 = arith.constant 0 : index
    %71 = arith.index_cast %c1_i32 : i32 to index
    %c0_28 = arith.constant 0 : index
    %c0_29 = arith.constant 0 : index
    %72 = vector.load %arg6[%c0_26, %c0_27, %71, %c0_28, %c0_29] : memref<1x1x2x1x512xf32, #tpu.memory_space<vmem>>, vector<1x1x1x1x512xf32>
    %73 = vector.shape_cast %72 : vector<1x1x1x1x512xf32> to vector<1x512xf32>
    %74 = vector.shape_cast %70 : vector<1x512xf32> to vector<1x1x1x1x512xf32>
    tpu.vector_store %arg6[%c0_26, %c0_27, %71, %c0_28, %c0_29], %74 {strides = array<i32>} : memref<1x1x2x1x512xf32, #tpu.memory_space<vmem>>, vector<1x1x1x1x512xf32>,
    %c2_i32 = arith.constant 2 : i32
    %c0_30 = arith.constant 0 : index
    %c0_31 = arith.constant 0 : index
    %c0_32 = arith.constant 0 : index
    %75 = vector.load %arg5[%c0_30, %c0_31, %c0_32] : memref<1x512x1xf32, #tpu.memory_space<vmem>>, vector<1x512x1xf32>
    %76 = vector.shape_cast %75 : vector<1x512x1xf32> to vector<512x1xf32>
    %77 = vector.shape_cast %64 : vector<512x1xf32> to vector<1x512x1xf32>
    tpu.vector_store %arg5[%c0_30, %c0_31, %c0_32], %77 {strides = array<i32>} : memref<1x512x1xf32, #tpu.memory_space<vmem>>, vector<1x512x1xf32>,
    return
  }
  func.func @transform_0(%arg0: i32, %arg1: i32, %arg2: i32) -> (i32, i32, i32) {
    %c2_i32 = arith.constant 2 : i32
    %0 = arith.muli %arg1, %c2_i32 : i32
    %1 = arith.addi %0, %arg2 : i32
    %c0_i32 = arith.constant 0 : i32
    %c0_i32_0 = arith.constant 0 : i32
    return %arg0, %1, %c0_i32 : i32, i32, i32
  }
  func.func @transform_1(%arg0: i32, %arg1: i32, %arg2: i32) -> (i32, i32, i32, i32) {
    %c0_i32 = arith.constant 0 : i32
    %c0_i32_0 = arith.constant 0 : i32
    %c0_i32_1 = arith.constant 0 : i32
    %c0_i32_2 = arith.constant 0 : i32
    return %arg0, %c0_i32, %c0_i32_0, %c0_i32_1 : i32, i32, i32, i32
  }
  func.func @transform_2(%arg0: i32, %arg1: i32, %arg2: i32) -> (i32, i32, i32) {
    %c2_i32 = arith.constant 2 : i32
    %0 = arith.muli %arg1, %c2_i32 : i32
    %1 = arith.addi %0, %arg2 : i32
    %c0_i32 = arith.constant 0 : i32
    %c0_i32_0 = arith.constant 0 : i32
    return %arg0, %1, %c0_i32 : i32, i32, i32
  }
  func.func @transform_3(%arg0: i32, %arg1: i32, %arg2: i32) -> (i32, i32, i32, i32, i32) {
    %c0_i32 = arith.constant 0 : i32
    %c0_i32_0 = arith.constant 0 : i32
    %c0_i32_1 = arith.constant 0 : i32
    %c0_i32_2 = arith.constant 0 : i32
    return %arg0, %arg1, %c0_i32, %c0_i32_0, %c0_i32_1 : i32, i32, i32, i32, i32
  }
}

</mosaic_0001>

<bundles_post_ra>
// kernel: chamfer_distance_l2_split.1
= control target key start
LH: loop header
LB: loop body
LE: loop exit
PB: predicated region body
PF: predicated region fallthrough
CT: control target
= control target key end

     0   :  { %s7061_s12 = smov 0   ;;  %s7063_s13 = smov 0   ;;  %s12214_s0 = inlined_call_operand.vmem [shape: f32[2,2048,3], index: 0, kind: input, shape index: {}]   ;;  %s12215_s1 = inlined_call_operand.vmem [shape: f32[2,2,3,512], index: 1, kind: input, shape index: {}]   ;;  %s12216_s2 = inlined_call_operand.vmem [shape: f32[2,2048,1], index: 2, kind: output, shape index: {0}]   ;;  %s12217_s3 = inlined_call_operand.vmem [shape: f32[2,2,2,1,512], index: 3, kind: output, shape index: {1}]  }
   0x1   :  { %s7065_s14 = smov 0   ;;  %s7067_s15 = smov 0  }
   0x2   :  { %s7069_s16 = smov 0   ;;  %s7071_s17 = smov 0  }
   0x3   :  { %s7073_s18 = smov 0  }
   0x4 LB: > { %s26_s19 = sadd.s32 1, %s7023_s15  ;;  %s29_s20 = sadd.s32 1, %s7027_s16  ;;  %s7035_s18 = sphi %s7073_s18, %s14_s18   ;;  %s7031_s17 = sphi %s7071_s17, %s13305_s17   ;;  %s7027_s16 = sphi %s7069_s16, %s13304_s16   ;;  %s7023_s15 = sphi %s7067_s15, %s13303_s15   ;;  %s7019_s14 = sphi %s7065_s14, %s13302_s14   ;;  %s7015_s13 = sphi %s7063_s13, %s13301_s13   ;;  %s7011_s12 = sphi %s7061_s12, %s13300_s12  }
   0x5   : > { %p27_p0 = scmp.ge.s32.totalorder %s26_s19, 2  ;;  %p6891_p1 = scmp.ge.s32.totalorder %s7035_s18, 1 }
   0x6   : > { %p192_p2 = scmp.lt.s32.totalorder %s7035_s18, 9  ;;  %s33_s21 = sadd.s32 1, %s7031_s17 }
   0x7   : > { %s13307_s19 = smov (%p27_p0, %s26_s19), 0  ;;  %s13309_s20 = smov (!%p27_p0, %s29_s20), %s7027_s16 }
   0x8   : > { %p193_p3 = pnand %p6891_p1, %p192_p2  ;;  %p31_p4 = scmp.ge.s32.totalorder %s13309_s20, 2 }
   0xa   : > { %s13311_s20 = smov (%p31_p4, %s13309_s20), 0  ;;  %s13313_s21 = smov (!%p31_p4, %s33_s21), %s7031_s17 }
   0xb   : > { %p35_p5 = scmp.ge.s32.totalorder %s13313_s21, 2  ;;  %196 = sbr.rel (%p193_p3) target bundleno = 2060 (0x80c), region = 28 }
   0xd   : > { %s13315_s21 = smov (%p35_p5, %s13313_s21), 0 }
  0x10   : > { %s6892_s22 = sshll.u32 %s7015_s13, 1  ;;  %p244_p6 = scmp.lt.s32.totalorder %s7019_s14, 1  ;;  %v7037_v0 = vmov 0  }
  0x11   : > { %6974 = vset.pattern.permute.xlu2 %v7037_v0  ;;  %6973 = vset.pattern.permute.xlu1 %v7037_v0  ;;  %s242_s23 = sadd.s32 %s7011_s12, %s6892_s22  ;;  %p276_p8 = scmp.lt.s32.totalorder %s7015_s13, 1 }
  0x12   : > { %6972 = vset.pattern.permute.xlu0 %v7037_v0  ;;  %s6893_s24 = sshll.u32 %s242_s23, 6  ;;  %s13317_s14 = smov (!%p244_p6, %s7019_s14), 1 }
  0x13   : > { %p246_p7 = scmp.lt.s32.totalorder %s6893_s24, 255  ;;  %s6894_s25 = sshll.u32 %s13317_s14, 8 }
  0x14   : > { %s6911_s26 = sshll.u32 %s13317_s14, 5  ;;  %s6903_s5 = sshll.u32 %s13317_s14, 4 }
  0x15   : > { %s13319_s24 = smov (!%p246_p7, %s6893_s24), 255  ;;  %s7112_s29 = scalar_lea.vmem %s12215_s1, %s6911_s26 }
  0x16   : > { %s249_s30 = sadd.s32 %s6894_s25, %s13319_s24  ;;  %s13321_s13 = smov (!%p276_p8, %s7015_s13), 1 }
  0x17   : > { %s6895_s4 = sshll.u32 %s249_s30, 3  ;;  %s6902_s14 = sshll.u32 %s13321_s13, 3 }
  0x18   : > { %s7118_s8 = scalar_lea.vmem %s12214_s0, %s6895_s4  ;;  %s7123_s11 = scalar_lea.vmem %s12216_s2, %s6895_s4 }
  0x19   : > { %v7127_v1 = vld [vmem:[%s7118_s8 + $0x20] sm:$0xff]  ;;  %v7130_v2 = vld [vmem:[%s7118_s8 + $0x10] sm:$0xff]  ;;  %s280_s22 = sadd.s32 %s6903_s5, %s6902_s14  ;;  %v7144_v4 = vld [vmem:[%s7118_s8 + $0x28] sm:$0xff]  ;;  %p6904_p9 = scmp.ne.s32.totalorder %s7011_s12, 0 }
  0x1a   : > { %v7133_v3 = vld [vmem:[%s7118_s8] sm:$0xff]  ;;  %368 = vperm.xlu2 %6974, %v7127_v1   ;;  %358 = vperm.xlu1 %6973, %v7130_v2   ;;  %s7141_s25 = scalar_lea.vmem %s12217_s3, %s280_s22  ;;  %v7147_v5 = vld [vmem:[%s7118_s8 + $0x18] sm:$0xff]  ;;  %v7150_v6 = vld [vmem:[%s7118_s8 + $0x8] sm:$0xff] }
  0x1b   : > { %348 = vperm.xlu0 %6972, %v7133_v3   ;;  %12619 = vst [vmem:[#allocation2_spill] sm:$0xff] %v7150_v6  ;;  %v7156_v7 = vld [vmem:[%s7118_s8 + $0x40] sm:$0xff]  ;;  %v7159_v8 = vld [vmem:[%s7118_s8 + $0x38] sm:$0xff]  ;;  %v7162_v9 = vld [vmem:[%s7118_s8 + $0x30] sm:$0xff] }
  0x1c   : > { %v7168_v10 = vld [vmem:[%s7118_s8 + $0x58] sm:$0xff]  ;;  %v7171_v11 = vld [vmem:[%s7118_s8 + $0x50] sm:$0xff]  ;;  %v7174_v12 = vld [vmem:[%s7118_s8 + $0x48] sm:$0xff] }
  0x1d   : > { %v7180_v13 = vld [vmem:[%s7118_s8 + $0x70] sm:$0xff]  ;;  %v7183_v14 = vld [vmem:[%s7118_s8 + $0x68] sm:$0xff]  ;;  %v7186_v15 = vld [vmem:[%s7118_s8 + $0x60] sm:$0xff] }
  0x1e   : > { %v7192_v16 = vld [vmem:[%s7118_s8 + $0x88] sm:$0xff]  ;;  %v7195_v17 = vld [vmem:[%s7118_s8 + $0x80] sm:$0xff]  ;;  %v7198_v18 = vld [vmem:[%s7118_s8 + $0x78] sm:$0xff] }
  0x1f   : > { %v7204_v19 = vld [vmem:[%s7118_s8 + $0xa0] sm:$0xff]  ;;  %v7207_v20 = vld [vmem:[%s7118_s8 + $0x98] sm:$0xff]  ;;  %v7210_v21 = vld [vmem:[%s7118_s8 + $0x90] sm:$0xff] }
  0x20   : > { %v7216_v22 = vld [vmem:[%s7118_s8 + $0xb8] sm:$0xff]  ;;  %v7219_v23 = vld [vmem:[%s7118_s8 + $0xb0] sm:$0xff]  ;;  %v7222_v24 = vld [vmem:[%s7118_s8 + $0xa8] sm:$0xff] }
  0x21   : > { %v7228_v25 = vld [vmem:[%s7118_s8 + $0xd0] sm:$0xff]  ;;  %v7231_v26 = vld [vmem:[%s7118_s8 + $0xc8] sm:$0xff]  ;;  %v7234_v27 = vld [vmem:[%s7118_s8 + $0xc0] sm:$0xff] }
  0x22   : > { %373 = vperm.xlu2 %6974, %v7144_v4   ;;  %363 = vperm.xlu1 %6973, %v7147_v5   ;;  %v7240_v28 = vld [vmem:[%s7118_s8 + $0xe8] sm:$0xff]  ;;  %v7243_v29 = vld [vmem:[%s7118_s8 + $0xe0] sm:$0xff]  ;;  %v7246_v30 = vld [vmem:[%s7118_s8 + $0xd8] sm:$0xff] }
  0x23   : > { %353 = vperm.xlu0 %6972, %v7150_v6   ;;  %v7252_v31 = vld [vmem:[%s7118_s8 + $0x100] sm:$0xff]  ;;  %v7255_v32 = vld [vmem:[%s7118_s8 + $0xf8] sm:$0xff]  ;;  %v7258_v33 = vld [vmem:[%s7118_s8 + $0xf0] sm:$0xff] }
  0x24   : > { %v7264_v34 = vld [vmem:[%s7118_s8 + $0x118] sm:$0xff]  ;;  %v7267_v35 = vld [vmem:[%s7118_s8 + $0x110] sm:$0xff]  ;;  %v7270_v36 = vld [vmem:[%s7118_s8 + $0x108] sm:$0xff] }
  0x25   : > { %v7278_v38 = vld [vmem:[%s7118_s8 + $0x130] sm:$0xff]  ;;  %v7281_v39 = vld [vmem:[%s7118_s8 + $0x128] sm:$0xff]  ;;  %v7284_v40 = vld [vmem:[%s7118_s8 + $0x120] sm:$0xff] }
  0x26   : > { %v7292_v42 = vld [vmem:[%s7118_s8 + $0x148] sm:$0xff]  ;;  %v7295_v43 = vld [vmem:[%s7118_s8 + $0x140] sm:$0xff]  ;;  %v7298_v44 = vld [vmem:[%s7118_s8 + $0x138] sm:$0xff] }
  0x27   : > { %v7306_v46 = vld [vmem:[%s7118_s8 + $0x160] sm:$0xff]  ;;  %v7309_v47 = vld [vmem:[%s7118_s8 + $0x158] sm:$0xff]  ;;  %v7312_v48 = vld [vmem:[%s7118_s8 + $0x150] sm:$0xff] }
  0x28   : > { %v7324_v52 = vld [vmem:[%s7118_s8 + $0x178] sm:$0xff]  ;;  %v7327_v53 = vld [vmem:[%s7118_s8 + $0x170] sm:$0xff]  ;;  %v7330_v54 = vld [vmem:[%s7118_s8 + $0x168] sm:$0xff] }
  0x29   : > { %v7342_v58 = vld [vmem:[%s7118_s8 + $0x190] sm:$0xff]  ;;  %v7345_v59 = vld [vmem:[%s7118_s8 + $0x188] sm:$0xff]  ;;  %v7348_v60 = vld [vmem:[%s7118_s8 + $0x180] sm:$0xff] }
  0x2a   : > { %388 = vperm.xlu2 %6974, %v7156_v7   ;;  %383 = vperm.xlu1 %6973, %v7159_v8   ;;  %v7360_v0 = vld [vmem:[%s7118_s8 + $0x1a8] sm:$0xff] }
  0x2b   : > { %378 = vperm.xlu0 %6972, %v7162_v9  }
  0x32   : > { %403 = vperm.xlu2 %6974, %v7168_v10   ;;  %398 = vperm.xlu1 %6973, %v7171_v11  }
  0x33   : > { %393 = vperm.xlu0 %6972, %v7174_v12  }
  0x3a   : > { %418 = vperm.xlu2 %6974, %v7180_v13   ;;  %413 = vperm.xlu1 %6973, %v7183_v14  }
  0x3b   : > { %408 = vperm.xlu0 %6972, %v7186_v15  }
  0x42   : > { %433 = vperm.xlu2 %6974, %v7192_v16   ;;  %428 = vperm.xlu1 %6973, %v7195_v17  }
  0x43   : > { %423 = vperm.xlu0 %6972, %v7198_v18  }
  0x4a   : > { %448 = vperm.xlu2 %6974, %v7204_v19   ;;  %443 = vperm.xlu1 %6973, %v7207_v20  }
  0x4b   : > { %438 = vperm.xlu0 %6972, %v7210_v21  }
  0x52   : > { %463 = vperm.xlu2 %6974, %v7216_v22   ;;  %458 = vperm.xlu1 %6973, %v7219_v23  }
  0x53   : > { %453 = vperm.xlu0 %6972, %v7222_v24  }
  0x5a   : > { %478 = vperm.xlu2 %6974, %v7228_v25   ;;  %473 = vperm.xlu1 %6973, %v7231_v26  }
  0x5b   : > { %468 = vperm.xlu0 %6972, %v7234_v27  }
  0x62   : > { %493 = vperm.xlu2 %6974, %v7240_v28   ;;  %488 = vperm.xlu1 %6973, %v7243_v29  }
  0x63   : > { %483 = vperm.xlu0 %6972, %v7246_v30  }
  0x6a   : > { %508 = vperm.xlu2 %6974, %v7252_v31   ;;  %503 = vperm.xlu1 %6973, %v7255_v32  }
  0x6b   : > { %498 = vperm.xlu0 %6972, %v7258_v33  }
  0x72   : > { %523 = vperm.xlu2 %6974, %v7264_v34   ;;  %518 = vperm.xlu1 %6973, %v7267_v35  }
  0x73   : > { %513 = vperm.xlu0 %6972, %v7270_v36  }
  0x74   : > { %v7275_v37 = vpop.permute.xlu2 %368 }
  0x75   : > { %12620 = vst [vmem:[#allocation3_spill] sm:$0xff] %v7275_v37 }
  0x7a   : > { %538 = vperm.xlu2 %6974, %v7278_v38   ;;  %533 = vperm.xlu1 %6973, %v7281_v39  }
  0x7b   : > { %528 = vperm.xlu0 %6972, %v7284_v40  }
  0x7c   : > { %v7289_v41 = vpop.permute.xlu2 %373 }
  0x7d   : > { %12621 = vst [vmem:[#allocation4_spill] sm:$0xff] %v7289_v41  ;;  %v7396_v41 = vld [vmem:[%s7118_s8 + $0x1d8] sm:$0xff] }
  0x7e   : > { %12642 = vst [vmem:[#allocation25_spill] sm:$0xff] %v7396_v41 }
  0x82   : > { %553 = vperm.xlu2 %6974, %v7292_v42   ;;  %548 = vperm.xlu1 %6973, %v7295_v43  }
  0x83   : > { %543 = vperm.xlu0 %6972, %v7298_v44  }
  0x84   : > { %v7303_v45 = vpop.permute.xlu2 %388 }
  0x85   : > { %12622 = vst [vmem:[#allocation5_spill] sm:$0xff] %v7303_v45  ;;  %v7378_v45 = vld [vmem:[%s7118_s8 + $0x1c0] sm:$0xff] }
  0x86   : > { %12636 = vst [vmem:[#allocation19_spill] sm:$0xff] %v7378_v45 }
  0x8a   : > { %568 = vperm.xlu2 %6974, %v7306_v46   ;;  %563 = vperm.xlu1 %6973, %v7309_v47  }
  0x8b   : > { %558 = vperm.xlu0 %6972, %v7312_v48  }
  0x8c   : > { %v7317_v49 = vpop.permute.xlu2 %403  ;;  %v7319_v50 = vpop.permute.xlu1 %358 }
  0x8d   : > { %12623 = vst [vmem:[#allocation6_spill] sm:$0xff] %v7317_v49  ;;  %v7321_v51 = vpop.permute.xlu0 %348  ;;  %v7366_v49 = vld [vmem:[%s7118_s8 + $0x198] sm:$0xff] }
  0x8e   : > { %12624 = vst [vmem:[#allocation7_spill] sm:$0xff] %v7319_v50  ;;  %v7402_v50 = vld [vmem:[%s7118_s8 + $0x1c8] sm:$0xff] }
  0x8f   : > { %12625 = vst [vmem:[#allocation8_spill] sm:$0xff] %v7321_v51  ;;  %v7399_v51 = vld [vmem:[%s7118_s8 + $0x1d0] sm:$0xff] }
  0x90   : > { %12632 = vst [vmem:[#allocation15_spill] sm:$0xff] %v7366_v49 }
  0x91   : > { %12643 = vst [vmem:[#allocation26_spill] sm:$0xff] %v7399_v51 }
  0x92   : > { %583 = vperm.xlu2 %6974, %v7324_v52   ;;  %578 = vperm.xlu1 %6973, %v7327_v53   ;;  %12644 = vst [vmem:[#allocation27_spill] sm:$0xff] %v7402_v50 }
  0x93   : > { %573 = vperm.xlu0 %6972, %v7330_v54  }
  0x94   : > { %v7335_v55 = vpop.permute.xlu2 %418  ;;  %v7337_v56 = vpop.permute.xlu1 %363 }
  0x95   : > { %12626 = vst [vmem:[#allocation9_spill] sm:$0xff] %v7335_v55  ;;  %v7339_v57 = vpop.permute.xlu0 %353  ;;  %v7363_v55 = vld [vmem:[%s7118_s8 + $0x1a0] sm:$0xff] }
  0x96   : > { %12627 = vst [vmem:[#allocation10_spill] sm:$0xff] %v7337_v56  ;;  %v7384_v56 = vld [vmem:[%s7118_s8 + $0x1b0] sm:$0xff] }
  0x97   : > { %12628 = vst [vmem:[#allocation11_spill] sm:$0xff] %v7339_v57  ;;  %v7381_v57 = vld [vmem:[%s7118_s8 + $0x1b8] sm:$0xff] }
  0x98   : > { %12637 = vst [vmem:[#allocation20_spill] sm:$0xff] %v7381_v57 }
  0x99   : > { %12638 = vst [vmem:[#allocation21_spill] sm:$0xff] %v7384_v56 }
  0x9a   : > { %598 = vperm.xlu2 %6974, %v7342_v58   ;;  %593 = vperm.xlu1 %6973, %v7345_v59  }
  0x9b   : > { %588 = vperm.xlu0 %6972, %v7348_v60  }
  0x9c   : > { %v7353_v61 = vpop.permute.xlu2 %433  ;;  %v7355_v62 = vpop.permute.xlu1 %383 }
  0x9d   : > { %12629 = vst [vmem:[#allocation12_spill] sm:$0xff] %v7353_v61  ;;  %v7357_v63 = vpop.permute.xlu0 %378 }
  0x9e   : > { %12630 = vst [vmem:[#allocation13_spill] sm:$0xff] %v7355_v62 }
  0x9f   : > { %12631 = vst [vmem:[#allocation14_spill] sm:$0xff] %v7357_v63 }
  0xa2   : > { %613 = vperm.xlu2 %6974, %v7360_v0   ;;  %608 = vperm.xlu1 %6973, %v7363_v55  }
  0xa3   : > { %603 = vperm.xlu0 %6972, %v7366_v49  }
  0xa4   : > { %v7371_v61 = vpop.permute.xlu2 %448  ;;  %v7373_v62 = vpop.permute.xlu1 %398 }
  0xa5   : > { %12633 = vst [vmem:[#allocation16_spill] sm:$0xff] %v7371_v61  ;;  %v7375_v63 = vpop.permute.xlu0 %393 }
  0xa6   : > { %12634 = vst [vmem:[#allocation17_spill] sm:$0xff] %v7373_v62 }
  0xa7   : > { %12635 = vst [vmem:[#allocation18_spill] sm:$0xff] %v7375_v63 }
  0xaa   : > { %628 = vperm.xlu2 %6974, %v7378_v45   ;;  %623 = vperm.xlu1 %6973, %v7381_v57   ;;  %v7417_v45 = vld [vmem:[%s7118_s8 + $0x1e8] sm:$0xff]  ;;  %v7420_v57 = vld [vmem:[%s7118_s8 + $0x1e0] sm:$0xff] }
  0xab   : > { %618 = vperm.xlu0 %6972, %v7384_v56   ;;  %12649 = vst [vmem:[#allocation32_spill] sm:$0xff] %v7417_v45 }
  0xac   : > { %v7389_v61 = vpop.permute.xlu2 %463  ;;  %v7391_v62 = vpop.permute.xlu1 %413  ;;  %12650 = vst [vmem:[#allocation33_spill] sm:$0xff] %v7420_v57 }
  0xad   : > { %12639 = vst [vmem:[#allocation22_spill] sm:$0xff] %v7389_v61  ;;  %v7393_v63 = vpop.permute.xlu0 %408 }
  0xae   : > { %12640 = vst [vmem:[#allocation23_spill] sm:$0xff] %v7391_v62 }
  0xaf   : > { %12641 = vst [vmem:[#allocation24_spill] sm:$0xff] %v7393_v63  ;;  %v7414_v63 = vld [vmem:[%s7118_s8 + $0x1f0] sm:$0xff] }
  0xb0   : > { %12648 = vst [vmem:[#allocation31_spill] sm:$0xff] %v7414_v63 }
  0xb2   : > { %643 = vperm.xlu2 %6974, %v7396_v41   ;;  %638 = vperm.xlu1 %6973, %v7399_v51  }
  0xb3   : > { %633 = vperm.xlu0 %6972, %v7402_v50  }
  0xb4   : > { %v7407_v37 = vpop.permute.xlu2 %478  ;;  %v7409_v61 = vpop.permute.xlu1 %428 }
  0xb5   : > { %12645 = vst [vmem:[#allocation28_spill] sm:$0xff] %v7407_v37  ;;  %v7411_v62 = vpop.permute.xlu0 %423 }
  0xb6   : > { %12646 = vst [vmem:[#allocation29_spill] sm:$0xff] %v7409_v61  ;;  %v7432_v61 = vld [vmem:[%s7118_s8 + $0x1f8] sm:$0xff] }
  0xb7   : > { %12647 = vst [vmem:[#allocation30_spill] sm:$0xff] %v7411_v62  ;;  %v7038_v62 = vmov 1  }
  0xb8   : > { %12654 = vst [vmem:[#allocation37_spill] sm:$0xff] %v7432_v61 }
  0xba   : > { %658 = vperm.xlu2 %6974, %v7414_v63   ;;  %653 = vperm.xlu1 %6973, %v7417_v45  }
  0xbb   : > { %648 = vperm.xlu0 %6972, %v7420_v57  }
  0xbc   : > { %v7425_v41 = vpop.permute.xlu2 %493  ;;  %v7427_v51 = vpop.permute.xlu1 %443 }
  0xbd   : > { %12651 = vst [vmem:[#allocation34_spill] sm:$0xff] %v7425_v41  ;;  %v7429_v37 = vpop.permute.xlu0 %438 }
  0xbe   : > { %12652 = vst [vmem:[#allocation35_spill] sm:$0xff] %v7427_v51 }
  0xbf   : > { %12653 = vst [vmem:[#allocation36_spill] sm:$0xff] %v7429_v37 }
  0xc2   : > { %6976 = vset.pattern.permute.xlu2 %v7038_v62  ;;  %6975 = vset.pattern.permute.xlu1 %v7038_v62 }
  0xc3   : > { %663 = vperm.xlu0 %6972, %v7432_v61   ;;  %671 = vperm.xlu2 %6976, %v7150_v6  }
  0xc4   : > { %667 = vperm.xlu1 %6975, %v7133_v3   ;;  %v7437_v63 = vpop.permute.xlu2 %508  ;;  %v7439_v45 = vpop.permute.xlu1 %458 }
  0xc5   : > { %12655 = vst [vmem:[#allocation38_spill] sm:$0xff] %v7437_v63  ;;  %v7441_v41 = vpop.permute.xlu0 %453 }
  0xc6   : > { %12656 = vst [vmem:[#allocation39_spill] sm:$0xff] %v7439_v45 }
  0xc7   : > { %12657 = vst [vmem:[#allocation40_spill] sm:$0xff] %v7441_v41 }
  0xcb   : > { %6977 = vset.pattern.permute.xlu0 %v7038_v62  ;;  %683 = vperm.xlu2 %6976, %v7127_v1  }
  0xcc   : > { %679 = vperm.xlu1 %6975, %v7147_v5   ;;  %675 = vperm.xlu0 %6977, %v7130_v2   ;;  %v7446_v37 = vpop.permute.xlu2 %523  ;;  %v7448_v51 = vpop.permute.xlu1 %473 }
  0xcd   : > { %12658 = vst [vmem:[#allocation41_spill] sm:$0xff] %v7446_v37  ;;  %v7450_v6 = vpop.permute.xlu0 %468 }
  0xce   : > { %12659 = vst [vmem:[#allocation42_spill] sm:$0xff] %v7448_v51 }
  0xcf   : > { %12660 = vst [vmem:[#allocation43_spill] sm:$0xff] %v7450_v6 }
  0xd3   : > { %691 = vperm.xlu2 %6976, %v7162_v9  }
  0xd4   : > { %687 = vperm.xlu1 %6975, %v7144_v4   ;;  %695 = vperm.xlu0 %6977, %v7159_v8   ;;  %v7455_v63 = vpop.permute.xlu2 %538  ;;  %v7457_v62 = vpop.permute.xlu1 %488 }
  0xd5   : > { %12661 = vst [vmem:[#allocation44_spill] sm:$0xff] %v7455_v63  ;;  %v7459_v41 = vpop.permute.xlu0 %483 }
  0xd6   : > { %12662 = vst [vmem:[#allocation45_spill] sm:$0xff] %v7457_v62 }
  0xd7   : > { %12663 = vst [vmem:[#allocation46_spill] sm:$0xff] %v7459_v41 }
  0xdb   : > { %703 = vperm.xlu2 %6976, %v7174_v12  }
  0xdc   : > { %699 = vperm.xlu1 %6975, %v7156_v7   ;;  %707 = vperm.xlu0 %6977, %v7171_v11   ;;  %v7464_v37 = vpop.permute.xlu2 %553  ;;  %v7466_v6 = vpop.permute.xlu1 %503 }
  0xdd   : > { %12664 = vst [vmem:[#allocation47_spill] sm:$0xff] %v7464_v37  ;;  %v7468_v51 = vpop.permute.xlu0 %498 }
  0xde   : > { %12665 = vst [vmem:[#allocation48_spill] sm:$0xff] %v7466_v6 }
  0xdf   : > { %12666 = vst [vmem:[#allocation49_spill] sm:$0xff] %v7468_v51 }
  0xe3   : > { %715 = vperm.xlu2 %6976, %v7186_v15  }
  0xe4   : > { %711 = vperm.xlu1 %6975, %v7168_v10   ;;  %719 = vperm.xlu0 %6977, %v7183_v14   ;;  %v7473_v63 = vpop.permute.xlu2 %568  ;;  %v7475_v41 = vpop.permute.xlu1 %518 }
  0xe5   : > { %12667 = vst [vmem:[#allocation50_spill] sm:$0xff] %v7473_v63  ;;  %v7477_v62 = vpop.permute.xlu0 %513 }
  0xe6   : > { %12668 = vst [vmem:[#allocation51_spill] sm:$0xff] %v7475_v41 }
  0xe7   : > { %12669 = vst [vmem:[#allocation52_spill] sm:$0xff] %v7477_v62 }
  0xeb   : > { %727 = vperm.xlu2 %6976, %v7198_v18  }
  0xec   : > { %723 = vperm.xlu1 %6975, %v7180_v13   ;;  %731 = vperm.xlu0 %6977, %v7195_v17   ;;  %v7482_v37 = vpop.permute.xlu2 %583  ;;  %v7484_v51 = vpop.permute.xlu1 %533 }
  0xed   : > { %12670 = vst [vmem:[#allocation53_spill] sm:$0xff] %v7482_v37  ;;  %v7486_v6 = vpop.permute.xlu0 %528 }
  0xee   : > { %12671 = vst [vmem:[#allocation54_spill] sm:$0xff] %v7484_v51 }
  0xef   : > { %12672 = vst [vmem:[#allocation55_spill] sm:$0xff] %v7486_v6 }
  0xf3   : > { %739 = vperm.xlu2 %6976, %v7210_v21  }
  0xf4   : > { %735 = vperm.xlu1 %6975, %v7192_v16   ;;  %743 = vperm.xlu0 %6977, %v7207_v20   ;;  %v7491_v63 = vpop.permute.xlu2 %598  ;;  %v7493_v62 = vpop.permute.xlu1 %548 }
  0xf5   : > { %12673 = vst [vmem:[#allocation56_spill] sm:$0xff] %v7491_v63  ;;  %v7495_v41 = vpop.permute.xlu0 %543 }
  0xf6   : > { %12674 = vst [vmem:[#allocation57_spill] sm:$0xff] %v7493_v62 }
  0xf7   : > { %12675 = vst [vmem:[#allocation58_spill] sm:$0xff] %v7495_v41 }
  0xfb   : > { %751 = vperm.xlu2 %6976, %v7222_v24  }
  0xfc   : > { %747 = vperm.xlu1 %6975, %v7204_v19   ;;  %755 = vperm.xlu0 %6977, %v7219_v23   ;;  %v7500_v37 = vpop.permute.xlu2 %613  ;;  %v7502_v6 = vpop.permute.xlu1 %563 }
  0xfd   : > { %12676 = vst [vmem:[#allocation59_spill] sm:$0xff] %v7500_v37  ;;  %v7504_v51 = vpop.permute.xlu0 %558 }
  0xfe   : > { %12677 = vst [vmem:[#allocation60_spill] sm:$0xff] %v7502_v6 }
  0xff   : > { %12678 = vst [vmem:[#allocation61_spill] sm:$0xff] %v7504_v51 }
 0x103   : > { %763 = vperm.xlu2 %6976, %v7234_v27  }
 0x104   : > { %759 = vperm.xlu1 %6975, %v7216_v22   ;;  %767 = vperm.xlu0 %6977, %v7231_v26   ;;  %v7509_v63 = vpop.permute.xlu2 %628  ;;  %v7511_v41 = vpop.permute.xlu1 %578 }
 0x105   : > { %12679 = vst [vmem:[#allocation62_spill] sm:$0xff] %v7509_v63  ;;  %v7513_v62 = vpop.permute.xlu0 %573 }
 0x106   : > { %12680 = vst [vmem:[#allocation63_spill] sm:$0xff] %v7511_v41 }
 0x107   : > { %12681 = vst [vmem:[#allocation64_spill] sm:$0xff] %v7513_v62 }
 0x10b   : > { %775 = vperm.xlu2 %6976, %v7246_v30  }
 0x10c   : > { %771 = vperm.xlu1 %6975, %v7228_v25   ;;  %779 = vperm.xlu0 %6977, %v7243_v29   ;;  %v7518_v37 = vpop.permute.xlu2 %643  ;;  %v7520_v51 = vpop.permute.xlu1 %593 }
 0x10d   : > { %12682 = vst [vmem:[#allocation65_spill] sm:$0xff] %v7518_v37  ;;  %v7522_v6 = vpop.permute.xlu0 %588 }
 0x10e   : > { %12683 = vst [vmem:[#allocation66_spill] sm:$0xff] %v7520_v51 }
 0x10f   : > { %12684 = vst [vmem:[#allocation67_spill] sm:$0xff] %v7522_v6 }
 0x113   : > { %787 = vperm.xlu2 %6976, %v7258_v33  }
 0x114   : > { %783 = vperm.xlu1 %6975, %v7240_v28   ;;  %791 = vperm.xlu0 %6977, %v7255_v32   ;;  %v7527_v63 = vpop.permute.xlu2 %658  ;;  %v7529_v62 = vpop.permute.xlu1 %608 }
 0x115   : > { %12685 = vst [vmem:[#allocation68_spill] sm:$0xff] %v7527_v63  ;;  %v7531_v41 = vpop.permute.xlu0 %603 }
 0x116   : > { %12686 = vst [vmem:[#allocation69_spill] sm:$0xff] %v7529_v62 }
 0x117   : > { %12687 = vst [vmem:[#allocation70_spill] sm:$0xff] %v7531_v41 }
 0x11b   : > { %799 = vperm.xlu2 %6976, %v7270_v36  }
 0x11c   : > { %795 = vperm.xlu1 %6975, %v7252_v31   ;;  %803 = vperm.xlu0 %6977, %v7267_v35   ;;  %v7536_v37 = vpop.permute.xlu1 %623 }
 0x11d   : > { %12688 = vst [vmem:[#allocation71_spill] sm:$0xff] %v7536_v37  ;;  %v7538_v6 = vpop.permute.xlu0 %618  ;;  %v7540_v51 = vpop.permute.xlu2 %671 }
 0x11e   : > { %12689 = vst [vmem:[#allocation72_spill] sm:$0xff] %v7538_v6 }
 0x11f   : > { %12690 = vst [vmem:[#allocation73_spill] sm:$0xff] %v7540_v51 }
 0x123   : > { %811 = vperm.xlu2 %6976, %v7284_v40  }
 0x124   : > { %807 = vperm.xlu1 %6975, %v7264_v34   ;;  %815 = vperm.xlu0 %6977, %v7281_v39   ;;  %v7545_v63 = vpop.permute.xlu1 %638 }
 0x125   : > { %12691 = vst [vmem:[#allocation74_spill] sm:$0xff] %v7545_v63  ;;  %v7547_v41 = vpop.permute.xlu0 %633  ;;  %v7549_v62 = vpop.permute.xlu2 %683 }
 0x126   : > { %12692 = vst [vmem:[#allocation75_spill] sm:$0xff] %v7547_v41 }
 0x127   : > { %12693 = vst [vmem:[#allocation76_spill] sm:$0xff] %v7549_v62 }
 0x12b   : > { %823 = vperm.xlu2 %6976, %v7298_v44  }
 0x12c   : > { %819 = vperm.xlu1 %6975, %v7278_v38   ;;  %827 = vperm.xlu0 %6977, %v7295_v43   ;;  %v7554_v6 = vpop.permute.xlu1 %653 }
 0x12d   : > { %12694 = vst [vmem:[#allocation77_spill] sm:$0xff] %v7554_v6  ;;  %v7556_v37 = vpop.permute.xlu0 %648  ;;  %v7558_v45 = vpop.permute.xlu2 %691 }
 0x12e   : > { %12695 = vst [vmem:[#allocation78_spill] sm:$0xff] %v7556_v37 }
 0x12f   : > { %12696 = vst [vmem:[#allocation79_spill] sm:$0xff] %v7558_v45 }
 0x133   : > { %835 = vperm.xlu2 %6976, %v7312_v48  }
 0x134   : > { %831 = vperm.xlu1 %6975, %v7292_v42   ;;  %839 = vperm.xlu0 %6977, %v7309_v47  }
 0x135   : > { %v7563_v41 = vpop.permute.xlu0 %663  ;;  %v7565_v63 = vpop.permute.xlu2 %703 }
 0x136   : > { %12697 = vst [vmem:[#allocation80_spill] sm:$0xff] %v7563_v41  ;;  %v7567_v51 = vpop.permute.xlu1 %667 }
 0x137   : > { %12698 = vst [vmem:[#allocation81_spill] sm:$0xff] %v7565_v63 }
 0x138   : > { %12699 = vst [vmem:[#allocation82_spill] sm:$0xff] %v7567_v51 }
 0x13b   : > { %847 = vperm.xlu2 %6976, %v7330_v54  }
 0x13c   : > { %843 = vperm.xlu1 %6975, %v7306_v46   ;;  %851 = vperm.xlu0 %6977, %v7327_v53  }
 0x13d   : > { %v7572_v37 = vpop.permute.xlu2 %715 }
 0x13e   : > { %12700 = vst [vmem:[#allocation83_spill] sm:$0xff] %v7572_v37  ;;  %v7574_v6 = vpop.permute.xlu1 %679  ;;  %v7576_v45 = vpop.permute.xlu0 %675 }
 0x13f   : > { %12701 = vst [vmem:[#allocation84_spill] sm:$0xff] %v7574_v6 }
 0x140   : > { %12702 = vst [vmem:[#allocation85_spill] sm:$0xff] %v7576_v45 }
 0x143   : > { %859 = vperm.xlu2 %6976, %v7348_v60  }
 0x144   : > { %855 = vperm.xlu1 %6975, %v7324_v52   ;;  %863 = vperm.xlu0 %6977, %v7345_v59  }
 0x145   : > { %v7581_v41 = vpop.permute.xlu2 %727 }
 0x146   : > { %12703 = vst [vmem:[#allocation86_spill] sm:$0xff] %v7581_v41  ;;  %v7583_v63 = vpop.permute.xlu1 %687  ;;  %v7585_v51 = vpop.permute.xlu0 %695  ;;  %v12709_v41 = vld [vmem:[#allocation20_spill] sm:$0xff] }
 0x147   : > { %12704 = vst [vmem:[#allocation87_spill] sm:$0xff] %v7583_v63 }
 0x148   : > { %12705 = vst [vmem:[#allocation88_spill] sm:$0xff] %v7585_v51 }
 0x14b   : > { %871 = vperm.xlu2 %6976, %v7366_v49   ;;  %v12713_v49 = vld [vmem:[#allocation19_spill] sm:$0xff] }
 0x14c   : > { %867 = vperm.xlu1 %6975, %v7342_v58   ;;  %875 = vperm.xlu0 %6977, %v7363_v55  }
 0x14d   : > { %v7590_v37 = vpop.permute.xlu2 %739 }
 0x14e   : > { %12706 = vst [vmem:[#allocation89_spill] sm:$0xff] %v7590_v37  ;;  %v7592_v6 = vpop.permute.xlu1 %699  ;;  %v7594_v45 = vpop.permute.xlu0 %707  ;;  %v12714_v37 = vld [vmem:[#allocation26_spill] sm:$0xff] }
 0x14f   : > { %12707 = vst [vmem:[#allocation90_spill] sm:$0xff] %v7592_v6 }
 0x150   : > { %12708 = vst [vmem:[#allocation91_spill] sm:$0xff] %v7594_v45 }
 0x153   : > { %883 = vperm.xlu2 %6976, %v7384_v56  }
 0x154   : > { %879 = vperm.xlu1 %6975, %v7360_v0   ;;  %887 = vperm.xlu0 %6977, %v12709_v41   ;;  %v12718_v41 = vld [vmem:[#allocation25_spill] sm:$0xff] }
 0x155   : > { %v7599_v63 = vpop.permute.xlu2 %751 }
 0x156   : > { %12710 = vst [vmem:[#allocation92_spill] sm:$0xff] %v7599_v63  ;;  %v7601_v51 = vpop.permute.xlu1 %711  ;;  %v7603_v62 = vpop.permute.xlu0 %719  ;;  %v12719_v63 = vld [vmem:[#allocation32_spill] sm:$0xff] }
 0x157   : > { %12711 = vst [vmem:[#allocation93_spill] sm:$0xff] %v7601_v51 }
 0x158   : > { %12712 = vst [vmem:[#allocation94_spill] sm:$0xff] %v7603_v62 }
 0x15b   : > { %895 = vperm.xlu2 %6976, %v7402_v50  }
 0x15c   : > { %891 = vperm.xlu1 %6975, %v12713_v49   ;;  %899 = vperm.xlu0 %6977, %v12714_v37   ;;  %v12723_v37 = vld [vmem:[#allocation31_spill] sm:$0xff] }
 0x15d   : > { %v7608_v6 = vpop.permute.xlu2 %763 }
 0x15e   : > { %12715 = vst [vmem:[#allocation19_spill] sm:$0xff] %v7608_v6  ;;  %v7610_v45 = vpop.permute.xlu1 %723  ;;  %v7612_v56 = vpop.permute.xlu0 %731  ;;  %v7039_v6 = vmov 2  }
 0x15f   : > { %12716 = vst [vmem:[#allocation95_spill] sm:$0xff] %v7610_v45 }
 0x160   : > { %12717 = vst [vmem:[#allocation96_spill] sm:$0xff] %v7612_v56 }
 0x163   : > { %907 = vperm.xlu2 %6976, %v7420_v57  }
 0x164   : > { %903 = vperm.xlu1 %6975, %v12718_v41   ;;  %911 = vperm.xlu0 %6977, %v12719_v63  }
 0x165   : > { %v7617_v51 = vpop.permute.xlu2 %775 }
 0x166   : > { %12720 = vst [vmem:[#allocation25_spill] sm:$0xff] %v7617_v51  ;;  %v7619_v62 = vpop.permute.xlu1 %735  ;;  %v7621_v50 = vpop.permute.xlu0 %743  ;;  %v12727_v51 = vld [vmem:[#allocation2_spill] sm:$0xff] }
 0x167   : > { %12721 = vst [vmem:[#allocation32_spill] sm:$0xff] %v7619_v62 }
 0x168   : > { %12722 = vst [vmem:[#allocation97_spill] sm:$0xff] %v7621_v50 }
 0x16b   : > { %919 = vperm.xlu2 %6976, %v7432_v61  }
 0x16c   : > { %915 = vperm.xlu1 %6975, %v12723_v37   ;;  %6978 = vset.pattern.permute.xlu0 %v7039_v6 }
 0x16d   : > { %923 = vperm.xlu0 %6978, %v7133_v3   ;;  %v7626_v56 = vpop.permute.xlu2 %787 }
 0x16e   : > { %12724 = vst [vmem:[#allocation31_spill] sm:$0xff] %v7626_v56  ;;  %v7628_v45 = vpop.permute.xlu1 %747  ;;  %v7630_v57 = vpop.permute.xlu0 %755 }
 0x16f   : > { %12725 = vst [vmem:[#allocation98_spill] sm:$0xff] %v7628_v45 }
 0x170   : > { %12726 = vst [vmem:[#allocation99_spill] sm:$0xff] %v7630_v57 }
 0x173   : > { %6980 = vset.pattern.permute.xlu2 %v7039_v6 }
 0x174   : > { %6979 = vset.pattern.permute.xlu1 %v7039_v6  ;;  %931 = vperm.xlu2 %6980, %v7130_v2  }
 0x175   : > { %927 = vperm.xlu1 %6979, %v12727_v51   ;;  %943 = vperm.xlu0 %6978, %v7144_v4   ;;  %v7635_v50 = vpop.permute.xlu2 %799 }
 0x176   : > { %12728 = vst [vmem:[#allocation2_spill] sm:$0xff] %v7635_v50  ;;  %v7637_v62 = vpop.permute.xlu1 %759  ;;  %v7639_v61 = vpop.permute.xlu0 %767 }
 0x177   : > { %12729 = vst [vmem:[#allocation100_spill] sm:$0xff] %v7637_v62 }
 0x178   : > { %12730 = vst [vmem:[#allocation101_spill] sm:$0xff] %v7639_v61 }
 0x17c   : > { %939 = vperm.xlu2 %6980, %v7127_v1  }
 0x17d   : > { %935 = vperm.xlu1 %6979, %v7147_v5   ;;  %955 = vperm.xlu0 %6978, %v7156_v7   ;;  %v7644_v3 = vpop.permute.xlu2 %811 }
 0x17e   : > { %12731 = vst [vmem:[#allocation102_spill] sm:$0xff] %v7644_v3  ;;  %v7646_v6 = vpop.permute.xlu1 %771  ;;  %v7648_v2 = vpop.permute.xlu0 %779 }
 0x17f   : > { %12732 = vst [vmem:[#allocation103_spill] sm:$0xff] %v7646_v6 }
 0x180   : > { %12733 = vst [vmem:[#allocation104_spill] sm:$0xff] %v7648_v2 }
 0x184   : > { %951 = vperm.xlu2 %6980, %v7159_v8  }
 0x185   : > { %947 = vperm.xlu1 %6979, %v7162_v9   ;;  %967 = vperm.xlu0 %6978, %v7168_v10   ;;  %v7653_v4 = vpop.permute.xlu2 %823 }
 0x186   : > { %12734 = vst [vmem:[#allocation105_spill] sm:$0xff] %v7653_v4  ;;  %v7655_v51 = vpop.permute.xlu1 %783  ;;  %v7657_v1 = vpop.permute.xlu0 %791 }
 0x187   : > { %12735 = vst [vmem:[#allocation106_spill] sm:$0xff] %v7655_v51 }
 0x188   : > { %12736 = vst [vmem:[#allocation107_spill] sm:$0xff] %v7657_v1 }
 0x18c   : > { %963 = vperm.xlu2 %6980, %v7171_v11  }
 0x18d   : > { %959 = vperm.xlu1 %6979, %v7174_v12   ;;  %979 = vperm.xlu0 %6978, %v7180_v13   ;;  %v7662_v5 = vpop.permute.xlu2 %835 }
 0x18e   : > { %12737 = vst [vmem:[#allocation108_spill] sm:$0xff] %v7662_v5  ;;  %v7664_v7 = vpop.permute.xlu1 %795  ;;  %v7666_v8 = vpop.permute.xlu0 %803 }
 0x18f   : > { %12738 = vst [vmem:[#allocation109_spill] sm:$0xff] %v7664_v7 }
 0x190   : > { %12739 = vst [vmem:[#allocation110_spill] sm:$0xff] %v7666_v8 }
 0x194   : > { %975 = vperm.xlu2 %6980, %v7183_v14  }
 0x195   : > { %971 = vperm.xlu1 %6979, %v7186_v15   ;;  %991 = vperm.xlu0 %6978, %v7192_v16   ;;  %v7671_v9 = vpop.permute.xlu2 %847 }
 0x196   : > { %12740 = vst [vmem:[#allocation111_spill] sm:$0xff] %v7671_v9  ;;  %v7673_v10 = vpop.permute.xlu1 %807  ;;  %v7675_v11 = vpop.permute.xlu0 %815 }
 0x197   : > { %12741 = vst [vmem:[#allocation112_spill] sm:$0xff] %v7673_v10 }
 0x198   : > { %12742 = vst [vmem:[#allocation113_spill] sm:$0xff] %v7675_v11 }
 0x19c   : > { %987 = vperm.xlu2 %6980, %v7195_v17  }
 0x19d   : > { %983 = vperm.xlu1 %6979, %v7198_v18   ;;  %1003 = vperm.xlu0 %6978, %v7204_v19   ;;  %v7680_v12 = vpop.permute.xlu2 %859 }
 0x19e   : > { %12743 = vst [vmem:[#allocation114_spill] sm:$0xff] %v7680_v12  ;;  %v7682_v13 = vpop.permute.xlu1 %819  ;;  %v7684_v14 = vpop.permute.xlu0 %827 }
 0x19f   : > { %12744 = vst [vmem:[#allocation115_spill] sm:$0xff] %v7682_v13 }
 0x1a0   : > { %12745 = vst [vmem:[#allocation116_spill] sm:$0xff] %v7684_v14 }
 0x1a4   : > { %999 = vperm.xlu2 %6980, %v7207_v20  }
 0x1a5   : > { %995 = vperm.xlu1 %6979, %v7210_v21   ;;  %1015 = vperm.xlu0 %6978, %v7216_v22   ;;  %v7689_v15 = vpop.permute.xlu2 %871 }
 0x1a6   : > { %12746 = vst [vmem:[#allocation117_spill] sm:$0xff] %v7689_v15  ;;  %v7691_v16 = vpop.permute.xlu1 %831  ;;  %v7693_v17 = vpop.permute.xlu0 %839 }
 0x1a7   : > { %12747 = vst [vmem:[#allocation118_spill] sm:$0xff] %v7691_v16 }
 0x1a8   : > { %12748 = vst [vmem:[#allocation119_spill] sm:$0xff] %v7693_v17 }
 0x1ac   : > { %1011 = vperm.xlu2 %6980, %v7219_v23  }
 0x1ad   : > { %1007 = vperm.xlu1 %6979, %v7222_v24   ;;  %1027 = vperm.xlu0 %6978, %v7228_v25   ;;  %v7698_v18 = vpop.permute.xlu2 %883 }
 0x1ae   : > { %12749 = vst [vmem:[#allocation120_spill] sm:$0xff] %v7698_v18  ;;  %v7700_v19 = vpop.permute.xlu1 %843  ;;  %v7702_v20 = vpop.permute.xlu0 %851 }
 0x1af   : > { %12750 = vst [vmem:[#allocation121_spill] sm:$0xff] %v7700_v19 }
 0x1b0   : > { %12751 = vst [vmem:[#allocation122_spill] sm:$0xff] %v7702_v20 }
 0x1b4   : > { %1023 = vperm.xlu2 %6980, %v7231_v26  }
 0x1b5   : > { %1019 = vperm.xlu1 %6979, %v7234_v27   ;;  %1039 = vperm.xlu0 %6978, %v7240_v28   ;;  %v7707_v21 = vpop.permute.xlu2 %895 }
 0x1b6   : > { %12752 = vst [vmem:[#allocation123_spill] sm:$0xff] %v7707_v21  ;;  %v7709_v22 = vpop.permute.xlu1 %855  ;;  %v7711_v23 = vpop.permute.xlu0 %863 }
 0x1b7   : > { %12753 = vst [vmem:[#allocation124_spill] sm:$0xff] %v7709_v22 }
 0x1b8   : > { %12754 = vst [vmem:[#allocation125_spill] sm:$0xff] %v7711_v23 }
 0x1bc   : > { %1035 = vperm.xlu2 %6980, %v7243_v29  }
 0x1bd   : > { %1031 = vperm.xlu1 %6979, %v7246_v30   ;;  %1051 = vperm.xlu0 %6978, %v7252_v31   ;;  %v7716_v24 = vpop.permute.xlu2 %907 }
 0x1be   : > { %12755 = vst [vmem:[#allocation126_spill] sm:$0xff] %v7716_v24  ;;  %v7718_v25 = vpop.permute.xlu1 %867  ;;  %v7720_v26 = vpop.permute.xlu0 %875 }
 0x1bf   : > { %12756 = vst [vmem:[#allocation127_spill] sm:$0xff] %v7718_v25 }
 0x1c0   : > { %12757 = vst [vmem:[#allocation128_spill] sm:$0xff] %v7720_v26 }
 0x1c4   : > { %1047 = vperm.xlu2 %6980, %v7255_v32  }
 0x1c5   : > { %1043 = vperm.xlu1 %6979, %v7258_v33   ;;  %1063 = vperm.xlu0 %6978, %v7264_v34   ;;  %v7725_v27 = vpop.permute.xlu2 %919 }
 0x1c6   : > { %12758 = vst [vmem:[#allocation129_spill] sm:$0xff] %v7725_v27  ;;  %v7727_v28 = vpop.permute.xlu1 %879  ;;  %v7729_v29 = vpop.permute.xlu0 %887 }
 0x1c7   : > { %12759 = vst [vmem:[#allocation130_spill] sm:$0xff] %v7727_v28 }
 0x1c8   : > { %12760 = vst [vmem:[#allocation131_spill] sm:$0xff] %v7729_v29 }
 0x1cc   : > { %1059 = vperm.xlu2 %6980, %v7267_v35  }
 0x1cd   : > { %1055 = vperm.xlu1 %6979, %v7270_v36   ;;  %1075 = vperm.xlu0 %6978, %v7278_v38  }
 0x1ce   : > { %v7734_v30 = vpop.permute.xlu1 %891  ;;  %v7736_v31 = vpop.permute.xlu0 %899 }
 0x1cf   : > { %12761 = vst [vmem:[#allocation132_spill] sm:$0xff] %v7734_v30  ;;  %v7738_v32 = vpop.permute.xlu2 %931 }
 0x1d0   : > { %12762 = vst [vmem:[#allocation133_spill] sm:$0xff] %v7736_v31 }
 0x1d1   : > { %12763 = vst [vmem:[#allocation134_spill] sm:$0xff] %v7738_v32 }
 0x1d4   : > { %1071 = vperm.xlu2 %6980, %v7281_v39  }
 0x1d5   : > { %1067 = vperm.xlu1 %6979, %v7284_v40   ;;  %1087 = vperm.xlu0 %6978, %v7292_v42  }
 0x1d6   : > { %v7743_v33 = vpop.permute.xlu1 %903  ;;  %v7745_v34 = vpop.permute.xlu0 %911 }
 0x1d7   : > { %12764 = vst [vmem:[#allocation135_spill] sm:$0xff] %v7743_v33  ;;  %v7747_v35 = vpop.permute.xlu2 %939 }
 0x1d8   : > { %12765 = vst [vmem:[#allocation136_spill] sm:$0xff] %v7745_v34 }
 0x1d9   : > { %12766 = vst [vmem:[#allocation137_spill] sm:$0xff] %v7747_v35 }
 0x1dc   : > { %1083 = vperm.xlu2 %6980, %v7295_v43  }
 0x1dd   : > { %1079 = vperm.xlu1 %6979, %v7298_v44   ;;  %1099 = vperm.xlu0 %6978, %v7306_v46  }
 0x1de   : > { %v7752_v36 = vpop.permute.xlu1 %915 }
 0x1df   : > { %12767 = vst [vmem:[#allocation138_spill] sm:$0xff] %v7752_v36  ;;  %v7754_v38 = vpop.permute.xlu2 %951  ;;  %v7756_v39 = vpop.permute.xlu0 %923 }
 0x1e0   : > { %12768 = vst [vmem:[#allocation139_spill] sm:$0xff] %v7754_v38 }
 0x1e1   : > { %12769 = vst [vmem:[#allocation140_spill] sm:$0xff] %v7756_v39 }
 0x1e4   : > { %1095 = vperm.xlu2 %6980, %v7309_v47  }
 0x1e5   : > { %1091 = vperm.xlu1 %6979, %v7312_v48   ;;  %1111 = vperm.xlu0 %6978, %v7324_v52  }
 0x1e7   : > { %v7761_v40 = vpop.permute.xlu2 %963  ;;  %v7763_v42 = vpop.permute.xlu1 %927 }
 0x1e8   : > { %12770 = vst [vmem:[#allocation141_spill] sm:$0xff] %v7761_v40  ;;  %v7765_v43 = vpop.permute.xlu0 %943 }
 0x1e9   : > { %12771 = vst [vmem:[#allocation142_spill] sm:$0xff] %v7765_v43 }
 0x1ec   : > { %1107 = vperm.xlu2 %6980, %v7327_v53  }
 0x1ed   : > { %1103 = vperm.xlu1 %6979, %v7330_v54   ;;  %1123 = vperm.xlu0 %6978, %v7342_v58   ;;  %v12778_v54 = vld [vmem:[#allocation15_spill] sm:$0xff] }
 0x1ef   : > { %v7770_v44 = vpop.permute.xlu2 %975  ;;  %v7772_v46 = vpop.permute.xlu1 %935 }
 0x1f0   : > { %12772 = vst [vmem:[#allocation143_spill] sm:$0xff] %v7770_v44  ;;  %v7774_v47 = vpop.permute.xlu0 %955 }
 0x1f1   : > { %12773 = vst [vmem:[#allocation144_spill] sm:$0xff] %v7772_v46 }
 0x1f2   : > { %12774 = vst [vmem:[#allocation145_spill] sm:$0xff] %v7774_v47 }
 0x1f4   : > { %1119 = vperm.xlu2 %6980, %v7345_v59  }
 0x1f5   : > { %1115 = vperm.xlu1 %6979, %v7348_v60   ;;  %1135 = vperm.xlu0 %6978, %v7360_v0   ;;  %v12782_v60 = vld [vmem:[#allocation20_spill] sm:$0xff]  ;;  %v12783_v0 = vld [vmem:[#allocation21_spill] sm:$0xff] }
 0x1f7   : > { %v7779_v48 = vpop.permute.xlu2 %987  ;;  %v7781_v52 = vpop.permute.xlu1 %947 }
 0x1f8   : > { %12775 = vst [vmem:[#allocation146_spill] sm:$0xff] %v7779_v48  ;;  %v7783_v53 = vpop.permute.xlu0 %967 }
 0x1f9   : > { %12776 = vst [vmem:[#allocation147_spill] sm:$0xff] %v7781_v52 }
 0x1fa   : > { %12777 = vst [vmem:[#allocation148_spill] sm:$0xff] %v7783_v53 }
 0x1fc   : > { %1131 = vperm.xlu2 %6980, %v7363_v55  }
 0x1fd   : > { %1127 = vperm.xlu1 %6979, %v12778_v54   ;;  %1147 = vperm.xlu0 %6978, %v12713_v49   ;;  %v12787_v54 = vld [vmem:[#allocation26_spill] sm:$0xff]  ;;  %v12788_v49 = vld [vmem:[#allocation27_spill] sm:$0xff] }
 0x1ff   : > { %v7788_v58 = vpop.permute.xlu2 %999  ;;  %v7790_v27 = vpop.permute.xlu1 %959 }
 0x200   : > { %12779 = vst [vmem:[#allocation15_spill] sm:$0xff] %v7788_v58  ;;  %v7792_v59 = vpop.permute.xlu0 %979 }
 0x201   : > { %12780 = vst [vmem:[#allocation149_spill] sm:$0xff] %v7790_v27 }
 0x202   : > { %12781 = vst [vmem:[#allocation150_spill] sm:$0xff] %v7792_v59 }
 0x204   : > { %1143 = vperm.xlu2 %6980, %v12782_v60  }
 0x205   : > { %1139 = vperm.xlu1 %6979, %v12783_v0   ;;  %1159 = vperm.xlu0 %6978, %v12718_v41   ;;  %v12792_v41 = vld [vmem:[#allocation33_spill] sm:$0xff] }
 0x207   : > { %v7797_v24 = vpop.permute.xlu2 %1011  ;;  %v7799_v34 = vpop.permute.xlu1 %971 }
 0x208   : > { %12784 = vst [vmem:[#allocation20_spill] sm:$0xff] %v7797_v24  ;;  %v7801_v55 = vpop.permute.xlu0 %991 }
 0x209   : > { %12785 = vst [vmem:[#allocation21_spill] sm:$0xff] %v7799_v34 }
 0x20a   : > { %12786 = vst [vmem:[#allocation151_spill] sm:$0xff] %v7801_v55 }
 0x20c   : > { %1155 = vperm.xlu2 %6980, %v12787_v54   ;;  %v12796_v54 = vld [vmem:[#allocation37_spill] sm:$0xff] }
 0x20d   : > { %1151 = vperm.xlu1 %6979, %v12788_v49   ;;  %1171 = vperm.xlu0 %6978, %v12723_v37  }
 0x20f   : > { %v7806_v36 = vpop.permute.xlu2 %1023  ;;  %v7808_v21 = vpop.permute.xlu1 %983 }
 0x210   : > { %12789 = vst [vmem:[#allocation26_spill] sm:$0xff] %v7806_v36  ;;  %v7810_v60 = vpop.permute.xlu0 %1003 }
 0x211   : > { %12790 = vst [vmem:[#allocation27_spill] sm:$0xff] %v7808_v21 }
 0x212   : > { %12791 = vst [vmem:[#allocation152_spill] sm:$0xff] %v7810_v60 }
 0x214   : > { %1167 = vperm.xlu2 %6980, %v12719_v63  }
 0x215   : > { %1163 = vperm.xlu1 %6979, %v12792_v41  }
 0x217   : > { %v7814_v0 = vpop.permute.xlu2 %1035  ;;  %v7816_v31 = vpop.permute.xlu1 %995 }
 0x218   : > { %12793 = vst [vmem:[#allocation33_spill] sm:$0xff] %v7814_v0  ;;  %v7818_v33 = vpop.permute.xlu0 %1015 }
 0x219   : > { %12794 = vst [vmem:[#allocation153_spill] sm:$0xff] %v7816_v31 }
 0x21a   : > { %12795 = vst [vmem:[#allocation154_spill] sm:$0xff] %v7818_v33 }
 0x21d   : > { %1175 = vperm.xlu1 %6979, %v12796_v54  }
 0x21f   : > { %v7821_v49 = vpop.permute.xlu2 %1047  ;;  %v7823_v37 = vpop.permute.xlu1 %1007 }
 0x220   : > { %12797 = vst [vmem:[#allocation37_spill] sm:$0xff] %v7821_v49  ;;  %v7825_v18 = vpop.permute.xlu0 %1027 }
 0x221   : > { %12798 = vst [vmem:[#allocation155_spill] sm:$0xff] %v7823_v37 }
 0x222   : > { %12799 = vst [vmem:[#allocation156_spill] sm:$0xff] %v7825_v18 }
 0x227   : > { %v7827_v29 = vpop.permute.xlu2 %1059  ;;  %v7829_v30 = vpop.permute.xlu1 %1019 }
 0x228   : > { %12800 = vst [vmem:[#allocation157_spill] sm:$0xff] %v7827_v29  ;;  %v7831_v63 = vpop.permute.xlu0 %1039 }
 0x229   : > { %12801 = vst [vmem:[#allocation158_spill] sm:$0xff] %v7829_v30 }
 0x22a   : > { %12802 = vst [vmem:[#allocation159_spill] sm:$0xff] %v7831_v63 }
 0x22f   : > { %v7833_v41 = vpop.permute.xlu2 %1071  ;;  %v7835_v15 = vpop.permute.xlu1 %1031 }
 0x230   : > { %12803 = vst [vmem:[#allocation160_spill] sm:$0xff] %v7833_v41  ;;  %v7837_v26 = vpop.permute.xlu0 %1051 }
 0x231   : > { %12804 = vst [vmem:[#allocation161_spill] sm:$0xff] %v7835_v15 }
 0x232   : > { %12805 = vst [vmem:[#allocation162_spill] sm:$0xff] %v7837_v26 }
 0x237   : > { %v7839_v28 = vpop.permute.xlu2 %1083  ;;  %v7841_v54 = vpop.permute.xlu1 %1043 }
 0x238   : > { %12806 = vst [vmem:[#allocation163_spill] sm:$0xff] %v7839_v28  ;;  %v7843_v12 = vpop.permute.xlu0 %1063 }
 0x239   : > { %12807 = vst [vmem:[#allocation164_spill] sm:$0xff] %v7841_v54 }
 0x23a   : > { %12808 = vst [vmem:[#allocation165_spill] sm:$0xff] %v7843_v12 }
 0x23f   : > { %v7845_v23 = vpop.permute.xlu2 %1095  ;;  %v7847_v25 = vpop.permute.xlu1 %1055 }
 0x240   : > { %12809 = vst [vmem:[#allocation166_spill] sm:$0xff] %v7845_v23  ;;  %v7849_v9 = vpop.permute.xlu0 %1075 }
 0x241   : > { %12810 = vst [vmem:[#allocation167_spill] sm:$0xff] %v7847_v25 }
 0x242   : > { %12811 = vst [vmem:[#allocation168_spill] sm:$0xff] %v7849_v9 }
 0x247   : > { %v7851_v20 = vpop.permute.xlu2 %1107  ;;  %v7853_v22 = vpop.permute.xlu1 %1067 }
 0x248   : > { %12812 = vst [vmem:[#allocation169_spill] sm:$0xff] %v7851_v20  ;;  %v7855_v5 = vpop.permute.xlu0 %1087 }
 0x249   : > { %12813 = vst [vmem:[#allocation170_spill] sm:$0xff] %v7853_v22 }
 0x24a   : > { %12814 = vst [vmem:[#allocation171_spill] sm:$0xff] %v7855_v5 }
 0x24f   : > { %v7857_v17 = vpop.permute.xlu2 %1119  ;;  %v7859_v19 = vpop.permute.xlu1 %1079 }
 0x250   : > { %12815 = vst [vmem:[#allocation172_spill] sm:$0xff] %v7857_v17  ;;  %v7861_v4 = vpop.permute.xlu0 %1099 }
 0x251   : > { %12816 = vst [vmem:[#allocation173_spill] sm:$0xff] %v7859_v19 }
 0x252   : > { %12817 = vst [vmem:[#allocation174_spill] sm:$0xff] %v7861_v4 }
 0x257   : > { %v7863_v28 = vpop.permute.xlu2 %1131  ;;  %v7865_v14 = vpop.permute.xlu1 %1091 }
 0x258   : > { %12818 = vst [vmem:[#allocation175_spill] sm:$0xff] %v7863_v28  ;;  %v7867_v23 = vpop.permute.xlu0 %1111 }
 0x259   : > { %12819 = vst [vmem:[#allocation176_spill] sm:$0xff] %v7865_v14 }
 0x25a   : > { %12820 = vst [vmem:[#allocation177_spill] sm:$0xff] %v7867_v23 }
 0x25f   : > { %v7869_v16 = vpop.permute.xlu2 %1143  ;;  %v7871_v3 = vpop.permute.xlu1 %1103 }
 0x260   : > { %12821 = vst [vmem:[#allocation178_spill] sm:$0xff] %v7869_v16  ;;  %v7873_v20 = vpop.permute.xlu0 %1123 }
 0x261   : > { %12822 = vst [vmem:[#allocation179_spill] sm:$0xff] %v7871_v3 }
 0x262   : > { %12823 = vst [vmem:[#allocation180_spill] sm:$0xff] %v7873_v20 }
 0x267   : > { %v7875_v22 = vpop.permute.xlu2 %1155  ;;  %v7877_v5 = vpop.permute.xlu1 %1115 }
 0x268   : > { %12824 = vst [vmem:[#allocation181_spill] sm:$0xff] %v7875_v22  ;;  %v7879_v17 = vpop.permute.xlu0 %1135 }
 0x269   : > { %12825 = vst [vmem:[#allocation182_spill] sm:$0xff] %v7877_v5 }
 0x26a   : > { %12826 = vst [vmem:[#allocation183_spill] sm:$0xff] %v7879_v17 }
 0x26f   : > { %v7881_v19 = vpop.permute.xlu2 %1167  ;;  %v7883_v4 = vpop.permute.xlu1 %1127 }
 0x270   : > { %12827 = vst [vmem:[#allocation184_spill] sm:$0xff] %v7881_v19  ;;  %v7885_v28 = vpop.permute.xlu0 %1147 }
 0x271   : > { %12828 = vst [vmem:[#allocation185_spill] sm:$0xff] %v7883_v4 }
 0x272   : > { %12829 = vst [vmem:[#allocation186_spill] sm:$0xff] %v7885_v28 }
 0x277   : > { %v7887_v14 = vpop.permute.xlu1 %1139 }
 0x278   : > { %12830 = vst [vmem:[#allocation187_spill] sm:$0xff] %v7887_v14  ;;  %v7889_v23 = vpop.permute.xlu0 %1159 }
 0x279   : > { %12831 = vst [vmem:[#allocation188_spill] sm:$0xff] %v7889_v23 }
 0x27f   : > { %v7891_v16 = vpop.permute.xlu1 %1151 }
 0x280   : > { %12832 = vst [vmem:[#allocation189_spill] sm:$0xff] %v7891_v16  ;;  %v7893_v3 = vpop.permute.xlu0 %1171 }
 0x281   : > { %12833 = vst [vmem:[#allocation190_spill] sm:$0xff] %v7893_v3 }
 0x287   : > { %v7895_v20 = vpop.permute.xlu1 %1163 }
 0x288   : > { %12834 = vst [vmem:[#allocation191_spill] sm:$0xff] %v7895_v20 }
 0x28c   : > { %1181 = sbr.rel (%p6904_p9) target bundleno = 662 (0x296), region = 32 }
 0x28f   : > { %v7897_v22 = vpop.permute.xlu1 %1175 }
 0x290   : > { %12835 = vst [vmem:[#allocation192_spill] sm:$0xff] %v7897_v22 }
 0x291   : > { %v1182_v19 = vlaneseq  ;;  %v7040_v28 = vmov inf  }
 0x293   : > { %vm1184_vm0 = vcmp.lt.s32.totalorder %v1182_v19, 512 }
 0x294   : > { %1186 = vst.msk [vmem:[%s7141_s25] sm:$0xf] %vm1184_vm0, %v7040_v28 }
 0x295   : > { %1187 = vst.msk [vmem:[%s7141_s25 + $0x4] sm:$0xf] %vm1184_vm0, %v7040_v28 }
 0x296 PF: > { %v1188_v16 = vld [vmem:[%s7112_s29] sm:$0x77]  ;;  %v1189_v23 = vld [vmem:[%s7112_s29 + $0x8] sm:$0x77]  ;;  %vm3880_vm1 = vcmask 1040384   ;;  %vm3882_vm2 = vcmask 1042434  }
 0x297   : > { %v1192_v3 = vperm.slane %v1188_v16, 0  ;;  %v1193_v14 = vperm.slane %v1188_v16, 4  ;;  %v1194_v20 = vperm.slane %v1189_v23, 0  ;;  %v1195_v4 = vperm.slane %v1189_v23, 4  ;;  %v12836_v8 = vld [vmem:[#allocation3_spill] sm:$0xff] }
 0x298   : > { %v1460_v22 = vperm.slane %v1188_v16, 1  ;;  %v1461_v17 = vperm.slane %v1188_v16, 5  ;;  %v1462_v5 = vperm.slane %v1189_v23, 1  ;;  %v1463_v41 = vperm.slane %v1189_v23, 5 }
 0x299   : > { %v7904_v11 = vperm.slane %v1192_v3, 0  ;;  %v7906_v9 = vperm.slane %v1193_v14, 0  ;;  %v7908_v19 = vperm.slane %v1194_v20, 0  ;;  %v7910_v28 = vperm.slane %v1195_v4, 0  ;;  %v12837_v20 = vld [vmem:[#allocation76_spill] sm:$0xff] }
 0x29a   : > { %v7912_v13 = vperm.slane %v1460_v22, 1  ;;  %v7914_v25 = vperm.slane %v1461_v17, 1  ;;  %v7916_v50 = vperm.slane %v1462_v5, 1  ;;  %v7918_v29 = vperm.slane %v1463_v41, 1 }
 0x29b   : > { %v1220_v12 = vsub.f32 %v12836_v8, %v7904_v11  ;;  %v1221_v3 = vsub.f32 %v12836_v8, %v7906_v9  ;;  %v1222_v14 = vsub.f32 %v12836_v8, %v7908_v19  ;;  %v1223_v4 = vsub.f32 %v12836_v8, %v7910_v28 }
 0x29c   : > { %v1488_v17 = vsub.f32 %v12837_v20, %v7912_v13  ;;  %v1489_v5 = vsub.f32 %v12837_v20, %v7914_v25  ;;  %v1490_v22 = vsub.f32 %v12837_v20, %v7916_v50  ;;  %v1491_v41 = vsub.f32 %v12837_v20, %v7918_v29 }
 0x29d   : > { %v1728_v10 = vperm.slane %v1188_v16, 2  ;;  %v1729_v54 = vperm.slane %v1188_v16, 6  ;;  %v1730_v56 = vperm.slane %v1189_v23, 2  ;;  %v1731_v49 = vperm.slane %v1189_v23, 6 }
 0x29e   : > { %v2012_v1 = vmul.f32 %v1220_v12, %v1220_v12  ;;  %v2013_v26 = vmul.f32 %v1221_v3, %v1221_v3  ;;  %v2014_v7 = vmul.f32 %v1222_v14, %v1222_v14  ;;  %v2015_v8 = vmul.f32 %v1223_v4, %v1223_v4 }
 0x29f   : > { %v7936_v15 = vperm.slane %v1728_v10, 2  ;;  %v7938_v0 = vperm.slane %v1729_v54, 2  ;;  %v7940_v2 = vperm.slane %v1730_v56, 2  ;;  %v7942_v63 = vperm.slane %v1731_v49, 2 }
 0x2a0   : > { %v2268_v51 = vmul.f32 %v1488_v17, %v1488_v17  ;;  %v2269_v30 = vmul.f32 %v1489_v5, %v1489_v5  ;;  %v2270_v36 = vmul.f32 %v1490_v22, %v1490_v22  ;;  %v2271_v20 = vmul.f32 %v1491_v41, %v1491_v41  ;;  %v12838_v22 = vld [vmem:[#allocation7_spill] sm:$0xff] }
 0x2a1   : > { %v1756_v16 = vsub.f32 %v7747_v35, %v7936_v15  ;;  %v1757_v12 = vsub.f32 %v7747_v35, %v7938_v0  ;;  %v1758_v10 = vsub.f32 %v7747_v35, %v7940_v2  ;;  %v1759_v23 = vsub.f32 %v7747_v35, %v7942_v63 }
 0x2a2   : > { %v2524_v56 = vadd.f32 %v2268_v51, %v2012_v1  ;;  %v2525_v54 = vadd.f32 %v2269_v30, %v2013_v26  ;;  %v2526_v49 = vadd.f32 %v2270_v36, %v2014_v7  ;;  %v2527_v3 = vadd.f32 %v2271_v20, %v2015_v8  ;;  %v12839_v26 = vld [vmem:[#allocation85_spill] sm:$0xff] }
 0x2a3   : > { %v2780_v14 = vmul.f32 %v1756_v16, %v1756_v16  ;;  %v2781_v4 = vmul.f32 %v1757_v12, %v1757_v12  ;;  %v2782_v17 = vmul.f32 %v1758_v10, %v1758_v10  ;;  %v2783_v5 = vmul.f32 %v1759_v23, %v1759_v23 }
 0x2a4   : > { %v1212_v41 = vsub.f32 %v12838_v22, %v7904_v11  ;;  %v1213_v61 = vsub.f32 %v12838_v22, %v7906_v9  ;;  %v1214_v18 = vsub.f32 %v12838_v22, %v7908_v19  ;;  %v1215_v35 = vsub.f32 %v12838_v22, %v7910_v28 }
 0x2a5   : > { %v7960_v51 = vadd.f32 %v2780_v14, %v2524_v56  ;;  %v7962_v1 = vadd.f32 %v2781_v4, %v2525_v54  ;;  %v7964_v7 = vadd.f32 %v2782_v17, %v2526_v49  ;;  %v7966_v8 = vadd.f32 %v2783_v5, %v2527_v3 }
 0x2a6   : > { %v1480_v30 = vsub.f32 %v12839_v26, %v7912_v13  ;;  %v1481_v36 = vsub.f32 %v12839_v26, %v7914_v25  ;;  %v1482_v20 = vsub.f32 %v12839_v26, %v7916_v50  ;;  %v1483_v16 = vsub.f32 %v12839_v26, %v7918_v29 }
 0x2a7   : > { %v3296_v12 = vmin.f32 %v7960_v51, %v7962_v1  ;;  %v1748_v10 = vsub.f32 %v7738_v32, %v7936_v15  ;;  %v1749_v23 = vsub.f32 %v7738_v32, %v7938_v0  ;;  %v1750_v56 = vsub.f32 %v7738_v32, %v7940_v2 }
 0x2a8   : > { %v1751_v54 = vsub.f32 %v7738_v32, %v7942_v63  ;;  %v2004_v49 = vmul.f32 %v1212_v41, %v1212_v41  ;;  %v2005_v3 = vmul.f32 %v1213_v61, %v1213_v61  ;;  %v2006_v14 = vmul.f32 %v1214_v18, %v1214_v18  ;;  %v12840_v61 = vld [vmem:[#allocation8_spill] sm:$0xff] }
 0x2a9   : > { %v3297_v4 = vmin.f32 %v3296_v12, %v7964_v7  ;;  %v2007_v17 = vmul.f32 %v1215_v35, %v1215_v35  ;;  %v2260_v5 = vmul.f32 %v1480_v30, %v1480_v30  ;;  %v2261_v26 = vmul.f32 %v1481_v36, %v1481_v36 }
 0x2aa   : > { %v2262_v22 = vmul.f32 %v1482_v20, %v1482_v20  ;;  %v2263_v6 = vmul.f32 %v1483_v16, %v1483_v16  ;;  %v2772_v37 = vmul.f32 %v1748_v10, %v1748_v10  ;;  %v2773_v24 = vmul.f32 %v1749_v23, %v1749_v23 }
 0x2ab   : > { %v3298_v57 = vmin.f32 %v3297_v4, %v7966_v8  ;;  %v2516_v33 = vadd.f32 %v2260_v5, %v2004_v49  ;;  %v2517_v62 = vadd.f32 %v2261_v26, %v2005_v3  ;;  %v2774_v31 = vmul.f32 %v1750_v56, %v1750_v56 }
 0x2ac   : > { %v2518_v58 = vadd.f32 %v2262_v22, %v2006_v14  ;;  %v2519_v60 = vadd.f32 %v2263_v6, %v2007_v17  ;;  %v2775_v32 = vmul.f32 %v1751_v54, %v1751_v54  ;;  %v1204_v18 = vsub.f32 %v12840_v61, %v7904_v11  ;;  %v12841_v6 = vld [vmem:[#allocation82_spill] sm:$0xff] }
 0x2ad   : > { %3299 = vmin.xlane.f32.xlu2 %v3298_v57  ;;  %v3028_v41 = vadd.f32 %v2772_v37, %v2516_v33  ;;  %v3029_v35 = vadd.f32 %v2773_v24, %v2517_v62  ;;  %v1205_v30 = vsub.f32 %v12840_v61, %v7906_v9  ;;  %v1206_v36 = vsub.f32 %v12840_v61, %v7908_v19 }
 0x2ae   : > { %v3030_v20 = vadd.f32 %v2774_v31, %v2518_v58  ;;  %v3031_v16 = vadd.f32 %v2775_v32, %v2519_v60  ;;  %v1207_v26 = vsub.f32 %v12840_v61, %v7910_v28  ;;  %v1472_v22 = vsub.f32 %v12841_v6, %v7912_v13 }
 0x2af   : > { %v3596_v12 = vmin.f32 %v3028_v41, %v7960_v51  ;;  %v3665_v57 = vmin.f32 %v3029_v35, %v7962_v1  ;;  %v3286_v33 = vmin.f32 %v3028_v41, %v3029_v35  ;;  %v1473_v62 = vsub.f32 %v12841_v6, %v7914_v25 }
 0x2b0   : > { %v3734_v24 = vmin.f32 %v3030_v20, %v7964_v7  ;;  %v3803_v37 = vmin.f32 %v3031_v16, %v7966_v8  ;;  %v1474_v31 = vsub.f32 %v12841_v6, %v7916_v50  ;;  %v1475_v32 = vsub.f32 %v12841_v6, %v7918_v29 }
 0x2b1   : > { %v3287_v58 = vmin.f32 %v3286_v33, %v3030_v20  ;;  %v1740_v60 = vsub.f32 %v7756_v39, %v7936_v15  ;;  %v1741_v51 = vsub.f32 %v7756_v39, %v7938_v0  ;;  %v1742_v1 = vsub.f32 %v7756_v39, %v7940_v2 }
 0x2b2   : > { %v1743_v7 = vsub.f32 %v7756_v39, %v7942_v63  ;;  %v1996_v8 = vmul.f32 %v1204_v18, %v1204_v18  ;;  %v1997_v10 = vmul.f32 %v1205_v30, %v1205_v30  ;;  %v1998_v23 = vmul.f32 %v1206_v36, %v1206_v36  ;;  %v12842_v39 = vld [vmem:[#allocation4_spill] sm:$0xff] }
 0x2b3   : > { %v3288_v56 = vmin.f32 %v3287_v58, %v3031_v16  ;;  %v1999_v54 = vmul.f32 %v1207_v26, %v1207_v26  ;;  %v2252_v49 = vmul.f32 %v1472_v22, %v1472_v22  ;;  %v2253_v3 = vmul.f32 %v1473_v62, %v1473_v62 }
 0x2b4   : > { %v2254_v14 = vmul.f32 %v1474_v31, %v1474_v31  ;;  %v2255_v4 = vmul.f32 %v1475_v32, %v1475_v32  ;;  %v2764_v17 = vmul.f32 %v1740_v60, %v1740_v60  ;;  %v2765_v5 = vmul.f32 %v1741_v51, %v1741_v51  ;;  %v12843_v32 = vld [vmem:[#allocation87_spill] sm:$0xff] }
 0x2b5   : > { %3289 = vmin.xlane.f32.xlu1 %v3288_v56  ;;  %v2508_v41 = vadd.f32 %v2252_v49, %v1996_v8  ;;  %v2509_v35 = vadd.f32 %v2253_v3, %v1997_v10  ;;  %v2766_v20 = vmul.f32 %v1742_v1, %v1742_v1  ;;  %v2767_v33 = vmul.f32 %v1743_v7, %v1743_v7 }
 0x2b6   : > { %v2510_v6 = vadd.f32 %v2254_v14, %v1998_v23  ;;  %v2511_v61 = vadd.f32 %v2255_v4, %v1999_v54  ;;  %v1224_v18 = vsub.f32 %v12842_v39, %v7904_v11  ;;  %v1225_v30 = vsub.f32 %v12842_v39, %v7906_v9 }
 0x2b7   : > { %v3020_v36 = vadd.f32 %v2764_v17, %v2508_v41  ;;  %v3021_v16 = vadd.f32 %v2765_v5, %v2509_v35  ;;  %v1226_v26 = vsub.f32 %v12842_v39, %v7908_v19  ;;  %v1227_v22 = vsub.f32 %v12842_v39, %v7910_v28 }
 0x2b8   : > { %v3022_v62 = vadd.f32 %v2766_v20, %v2510_v6  ;;  %v3023_v31 = vadd.f32 %v2767_v33, %v2511_v61  ;;  %v1492_v58 = vsub.f32 %v12843_v32, %v7912_v13  ;;  %v1493_v60 = vsub.f32 %v12843_v32, %v7914_v25 }
 0x2b9   : > { %v8028_v51 = vmin.f32 %v3596_v12, %v3020_v36  ;;  %v8030_v1 = vmin.f32 %v3665_v57, %v3021_v16  ;;  %v3276_v7 = vmin.f32 %v3020_v36, %v3021_v16  ;;  %v1494_v8 = vsub.f32 %v12843_v32, %v7916_v50 }
 0x2ba   : > { %v8034_v10 = vmin.f32 %v3734_v24, %v3022_v62  ;;  %v8036_v23 = vmin.f32 %v3803_v37, %v3023_v31  ;;  %v1495_v61 = vsub.f32 %v12843_v32, %v7918_v29  ;;  %v1760_v6 = vsub.f32 %v7765_v43, %v7936_v15 }
 0x2bb   : > { %v3277_v56 = vmin.f32 %v3276_v7, %v3022_v62  ;;  %v1761_v12 = vsub.f32 %v7765_v43, %v7938_v0  ;;  %v1762_v57 = vsub.f32 %v7765_v43, %v7940_v2  ;;  %v1763_v54 = vsub.f32 %v7765_v43, %v7942_v63  ;;  %v12844_v43 = vld [vmem:[#allocation10_spill] sm:$0xff] }
 0x2bc   : > { %v2016_v24 = vmul.f32 %v1224_v18, %v1224_v18  ;;  %v2017_v49 = vmul.f32 %v1225_v30, %v1225_v30  ;;  %v2018_v37 = vmul.f32 %v1226_v26, %v1226_v26  ;;  %v2019_v3 = vmul.f32 %v1227_v22, %v1227_v22 }
 0x2bd   : > { %v3278_v14 = vmin.f32 %v3277_v56, %v3023_v31  ;;  %v2272_v4 = vmul.f32 %v1492_v58, %v1492_v58  ;;  %v2273_v17 = vmul.f32 %v1493_v60, %v1493_v60  ;;  %v2274_v5 = vmul.f32 %v1494_v8, %v1494_v8 }
 0x2be   : > { %v2275_v41 = vmul.f32 %v1495_v61, %v1495_v61  ;;  %v2784_v35 = vmul.f32 %v1760_v6, %v1760_v6  ;;  %v2785_v20 = vmul.f32 %v1761_v12, %v1761_v12  ;;  %v2786_v33 = vmul.f32 %v1762_v57, %v1762_v57  ;;  %v12845_v61 = vld [vmem:[#allocation84_spill] sm:$0xff] }
 0x2bf   : > { %3279 = vmin.xlane.f32.xlu0 %v3278_v14  ;;  %v2528_v36 = vadd.f32 %v2272_v4, %v2016_v24  ;;  %v2529_v16 = vadd.f32 %v2273_v17, %v2017_v49  ;;  %v2530_v62 = vadd.f32 %v2274_v5, %v2018_v37  ;;  %v2787_v7 = vmul.f32 %v1763_v54, %v1763_v54 }
 0x2c0   : > { %v2531_v32 = vadd.f32 %v2275_v41, %v2019_v3  ;;  %v1216_v18 = vsub.f32 %v12844_v43, %v7904_v11  ;;  %v1217_v30 = vsub.f32 %v12844_v43, %v7906_v9  ;;  %v1218_v26 = vsub.f32 %v12844_v43, %v7908_v19 }
 0x2c1   : > { %v3040_v22 = vadd.f32 %v2784_v35, %v2528_v36  ;;  %v3041_v31 = vadd.f32 %v2785_v20, %v2529_v16  ;;  %v3042_v58 = vadd.f32 %v2786_v33, %v2530_v62  ;;  %v1219_v60 = vsub.f32 %v12844_v43, %v7910_v28  ;;  %v12848_v43 = vld [vmem:[#allocation5_spill] sm:$0xff] }
 0x2c2   : > { %v3043_v8 = vadd.f32 %v2787_v7, %v2531_v32  ;;  %v1484_v6 = vsub.f32 %v12845_v61, %v7912_v13  ;;  %v1485_v56 = vsub.f32 %v12845_v61, %v7914_v25  ;;  %v1486_v12 = vsub.f32 %v12845_v61, %v7916_v50 }
 0x2c3   : > { %v3598_v57 = vmin.f32 %v8028_v51, %v3040_v22  ;;  %v3667_v54 = vmin.f32 %v8030_v1, %v3041_v31  ;;  %v3736_v24 = vmin.f32 %v8034_v10, %v3042_v58  ;;  %v3301_v49 = vmin.f32 %v3040_v22, %v3041_v31 }
 0x2c4   : > { %v3805_v37 = vmin.f32 %v8036_v23, %v3043_v8  ;;  %v1487_v32 = vsub.f32 %v12845_v61, %v7918_v29  ;;  %v1752_v3 = vsub.f32 %v7772_v46, %v7936_v15  ;;  %v1753_v14 = vsub.f32 %v7772_v46, %v7938_v0 }
 0x2c5   : > { %v3302_v4 = vmin.f32 %v3301_v49, %v3042_v58  ;;  %v1754_v51 = vsub.f32 %v7772_v46, %v7940_v2  ;;  %v1755_v1 = vsub.f32 %v7772_v46, %v7942_v63  ;;  %v2008_v10 = vmul.f32 %v1216_v18, %v1216_v18  ;;  %v12846_v18 = vld [vmem:[#allocation11_spill] sm:$0xff] }
 0x2c6   : > { %v2009_v17 = vmul.f32 %v1217_v30, %v1217_v30  ;;  %v2010_v5 = vmul.f32 %v1218_v26, %v1218_v26  ;;  %v2011_v23 = vmul.f32 %v1219_v60, %v1219_v60  ;;  %v2264_v41 = vmul.f32 %v1484_v6, %v1484_v6 }
 0x2c7   : > { %v3303_v35 = vmin.f32 %v3302_v4, %v3043_v8  ;;  %v2265_v20 = vmul.f32 %v1485_v56, %v1485_v56  ;;  %v2266_v33 = vmul.f32 %v1486_v12, %v1486_v12  ;;  %v2267_v36 = vmul.f32 %v1487_v32, %v1487_v32 }
 0x2c8   : > { %v2520_v16 = vadd.f32 %v2264_v41, %v2008_v10  ;;  %v2776_v62 = vmul.f32 %v1752_v3, %v1752_v3  ;;  %v2777_v7 = vmul.f32 %v1753_v14, %v1753_v14  ;;  %v2778_v22 = vmul.f32 %v1754_v51, %v1754_v51  ;;  %v12847_v3 = vld [vmem:[#allocation73_spill] sm:$0xff] }
 0x2c9   : > { %3304 = vmin.xlane.f32.xlu2 %v3303_v35  ;;  %v2521_v31 = vadd.f32 %v2265_v20, %v2009_v17  ;;  %v2522_v58 = vadd.f32 %v2266_v33, %v2010_v5  ;;  %v2523_v49 = vadd.f32 %v2267_v36, %v2011_v23  ;;  %v2779_v39 = vmul.f32 %v1755_v1, %v1755_v1 }
 0x2ca   : > { %v3032_v61 = vadd.f32 %v2776_v62, %v2520_v16  ;;  %v1208_v30 = vsub.f32 %v12846_v18, %v7904_v11  ;;  %v1209_v26 = vsub.f32 %v12846_v18, %v7906_v9  ;;  %v1210_v60 = vsub.f32 %v12846_v18, %v7908_v19 }
 0x2cb   : > { %v3033_v8 = vadd.f32 %v2777_v7, %v2521_v31  ;;  %v3034_v6 = vadd.f32 %v2778_v22, %v2522_v58  ;;  %v3035_v56 = vadd.f32 %v2779_v39, %v2523_v49  ;;  %v1211_v12 = vsub.f32 %v12846_v18, %v7910_v28 }
 0x2cc   : > { %v8084_v32 = vmin.f32 %v3598_v57, %v3032_v61  ;;  %v1476_v14 = vsub.f32 %v12847_v3, %v7912_v13  ;;  %v1477_v4 = vsub.f32 %v12847_v3, %v7914_v25  ;;  %v1478_v51 = vsub.f32 %v12847_v3, %v7916_v50 }
 0x2cd   : > { %v8092_v1 = vmin.f32 %v3667_v54, %v3033_v8  ;;  %v8094_v10 = vmin.f32 %v3736_v24, %v3034_v6  ;;  %v8096_v17 = vmin.f32 %v3805_v37, %v3035_v56  ;;  %v3291_v39 = vmin.f32 %v3032_v61, %v3033_v8 }
 0x2ce   : > { %v1479_v57 = vsub.f32 %v12847_v3, %v7918_v29  ;;  %v1744_v5 = vsub.f32 %v7763_v42, %v7936_v15  ;;  %v1745_v23 = vsub.f32 %v7763_v42, %v7938_v0  ;;  %v1746_v41 = vsub.f32 %v7763_v42, %v7940_v2 }
 0x2cf   : > { %v3292_v35 = vmin.f32 %v3291_v39, %v3034_v6  ;;  %v1747_v54 = vsub.f32 %v7763_v42, %v7942_v63  ;;  %v2000_v24 = vmul.f32 %v1208_v30, %v1208_v30  ;;  %v2001_v37 = vmul.f32 %v1209_v26, %v1209_v26 }
 0x2d0   : > { %v2002_v20 = vmul.f32 %v1210_v60, %v1210_v60  ;;  %v2003_v61 = vmul.f32 %v1211_v12, %v1211_v12  ;;  %v2256_v33 = vmul.f32 %v1476_v14, %v1476_v14  ;;  %v2257_v36 = vmul.f32 %v1477_v4, %v1477_v4 }
 0x2d1   : > { %v3293_v16 = vmin.f32 %v3292_v35, %v3035_v56  ;;  %v2258_v62 = vmul.f32 %v1478_v51, %v1478_v51  ;;  %v2259_v7 = vmul.f32 %v1479_v57, %v1479_v57  ;;  %v2768_v22 = vmul.f32 %v1744_v5, %v1744_v5  ;;  %v12849_v57 = vld [vmem:[#allocation90_spill] sm:$0xff] }
 0x2d2   : > { %v2512_v31 = vadd.f32 %v2256_v33, %v2000_v24  ;;  %v2513_v58 = vadd.f32 %v2257_v36, %v2001_v37  ;;  %v2769_v49 = vmul.f32 %v1745_v23, %v1745_v23  ;;  %v2770_v8 = vmul.f32 %v1746_v41, %v1746_v41 }
 0x2d3   : > { %3294 = vmin.xlane.f32.xlu1 %v3293_v16  ;;  %v2514_v46 = vadd.f32 %v2258_v62, %v2002_v20  ;;  %v2515_v6 = vadd.f32 %v2259_v7, %v2003_v61  ;;  %v2771_v39 = vmul.f32 %v1747_v54, %v1747_v54  ;;  %v1236_v30 = vsub.f32 %v12848_v43, %v7904_v11 }
 0x2d4   : > { %v3024_v26 = vadd.f32 %v2768_v22, %v2512_v31  ;;  %v3025_v60 = vadd.f32 %v2769_v49, %v2513_v58  ;;  %v1237_v12 = vsub.f32 %v12848_v43, %v7906_v9  ;;  %v1238_v56 = vsub.f32 %v12848_v43, %v7908_v19 }
 0x2d5   : > { %v3026_v14 = vadd.f32 %v2770_v8, %v2514_v46  ;;  %v3027_v4 = vadd.f32 %v2771_v39, %v2515_v6  ;;  %v1239_v51 = vsub.f32 %v12848_v43, %v7910_v28  ;;  %v1504_v5 = vsub.f32 %v12849_v57, %v7912_v13 }
 0x2d6   : > { %v3600_v23 = vmin.f32 %v8084_v32, %v3024_v26  ;;  %v3669_v41 = vmin.f32 %v8092_v1, %v3025_v60  ;;  %v3281_v35 = vmin.f32 %v3024_v26, %v3025_v60  ;;  %v1505_v54 = vsub.f32 %v12849_v57, %v7914_v25 }
 0x2d7   : > { %v3738_v24 = vmin.f32 %v8094_v10, %v3026_v14  ;;  %v3807_v37 = vmin.f32 %v8096_v17, %v3027_v4  ;;  %v1506_v46 = vsub.f32 %v12849_v57, %v7916_v50  ;;  %v1507_v20 = vsub.f32 %v12849_v57, %v7918_v29 }
 0x2d8   : > { %v3282_v61 = vmin.f32 %v3281_v35, %v3026_v14  ;;  %v1772_v32 = vsub.f32 %v7774_v47, %v7936_v15  ;;  %v1773_v1 = vsub.f32 %v7774_v47, %v7938_v0  ;;  %v1774_v33 = vsub.f32 %v7774_v47, %v7940_v2 }
 0x2d9   : > { %v1775_v10 = vsub.f32 %v7774_v47, %v7942_v63  ;;  %v2028_v17 = vmul.f32 %v1236_v30, %v1236_v30  ;;  %v2029_v36 = vmul.f32 %v1237_v12, %v1237_v12  ;;  %v2030_v16 = vmul.f32 %v1238_v56, %v1238_v56  ;;  %v12850_v47 = vld [vmem:[#allocation13_spill] sm:$0xff] }
 0x2da   : > { %v3283_v62 = vmin.f32 %v3282_v61, %v3027_v4  ;;  %v2031_v7 = vmul.f32 %v1239_v51, %v1239_v51  ;;  %v2284_v22 = vmul.f32 %v1504_v5, %v1504_v5  ;;  %v2285_v31 = vmul.f32 %v1505_v54, %v1505_v54 }
 0x2db   : > { %v2286_v58 = vmul.f32 %v1506_v46, %v1506_v46  ;;  %v2287_v49 = vmul.f32 %v1507_v20, %v1507_v20  ;;  %v2796_v8 = vmul.f32 %v1772_v32, %v1772_v32  ;;  %v2797_v6 = vmul.f32 %v1773_v1, %v1773_v1  ;;  %v12851_v20 = vld [vmem:[#allocation88_spill] sm:$0xff] }
 0x2dc   : > { %3284 = vmin.xlane.f32.xlu0 %v3283_v62  ;;  %v2540_v39 = vadd.f32 %v2284_v22, %v2028_v17  ;;  %v2541_v26 = vadd.f32 %v2285_v31, %v2029_v36  ;;  %v2798_v60 = vmul.f32 %v1774_v33, %v1774_v33  ;;  %v2799_v14 = vmul.f32 %v1775_v10, %v1775_v10 }
 0x2dd   : > { %v2542_v35 = vadd.f32 %v2286_v58, %v2030_v16  ;;  %v2543_v57 = vadd.f32 %v2287_v49, %v2031_v7  ;;  %v1232_v30 = vsub.f32 %v12850_v47, %v7904_v11  ;;  %v1233_v12 = vsub.f32 %v12850_v47, %v7906_v9 }
 0x2de   : > { %v3052_v56 = vadd.f32 %v2796_v8, %v2540_v39  ;;  %v3053_v4 = vadd.f32 %v2797_v6, %v2541_v26  ;;  %v1234_v51 = vsub.f32 %v12850_v47, %v7908_v19  ;;  %v1235_v5 = vsub.f32 %v12850_v47, %v7910_v28 }
 0x2df   : > { %v3054_v54 = vadd.f32 %v2798_v60, %v2542_v35  ;;  %v3055_v46 = vadd.f32 %v2799_v14, %v2543_v57  ;;  %v1500_v61 = vsub.f32 %v12851_v20, %v7912_v13  ;;  %v1501_v32 = vsub.f32 %v12851_v20, %v7914_v25 }
 0x2e0   : > { %v8148_v1 = vmin.f32 %v3600_v23, %v3052_v56  ;;  %v8150_v33 = vmin.f32 %v3669_v41, %v3053_v4  ;;  %v3316_v10 = vmin.f32 %v3052_v56, %v3053_v4  ;;  %v1502_v17 = vsub.f32 %v12851_v20, %v7916_v50 }
 0x2e1   : > { %v8154_v36 = vmin.f32 %v3738_v24, %v3054_v54  ;;  %v8156_v16 = vmin.f32 %v3807_v37, %v3055_v46  ;;  %v1503_v57 = vsub.f32 %v12851_v20, %v7918_v29  ;;  %v1768_v62 = vsub.f32 %v7754_v38, %v7936_v15 }
 0x2e2   : > { %v3317_v7 = vmin.f32 %v3316_v10, %v3054_v54  ;;  %v1769_v23 = vsub.f32 %v7754_v38, %v7938_v0  ;;  %v1770_v41 = vsub.f32 %v7754_v38, %v7940_v2  ;;  %v1771_v22 = vsub.f32 %v7754_v38, %v7942_v63  ;;  %v12852_v38 = vld [vmem:[#allocation14_spill] sm:$0xff] }
 0x2e3   : > { %v2024_v24 = vmul.f32 %v1232_v30, %v1232_v30  ;;  %v2025_v31 = vmul.f32 %v1233_v12, %v1233_v12  ;;  %v2026_v37 = vmul.f32 %v1234_v51, %v1234_v51  ;;  %v2027_v58 = vmul.f32 %v1235_v5, %v1235_v5 }
 0x2e4   : > { %v3318_v49 = vmin.f32 %v3317_v7, %v3055_v46  ;;  %v2280_v8 = vmul.f32 %v1500_v61, %v1500_v61  ;;  %v2281_v6 = vmul.f32 %v1501_v32, %v1501_v32  ;;  %v2282_v39 = vmul.f32 %v1502_v17, %v1502_v17 }
 0x2e5   : > { %v2283_v26 = vmul.f32 %v1503_v57, %v1503_v57  ;;  %v2792_v60 = vmul.f32 %v1768_v62, %v1768_v62  ;;  %v2793_v14 = vmul.f32 %v1769_v23, %v1769_v23  ;;  %v2794_v35 = vmul.f32 %v1770_v41, %v1770_v41  ;;  %v12853_v57 = vld [vmem:[#allocation79_spill] sm:$0xff] }
 0x2e6   : > { %3319 = vmin.xlane.f32.xlu2 %v3318_v49  ;;  %v2536_v56 = vadd.f32 %v2280_v8, %v2024_v24  ;;  %v2537_v4 = vadd.f32 %v2281_v6, %v2025_v31  ;;  %v2538_v54 = vadd.f32 %v2282_v39, %v2026_v37  ;;  %v2795_v10 = vmul.f32 %v1771_v22, %v1771_v22 }
 0x2e7   : > { %v2539_v43 = vadd.f32 %v2283_v26, %v2027_v58  ;;  %v1228_v30 = vsub.f32 %v12852_v38, %v7904_v11  ;;  %v1229_v12 = vsub.f32 %v12852_v38, %v7906_v9  ;;  %v1230_v51 = vsub.f32 %v12852_v38, %v7908_v19 }
 0x2e8   : > { %v3048_v5 = vadd.f32 %v2792_v60, %v2536_v56  ;;  %v3049_v46 = vadd.f32 %v2793_v14, %v2537_v4  ;;  %v3050_v61 = vadd.f32 %v2794_v35, %v2538_v54  ;;  %v1231_v32 = vsub.f32 %v12852_v38, %v7910_v28 }
 0x2e9   : > { %v3051_v17 = vadd.f32 %v2795_v10, %v2539_v43  ;;  %v1496_v62 = vsub.f32 %v12853_v57, %v7912_v13  ;;  %v1497_v7 = vsub.f32 %v12853_v57, %v7914_v25  ;;  %v1498_v23 = vsub.f32 %v12853_v57, %v7916_v50 }
 0x2ea   : > { %v3602_v41 = vmin.f32 %v8148_v1, %v3048_v5  ;;  %v3671_v22 = vmin.f32 %v8150_v33, %v3049_v46  ;;  %v3740_v24 = vmin.f32 %v8154_v36, %v3050_v61  ;;  %v3311_v31 = vmin.f32 %v3048_v5, %v3049_v46 }
 0x2eb   : > { %v3809_v37 = vmin.f32 %v8156_v16, %v3051_v17  ;;  %v1499_v43 = vsub.f32 %v12853_v57, %v7918_v29  ;;  %v1764_v58 = vsub.f32 %v7781_v52, %v7936_v15  ;;  %v1765_v49 = vsub.f32 %v7781_v52, %v7938_v0 }
 0x2ec   : > { %v3312_v8 = vmin.f32 %v3311_v31, %v3050_v61  ;;  %v1766_v1 = vsub.f32 %v7781_v52, %v7940_v2  ;;  %v1767_v33 = vsub.f32 %v7781_v52, %v7942_v63  ;;  %v2020_v36 = vmul.f32 %v1228_v30, %v1228_v30  ;;  %v12854_v30 = vld [vmem:[#allocation6_spill] sm:$0xff] }
 0x2ed   : > { %v2021_v6 = vmul.f32 %v1229_v12, %v1229_v12  ;;  %v2022_v39 = vmul.f32 %v1230_v51, %v1230_v51  ;;  %v2023_v16 = vmul.f32 %v1231_v32, %v1231_v32  ;;  %v2276_v26 = vmul.f32 %v1496_v62, %v1496_v62 }
 0x2ee   : > { %v3313_v60 = vmin.f32 %v3312_v8, %v3051_v17  ;;  %v2277_v14 = vmul.f32 %v1497_v7, %v1497_v7  ;;  %v2278_v35 = vmul.f32 %v1498_v23, %v1498_v23  ;;  %v2279_v56 = vmul.f32 %v1499_v43, %v1499_v43 }
 0x2ef   : > { %v2532_v4 = vadd.f32 %v2276_v26, %v2020_v36  ;;  %v2788_v54 = vmul.f32 %v1764_v58, %v1764_v58  ;;  %v2789_v10 = vmul.f32 %v1765_v49, %v1765_v49  ;;  %v2790_v5 = vmul.f32 %v1766_v1, %v1766_v1  ;;  %v12855_v58 = vld [vmem:[#allocation93_spill] sm:$0xff] }
 0x2f0   : > { %3314 = vmin.xlane.f32.xlu1 %v3313_v60  ;;  %v2533_v46 = vadd.f32 %v2277_v14, %v2021_v6  ;;  %v2534_v61 = vadd.f32 %v2278_v35, %v2022_v39  ;;  %v2535_v31 = vadd.f32 %v2279_v56, %v2023_v16  ;;  %v2791_v57 = vmul.f32 %v1767_v33, %v1767_v33 }
 0x2f1   : > { %v3044_v38 = vadd.f32 %v2788_v54, %v2532_v4  ;;  %v1248_v12 = vsub.f32 %v12854_v30, %v7904_v11  ;;  %v1249_v51 = vsub.f32 %v12854_v30, %v7906_v9  ;;  %v1250_v32 = vsub.f32 %v12854_v30, %v7908_v19 }
 0x2f2   : > { %v3045_v17 = vadd.f32 %v2789_v10, %v2533_v46  ;;  %v3046_v62 = vadd.f32 %v2790_v5, %v2534_v61  ;;  %v3047_v7 = vadd.f32 %v2791_v57, %v2535_v31  ;;  %v1251_v23 = vsub.f32 %v12854_v30, %v7910_v28 }
 0x2f3   : > { %v8204_v43 = vmin.f32 %v3602_v41, %v3044_v38  ;;  %v1516_v49 = vsub.f32 %v12855_v58, %v7912_v13  ;;  %v1517_v8 = vsub.f32 %v12855_v58, %v7914_v25  ;;  %v1518_v1 = vsub.f32 %v12855_v58, %v7916_v50 }
 0x2f4   : > { %v8212_v33 = vmin.f32 %v3671_v22, %v3045_v17  ;;  %v8214_v36 = vmin.f32 %v3740_v24, %v3046_v62  ;;  %v8216_v6 = vmin.f32 %v3809_v37, %v3047_v7  ;;  %v3306_v57 = vmin.f32 %v3044_v38, %v3045_v17 }
 0x2f5   : > { %v1519_v41 = vsub.f32 %v12855_v58, %v7918_v29  ;;  %v1784_v39 = vsub.f32 %v7783_v53, %v7936_v15  ;;  %v1785_v16 = vsub.f32 %v7783_v53, %v7938_v0  ;;  %v1786_v26 = vsub.f32 %v7783_v53, %v7940_v2 }
 0x2f6   : > { %v3307_v60 = vmin.f32 %v3306_v57, %v3046_v62  ;;  %v1787_v22 = vsub.f32 %v7783_v53, %v7942_v63  ;;  %v2040_v24 = vmul.f32 %v1248_v12, %v1248_v12  ;;  %v2041_v37 = vmul.f32 %v1249_v51, %v1249_v51  ;;  %v12856_v53 = vld [vmem:[#allocation17_spill] sm:$0xff] }
 0x2f7   : > { %v2042_v14 = vmul.f32 %v1250_v32, %v1250_v32  ;;  %v2043_v38 = vmul.f32 %v1251_v23, %v1251_v23  ;;  %v2296_v35 = vmul.f32 %v1516_v49, %v1516_v49  ;;  %v2297_v56 = vmul.f32 %v1517_v8, %v1517_v8 }
 0x2f8   : > { %v3308_v4 = vmin.f32 %v3307_v60, %v3047_v7  ;;  %v2298_v54 = vmul.f32 %v1518_v1, %v1518_v1  ;;  %v2299_v10 = vmul.f32 %v1519_v41, %v1519_v41  ;;  %v2808_v5 = vmul.f32 %v1784_v39, %v1784_v39  ;;  %v12857_v41 = vld [vmem:[#allocation91_spill] sm:$0xff] }
 0x2f9   : > { %v2552_v46 = vadd.f32 %v2296_v35, %v2040_v24  ;;  %v2553_v61 = vadd.f32 %v2297_v56, %v2041_v37  ;;  %v2809_v31 = vmul.f32 %v1785_v16, %v1785_v16  ;;  %v2810_v17 = vmul.f32 %v1786_v26, %v1786_v26 }
 0x2fa   : > { %3309 = vmin.xlane.f32.xlu0 %v3308_v4  ;;  %v2554_v58 = vadd.f32 %v2298_v54, %v2042_v14  ;;  %v2555_v62 = vadd.f32 %v2299_v10, %v2043_v38  ;;  %v2811_v57 = vmul.f32 %v1787_v22, %v1787_v22  ;;  %v1244_v12 = vsub.f32 %v12856_v53, %v7904_v11 }
 0x2fb   : > { %v3064_v51 = vadd.f32 %v2808_v5, %v2552_v46  ;;  %v3065_v32 = vadd.f32 %v2809_v31, %v2553_v61  ;;  %v1245_v23 = vsub.f32 %v12856_v53, %v7906_v9  ;;  %v1246_v7 = vsub.f32 %v12856_v53, %v7908_v19 }
 0x2fc   : > { %v3066_v49 = vadd.f32 %v2810_v17, %v2554_v58  ;;  %v3067_v8 = vadd.f32 %v2811_v57, %v2555_v62  ;;  %v1247_v1 = vsub.f32 %v12856_v53, %v7910_v28  ;;  %v1512_v39 = vsub.f32 %v12857_v41, %v7912_v13 }
 0x2fd   : > { %v3604_v16 = vmin.f32 %v8204_v43, %v3064_v51  ;;  %v3673_v26 = vmin.f32 %v8212_v33, %v3065_v32  ;;  %v3331_v60 = vmin.f32 %v3064_v51, %v3065_v32  ;;  %v1513_v22 = vsub.f32 %v12857_v41, %v7914_v25 }
 0x2fe   : > { %v3742_v24 = vmin.f32 %v8214_v36, %v3066_v49  ;;  %v3811_v37 = vmin.f32 %v8216_v6, %v3067_v8  ;;  %v1514_v58 = vsub.f32 %v12857_v41, %v7916_v50  ;;  %v1515_v14 = vsub.f32 %v12857_v41, %v7918_v29 }
 0x2ff   : > { %v3332_v38 = vmin.f32 %v3331_v60, %v3066_v49  ;;  %v1780_v43 = vsub.f32 %v7761_v40, %v7936_v15  ;;  %v1781_v33 = vsub.f32 %v7761_v40, %v7938_v0  ;;  %v1782_v35 = vsub.f32 %v7761_v40, %v7940_v2 }
 0x300   : > { %v1783_v36 = vsub.f32 %v7761_v40, %v7942_v63  ;;  %v2036_v6 = vmul.f32 %v1244_v12, %v1244_v12  ;;  %v2037_v56 = vmul.f32 %v1245_v23, %v1245_v23  ;;  %v2038_v4 = vmul.f32 %v1246_v7, %v1246_v7  ;;  %v12858_v40 = vld [vmem:[#allocation18_spill] sm:$0xff] }
 0x301   : > { %v3333_v54 = vmin.f32 %v3332_v38, %v3067_v8  ;;  %v2039_v10 = vmul.f32 %v1247_v1, %v1247_v1  ;;  %v2292_v5 = vmul.f32 %v1512_v39, %v1512_v39  ;;  %v2293_v46 = vmul.f32 %v1513_v22, %v1513_v22 }
 0x302   : > { %v2294_v61 = vmul.f32 %v1514_v58, %v1514_v58  ;;  %v2295_v31 = vmul.f32 %v1515_v14, %v1515_v14  ;;  %v2804_v17 = vmul.f32 %v1780_v43, %v1780_v43  ;;  %v2805_v62 = vmul.f32 %v1781_v33, %v1781_v33  ;;  %v12859_v14 = vld [vmem:[#allocation81_spill] sm:$0xff] }
 0x303   : > { %3334 = vmin.xlane.f32.xlu2 %v3333_v54  ;;  %v2548_v57 = vadd.f32 %v2292_v5, %v2036_v6  ;;  %v2549_v51 = vadd.f32 %v2293_v46, %v2037_v56  ;;  %v2806_v32 = vmul.f32 %v1782_v35, %v1782_v35  ;;  %v2807_v49 = vmul.f32 %v1783_v36, %v1783_v36 }
 0x304   : > { %v2550_v60 = vadd.f32 %v2294_v61, %v2038_v4  ;;  %v2551_v30 = vadd.f32 %v2295_v31, %v2039_v10  ;;  %v1240_v12 = vsub.f32 %v12858_v40, %v7904_v11  ;;  %v1241_v23 = vsub.f32 %v12858_v40, %v7906_v9 }
 0x305   : > { %v3060_v7 = vadd.f32 %v2804_v17, %v2548_v57  ;;  %v3061_v8 = vadd.f32 %v2805_v62, %v2549_v51  ;;  %v1242_v1 = vsub.f32 %v12858_v40, %v7908_v19  ;;  %v1243_v39 = vsub.f32 %v12858_v40, %v7910_v28  ;;  %v13008_v40 = vld [vmem:[#allocation8_spill] sm:$0xff] }
 0x306   : > { %v3062_v22 = vadd.f32 %v2806_v32, %v2550_v60  ;;  %v3063_v58 = vadd.f32 %v2807_v49, %v2551_v30  ;;  %v1508_v38 = vsub.f32 %v12859_v14, %v7912_v13  ;;  %v1509_v43 = vsub.f32 %v12859_v14, %v7914_v25 }
 0x307   : > { %v8268_v33 = vmin.f32 %v3604_v16, %v3060_v7  ;;  %v8270_v35 = vmin.f32 %v3673_v26, %v3061_v8  ;;  %v3326_v36 = vmin.f32 %v3060_v7, %v3061_v8  ;;  %v1510_v6 = vsub.f32 %v12859_v14, %v7916_v50 }
 0x308   : > { %v8274_v56 = vmin.f32 %v3742_v24, %v3062_v22  ;;  %v8276_v4 = vmin.f32 %v3811_v37, %v3063_v58  ;;  %v1511_v30 = vsub.f32 %v12859_v14, %v7918_v29  ;;  %v1776_v54 = vsub.f32 %v7790_v27, %v7936_v15 }
 0x309   : > { %v3327_v10 = vmin.f32 %v3326_v36, %v3062_v22  ;;  %v1777_v16 = vsub.f32 %v7790_v27, %v7938_v0  ;;  %v1778_v26 = vsub.f32 %v7790_v27, %v7940_v2  ;;  %v1779_v5 = vsub.f32 %v7790_v27, %v7942_v63  ;;  %v12860_v27 = vld [vmem:[#allocation9_spill] sm:$0xff] }
 0x30a   : > { %v2032_v24 = vmul.f32 %v1240_v12, %v1240_v12  ;;  %v2033_v46 = vmul.f32 %v1241_v23, %v1241_v23  ;;  %v2034_v37 = vmul.f32 %v1242_v1, %v1242_v1  ;;  %v2035_v61 = vmul.f32 %v1243_v39, %v1243_v39 }
 0x30b   : > { %v3328_v31 = vmin.f32 %v3327_v10, %v3063_v58  ;;  %v2288_v17 = vmul.f32 %v1508_v38, %v1508_v38  ;;  %v2289_v62 = vmul.f32 %v1509_v43, %v1509_v43  ;;  %v2290_v57 = vmul.f32 %v1510_v6, %v1510_v6 }
 0x30c   : > { %v2291_v51 = vmul.f32 %v1511_v30, %v1511_v30  ;;  %v2800_v32 = vmul.f32 %v1776_v54, %v1776_v54  ;;  %v2801_v49 = vmul.f32 %v1777_v16, %v1777_v16  ;;  %v2802_v60 = vmul.f32 %v1778_v26, %v1778_v26  ;;  %v12861_v30 = vld [vmem:[#allocation95_spill] sm:$0xff] }
 0x30d   : > { %3329 = vmin.xlane.f32.xlu1 %v3328_v31  ;;  %v2544_v7 = vadd.f32 %v2288_v17, %v2032_v24  ;;  %v2545_v8 = vadd.f32 %v2289_v62, %v2033_v46  ;;  %v2546_v22 = vadd.f32 %v2290_v57, %v2034_v37  ;;  %v2803_v36 = vmul.f32 %v1779_v5, %v1779_v5 }
 0x30e   : > { %v2547_v14 = vadd.f32 %v2291_v51, %v2035_v61  ;;  %v1260_v12 = vsub.f32 %v12860_v27, %v7904_v11  ;;  %v1261_v23 = vsub.f32 %v12860_v27, %v7906_v9  ;;  %v1262_v1 = vsub.f32 %v12860_v27, %v7908_v19 }
 0x30f   : > { %v3056_v39 = vadd.f32 %v2800_v32, %v2544_v7  ;;  %v3057_v58 = vadd.f32 %v2801_v49, %v2545_v8  ;;  %v3058_v38 = vadd.f32 %v2802_v60, %v2546_v22  ;;  %v1263_v43 = vsub.f32 %v12860_v27, %v7910_v28 }
 0x310   : > { %v3059_v6 = vadd.f32 %v2803_v36, %v2547_v14  ;;  %v1528_v54 = vsub.f32 %v12861_v30, %v7912_v13  ;;  %v1529_v10 = vsub.f32 %v12861_v30, %v7914_v25  ;;  %v1530_v16 = vsub.f32 %v12861_v30, %v7916_v50 }
 0x311   : > { %v3606_v26 = vmin.f32 %v8268_v33, %v3056_v39  ;;  %v3675_v5 = vmin.f32 %v8270_v35, %v3057_v58  ;;  %v3744_v24 = vmin.f32 %v8274_v56, %v3058_v38  ;;  %v3321_v46 = vmin.f32 %v3056_v39, %v3057_v58 }
 0x312   : > { %v3813_v37 = vmin.f32 %v8276_v4, %v3059_v6  ;;  %v1531_v14 = vsub.f32 %v12861_v30, %v7918_v29  ;;  %v1796_v61 = vsub.f32 %v7792_v59, %v7936_v15  ;;  %v1797_v31 = vsub.f32 %v7792_v59, %v7938_v0 }
 0x313   : > { %v3322_v17 = vmin.f32 %v3321_v46, %v3058_v38  ;;  %v1798_v33 = vsub.f32 %v7792_v59, %v7940_v2  ;;  %v1799_v35 = vsub.f32 %v7792_v59, %v7942_v63  ;;  %v2052_v56 = vmul.f32 %v1260_v12, %v1260_v12  ;;  %v12862_v12 = vld [vmem:[#allocation23_spill] sm:$0xff] }
 0x314   : > { %v2053_v62 = vmul.f32 %v1261_v23, %v1261_v23  ;;  %v2054_v57 = vmul.f32 %v1262_v1, %v1262_v1  ;;  %v2055_v4 = vmul.f32 %v1263_v43, %v1263_v43  ;;  %v2308_v51 = vmul.f32 %v1528_v54, %v1528_v54 }
 0x315   : > { %v3323_v32 = vmin.f32 %v3322_v17, %v3059_v6  ;;  %v2309_v49 = vmul.f32 %v1529_v10, %v1529_v10  ;;  %v2310_v60 = vmul.f32 %v1530_v16, %v1530_v16  ;;  %v2311_v7 = vmul.f32 %v1531_v14, %v1531_v14 }
 0x316   : > { %v2564_v8 = vadd.f32 %v2308_v51, %v2052_v56  ;;  %v2820_v22 = vmul.f32 %v1796_v61, %v1796_v61  ;;  %v2821_v36 = vmul.f32 %v1797_v31, %v1797_v31  ;;  %v2822_v39 = vmul.f32 %v1798_v33, %v1798_v33  ;;  %v12863_v61 = vld [vmem:[#allocation94_spill] sm:$0xff] }
 0x317   : > { %3324 = vmin.xlane.f32.xlu0 %v3323_v32  ;;  %v2565_v58 = vadd.f32 %v2309_v49, %v2053_v62  ;;  %v2566_v38 = vadd.f32 %v2310_v60, %v2054_v57  ;;  %v2567_v46 = vadd.f32 %v2311_v7, %v2055_v4  ;;  %v2823_v30 = vmul.f32 %v1799_v35, %v1799_v35 }
 0x318   : > { %v3076_v27 = vadd.f32 %v2820_v22, %v2564_v8  ;;  %v1256_v23 = vsub.f32 %v12862_v12, %v7904_v11  ;;  %v1257_v1 = vsub.f32 %v12862_v12, %v7906_v9  ;;  %v1258_v43 = vsub.f32 %v12862_v12, %v7908_v19 }
 0x319   : > { %v3077_v6 = vadd.f32 %v2821_v36, %v2565_v58  ;;  %v3078_v54 = vadd.f32 %v2822_v39, %v2566_v38  ;;  %v3079_v10 = vadd.f32 %v2823_v30, %v2567_v46  ;;  %v1259_v16 = vsub.f32 %v12862_v12, %v7910_v28 }
 0x31a   : > { %v8324_v14 = vmin.f32 %v3606_v26, %v3076_v27  ;;  %v1524_v31 = vsub.f32 %v12863_v61, %v7912_v13  ;;  %v1525_v17 = vsub.f32 %v12863_v61, %v7914_v25  ;;  %v1526_v33 = vsub.f32 %v12863_v61, %v7916_v50 }
 0x31b   : > { %v8332_v35 = vmin.f32 %v3675_v5, %v3077_v6  ;;  %v8334_v56 = vmin.f32 %v3744_v24, %v3078_v54  ;;  %v8336_v62 = vmin.f32 %v3813_v37, %v3079_v10  ;;  %v3346_v30 = vmin.f32 %v3076_v27, %v3077_v6 }
 0x31c   : > { %v1527_v26 = vsub.f32 %v12863_v61, %v7918_v29  ;;  %v1792_v57 = vsub.f32 %v7770_v44, %v7936_v15  ;;  %v1793_v4 = vsub.f32 %v7770_v44, %v7938_v0  ;;  %v1794_v51 = vsub.f32 %v7770_v44, %v7940_v2 }
 0x31d   : > { %v3347_v32 = vmin.f32 %v3346_v30, %v3078_v54  ;;  %v1795_v5 = vsub.f32 %v7770_v44, %v7942_v63  ;;  %v2048_v24 = vmul.f32 %v1256_v23, %v1256_v23  ;;  %v2049_v37 = vmul.f32 %v1257_v1, %v1257_v1  ;;  %v12864_v44 = vld [vmem:[#allocation24_spill] sm:$0xff] }
 0x31e   : > { %v2050_v49 = vmul.f32 %v1258_v43, %v1258_v43  ;;  %v2051_v27 = vmul.f32 %v1259_v16, %v1259_v16  ;;  %v2304_v60 = vmul.f32 %v1524_v31, %v1524_v31  ;;  %v2305_v7 = vmul.f32 %v1525_v17, %v1525_v17 }
 0x31f   : > { %v3348_v8 = vmin.f32 %v3347_v32, %v3079_v10  ;;  %v2306_v22 = vmul.f32 %v1526_v33, %v1526_v33  ;;  %v2307_v36 = vmul.f32 %v1527_v26, %v1527_v26  ;;  %v2816_v39 = vmul.f32 %v1792_v57, %v1792_v57  ;;  %v12865_v26 = vld [vmem:[#allocation83_spill] sm:$0xff] }
 0x320   : > { %v2560_v58 = vadd.f32 %v2304_v60, %v2048_v24  ;;  %v2561_v38 = vadd.f32 %v2305_v7, %v2049_v37  ;;  %v2817_v46 = vmul.f32 %v1793_v4, %v1793_v4  ;;  %v2818_v6 = vmul.f32 %v1794_v51, %v1794_v51 }
 0x321   : > { %3349 = vmin.xlane.f32.xlu2 %v3348_v8  ;;  %v2562_v59 = vadd.f32 %v2306_v22, %v2050_v49  ;;  %v2563_v54 = vadd.f32 %v2307_v36, %v2051_v27  ;;  %v2819_v30 = vmul.f32 %v1795_v5, %v1795_v5  ;;  %v1252_v23 = vsub.f32 %v12864_v44, %v7904_v11 }
 0x322   : > { %v3072_v1 = vadd.f32 %v2816_v39, %v2560_v58  ;;  %v3073_v43 = vadd.f32 %v2817_v46, %v2561_v38  ;;  %v1253_v16 = vsub.f32 %v12864_v44, %v7906_v9  ;;  %v1254_v10 = vsub.f32 %v12864_v44, %v7908_v19 }
 0x323   : > { %v3074_v31 = vadd.f32 %v2818_v6, %v2562_v59  ;;  %v3075_v17 = vadd.f32 %v2819_v30, %v2563_v54  ;;  %v1255_v33 = vsub.f32 %v12864_v44, %v7910_v28  ;;  %v1520_v57 = vsub.f32 %v12865_v26, %v7912_v13 }
 0x324   : > { %v3608_v4 = vmin.f32 %v8324_v14, %v3072_v1  ;;  %v3677_v51 = vmin.f32 %v8332_v35, %v3073_v43  ;;  %v3341_v32 = vmin.f32 %v3072_v1, %v3073_v43  ;;  %v1521_v5 = vsub.f32 %v12865_v26, %v7914_v25 }
 0x325   : > { %v3746_v24 = vmin.f32 %v8334_v56, %v3074_v31  ;;  %v3815_v37 = vmin.f32 %v8336_v62, %v3075_v17  ;;  %v1522_v59 = vsub.f32 %v12865_v26, %v7916_v50  ;;  %v1523_v49 = vsub.f32 %v12865_v26, %v7918_v29 }
 0x326   : > { %v3342_v27 = vmin.f32 %v3341_v32, %v3074_v31  ;;  %v1788_v14 = vsub.f32 %v7799_v34, %v7936_v15  ;;  %v1789_v35 = vsub.f32 %v7799_v34, %v7938_v0  ;;  %v1790_v60 = vsub.f32 %v7799_v34, %v7940_v2 }
 0x327   : > { %v1791_v56 = vsub.f32 %v7799_v34, %v7942_v63  ;;  %v2044_v62 = vmul.f32 %v1252_v23, %v1252_v23  ;;  %v2045_v7 = vmul.f32 %v1253_v16, %v1253_v16  ;;  %v2046_v8 = vmul.f32 %v1254_v10, %v1254_v10  ;;  %v12866_v34 = vld [vmem:[#allocation12_spill] sm:$0xff] }
 0x328   : > { %v3343_v22 = vmin.f32 %v3342_v27, %v3075_v17  ;;  %v2047_v36 = vmul.f32 %v1255_v33, %v1255_v33  ;;  %v2300_v39 = vmul.f32 %v1520_v57, %v1520_v57  ;;  %v2301_v58 = vmul.f32 %v1521_v5, %v1521_v5 }
 0x329   : > { %v2302_v38 = vmul.f32 %v1522_v59, %v1522_v59  ;;  %v2303_v46 = vmul.f32 %v1523_v49, %v1523_v49  ;;  %v2812_v6 = vmul.f32 %v1788_v14, %v1788_v14  ;;  %v2813_v54 = vmul.f32 %v1789_v35, %v1789_v35  ;;  %v12867_v49 = vld [vmem:[#allocation32_spill] sm:$0xff] }
 0x32a   : > { %3344 = vmin.xlane.f32.xlu1 %v3343_v22  ;;  %v2556_v30 = vadd.f32 %v2300_v39, %v2044_v62  ;;  %v2557_v1 = vadd.f32 %v2301_v58, %v2045_v7  ;;  %v2814_v43 = vmul.f32 %v1790_v60, %v1790_v60  ;;  %v2815_v31 = vmul.f32 %v1791_v56, %v1791_v56 }
 0x32b   : > { %v2558_v32 = vadd.f32 %v2302_v38, %v2046_v8  ;;  %v2559_v26 = vadd.f32 %v2303_v46, %v2047_v36  ;;  %v1272_v23 = vsub.f32 %v12866_v34, %v7904_v11  ;;  %v1273_v16 = vsub.f32 %v12866_v34, %v7906_v9 }
 0x32c   : > { %v3068_v10 = vadd.f32 %v2812_v6, %v2556_v30  ;;  %v3069_v17 = vadd.f32 %v2813_v54, %v2557_v1  ;;  %v1274_v33 = vsub.f32 %v12866_v34, %v7908_v19  ;;  %v1275_v57 = vsub.f32 %v12866_v34, %v7910_v28 }
 0x32d   : > { %v3070_v5 = vadd.f32 %v2814_v43, %v2558_v32  ;;  %v3071_v59 = vadd.f32 %v2815_v31, %v2559_v26  ;;  %v1540_v27 = vsub.f32 %v12867_v49, %v7912_v13  ;;  %v1541_v14 = vsub.f32 %v12867_v49, %v7914_v25 }
 0x32e   : > { %v8388_v35 = vmin.f32 %v3608_v4, %v3068_v10  ;;  %v8390_v60 = vmin.f32 %v3677_v51, %v3069_v17  ;;  %v3336_v56 = vmin.f32 %v3068_v10, %v3069_v17  ;;  %v1542_v62 = vsub.f32 %v12867_v49, %v7916_v50 }
 0x32f   : > { %v8394_v7 = vmin.f32 %v3746_v24, %v3070_v5  ;;  %v8396_v8 = vmin.f32 %v3815_v37, %v3071_v59  ;;  %v1543_v26 = vsub.f32 %v12867_v49, %v7918_v29  ;;  %v1808_v22 = vsub.f32 %v7801_v55, %v7936_v15 }
 0x330   : > { %v3337_v36 = vmin.f32 %v3336_v56, %v3070_v5  ;;  %v1809_v4 = vsub.f32 %v7801_v55, %v7938_v0  ;;  %v1810_v51 = vsub.f32 %v7801_v55, %v7940_v2  ;;  %v1811_v39 = vsub.f32 %v7801_v55, %v7942_v63  ;;  %v12868_v55 = vld [vmem:[#allocation29_spill] sm:$0xff] }
 0x331   : > { %v2064_v24 = vmul.f32 %v1272_v23, %v1272_v23  ;;  %v2065_v58 = vmul.f32 %v1273_v16, %v1273_v16  ;;  %v2066_v37 = vmul.f32 %v1274_v33, %v1274_v33  ;;  %v2067_v38 = vmul.f32 %v1275_v57, %v1275_v57 }
 0x332   : > { %v3338_v46 = vmin.f32 %v3337_v36, %v3071_v59  ;;  %v2320_v6 = vmul.f32 %v1540_v27, %v1540_v27  ;;  %v2321_v54 = vmul.f32 %v1541_v14, %v1541_v14  ;;  %v2322_v30 = vmul.f32 %v1542_v62, %v1542_v62 }
 0x333   : > { %v2323_v1 = vmul.f32 %v1543_v26, %v1543_v26  ;;  %v2832_v43 = vmul.f32 %v1808_v22, %v1808_v22  ;;  %v2833_v31 = vmul.f32 %v1809_v4, %v1809_v4  ;;  %v2834_v32 = vmul.f32 %v1810_v51, %v1810_v51  ;;  %v12869_v26 = vld [vmem:[#allocation96_spill] sm:$0xff] }
 0x334   : > { %3339 = vmin.xlane.f32.xlu0 %v3338_v46  ;;  %v2576_v10 = vadd.f32 %v2320_v6, %v2064_v24  ;;  %v2577_v17 = vadd.f32 %v2321_v54, %v2065_v58  ;;  %v2578_v5 = vadd.f32 %v2322_v30, %v2066_v37  ;;  %v2835_v56 = vmul.f32 %v1811_v39, %v1811_v39 }
 0x335   : > { %v2579_v49 = vadd.f32 %v2323_v1, %v2067_v38  ;;  %v1268_v23 = vsub.f32 %v12868_v55, %v7904_v11  ;;  %v1269_v16 = vsub.f32 %v12868_v55, %v7906_v9  ;;  %v1270_v33 = vsub.f32 %v12868_v55, %v7908_v19 }
 0x336   : > { %v3088_v57 = vadd.f32 %v2832_v43, %v2576_v10  ;;  %v3089_v59 = vadd.f32 %v2833_v31, %v2577_v17  ;;  %v3090_v27 = vadd.f32 %v2834_v32, %v2578_v5  ;;  %v1271_v14 = vsub.f32 %v12868_v55, %v7910_v28 }
 0x337   : > { %v3091_v62 = vadd.f32 %v2835_v56, %v2579_v49  ;;  %v1536_v22 = vsub.f32 %v12869_v26, %v7912_v13  ;;  %v1537_v36 = vsub.f32 %v12869_v26, %v7914_v25  ;;  %v1538_v4 = vsub.f32 %v12869_v26, %v7916_v50 }
 0x338   : > { %v3610_v51 = vmin.f32 %v8388_v35, %v3088_v57  ;;  %v3679_v39 = vmin.f32 %v8390_v60, %v3089_v59  ;;  %v3748_v24 = vmin.f32 %v8394_v7, %v3090_v27  ;;  %v3361_v58 = vmin.f32 %v3088_v57, %v3089_v59 }
 0x339   : > { %v3817_v37 = vmin.f32 %v8396_v8, %v3091_v62  ;;  %v1539_v49 = vsub.f32 %v12869_v26, %v7918_v29  ;;  %v1804_v38 = vsub.f32 %v7779_v48, %v7936_v15  ;;  %v1805_v46 = vsub.f32 %v7779_v48, %v7938_v0 }
 0x33a   : > { %v3362_v6 = vmin.f32 %v3361_v58, %v3090_v27  ;;  %v1806_v35 = vsub.f32 %v7779_v48, %v7940_v2  ;;  %v1807_v60 = vsub.f32 %v7779_v48, %v7942_v63  ;;  %v2060_v7 = vmul.f32 %v1268_v23, %v1268_v23  ;;  %v12870_v23 = vld [vmem:[#allocation30_spill] sm:$0xff] }
 0x33b   : > { %v2061_v54 = vmul.f32 %v1269_v16, %v1269_v16  ;;  %v2062_v30 = vmul.f32 %v1270_v33, %v1270_v33  ;;  %v2063_v8 = vmul.f32 %v1271_v14, %v1271_v14  ;;  %v2316_v1 = vmul.f32 %v1536_v22, %v1536_v22 }
 0x33c   : > { %v3363_v43 = vmin.f32 %v3362_v6, %v3091_v62  ;;  %v2317_v31 = vmul.f32 %v1537_v36, %v1537_v36  ;;  %v2318_v32 = vmul.f32 %v1538_v4, %v1538_v4  ;;  %v2319_v10 = vmul.f32 %v1539_v49, %v1539_v49 }
 0x33d   : > { %v2572_v17 = vadd.f32 %v2316_v1, %v2060_v7  ;;  %v2828_v5 = vmul.f32 %v1804_v38, %v1804_v38  ;;  %v2829_v56 = vmul.f32 %v1805_v46, %v1805_v46  ;;  %v2830_v57 = vmul.f32 %v1806_v35, %v1806_v35  ;;  %v12871_v38 = vld [vmem:[#allocation86_spill] sm:$0xff] }
 0x33e   : > { %3364 = vmin.xlane.f32.xlu2 %v3363_v43  ;;  %v2573_v59 = vadd.f32 %v2317_v31, %v2061_v54  ;;  %v2574_v27 = vadd.f32 %v2318_v32, %v2062_v30  ;;  %v2575_v58 = vadd.f32 %v2319_v10, %v2063_v8  ;;  %v2831_v34 = vmul.f32 %v1807_v60, %v1807_v60 }
 0x33f   : > { %v3084_v26 = vadd.f32 %v2828_v5, %v2572_v17  ;;  %v1264_v16 = vsub.f32 %v12870_v23, %v7904_v11  ;;  %v1265_v33 = vsub.f32 %v12870_v23, %v7906_v9  ;;  %v1266_v14 = vsub.f32 %v12870_v23, %v7908_v19 }
 0x340   : > { %v3085_v62 = vadd.f32 %v2829_v56, %v2573_v59  ;;  %v3086_v22 = vadd.f32 %v2830_v57, %v2574_v27  ;;  %v3087_v36 = vadd.f32 %v2831_v34, %v2575_v58  ;;  %v1267_v4 = vsub.f32 %v12870_v23, %v7910_v28 }
 0x341   : > { %v8444_v49 = vmin.f32 %v3610_v51, %v3084_v26  ;;  %v1532_v46 = vsub.f32 %v12871_v38, %v7912_v13  ;;  %v1533_v6 = vsub.f32 %v12871_v38, %v7914_v25  ;;  %v1534_v35 = vsub.f32 %v12871_v38, %v7916_v50 }
 0x342   : > { %v8452_v60 = vmin.f32 %v3679_v39, %v3085_v62  ;;  %v8454_v7 = vmin.f32 %v3748_v24, %v3086_v22  ;;  %v8456_v54 = vmin.f32 %v3817_v37, %v3087_v36  ;;  %v3356_v34 = vmin.f32 %v3084_v26, %v3085_v62 }
 0x343   : > { %v1535_v51 = vsub.f32 %v12871_v38, %v7918_v29  ;;  %v1800_v30 = vsub.f32 %v7808_v21, %v7936_v15  ;;  %v1801_v8 = vsub.f32 %v7808_v21, %v7938_v0  ;;  %v1802_v1 = vsub.f32 %v7808_v21, %v7940_v2 }
 0x344   : > { %v3357_v43 = vmin.f32 %v3356_v34, %v3086_v22  ;;  %v1803_v39 = vsub.f32 %v7808_v21, %v7942_v63  ;;  %v2056_v24 = vmul.f32 %v1264_v16, %v1264_v16  ;;  %v2057_v37 = vmul.f32 %v1265_v33, %v1265_v33  ;;  %v12872_v21 = vld [vmem:[#allocation16_spill] sm:$0xff] }
 0x345   : > { %v2058_v31 = vmul.f32 %v1266_v14, %v1266_v14  ;;  %v2059_v26 = vmul.f32 %v1267_v4, %v1267_v4  ;;  %v2312_v32 = vmul.f32 %v1532_v46, %v1532_v46  ;;  %v2313_v10 = vmul.f32 %v1533_v6, %v1533_v6 }
 0x346   : > { %v3358_v17 = vmin.f32 %v3357_v43, %v3087_v36  ;;  %v2314_v5 = vmul.f32 %v1534_v35, %v1534_v35  ;;  %v2315_v56 = vmul.f32 %v1535_v51, %v1535_v51  ;;  %v2824_v57 = vmul.f32 %v1800_v30, %v1800_v30 }
 0x347   : > { %v2568_v59 = vadd.f32 %v2312_v32, %v2056_v24  ;;  %v2569_v27 = vadd.f32 %v2313_v10, %v2057_v37  ;;  %v2825_v58 = vmul.f32 %v1801_v8, %v1801_v8  ;;  %v2826_v62 = vmul.f32 %v1802_v1, %v1802_v1 }
 0x348   : > { %3359 = vmin.xlane.f32.xlu1 %v3358_v17  ;;  %v2570_v38 = vadd.f32 %v2314_v5, %v2058_v31  ;;  %v2571_v22 = vadd.f32 %v2315_v56, %v2059_v26  ;;  %v2827_v34 = vmul.f32 %v1803_v39, %v1803_v39  ;;  %v1284_v16 = vsub.f32 %v12872_v21, %v7904_v11  ;;  %v12873_v26 = vld [vmem:[#allocation152_spill] sm:$0xff] }
 0x349   : > { %v3080_v33 = vadd.f32 %v2824_v57, %v2568_v59  ;;  %v3081_v14 = vadd.f32 %v2825_v58, %v2569_v27  ;;  %v1285_v4 = vsub.f32 %v12872_v21, %v7906_v9  ;;  %v1286_v36 = vsub.f32 %v12872_v21, %v7908_v19 }
 0x34a   : > { %v3082_v46 = vadd.f32 %v2826_v62, %v2570_v38  ;;  %v3083_v6 = vadd.f32 %v2827_v34, %v2571_v22  ;;  %v1287_v35 = vsub.f32 %v12872_v21, %v7910_v28  ;;  %v1552_v51 = vsub.f32 %v7628_v45, %v7912_v13 }
 0x34b   : > { %v3612_v30 = vmin.f32 %v8444_v49, %v3080_v33  ;;  %v3681_v8 = vmin.f32 %v8452_v60, %v3081_v14  ;;  %v3351_v1 = vmin.f32 %v3080_v33, %v3081_v14  ;;  %v1553_v43 = vsub.f32 %v7628_v45, %v7914_v25 }
 0x34c   : > { %v3750_v39 = vmin.f32 %v8454_v7, %v3082_v46  ;;  %v3819_v24 = vmin.f32 %v8456_v54, %v3083_v6  ;;  %v1554_v38 = vsub.f32 %v7628_v45, %v7916_v50  ;;  %v1555_v37 = vsub.f32 %v7628_v45, %v7918_v29 }
 0x34d   : > { %v3352_v31 = vmin.f32 %v3351_v1, %v3082_v46  ;;  %v1820_v49 = vsub.f32 %v12873_v26, %v7936_v15  ;;  %v1821_v60 = vsub.f32 %v12873_v26, %v7938_v0  ;;  %v1822_v32 = vsub.f32 %v12873_v26, %v7940_v2 }
 0x34e   : > { %v1823_v7 = vsub.f32 %v12873_v26, %v7942_v63  ;;  %v2076_v54 = vmul.f32 %v1284_v16, %v1284_v16  ;;  %v2077_v10 = vmul.f32 %v1285_v4, %v1285_v4  ;;  %v2078_v17 = vmul.f32 %v1286_v36, %v1286_v36  ;;  %v12874_v26 = vld [vmem:[#allocation35_spill] sm:$0xff] }
 0x34f   : > { %v3353_v5 = vmin.f32 %v3352_v31, %v3083_v6  ;;  %v2079_v56 = vmul.f32 %v1287_v35, %v1287_v35  ;;  %v2332_v57 = vmul.f32 %v1552_v51, %v1552_v51  ;;  %v2333_v59 = vmul.f32 %v1553_v43, %v1553_v43 }
 0x350   : > { %v2334_v27 = vmul.f32 %v1554_v38, %v1554_v38  ;;  %v2335_v58 = vmul.f32 %v1555_v37, %v1555_v37  ;;  %v2844_v62 = vmul.f32 %v1820_v49, %v1820_v49  ;;  %v2845_v22 = vmul.f32 %v1821_v60, %v1821_v60  ;;  %v12875_v37 = vld [vmem:[#allocation97_spill] sm:$0xff] }
 0x351   : > { %3354 = vmin.xlane.f32.xlu0 %v3353_v5  ;;  %v2588_v34 = vadd.f32 %v2332_v57, %v2076_v54  ;;  %v2589_v33 = vadd.f32 %v2333_v59, %v2077_v10  ;;  %v2846_v14 = vmul.f32 %v1822_v32, %v1822_v32  ;;  %v2847_v46 = vmul.f32 %v1823_v7, %v1823_v7  ;;  %v12876_v5 = vld [vmem:[#allocation15_spill] sm:$0xff] }
 0x352   : > { %v2590_v1 = vadd.f32 %v2334_v27, %v2078_v17  ;;  %v2591_v45 = vadd.f32 %v2335_v58, %v2079_v56  ;;  %v1280_v16 = vsub.f32 %v12874_v26, %v7904_v11  ;;  %v1281_v4 = vsub.f32 %v12874_v26, %v7906_v9 }
 0x353   : > { %v3100_v36 = vadd.f32 %v2844_v62, %v2588_v34  ;;  %v3101_v6 = vadd.f32 %v2845_v22, %v2589_v33  ;;  %v1282_v35 = vsub.f32 %v12874_v26, %v7908_v19  ;;  %v1283_v51 = vsub.f32 %v12874_v26, %v7910_v28 }
 0x354   : > { %v3102_v43 = vadd.f32 %v2846_v14, %v2590_v1  ;;  %v3103_v38 = vadd.f32 %v2847_v46, %v2591_v45  ;;  %v1548_v31 = vsub.f32 %v12875_v37, %v7912_v13  ;;  %v1549_v49 = vsub.f32 %v12875_v37, %v7914_v25 }
 0x355   : > { %v8508_v60 = vmin.f32 %v3612_v30, %v3100_v36  ;;  %v8510_v32 = vmin.f32 %v3681_v8, %v3101_v6  ;;  %v3376_v7 = vmin.f32 %v3100_v36, %v3101_v6  ;;  %v1550_v54 = vsub.f32 %v12875_v37, %v7916_v50 }
 0x356   : > { %v8514_v10 = vmin.f32 %v3750_v39, %v3102_v43  ;;  %v8516_v17 = vmin.f32 %v3819_v24, %v3103_v38  ;;  %v1551_v45 = vsub.f32 %v12875_v37, %v7918_v29  ;;  %v1816_v56 = vsub.f32 %v12876_v5, %v7936_v15 }
 0x357   : > { %v3377_v57 = vmin.f32 %v3376_v7, %v3102_v43  ;;  %v1817_v30 = vsub.f32 %v12876_v5, %v7938_v0  ;;  %v1818_v8 = vsub.f32 %v12876_v5, %v7940_v2  ;;  %v1819_v59 = vsub.f32 %v12876_v5, %v7942_v63  ;;  %v12877_v5 = vld [vmem:[#allocation36_spill] sm:$0xff] }
 0x358   : > { %v2072_v39 = vmul.f32 %v1280_v16, %v1280_v16  ;;  %v2073_v27 = vmul.f32 %v1281_v4, %v1281_v4  ;;  %v2074_v24 = vmul.f32 %v1282_v35, %v1282_v35  ;;  %v2075_v58 = vmul.f32 %v1283_v51, %v1283_v51 }
 0x359   : > { %v3378_v62 = vmin.f32 %v3377_v57, %v3103_v38  ;;  %v2328_v22 = vmul.f32 %v1548_v31, %v1548_v31  ;;  %v2329_v34 = vmul.f32 %v1549_v49, %v1549_v49  ;;  %v2330_v33 = vmul.f32 %v1550_v54, %v1550_v54 }
 0x35a   : > { %v2331_v14 = vmul.f32 %v1551_v45, %v1551_v45  ;;  %v2840_v46 = vmul.f32 %v1816_v56, %v1816_v56  ;;  %v2841_v1 = vmul.f32 %v1817_v30, %v1817_v30  ;;  %v2842_v36 = vmul.f32 %v1818_v8, %v1818_v8  ;;  %v12878_v45 = vld [vmem:[#allocation89_spill] sm:$0xff] }
 0x35b   : > { %3379 = vmin.xlane.f32.xlu2 %v3378_v62  ;;  %v2584_v6 = vadd.f32 %v2328_v22, %v2072_v39  ;;  %v2585_v43 = vadd.f32 %v2329_v34, %v2073_v27  ;;  %v2586_v7 = vadd.f32 %v2330_v33, %v2074_v24  ;;  %v2843_v21 = vmul.f32 %v1819_v59, %v1819_v59 }
 0x35c   : > { %v2587_v37 = vadd.f32 %v2331_v14, %v2075_v58  ;;  %v1276_v16 = vsub.f32 %v12877_v5, %v7904_v11  ;;  %v1277_v4 = vsub.f32 %v12877_v5, %v7906_v9  ;;  %v1278_v35 = vsub.f32 %v12877_v5, %v7908_v19 }
 0x35d   : > { %v3096_v51 = vadd.f32 %v2840_v46, %v2584_v6  ;;  %v3097_v38 = vadd.f32 %v2841_v1, %v2585_v43  ;;  %v3098_v31 = vadd.f32 %v2842_v36, %v2586_v7  ;;  %v1279_v49 = vsub.f32 %v12877_v5, %v7910_v28 }
 0x35e   : > { %v3099_v54 = vadd.f32 %v2843_v21, %v2587_v37  ;;  %v1544_v56 = vsub.f32 %v12878_v45, %v7912_v13  ;;  %v1545_v57 = vsub.f32 %v12878_v45, %v7914_v25  ;;  %v1546_v30 = vsub.f32 %v12878_v45, %v7916_v50  ;;  %v12879_v37 = vld [vmem:[#allocation153_spill] sm:$0xff] }
 0x35f   : > { %v3614_v8 = vmin.f32 %v8508_v60, %v3096_v51  ;;  %v3683_v59 = vmin.f32 %v8510_v32, %v3097_v38  ;;  %v3752_v39 = vmin.f32 %v8514_v10, %v3098_v31  ;;  %v3371_v27 = vmin.f32 %v3096_v51, %v3097_v38 }
 0x360   : > { %v3821_v24 = vmin.f32 %v8516_v17, %v3099_v54  ;;  %v1547_v21 = vsub.f32 %v12878_v45, %v7918_v29  ;;  %v1812_v58 = vsub.f32 %v12879_v37, %v7936_v15  ;;  %v1813_v62 = vsub.f32 %v12879_v37, %v7938_v0 }
 0x361   : > { %v3372_v22 = vmin.f32 %v3371_v27, %v3098_v31  ;;  %v1814_v60 = vsub.f32 %v12879_v37, %v7940_v2  ;;  %v1815_v32 = vsub.f32 %v12879_v37, %v7942_v63  ;;  %v2068_v10 = vmul.f32 %v1276_v16, %v1276_v16  ;;  %v12880_v16 = vld [vmem:[#allocation22_spill] sm:$0xff] }
 0x362   : > { %v2069_v34 = vmul.f32 %v1277_v4, %v1277_v4  ;;  %v2070_v33 = vmul.f32 %v1278_v35, %v1278_v35  ;;  %v2071_v17 = vmul.f32 %v1279_v49, %v1279_v49  ;;  %v2324_v14 = vmul.f32 %v1544_v56, %v1544_v56 }
 0x363   : > { %v3373_v46 = vmin.f32 %v3372_v22, %v3099_v54  ;;  %v2325_v1 = vmul.f32 %v1545_v57, %v1545_v57  ;;  %v2326_v36 = vmul.f32 %v1546_v30, %v1546_v30  ;;  %v2327_v6 = vmul.f32 %v1547_v21, %v1547_v21 }
 0x364   : > { %v2580_v43 = vadd.f32 %v2324_v14, %v2068_v10  ;;  %v2836_v7 = vmul.f32 %v1812_v58, %v1812_v58  ;;  %v2837_v51 = vmul.f32 %v1813_v62, %v1813_v62  ;;  %v2838_v38 = vmul.f32 %v1814_v60, %v1814_v60  ;;  %v12881_v58 = vld [vmem:[#allocation100_spill] sm:$0xff] }
 0x365   : > { %3374 = vmin.xlane.f32.xlu1 %v3373_v46  ;;  %v2581_v31 = vadd.f32 %v2325_v1, %v2069_v34  ;;  %v2582_v27 = vadd.f32 %v2326_v36, %v2070_v33  ;;  %v2583_v45 = vadd.f32 %v2327_v6, %v2071_v17  ;;  %v2839_v5 = vmul.f32 %v1815_v32, %v1815_v32 }
 0x366   : > { %v3092_v26 = vadd.f32 %v2836_v7, %v2580_v43  ;;  %v1296_v4 = vsub.f32 %v12880_v16, %v7904_v11  ;;  %v1297_v35 = vsub.f32 %v12880_v16, %v7906_v9  ;;  %v1298_v49 = vsub.f32 %v12880_v16, %v7908_v19 }
 0x367   : > { %v3093_v54 = vadd.f32 %v2837_v51, %v2581_v31  ;;  %v3094_v56 = vadd.f32 %v2838_v38, %v2582_v27  ;;  %v3095_v57 = vadd.f32 %v2839_v5, %v2583_v45  ;;  %v1299_v30 = vsub.f32 %v12880_v16, %v7910_v28 }
 0x368   : > { %v8564_v21 = vmin.f32 %v3614_v8, %v3092_v26  ;;  %v1564_v62 = vsub.f32 %v12881_v58, %v7912_v13  ;;  %v1565_v22 = vsub.f32 %v12881_v58, %v7914_v25  ;;  %v1566_v60 = vsub.f32 %v12881_v58, %v7916_v50  ;;  %v12882_v8 = vld [vmem:[#allocation154_spill] sm:$0xff] }
 0x369   : > { %v8572_v32 = vmin.f32 %v3683_v59, %v3093_v54  ;;  %v8574_v10 = vmin.f32 %v3752_v39, %v3094_v56  ;;  %v8576_v34 = vmin.f32 %v3821_v24, %v3095_v57  ;;  %v3366_v5 = vmin.f32 %v3092_v26, %v3093_v54 }
 0x36a   : > { %v1567_v45 = vsub.f32 %v12881_v58, %v7918_v29  ;;  %v1832_v33 = vsub.f32 %v12882_v8, %v7936_v15  ;;  %v1833_v17 = vsub.f32 %v12882_v8, %v7938_v0  ;;  %v1834_v14 = vsub.f32 %v12882_v8, %v7940_v2 }
 0x36b   : > { %v3367_v46 = vmin.f32 %v3366_v5, %v3094_v56  ;;  %v1835_v59 = vsub.f32 %v12882_v8, %v7942_v63  ;;  %v2088_v39 = vmul.f32 %v1296_v4, %v1296_v4  ;;  %v2089_v24 = vmul.f32 %v1297_v35, %v1297_v35  ;;  %v12883_v8 = vld [vmem:[#allocation39_spill] sm:$0xff] }
 0x36c   : > { %v2090_v1 = vmul.f32 %v1298_v49, %v1298_v49  ;;  %v2091_v26 = vmul.f32 %v1299_v30, %v1299_v30  ;;  %v2344_v36 = vmul.f32 %v1564_v62, %v1564_v62  ;;  %v2345_v6 = vmul.f32 %v1565_v22, %v1565_v22 }
 0x36d   : > { %v3368_v43 = vmin.f32 %v3367_v46, %v3095_v57  ;;  %v2346_v7 = vmul.f32 %v1566_v60, %v1566_v60  ;;  %v2347_v51 = vmul.f32 %v1567_v45, %v1567_v45  ;;  %v2856_v38 = vmul.f32 %v1832_v33, %v1832_v33  ;;  %v12884_v45 = vld [vmem:[#allocation99_spill] sm:$0xff] }
 0x36e   : > { %v2600_v31 = vadd.f32 %v2344_v36, %v2088_v39  ;;  %v2601_v27 = vadd.f32 %v2345_v6, %v2089_v24  ;;  %v2857_v54 = vmul.f32 %v1833_v17, %v1833_v17  ;;  %v2858_v58 = vmul.f32 %v1834_v14, %v1834_v14 }
 0x36f   : > { %3369 = vmin.xlane.f32.xlu0 %v3368_v43  ;;  %v2602_v16 = vadd.f32 %v2346_v7, %v2090_v1  ;;  %v2603_v56 = vadd.f32 %v2347_v51, %v2091_v26  ;;  %v2859_v5 = vmul.f32 %v1835_v59, %v1835_v59  ;;  %v1292_v4 = vsub.f32 %v12883_v8, %v7904_v11  ;;  %v12885_v26 = vld [vmem:[#allocation20_spill] sm:$0xff] }
 0x370   : > { %v3112_v35 = vadd.f32 %v2856_v38, %v2600_v31  ;;  %v3113_v49 = vadd.f32 %v2857_v54, %v2601_v27  ;;  %v1293_v30 = vsub.f32 %v12883_v8, %v7906_v9  ;;  %v1294_v57 = vsub.f32 %v12883_v8, %v7908_v19 }
 0x371   : > { %v3114_v62 = vadd.f32 %v2858_v58, %v2602_v16  ;;  %v3115_v22 = vadd.f32 %v2859_v5, %v2603_v56  ;;  %v1295_v60 = vsub.f32 %v12883_v8, %v7910_v28  ;;  %v1560_v33 = vsub.f32 %v12884_v45, %v7912_v13 }
 0x372   : > { %v3616_v17 = vmin.f32 %v8564_v21, %v3112_v35  ;;  %v3685_v14 = vmin.f32 %v8572_v32, %v3113_v49  ;;  %v3391_v46 = vmin.f32 %v3112_v35, %v3113_v49  ;;  %v1561_v59 = vsub.f32 %v12884_v45, %v7914_v25 }
 0x373   : > { %v3754_v39 = vmin.f32 %v8574_v10, %v3114_v62  ;;  %v3823_v24 = vmin.f32 %v8576_v34, %v3115_v22  ;;  %v1562_v16 = vsub.f32 %v12884_v45, %v7916_v50  ;;  %v1563_v58 = vsub.f32 %v12884_v45, %v7918_v29 }
 0x374   : > { %v3392_v1 = vmin.f32 %v3391_v46, %v3114_v62  ;;  %v1828_v21 = vsub.f32 %v12885_v26, %v7936_v15  ;;  %v1829_v32 = vsub.f32 %v12885_v26, %v7938_v0  ;;  %v1830_v36 = vsub.f32 %v12885_v26, %v7940_v2 }
 0x375   : > { %v1831_v10 = vsub.f32 %v12885_v26, %v7942_v63  ;;  %v2084_v34 = vmul.f32 %v1292_v4, %v1292_v4  ;;  %v2085_v6 = vmul.f32 %v1293_v30, %v1293_v30  ;;  %v2086_v43 = vmul.f32 %v1294_v57, %v1294_v57  ;;  %v12886_v26 = vld [vmem:[#allocation40_spill] sm:$0xff] }
 0x376   : > { %v3393_v7 = vmin.f32 %v3392_v1, %v3115_v22  ;;  %v2087_v51 = vmul.f32 %v1295_v60, %v1295_v60  ;;  %v2340_v38 = vmul.f32 %v1560_v33, %v1560_v33  ;;  %v2341_v31 = vmul.f32 %v1561_v59, %v1561_v59 }
 0x377   : > { %v2342_v27 = vmul.f32 %v1562_v16, %v1562_v16  ;;  %v2343_v54 = vmul.f32 %v1563_v58, %v1563_v58  ;;  %v2852_v56 = vmul.f32 %v1828_v21, %v1828_v21  ;;  %v2853_v5 = vmul.f32 %v1829_v32, %v1829_v32  ;;  %v12887_v58 = vld [vmem:[#allocation92_spill] sm:$0xff] }
 0x378   : > { %3394 = vmin.xlane.f32.xlu2 %v3393_v7  ;;  %v2596_v35 = vadd.f32 %v2340_v38, %v2084_v34  ;;  %v2597_v49 = vadd.f32 %v2341_v31, %v2085_v6  ;;  %v2854_v62 = vmul.f32 %v1830_v36, %v1830_v36  ;;  %v2855_v46 = vmul.f32 %v1831_v10, %v1831_v10 }
 0x379   : > { %v2598_v45 = vadd.f32 %v2342_v27, %v2086_v43  ;;  %v2599_v8 = vadd.f32 %v2343_v54, %v2087_v51  ;;  %v1288_v4 = vsub.f32 %v12886_v26, %v7904_v11  ;;  %v1289_v30 = vsub.f32 %v12886_v26, %v7906_v9 }
 0x37a   : > { %v3108_v57 = vadd.f32 %v2852_v56, %v2596_v35  ;;  %v3109_v22 = vadd.f32 %v2853_v5, %v2597_v49  ;;  %v1290_v60 = vsub.f32 %v12886_v26, %v7908_v19  ;;  %v1291_v33 = vsub.f32 %v12886_v26, %v7910_v28 }
 0x37b   : > { %v3110_v59 = vadd.f32 %v2854_v62, %v2598_v45  ;;  %v3111_v16 = vadd.f32 %v2855_v46, %v2599_v8  ;;  %v1556_v1 = vsub.f32 %v12887_v58, %v7912_v13  ;;  %v1557_v21 = vsub.f32 %v12887_v58, %v7914_v25  ;;  %v12888_v45 = vld [vmem:[#allocation155_spill] sm:$0xff] }
 0x37c   : > { %v8628_v32 = vmin.f32 %v3616_v17, %v3108_v57  ;;  %v8630_v36 = vmin.f32 %v3685_v14, %v3109_v22  ;;  %v3386_v10 = vmin.f32 %v3108_v57, %v3109_v22  ;;  %v1558_v34 = vsub.f32 %v12887_v58, %v7916_v50 }
 0x37d   : > { %v8634_v6 = vmin.f32 %v3754_v39, %v3110_v59  ;;  %v8636_v43 = vmin.f32 %v3823_v24, %v3111_v16  ;;  %v1559_v8 = vsub.f32 %v12887_v58, %v7918_v29  ;;  %v1824_v7 = vsub.f32 %v12888_v45, %v7936_v15 }
 0x37e   : > { %v3387_v51 = vmin.f32 %v3386_v10, %v3110_v59  ;;  %v1825_v17 = vsub.f32 %v12888_v45, %v7938_v0  ;;  %v1826_v14 = vsub.f32 %v12888_v45, %v7940_v2  ;;  %v1827_v38 = vsub.f32 %v12888_v45, %v7942_v63  ;;  %v12889_v45 = vld [vmem:[#allocation28_spill] sm:$0xff] }
 0x37f   : > { %v2080_v39 = vmul.f32 %v1288_v4, %v1288_v4  ;;  %v2081_v31 = vmul.f32 %v1289_v30, %v1289_v30  ;;  %v2082_v24 = vmul.f32 %v1290_v60, %v1290_v60  ;;  %v2083_v27 = vmul.f32 %v1291_v33, %v1291_v33 }
 0x380   : > { %v3388_v54 = vmin.f32 %v3387_v51, %v3111_v16  ;;  %v2336_v56 = vmul.f32 %v1556_v1, %v1556_v1  ;;  %v2337_v5 = vmul.f32 %v1557_v21, %v1557_v21  ;;  %v2338_v35 = vmul.f32 %v1558_v34, %v1558_v34 }
 0x381   : > { %v2339_v49 = vmul.f32 %v1559_v8, %v1559_v8  ;;  %v2848_v62 = vmul.f32 %v1824_v7, %v1824_v7  ;;  %v2849_v46 = vmul.f32 %v1825_v17, %v1825_v17  ;;  %v2850_v57 = vmul.f32 %v1826_v14, %v1826_v14  ;;  %v12890_v8 = vld [vmem:[#allocation103_spill] sm:$0xff] }
 0x382   : > { %3389 = vmin.xlane.f32.xlu1 %v3388_v54  ;;  %v2592_v22 = vadd.f32 %v2336_v56, %v2080_v39  ;;  %v2593_v59 = vadd.f32 %v2337_v5, %v2081_v31  ;;  %v2594_v10 = vadd.f32 %v2338_v35, %v2082_v24  ;;  %v2851_v58 = vmul.f32 %v1827_v38, %v1827_v38 }
 0x383   : > { %v2595_v26 = vadd.f32 %v2339_v49, %v2083_v27  ;;  %v1308_v4 = vsub.f32 %v12889_v45, %v7904_v11  ;;  %v1309_v30 = vsub.f32 %v12889_v45, %v7906_v9  ;;  %v1310_v60 = vsub.f32 %v12889_v45, %v7908_v19 }
 0x384   : > { %v3104_v33 = vadd.f32 %v2848_v62, %v2592_v22  ;;  %v3105_v16 = vadd.f32 %v2849_v46, %v2593_v59  ;;  %v3106_v1 = vadd.f32 %v2850_v57, %v2594_v10  ;;  %v1311_v21 = vsub.f32 %v12889_v45, %v7910_v28 }
 0x385   : > { %v3107_v34 = vadd.f32 %v2851_v58, %v2595_v26  ;;  %v1576_v7 = vsub.f32 %v12890_v8, %v7912_v13  ;;  %v1577_v51 = vsub.f32 %v12890_v8, %v7914_v25  ;;  %v1578_v17 = vsub.f32 %v12890_v8, %v7916_v50  ;;  %v12891_v58 = vld [vmem:[#allocation156_spill] sm:$0xff] }
 0x386   : > { %v3618_v14 = vmin.f32 %v8628_v32, %v3104_v33  ;;  %v3687_v38 = vmin.f32 %v8630_v36, %v3105_v16  ;;  %v3756_v39 = vmin.f32 %v8634_v6, %v3106_v1  ;;  %v3381_v31 = vmin.f32 %v3104_v33, %v3105_v16 }
 0x387   : > { %v3825_v24 = vmin.f32 %v8636_v43, %v3107_v34  ;;  %v1579_v26 = vsub.f32 %v12890_v8, %v7918_v29  ;;  %v1844_v27 = vsub.f32 %v12891_v58, %v7936_v15  ;;  %v1845_v54 = vsub.f32 %v12891_v58, %v7938_v0 }
 0x388   : > { %v3382_v56 = vmin.f32 %v3381_v31, %v3106_v1  ;;  %v1846_v32 = vsub.f32 %v12891_v58, %v7940_v2  ;;  %v1847_v36 = vsub.f32 %v12891_v58, %v7942_v63  ;;  %v2100_v6 = vmul.f32 %v1308_v4, %v1308_v4  ;;  %v12892_v4 = vld [vmem:[#allocation42_spill] sm:$0xff] }
 0x389   : > { %v2101_v5 = vmul.f32 %v1309_v30, %v1309_v30  ;;  %v2102_v35 = vmul.f32 %v1310_v60, %v1310_v60  ;;  %v2103_v43 = vmul.f32 %v1311_v21, %v1311_v21  ;;  %v2356_v49 = vmul.f32 %v1576_v7, %v1576_v7 }
 0x38a   : > { %v3383_v62 = vmin.f32 %v3382_v56, %v3107_v34  ;;  %v2357_v46 = vmul.f32 %v1577_v51, %v1577_v51  ;;  %v2358_v57 = vmul.f32 %v1578_v17, %v1578_v17  ;;  %v2359_v22 = vmul.f32 %v1579_v26, %v1579_v26 }
 0x38b   : > { %v2612_v59 = vadd.f32 %v2356_v49, %v2100_v6  ;;  %v2868_v10 = vmul.f32 %v1844_v27, %v1844_v27  ;;  %v2869_v33 = vmul.f32 %v1845_v54, %v1845_v54  ;;  %v2870_v16 = vmul.f32 %v1846_v32, %v1846_v32  ;;  %v12893_v27 = vld [vmem:[#allocation101_spill] sm:$0xff] }
 0x38c   : > { %3384 = vmin.xlane.f32.xlu0 %v3383_v62  ;;  %v2613_v1 = vadd.f32 %v2357_v46, %v2101_v5  ;;  %v2614_v31 = vadd.f32 %v2358_v57, %v2102_v35  ;;  %v2615_v8 = vadd.f32 %v2359_v22, %v2103_v43  ;;  %v2871_v45 = vmul.f32 %v1847_v36, %v1847_v36 }
 0x38d   : > { %v3124_v37 = vadd.f32 %v2868_v10, %v2612_v59  ;;  %v1304_v30 = vsub.f32 %v12892_v4, %v7904_v11  ;;  %v1305_v60 = vsub.f32 %v12892_v4, %v7906_v9  ;;  %v1306_v21 = vsub.f32 %v12892_v4, %v7908_v19 }
 0x38e   : > { %v3125_v34 = vadd.f32 %v2869_v33, %v2613_v1  ;;  %v3126_v7 = vadd.f32 %v2870_v16, %v2614_v31  ;;  %v3127_v51 = vadd.f32 %v2871_v45, %v2615_v8  ;;  %v1307_v17 = vsub.f32 %v12892_v4, %v7910_v28 }
 0x38f   : > { %v8684_v26 = vmin.f32 %v3618_v14, %v3124_v37  ;;  %v1572_v54 = vsub.f32 %v12893_v27, %v7912_v13  ;;  %v1573_v56 = vsub.f32 %v12893_v27, %v7914_v25  ;;  %v1574_v32 = vsub.f32 %v12893_v27, %v7916_v50  ;;  %v12894_v14 = vld [vmem:[#allocation26_spill] sm:$0xff] }
 0x390   : > { %v8692_v36 = vmin.f32 %v3687_v38, %v3125_v34  ;;  %v8694_v6 = vmin.f32 %v3756_v39, %v3126_v7  ;;  %v8696_v5 = vmin.f32 %v3825_v24, %v3127_v51  ;;  %v3406_v45 = vmin.f32 %v3124_v37, %v3125_v34 }
 0x391   : > { %v1575_v8 = vsub.f32 %v12893_v27, %v7918_v29  ;;  %v1840_v35 = vsub.f32 %v12894_v14, %v7936_v15  ;;  %v1841_v43 = vsub.f32 %v12894_v14, %v7938_v0  ;;  %v1842_v49 = vsub.f32 %v12894_v14, %v7940_v2 }
 0x392   : > { %v3407_v62 = vmin.f32 %v3406_v45, %v3126_v7  ;;  %v1843_v38 = vsub.f32 %v12894_v14, %v7942_v63  ;;  %v2096_v39 = vmul.f32 %v1304_v30, %v1304_v30  ;;  %v2097_v24 = vmul.f32 %v1305_v60, %v1305_v60  ;;  %v12895_v14 = vld [vmem:[#allocation43_spill] sm:$0xff] }
 0x393   : > { %v2098_v46 = vmul.f32 %v1306_v21, %v1306_v21  ;;  %v2099_v37 = vmul.f32 %v1307_v17, %v1307_v17  ;;  %v2352_v57 = vmul.f32 %v1572_v54, %v1572_v54  ;;  %v2353_v22 = vmul.f32 %v1573_v56, %v1573_v56 }
 0x394   : > { %v3408_v59 = vmin.f32 %v3407_v62, %v3127_v51  ;;  %v2354_v10 = vmul.f32 %v1574_v32, %v1574_v32  ;;  %v2355_v33 = vmul.f32 %v1575_v8, %v1575_v8  ;;  %v2864_v16 = vmul.f32 %v1840_v35, %v1840_v35  ;;  %v12896_v8 = vld [vmem:[#allocation19_spill] sm:$0xff] }
 0x395   : > { %v2608_v1 = vadd.f32 %v2352_v57, %v2096_v39  ;;  %v2609_v31 = vadd.f32 %v2353_v22, %v2097_v24  ;;  %v2865_v34 = vmul.f32 %v1841_v43, %v1841_v43  ;;  %v2866_v58 = vmul.f32 %v1842_v49, %v1842_v49 }
 0x396   : > { %3409 = vmin.xlane.f32.xlu2 %v3408_v59  ;;  %v2610_v27 = vadd.f32 %v2354_v10, %v2098_v46  ;;  %v2611_v7 = vadd.f32 %v2355_v33, %v2099_v37  ;;  %v2867_v45 = vmul.f32 %v1843_v38, %v1843_v38  ;;  %v1300_v30 = vsub.f32 %v12895_v14, %v7904_v11  ;;  %v12897_v37 = vld [vmem:[#allocation158_spill] sm:$0xff] }
 0x397   : > { %v3120_v60 = vadd.f32 %v2864_v16, %v2608_v1  ;;  %v3121_v21 = vadd.f32 %v2865_v34, %v2609_v31  ;;  %v1301_v17 = vsub.f32 %v12895_v14, %v7906_v9  ;;  %v1302_v51 = vsub.f32 %v12895_v14, %v7908_v19 }
 0x398   : > { %v3122_v54 = vadd.f32 %v2866_v58, %v2610_v27  ;;  %v3123_v56 = vadd.f32 %v2867_v45, %v2611_v7  ;;  %v1303_v32 = vsub.f32 %v12895_v14, %v7910_v28  ;;  %v1568_v35 = vsub.f32 %v12896_v8, %v7912_v13 }
 0x399   : > { %v3620_v43 = vmin.f32 %v8684_v26, %v3120_v60  ;;  %v3689_v49 = vmin.f32 %v8692_v36, %v3121_v21  ;;  %v3401_v62 = vmin.f32 %v3120_v60, %v3121_v21  ;;  %v1569_v38 = vsub.f32 %v12896_v8, %v7914_v25 }
 0x39a   : > { %v3758_v39 = vmin.f32 %v8694_v6, %v3122_v54  ;;  %v3827_v24 = vmin.f32 %v8696_v5, %v3123_v56  ;;  %v1570_v58 = vsub.f32 %v12896_v8, %v7916_v50  ;;  %v1571_v27 = vsub.f32 %v12896_v8, %v7918_v29 }
 0x39b   : > { %v3402_v46 = vmin.f32 %v3401_v62, %v3122_v54  ;;  %v1836_v26 = vsub.f32 %v12897_v37, %v7936_v15  ;;  %v1837_v36 = vsub.f32 %v12897_v37, %v7938_v0  ;;  %v1838_v57 = vsub.f32 %v12897_v37, %v7940_v2 }
 0x39c   : > { %v1839_v6 = vsub.f32 %v12897_v37, %v7942_v63  ;;  %v2092_v5 = vmul.f32 %v1300_v30, %v1300_v30  ;;  %v2093_v22 = vmul.f32 %v1301_v17, %v1301_v17  ;;  %v2094_v59 = vmul.f32 %v1302_v51, %v1302_v51  ;;  %v12898_v37 = vld [vmem:[#allocation34_spill] sm:$0xff] }
 0x39d   : > { %v3403_v10 = vmin.f32 %v3402_v46, %v3123_v56  ;;  %v2095_v33 = vmul.f32 %v1303_v32, %v1303_v32  ;;  %v2348_v16 = vmul.f32 %v1568_v35, %v1568_v35  ;;  %v2349_v1 = vmul.f32 %v1569_v38, %v1569_v38 }
 0x39e   : > { %v2350_v31 = vmul.f32 %v1570_v58, %v1570_v58  ;;  %v2351_v34 = vmul.f32 %v1571_v27, %v1571_v27  ;;  %v2860_v7 = vmul.f32 %v1836_v26, %v1836_v26  ;;  %v2861_v45 = vmul.f32 %v1837_v36, %v1837_v36  ;;  %v12899_v27 = vld [vmem:[#allocation106_spill] sm:$0xff] }
 0x39f   : > { %3404 = vmin.xlane.f32.xlu1 %v3403_v10  ;;  %v2604_v60 = vadd.f32 %v2348_v16, %v2092_v5  ;;  %v2605_v21 = vadd.f32 %v2349_v1, %v2093_v22  ;;  %v2862_v54 = vmul.f32 %v1838_v57, %v1838_v57  ;;  %v2863_v62 = vmul.f32 %v1839_v6, %v1839_v6 }
 0x3a0   : > { %v2606_v8 = vadd.f32 %v2350_v31, %v2094_v59  ;;  %v2607_v14 = vadd.f32 %v2351_v34, %v2095_v33  ;;  %v1320_v30 = vsub.f32 %v12898_v37, %v7904_v11  ;;  %v1321_v17 = vsub.f32 %v12898_v37, %v7906_v9 }
 0x3a1   : > { %v3116_v51 = vadd.f32 %v2860_v7, %v2604_v60  ;;  %v3117_v56 = vadd.f32 %v2861_v45, %v2605_v21  ;;  %v1322_v32 = vsub.f32 %v12898_v37, %v7908_v19  ;;  %v1323_v35 = vsub.f32 %v12898_v37, %v7910_v28 }
 0x3a2   : > { %v3118_v38 = vadd.f32 %v2862_v54, %v2606_v8  ;;  %v3119_v58 = vadd.f32 %v2863_v62, %v2607_v14  ;;  %v1588_v46 = vsub.f32 %v12899_v27, %v7912_v13  ;;  %v1589_v26 = vsub.f32 %v12899_v27, %v7914_v25  ;;  %v12900_v8 = vld [vmem:[#allocation159_spill] sm:$0xff] }
 0x3a3   : > { %v8748_v36 = vmin.f32 %v3620_v43, %v3116_v51  ;;  %v8750_v57 = vmin.f32 %v3689_v49, %v3117_v56  ;;  %v3396_v6 = vmin.f32 %v3116_v51, %v3117_v56  ;;  %v1590_v5 = vsub.f32 %v12899_v27, %v7916_v50 }
 0x3a4   : > { %v8754_v22 = vmin.f32 %v3758_v39, %v3118_v38  ;;  %v8756_v59 = vmin.f32 %v3827_v24, %v3119_v58  ;;  %v1591_v14 = vsub.f32 %v12899_v27, %v7918_v29  ;;  %v1856_v10 = vsub.f32 %v12900_v8, %v7936_v15 }
 0x3a5   : > { %v3397_v33 = vmin.f32 %v3396_v6, %v3118_v38  ;;  %v1857_v43 = vsub.f32 %v12900_v8, %v7938_v0  ;;  %v1858_v49 = vsub.f32 %v12900_v8, %v7940_v2  ;;  %v1859_v16 = vsub.f32 %v12900_v8, %v7942_v63  ;;  %v12901_v8 = vld [vmem:[#allocation45_spill] sm:$0xff] }
 0x3a6   : > { %v2112_v39 = vmul.f32 %v1320_v30, %v1320_v30  ;;  %v2113_v1 = vmul.f32 %v1321_v17, %v1321_v17  ;;  %v2114_v24 = vmul.f32 %v1322_v32, %v1322_v32  ;;  %v2115_v31 = vmul.f32 %v1323_v35, %v1323_v35 }
 0x3a7   : > { %v3398_v34 = vmin.f32 %v3397_v33, %v3119_v58  ;;  %v2368_v7 = vmul.f32 %v1588_v46, %v1588_v46  ;;  %v2369_v45 = vmul.f32 %v1589_v26, %v1589_v26  ;;  %v2370_v60 = vmul.f32 %v1590_v5, %v1590_v5 }
 0x3a8   : > { %v2371_v21 = vmul.f32 %v1591_v14, %v1591_v14  ;;  %v2880_v54 = vmul.f32 %v1856_v10, %v1856_v10  ;;  %v2881_v62 = vmul.f32 %v1857_v43, %v1857_v43  ;;  %v2882_v51 = vmul.f32 %v1858_v49, %v1858_v49  ;;  %v12902_v14 = vld [vmem:[#allocation104_spill] sm:$0xff] }
 0x3a9   : > { %3399 = vmin.xlane.f32.xlu0 %v3398_v34  ;;  %v2624_v56 = vadd.f32 %v2368_v7, %v2112_v39  ;;  %v2625_v38 = vadd.f32 %v2369_v45, %v2113_v1  ;;  %v2626_v6 = vadd.f32 %v2370_v60, %v2114_v24  ;;  %v2883_v27 = vmul.f32 %v1859_v16, %v1859_v16 }
 0x3aa   : > { %v2627_v37 = vadd.f32 %v2371_v21, %v2115_v31  ;;  %v1316_v30 = vsub.f32 %v12901_v8, %v7904_v11  ;;  %v1317_v17 = vsub.f32 %v12901_v8, %v7906_v9  ;;  %v1318_v32 = vsub.f32 %v12901_v8, %v7908_v19 }
 0x3ab   : > { %v3136_v35 = vadd.f32 %v2880_v54, %v2624_v56  ;;  %v3137_v58 = vadd.f32 %v2881_v62, %v2625_v38  ;;  %v3138_v46 = vadd.f32 %v2882_v51, %v2626_v6  ;;  %v1319_v26 = vsub.f32 %v12901_v8, %v7910_v28 }
 0x3ac   : > { %v3139_v5 = vadd.f32 %v2883_v27, %v2627_v37  ;;  %v1584_v10 = vsub.f32 %v12902_v14, %v7912_v13  ;;  %v1585_v33 = vsub.f32 %v12902_v14, %v7914_v25  ;;  %v1586_v43 = vsub.f32 %v12902_v14, %v7916_v50  ;;  %v12903_v27 = vld [vmem:[#allocation33_spill] sm:$0xff] }
 0x3ad   : > { %v3622_v49 = vmin.f32 %v8748_v36, %v3136_v35  ;;  %v3691_v16 = vmin.f32 %v8750_v57, %v3137_v58  ;;  %v3760_v39 = vmin.f32 %v8754_v22, %v3138_v46  ;;  %v3421_v1 = vmin.f32 %v3136_v35, %v3137_v58 }
 0x3ae   : > { %v3829_v24 = vmin.f32 %v8756_v59, %v3139_v5  ;;  %v1587_v37 = vsub.f32 %v12902_v14, %v7918_v29  ;;  %v1852_v31 = vsub.f32 %v12903_v27, %v7936_v15  ;;  %v1853_v34 = vsub.f32 %v12903_v27, %v7938_v0 }
 0x3af   : > { %v3422_v7 = vmin.f32 %v3421_v1, %v3138_v46  ;;  %v1854_v36 = vsub.f32 %v12903_v27, %v7940_v2  ;;  %v1855_v57 = vsub.f32 %v12903_v27, %v7942_v63  ;;  %v2108_v22 = vmul.f32 %v1316_v30, %v1316_v30  ;;  %v12904_v30 = vld [vmem:[#allocation46_spill] sm:$0xff] }
 0x3b0   : > { %v2109_v45 = vmul.f32 %v1317_v17, %v1317_v17  ;;  %v2110_v60 = vmul.f32 %v1318_v32, %v1318_v32  ;;  %v2111_v59 = vmul.f32 %v1319_v26, %v1319_v26  ;;  %v2364_v21 = vmul.f32 %v1584_v10, %v1584_v10 }
 0x3b1   : > { %v3423_v54 = vmin.f32 %v3422_v7, %v3139_v5  ;;  %v2365_v62 = vmul.f32 %v1585_v33, %v1585_v33  ;;  %v2366_v51 = vmul.f32 %v1586_v43, %v1586_v43  ;;  %v2367_v56 = vmul.f32 %v1587_v37, %v1587_v37 }
 0x3b2   : > { %v2620_v38 = vadd.f32 %v2364_v21, %v2108_v22  ;;  %v2876_v6 = vmul.f32 %v1852_v31, %v1852_v31  ;;  %v2877_v35 = vmul.f32 %v1853_v34, %v1853_v34  ;;  %v2878_v58 = vmul.f32 %v1854_v36, %v1854_v36  ;;  %v12905_v31 = vld [vmem:[#allocation25_spill] sm:$0xff] }
 0x3b3   : > { %3424 = vmin.xlane.f32.xlu2 %v3423_v54  ;;  %v2621_v46 = vadd.f32 %v2365_v62, %v2109_v45  ;;  %v2622_v1 = vadd.f32 %v2366_v51, %v2110_v60  ;;  %v2623_v14 = vadd.f32 %v2367_v56, %v2111_v59  ;;  %v2879_v8 = vmul.f32 %v1855_v57, %v1855_v57 }
 0x3b4   : > { %v3132_v4 = vadd.f32 %v2876_v6, %v2620_v38  ;;  %v1312_v17 = vsub.f32 %v12904_v30, %v7904_v11  ;;  %v1313_v32 = vsub.f32 %v12904_v30, %v7906_v9  ;;  %v1314_v26 = vsub.f32 %v12904_v30, %v7908_v19 }
 0x3b5   : > { %v3133_v5 = vadd.f32 %v2877_v35, %v2621_v46  ;;  %v3134_v10 = vadd.f32 %v2878_v58, %v2622_v1  ;;  %v3135_v33 = vadd.f32 %v2879_v8, %v2623_v14  ;;  %v1315_v43 = vsub.f32 %v12904_v30, %v7910_v28 }
 0x3b6   : > { %v8804_v37 = vmin.f32 %v3622_v49, %v3132_v4  ;;  %v1580_v34 = vsub.f32 %v12905_v31, %v7912_v13  ;;  %v1581_v7 = vsub.f32 %v12905_v31, %v7914_v25  ;;  %v1582_v36 = vsub.f32 %v12905_v31, %v7916_v50  ;;  %v12906_v49 = vld [vmem:[#allocation161_spill] sm:$0xff] }
 0x3b7   : > { %v8812_v57 = vmin.f32 %v3691_v16, %v3133_v5  ;;  %v8814_v22 = vmin.f32 %v3760_v39, %v3134_v10  ;;  %v8816_v45 = vmin.f32 %v3829_v24, %v3135_v33  ;;  %v3416_v8 = vmin.f32 %v3132_v4, %v3133_v5 }
 0x3b8   : > { %v1583_v14 = vsub.f32 %v12905_v31, %v7918_v29  ;;  %v1848_v60 = vsub.f32 %v12906_v49, %v7936_v15  ;;  %v1849_v59 = vsub.f32 %v12906_v49, %v7938_v0  ;;  %v1850_v21 = vsub.f32 %v12906_v49, %v7940_v2 }
 0x3b9   : > { %v3417_v54 = vmin.f32 %v3416_v8, %v3134_v10  ;;  %v1851_v16 = vsub.f32 %v12906_v49, %v7942_v63  ;;  %v2104_v39 = vmul.f32 %v1312_v17, %v1312_v17  ;;  %v2105_v24 = vmul.f32 %v1313_v32, %v1313_v32  ;;  %v12907_v49 = vld [vmem:[#allocation38_spill] sm:$0xff] }
 0x3ba   : > { %v2106_v62 = vmul.f32 %v1314_v26, %v1314_v26  ;;  %v2107_v4 = vmul.f32 %v1315_v43, %v1315_v43  ;;  %v2360_v51 = vmul.f32 %v1580_v34, %v1580_v34  ;;  %v2361_v56 = vmul.f32 %v1581_v7, %v1581_v7 }
 0x3bb   : > { %v3418_v38 = vmin.f32 %v3417_v54, %v3135_v33  ;;  %v2362_v6 = vmul.f32 %v1582_v36, %v1582_v36  ;;  %v2363_v35 = vmul.f32 %v1583_v14, %v1583_v14  ;;  %v2872_v58 = vmul.f32 %v1848_v60, %v1848_v60  ;;  %v12908_v14 = vld [vmem:[#allocation109_spill] sm:$0xff] }
 0x3bc   : > { %v2616_v46 = vadd.f32 %v2360_v51, %v2104_v39  ;;  %v2617_v1 = vadd.f32 %v2361_v56, %v2105_v24  ;;  %v2873_v5 = vmul.f32 %v1849_v59, %v1849_v59  ;;  %v2874_v31 = vmul.f32 %v1850_v21, %v1850_v21 }
 0x3bd   : > { %3419 = vmin.xlane.f32.xlu1 %v3418_v38  ;;  %v2618_v30 = vadd.f32 %v2362_v6, %v2106_v62  ;;  %v2619_v10 = vadd.f32 %v2363_v35, %v2107_v4  ;;  %v2875_v8 = vmul.f32 %v1851_v16, %v1851_v16  ;;  %v1332_v17 = vsub.f32 %v12907_v49, %v7904_v11  ;;  %v12909_v4 = vld [vmem:[#allocation162_spill] sm:$0xff] }
 0x3be   : > { %v3128_v32 = vadd.f32 %v2872_v58, %v2616_v46  ;;  %v3129_v26 = vadd.f32 %v2873_v5, %v2617_v1  ;;  %v1333_v43 = vsub.f32 %v12907_v49, %v7906_v9  ;;  %v1334_v33 = vsub.f32 %v12907_v49, %v7908_v19 }
 0x3bf   : > { %v3130_v34 = vadd.f32 %v2874_v31, %v2618_v30  ;;  %v3131_v7 = vadd.f32 %v2875_v8, %v2619_v10  ;;  %v1335_v36 = vsub.f32 %v12907_v49, %v7910_v28  ;;  %v1600_v60 = vsub.f32 %v12908_v14, %v7912_v13 }
 0x3c0   : > { %v3624_v59 = vmin.f32 %v8804_v37, %v3128_v32  ;;  %v3693_v21 = vmin.f32 %v8812_v57, %v3129_v26  ;;  %v3411_v54 = vmin.f32 %v3128_v32, %v3129_v26  ;;  %v1601_v16 = vsub.f32 %v12908_v14, %v7914_v25 }
 0x3c1   : > { %v3762_v39 = vmin.f32 %v8814_v22, %v3130_v34  ;;  %v3831_v24 = vmin.f32 %v8816_v45, %v3131_v7  ;;  %v1602_v30 = vsub.f32 %v12908_v14, %v7916_v50  ;;  %v1603_v31 = vsub.f32 %v12908_v14, %v7918_v29 }
 0x3c2   : > { %v3412_v62 = vmin.f32 %v3411_v54, %v3130_v34  ;;  %v1868_v37 = vsub.f32 %v12909_v4, %v7936_v15  ;;  %v1869_v57 = vsub.f32 %v12909_v4, %v7938_v0  ;;  %v1870_v51 = vsub.f32 %v12909_v4, %v7940_v2 }
 0x3c3   : > { %v1871_v22 = vsub.f32 %v12909_v4, %v7942_v63  ;;  %v2124_v45 = vmul.f32 %v1332_v17, %v1332_v17  ;;  %v2125_v56 = vmul.f32 %v1333_v43, %v1333_v43  ;;  %v2126_v38 = vmul.f32 %v1334_v33, %v1334_v33  ;;  %v12910_v4 = vld [vmem:[#allocation48_spill] sm:$0xff] }
 0x3c4   : > { %v3413_v6 = vmin.f32 %v3412_v62, %v3131_v7  ;;  %v2127_v35 = vmul.f32 %v1335_v36, %v1335_v36  ;;  %v2380_v58 = vmul.f32 %v1600_v60, %v1600_v60  ;;  %v2381_v46 = vmul.f32 %v1601_v16, %v1601_v16 }
 0x3c5   : > { %v2382_v1 = vmul.f32 %v1602_v30, %v1602_v30  ;;  %v2383_v5 = vmul.f32 %v1603_v31, %v1603_v31  ;;  %v2892_v10 = vmul.f32 %v1868_v37, %v1868_v37  ;;  %v2893_v8 = vmul.f32 %v1869_v57, %v1869_v57  ;;  %v12911_v31 = vld [vmem:[#allocation107_spill] sm:$0xff] }
 0x3c6   : > { %3414 = vmin.xlane.f32.xlu0 %v3413_v6  ;;  %v2636_v32 = vadd.f32 %v2380_v58, %v2124_v45  ;;  %v2637_v26 = vadd.f32 %v2381_v46, %v2125_v56  ;;  %v2894_v34 = vmul.f32 %v1870_v51, %v1870_v51  ;;  %v2895_v54 = vmul.f32 %v1871_v22, %v1871_v22 }
 0x3c7   : > { %v2638_v14 = vadd.f32 %v2382_v1, %v2126_v38  ;;  %v2639_v49 = vadd.f32 %v2383_v5, %v2127_v35  ;;  %v1328_v17 = vsub.f32 %v12910_v4, %v7904_v11  ;;  %v1329_v43 = vsub.f32 %v12910_v4, %v7906_v9 }
 0x3c8   : > { %v3148_v33 = vadd.f32 %v2892_v10, %v2636_v32  ;;  %v3149_v7 = vadd.f32 %v2893_v8, %v2637_v26  ;;  %v1330_v36 = vsub.f32 %v12910_v4, %v7908_v19  ;;  %v1331_v60 = vsub.f32 %v12910_v4, %v7910_v28 }
 0x3c9   : > { %v3150_v16 = vadd.f32 %v2894_v34, %v2638_v14  ;;  %v3151_v30 = vadd.f32 %v2895_v54, %v2639_v49  ;;  %v1596_v62 = vsub.f32 %v12911_v31, %v7912_v13  ;;  %v1597_v37 = vsub.f32 %v12911_v31, %v7914_v25  ;;  %v12912_v14 = vld [vmem:[#allocation37_spill] sm:$0xff] }
 0x3ca   : > { %v8868_v57 = vmin.f32 %v3624_v59, %v3148_v33  ;;  %v8870_v51 = vmin.f32 %v3693_v21, %v3149_v7  ;;  %v3436_v22 = vmin.f32 %v3148_v33, %v3149_v7  ;;  %v1598_v45 = vsub.f32 %v12911_v31, %v7916_v50 }
 0x3cb   : > { %v8874_v56 = vmin.f32 %v3762_v39, %v3150_v16  ;;  %v8876_v38 = vmin.f32 %v3831_v24, %v3151_v30  ;;  %v1599_v49 = vsub.f32 %v12911_v31, %v7918_v29  ;;  %v1864_v6 = vsub.f32 %v12912_v14, %v7936_v15 }
 0x3cc   : > { %v3437_v35 = vmin.f32 %v3436_v22, %v3150_v16  ;;  %v1865_v59 = vsub.f32 %v12912_v14, %v7938_v0  ;;  %v1866_v21 = vsub.f32 %v12912_v14, %v7940_v2  ;;  %v1867_v58 = vsub.f32 %v12912_v14, %v7942_v63  ;;  %v12913_v14 = vld [vmem:[#allocation49_spill] sm:$0xff] }
 0x3cd   : > { %v2120_v39 = vmul.f32 %v1328_v17, %v1328_v17  ;;  %v2121_v46 = vmul.f32 %v1329_v43, %v1329_v43  ;;  %v2122_v24 = vmul.f32 %v1330_v36, %v1330_v36  ;;  %v2123_v1 = vmul.f32 %v1331_v60, %v1331_v60 }
 0x3ce   : > { %v3438_v5 = vmin.f32 %v3437_v35, %v3151_v30  ;;  %v2376_v10 = vmul.f32 %v1596_v62, %v1596_v62  ;;  %v2377_v8 = vmul.f32 %v1597_v37, %v1597_v37  ;;  %v2378_v32 = vmul.f32 %v1598_v45, %v1598_v45 }
 0x3cf   : > { %v2379_v26 = vmul.f32 %v1599_v49, %v1599_v49  ;;  %v2888_v34 = vmul.f32 %v1864_v6, %v1864_v6  ;;  %v2889_v54 = vmul.f32 %v1865_v59, %v1865_v59  ;;  %v2890_v33 = vmul.f32 %v1866_v21, %v1866_v21  ;;  %v12914_v49 = vld [vmem:[#allocation31_spill] sm:$0xff] }
 0x3d0   : > { %3439 = vmin.xlane.f32.xlu2 %v3438_v5  ;;  %v2632_v7 = vadd.f32 %v2376_v10, %v2120_v39  ;;  %v2633_v16 = vadd.f32 %v2377_v8, %v2121_v46  ;;  %v2634_v22 = vadd.f32 %v2378_v32, %v2122_v24  ;;  %v2891_v31 = vmul.f32 %v1867_v58, %v1867_v58 }
 0x3d1   : > { %v2635_v4 = vadd.f32 %v2379_v26, %v2123_v1  ;;  %v1324_v17 = vsub.f32 %v12913_v14, %v7904_v11  ;;  %v1325_v43 = vsub.f32 %v12913_v14, %v7906_v9  ;;  %v1326_v36 = vsub.f32 %v12913_v14, %v7908_v19 }
 0x3d2   : > { %v3144_v60 = vadd.f32 %v2888_v34, %v2632_v7  ;;  %v3145_v30 = vadd.f32 %v2889_v54, %v2633_v16  ;;  %v3146_v62 = vadd.f32 %v2890_v33, %v2634_v22  ;;  %v1327_v37 = vsub.f32 %v12913_v14, %v7910_v28 }
 0x3d3   : > { %v3147_v45 = vadd.f32 %v2891_v31, %v2635_v4  ;;  %v1592_v6 = vsub.f32 %v12914_v49, %v7912_v13  ;;  %v1593_v35 = vsub.f32 %v12914_v49, %v7914_v25  ;;  %v1594_v59 = vsub.f32 %v12914_v49, %v7916_v50  ;;  %v12915_v31 = vld [vmem:[#allocation164_spill] sm:$0xff] }
 0x3d4   : > { %v3626_v21 = vmin.f32 %v8868_v57, %v3144_v60  ;;  %v3695_v58 = vmin.f32 %v8870_v51, %v3145_v30  ;;  %v3764_v39 = vmin.f32 %v8874_v56, %v3146_v62  ;;  %v3431_v46 = vmin.f32 %v3144_v60, %v3145_v30 }
 0x3d5   : > { %v3833_v24 = vmin.f32 %v8876_v38, %v3147_v45  ;;  %v1595_v4 = vsub.f32 %v12914_v49, %v7918_v29  ;;  %v1860_v1 = vsub.f32 %v12915_v31, %v7936_v15  ;;  %v1861_v5 = vsub.f32 %v12915_v31, %v7938_v0 }
 0x3d6   : > { %v3432_v10 = vmin.f32 %v3431_v46, %v3146_v62  ;;  %v1862_v57 = vsub.f32 %v12915_v31, %v7940_v2  ;;  %v1863_v51 = vsub.f32 %v12915_v31, %v7942_v63  ;;  %v2116_v56 = vmul.f32 %v1324_v17, %v1324_v17  ;;  %v12916_v17 = vld [vmem:[#allocation41_spill] sm:$0xff] }
 0x3d7   : > { %v2117_v8 = vmul.f32 %v1325_v43, %v1325_v43  ;;  %v2118_v32 = vmul.f32 %v1326_v36, %v1326_v36  ;;  %v2119_v38 = vmul.f32 %v1327_v37, %v1327_v37  ;;  %v2372_v26 = vmul.f32 %v1592_v6, %v1592_v6 }
 0x3d8   : > { %v3433_v34 = vmin.f32 %v3432_v10, %v3147_v45  ;;  %v2373_v54 = vmul.f32 %v1593_v35, %v1593_v35  ;;  %v2374_v33 = vmul.f32 %v1594_v59, %v1594_v59  ;;  %v2375_v7 = vmul.f32 %v1595_v4, %v1595_v4 }
 0x3d9   : > { %v2628_v16 = vadd.f32 %v2372_v26, %v2116_v56  ;;  %v2884_v22 = vmul.f32 %v1860_v1, %v1860_v1  ;;  %v2885_v60 = vmul.f32 %v1861_v5, %v1861_v5  ;;  %v2886_v30 = vmul.f32 %v1862_v57, %v1862_v57  ;;  %v12917_v1 = vld [vmem:[#allocation112_spill] sm:$0xff] }
 0x3da   : > { %3434 = vmin.xlane.f32.xlu1 %v3433_v34  ;;  %v2629_v62 = vadd.f32 %v2373_v54, %v2117_v8  ;;  %v2630_v46 = vadd.f32 %v2374_v33, %v2118_v32  ;;  %v2631_v49 = vadd.f32 %v2375_v7, %v2119_v38  ;;  %v2887_v14 = vmul.f32 %v1863_v51, %v1863_v51 }
 0x3db   : > { %v3140_v27 = vadd.f32 %v2884_v22, %v2628_v16  ;;  %v1344_v43 = vsub.f32 %v12916_v17, %v7904_v11  ;;  %v1345_v36 = vsub.f32 %v12916_v17, %v7906_v9  ;;  %v1346_v37 = vsub.f32 %v12916_v17, %v7908_v19 }
 0x3dc   : > { %v3141_v45 = vadd.f32 %v2885_v60, %v2629_v62  ;;  %v3142_v6 = vadd.f32 %v2886_v30, %v2630_v46  ;;  %v3143_v35 = vadd.f32 %v2887_v14, %v2631_v49  ;;  %v1347_v59 = vsub.f32 %v12916_v17, %v7910_v28 }
 0x3dd   : > { %v8924_v4 = vmin.f32 %v3626_v21, %v3140_v27  ;;  %v1612_v5 = vsub.f32 %v12917_v1, %v7912_v13  ;;  %v1613_v10 = vsub.f32 %v12917_v1, %v7914_v25  ;;  %v1614_v57 = vsub.f32 %v12917_v1, %v7916_v50  ;;  %v12918_v21 = vld [vmem:[#allocation165_spill] sm:$0xff] }
 0x3de   : > { %v8932_v51 = vmin.f32 %v3695_v58, %v3141_v45  ;;  %v8934_v56 = vmin.f32 %v3764_v39, %v3142_v6  ;;  %v8936_v8 = vmin.f32 %v3833_v24, %v3143_v35  ;;  %v3426_v14 = vmin.f32 %v3140_v27, %v3141_v45 }
 0x3df   : > { %v1615_v49 = vsub.f32 %v12917_v1, %v7918_v29  ;;  %v1880_v32 = vsub.f32 %v12918_v21, %v7936_v15  ;;  %v1881_v38 = vsub.f32 %v12918_v21, %v7938_v0  ;;  %v1882_v26 = vsub.f32 %v12918_v21, %v7940_v2 }
 0x3e0   : > { %v3427_v34 = vmin.f32 %v3426_v14, %v3142_v6  ;;  %v1883_v58 = vsub.f32 %v12918_v21, %v7942_v63  ;;  %v2136_v39 = vmul.f32 %v1344_v43, %v1344_v43  ;;  %v2137_v24 = vmul.f32 %v1345_v36, %v1345_v36  ;;  %v12919_v21 = vld [vmem:[#allocation51_spill] sm:$0xff] }
 0x3e1   : > { %v2138_v54 = vmul.f32 %v1346_v37, %v1346_v37  ;;  %v2139_v27 = vmul.f32 %v1347_v59, %v1347_v59  ;;  %v2392_v33 = vmul.f32 %v1612_v5, %v1612_v5  ;;  %v2393_v7 = vmul.f32 %v1613_v10, %v1613_v10 }
 0x3e2   : > { %v3428_v16 = vmin.f32 %v3427_v34, %v3143_v35  ;;  %v2394_v22 = vmul.f32 %v1614_v57, %v1614_v57  ;;  %v2395_v60 = vmul.f32 %v1615_v49, %v1615_v49  ;;  %v2904_v30 = vmul.f32 %v1880_v32, %v1880_v32  ;;  %v12920_v49 = vld [vmem:[#allocation110_spill] sm:$0xff] }
 0x3e3   : > { %v2648_v62 = vadd.f32 %v2392_v33, %v2136_v39  ;;  %v2649_v46 = vadd.f32 %v2393_v7, %v2137_v24  ;;  %v2905_v45 = vmul.f32 %v1881_v38, %v1881_v38  ;;  %v2906_v1 = vmul.f32 %v1882_v26, %v1882_v26 }
 0x3e4   : > { %3429 = vmin.xlane.f32.xlu0 %v3428_v16  ;;  %v2650_v17 = vadd.f32 %v2394_v22, %v2138_v54  ;;  %v2651_v6 = vadd.f32 %v2395_v60, %v2139_v27  ;;  %v2907_v14 = vmul.f32 %v1883_v58, %v1883_v58  ;;  %v1340_v43 = vsub.f32 %v12919_v21, %v7904_v11  ;;  %v12921_v27 = vld [vmem:[#allocation157_spill] sm:$0xff] }
 0x3e5   : > { %v3160_v36 = vadd.f32 %v2904_v30, %v2648_v62  ;;  %v3161_v37 = vadd.f32 %v2905_v45, %v2649_v46  ;;  %v1341_v59 = vsub.f32 %v12919_v21, %v7906_v9  ;;  %v1342_v35 = vsub.f32 %v12919_v21, %v7908_v19 }
 0x3e6   : > { %v3162_v5 = vadd.f32 %v2906_v1, %v2650_v17  ;;  %v3163_v10 = vadd.f32 %v2907_v14, %v2651_v6  ;;  %v1343_v57 = vsub.f32 %v12919_v21, %v7910_v28  ;;  %v1608_v32 = vsub.f32 %v12920_v49, %v7912_v13 }
 0x3e7   : > { %v3628_v38 = vmin.f32 %v8924_v4, %v3160_v36  ;;  %v3697_v26 = vmin.f32 %v8932_v51, %v3161_v37  ;;  %v3451_v34 = vmin.f32 %v3160_v36, %v3161_v37  ;;  %v1609_v58 = vsub.f32 %v12920_v49, %v7914_v25 }
 0x3e8   : > { %v3766_v39 = vmin.f32 %v8934_v56, %v3162_v5  ;;  %v3835_v24 = vmin.f32 %v8936_v8, %v3163_v10  ;;  %v1610_v17 = vsub.f32 %v12920_v49, %v7916_v50  ;;  %v1611_v1 = vsub.f32 %v12920_v49, %v7918_v29 }
 0x3e9   : > { %v3452_v54 = vmin.f32 %v3451_v34, %v3162_v5  ;;  %v1876_v4 = vsub.f32 %v12921_v27, %v7936_v15  ;;  %v1877_v51 = vsub.f32 %v12921_v27, %v7938_v0  ;;  %v1878_v33 = vsub.f32 %v12921_v27, %v7940_v2 }
 0x3ea   : > { %v1879_v56 = vsub.f32 %v12921_v27, %v7942_v63  ;;  %v2132_v8 = vmul.f32 %v1340_v43, %v1340_v43  ;;  %v2133_v7 = vmul.f32 %v1341_v59, %v1341_v59  ;;  %v2134_v16 = vmul.f32 %v1342_v35, %v1342_v35  ;;  %v12922_v27 = vld [vmem:[#allocation52_spill] sm:$0xff] }
 0x3eb   : > { %v3453_v22 = vmin.f32 %v3452_v54, %v3163_v10  ;;  %v2135_v60 = vmul.f32 %v1343_v57, %v1343_v57  ;;  %v2388_v30 = vmul.f32 %v1608_v32, %v1608_v32  ;;  %v2389_v62 = vmul.f32 %v1609_v58, %v1609_v58 }
 0x3ec   : > { %v2390_v46 = vmul.f32 %v1610_v17, %v1610_v17  ;;  %v2391_v45 = vmul.f32 %v1611_v1, %v1611_v1  ;;  %v2900_v6 = vmul.f32 %v1876_v4, %v1876_v4  ;;  %v2901_v14 = vmul.f32 %v1877_v51, %v1877_v51  ;;  %v12923_v1 = vld [vmem:[#allocation2_spill] sm:$0xff] }
 0x3ed   : > { %3454 = vmin.xlane.f32.xlu2 %v3453_v22  ;;  %v2644_v36 = vadd.f32 %v2388_v30, %v2132_v8  ;;  %v2645_v37 = vadd.f32 %v2389_v62, %v2133_v7  ;;  %v2902_v5 = vmul.f32 %v1878_v33, %v1878_v33  ;;  %v2903_v34 = vmul.f32 %v1879_v56, %v1879_v56 }
 0x3ee   : > { %v2646_v49 = vadd.f32 %v2390_v46, %v2134_v16  ;;  %v2647_v21 = vadd.f32 %v2391_v45, %v2135_v60  ;;  %v1336_v43 = vsub.f32 %v12922_v27, %v7904_v11  ;;  %v1337_v59 = vsub.f32 %v12922_v27, %v7906_v9 }
 0x3ef   : > { %v3156_v35 = vadd.f32 %v2900_v6, %v2644_v36  ;;  %v3157_v10 = vadd.f32 %v2901_v14, %v2645_v37  ;;  %v1338_v57 = vsub.f32 %v12922_v27, %v7908_v19  ;;  %v1339_v32 = vsub.f32 %v12922_v27, %v7910_v28 }
 0x3f0   : > { %v3158_v58 = vadd.f32 %v2902_v5, %v2646_v49  ;;  %v3159_v17 = vadd.f32 %v2903_v34, %v2647_v21  ;;  %v1604_v54 = vsub.f32 %v12923_v1, %v7912_v13  ;;  %v1605_v4 = vsub.f32 %v12923_v1, %v7914_v25  ;;  %v12924_v49 = vld [vmem:[#allocation167_spill] sm:$0xff] }
 0x3f1   : > { %v8988_v51 = vmin.f32 %v3628_v38, %v3156_v35  ;;  %v8990_v33 = vmin.f32 %v3697_v26, %v3157_v10  ;;  %v3446_v56 = vmin.f32 %v3156_v35, %v3157_v10  ;;  %v1606_v8 = vsub.f32 %v12923_v1, %v7916_v50 }
 0x3f2   : > { %v8994_v7 = vmin.f32 %v3766_v39, %v3158_v58  ;;  %v8996_v16 = vmin.f32 %v3835_v24, %v3159_v17  ;;  %v1607_v21 = vsub.f32 %v12923_v1, %v7918_v29  ;;  %v1872_v22 = vsub.f32 %v12924_v49, %v7936_v15 }
 0x3f3   : > { %v3447_v60 = vmin.f32 %v3446_v56, %v3158_v58  ;;  %v1873_v38 = vsub.f32 %v12924_v49, %v7938_v0  ;;  %v1874_v26 = vsub.f32 %v12924_v49, %v7940_v2  ;;  %v1875_v30 = vsub.f32 %v12924_v49, %v7942_v63  ;;  %v12925_v49 = vld [vmem:[#allocation44_spill] sm:$0xff] }
 0x3f4   : > { %v2128_v39 = vmul.f32 %v1336_v43, %v1336_v43  ;;  %v2129_v62 = vmul.f32 %v1337_v59, %v1337_v59  ;;  %v2130_v24 = vmul.f32 %v1338_v57, %v1338_v57  ;;  %v2131_v46 = vmul.f32 %v1339_v32, %v1339_v32 }
 0x3f5   : > { %v3448_v45 = vmin.f32 %v3447_v60, %v3159_v17  ;;  %v2384_v6 = vmul.f32 %v1604_v54, %v1604_v54  ;;  %v2385_v14 = vmul.f32 %v1605_v4, %v1605_v4  ;;  %v2386_v36 = vmul.f32 %v1606_v8, %v1606_v8 }
 0x3f6   : > { %v2387_v37 = vmul.f32 %v1607_v21, %v1607_v21  ;;  %v2896_v5 = vmul.f32 %v1872_v22, %v1872_v22  ;;  %v2897_v34 = vmul.f32 %v1873_v38, %v1873_v38  ;;  %v2898_v35 = vmul.f32 %v1874_v26, %v1874_v26  ;;  %v12926_v21 = vld [vmem:[#allocation115_spill] sm:$0xff] }
 0x3f7   : > { %3449 = vmin.xlane.f32.xlu1 %v3448_v45  ;;  %v2640_v10 = vadd.f32 %v2384_v6, %v2128_v39  ;;  %v2641_v58 = vadd.f32 %v2385_v14, %v2129_v62  ;;  %v2642_v56 = vadd.f32 %v2386_v36, %v2130_v24  ;;  %v2899_v1 = vmul.f32 %v1875_v30, %v1875_v30 }
 0x3f8   : > { %v2643_v27 = vadd.f32 %v2387_v37, %v2131_v46  ;;  %v1356_v43 = vsub.f32 %v12925_v49, %v7904_v11  ;;  %v1357_v59 = vsub.f32 %v12925_v49, %v7906_v9  ;;  %v1358_v57 = vsub.f32 %v12925_v49, %v7908_v19 }
 0x3f9   : > { %v3152_v32 = vadd.f32 %v2896_v5, %v2640_v10  ;;  %v3153_v17 = vadd.f32 %v2897_v34, %v2641_v58  ;;  %v3154_v54 = vadd.f32 %v2898_v35, %v2642_v56  ;;  %v1359_v4 = vsub.f32 %v12925_v49, %v7910_v28 }
 0x3fa   : > { %v3155_v8 = vadd.f32 %v2899_v1, %v2643_v27  ;;  %v1624_v22 = vsub.f32 %v12926_v21, %v7912_v13  ;;  %v1625_v60 = vsub.f32 %v12926_v21, %v7914_v25  ;;  %v1626_v38 = vsub.f32 %v12926_v21, %v7916_v50  ;;  %v12927_v1 = vld [vmem:[#allocation168_spill] sm:$0xff] }
 0x3fb   : > { %v3630_v26 = vmin.f32 %v8988_v51, %v3152_v32  ;;  %v3699_v30 = vmin.f32 %v8990_v33, %v3153_v17  ;;  %v3768_v39 = vmin.f32 %v8994_v7, %v3154_v54  ;;  %v3441_v62 = vmin.f32 %v3152_v32, %v3153_v17 }
 0x3fc   : > { %v3837_v24 = vmin.f32 %v8996_v16, %v3155_v8  ;;  %v1627_v27 = vsub.f32 %v12926_v21, %v7918_v29  ;;  %v1892_v46 = vsub.f32 %v12927_v1, %v7936_v15  ;;  %v1893_v45 = vsub.f32 %v12927_v1, %v7938_v0 }
 0x3fd   : > { %v3442_v6 = vmin.f32 %v3441_v62, %v3154_v54  ;;  %v1894_v51 = vsub.f32 %v12927_v1, %v7940_v2  ;;  %v1895_v33 = vsub.f32 %v12927_v1, %v7942_v63  ;;  %v2148_v7 = vmul.f32 %v1356_v43, %v1356_v43  ;;  %v12928_v43 = vld [vmem:[#allocation54_spill] sm:$0xff] }
 0x3fe   : > { %v2149_v14 = vmul.f32 %v1357_v59, %v1357_v59  ;;  %v2150_v36 = vmul.f32 %v1358_v57, %v1358_v57  ;;  %v2151_v16 = vmul.f32 %v1359_v4, %v1359_v4  ;;  %v2404_v37 = vmul.f32 %v1624_v22, %v1624_v22 }
 0x3ff   : > { %v3443_v5 = vmin.f32 %v3442_v6, %v3155_v8  ;;  %v2405_v34 = vmul.f32 %v1625_v60, %v1625_v60  ;;  %v2406_v35 = vmul.f32 %v1626_v38, %v1626_v38  ;;  %v2407_v10 = vmul.f32 %v1627_v27, %v1627_v27 }
 0x400   : > { %v2660_v58 = vadd.f32 %v2404_v37, %v2148_v7  ;;  %v2916_v56 = vmul.f32 %v1892_v46, %v1892_v46  ;;  %v2917_v32 = vmul.f32 %v1893_v45, %v1893_v45  ;;  %v2918_v17 = vmul.f32 %v1894_v51, %v1894_v51  ;;  %v12929_v46 = vld [vmem:[#allocation113_spill] sm:$0xff] }
 0x401   : > { %3444 = vmin.xlane.f32.xlu0 %v3443_v5  ;;  %v2661_v54 = vadd.f32 %v2405_v34, %v2149_v14  ;;  %v2662_v62 = vadd.f32 %v2406_v35, %v2150_v36  ;;  %v2663_v21 = vadd.f32 %v2407_v10, %v2151_v16  ;;  %v2919_v49 = vmul.f32 %v1895_v33, %v1895_v33 }
 0x402   : > { %v3172_v31 = vadd.f32 %v2916_v56, %v2660_v58  ;;  %v1352_v59 = vsub.f32 %v12928_v43, %v7904_v11  ;;  %v1353_v57 = vsub.f32 %v12928_v43, %v7906_v9  ;;  %v1354_v4 = vsub.f32 %v12928_v43, %v7908_v19 }
 0x403   : > { %v3173_v8 = vadd.f32 %v2917_v32, %v2661_v54  ;;  %v3174_v22 = vadd.f32 %v2918_v17, %v2662_v62  ;;  %v3175_v60 = vadd.f32 %v2919_v49, %v2663_v21  ;;  %v1355_v38 = vsub.f32 %v12928_v43, %v7910_v28 }
 0x404   : > { %v9044_v27 = vmin.f32 %v3630_v26, %v3172_v31  ;;  %v1620_v45 = vsub.f32 %v12929_v46, %v7912_v13  ;;  %v1621_v6 = vsub.f32 %v12929_v46, %v7914_v25  ;;  %v1622_v51 = vsub.f32 %v12929_v46, %v7916_v50  ;;  %v12930_v26 = vld [vmem:[#allocation160_spill] sm:$0xff] }
 0x405   : > { %v9052_v33 = vmin.f32 %v3699_v30, %v3173_v8  ;;  %v9054_v7 = vmin.f32 %v3768_v39, %v3174_v22  ;;  %v9056_v14 = vmin.f32 %v3837_v24, %v3175_v60  ;;  %v3466_v49 = vmin.f32 %v3172_v31, %v3173_v8 }
 0x406   : > { %v1623_v21 = vsub.f32 %v12929_v46, %v7918_v29  ;;  %v1888_v36 = vsub.f32 %v12930_v26, %v7936_v15  ;;  %v1889_v16 = vsub.f32 %v12930_v26, %v7938_v0  ;;  %v1890_v37 = vsub.f32 %v12930_v26, %v7940_v2 }
 0x407   : > { %v3467_v5 = vmin.f32 %v3466_v49, %v3174_v22  ;;  %v1891_v30 = vsub.f32 %v12930_v26, %v7942_v63  ;;  %v2144_v39 = vmul.f32 %v1352_v59, %v1352_v59  ;;  %v2145_v24 = vmul.f32 %v1353_v57, %v1353_v57  ;;  %v12931_v26 = vld [vmem:[#allocation55_spill] sm:$0xff] }
 0x408   : > { %v2146_v34 = vmul.f32 %v1354_v4, %v1354_v4  ;;  %v2147_v31 = vmul.f32 %v1355_v38, %v1355_v38  ;;  %v2400_v35 = vmul.f32 %v1620_v45, %v1620_v45  ;;  %v2401_v10 = vmul.f32 %v1621_v6, %v1621_v6 }
 0x409   : > { %v3468_v58 = vmin.f32 %v3467_v5, %v3175_v60  ;;  %v2402_v56 = vmul.f32 %v1622_v51, %v1622_v51  ;;  %v2403_v32 = vmul.f32 %v1623_v21, %v1623_v21  ;;  %v2912_v17 = vmul.f32 %v1888_v36, %v1888_v36  ;;  %v12932_v21 = vld [vmem:[#allocation102_spill] sm:$0xff] }
 0x40a   : > { %v2656_v54 = vadd.f32 %v2400_v35, %v2144_v39  ;;  %v2657_v62 = vadd.f32 %v2401_v10, %v2145_v24  ;;  %v2913_v8 = vmul.f32 %v1889_v16, %v1889_v16  ;;  %v2914_v1 = vmul.f32 %v1890_v37, %v1890_v37 }
 0x40b   : > { %3469 = vmin.xlane.f32.xlu2 %v3468_v58  ;;  %v2658_v46 = vadd.f32 %v2402_v56, %v2146_v34  ;;  %v2659_v22 = vadd.f32 %v2403_v32, %v2147_v31  ;;  %v2915_v49 = vmul.f32 %v1891_v30, %v1891_v30  ;;  %v1348_v59 = vsub.f32 %v12931_v26, %v7904_v11  ;;  %v12933_v31 = vld [vmem:[#allocation170_spill] sm:$0xff] }
 0x40c   : > { %v3168_v57 = vadd.f32 %v2912_v17, %v2656_v54  ;;  %v3169_v4 = vadd.f32 %v2913_v8, %v2657_v62  ;;  %v1349_v38 = vsub.f32 %v12931_v26, %v7906_v9  ;;  %v1350_v60 = vsub.f32 %v12931_v26, %v7908_v19 }
 0x40d   : > { %v3170_v45 = vadd.f32 %v2914_v1, %v2658_v46  ;;  %v3171_v6 = vadd.f32 %v2915_v49, %v2659_v22  ;;  %v1351_v51 = vsub.f32 %v12931_v26, %v7910_v28  ;;  %v1616_v36 = vsub.f32 %v12932_v21, %v7912_v13 }
 0x40e   : > { %v3632_v16 = vmin.f32 %v9044_v27, %v3168_v57  ;;  %v3701_v37 = vmin.f32 %v9052_v33, %v3169_v4  ;;  %v3461_v5 = vmin.f32 %v3168_v57, %v3169_v4  ;;  %v1617_v30 = vsub.f32 %v12932_v21, %v7914_v25 }
 0x40f   : > { %v3770_v39 = vmin.f32 %v9054_v7, %v3170_v45  ;;  %v3839_v24 = vmin.f32 %v9056_v14, %v3171_v6  ;;  %v1618_v1 = vsub.f32 %v12932_v21, %v7916_v50  ;;  %v1619_v46 = vsub.f32 %v12932_v21, %v7918_v29 }
 0x410   : > { %v3462_v34 = vmin.f32 %v3461_v5, %v3170_v45  ;;  %v1884_v27 = vsub.f32 %v12933_v31, %v7936_v15  ;;  %v1885_v33 = vsub.f32 %v12933_v31, %v7938_v0  ;;  %v1886_v35 = vsub.f32 %v12933_v31, %v7940_v2 }
 0x411   : > { %v1887_v7 = vsub.f32 %v12933_v31, %v7942_v63  ;;  %v2140_v14 = vmul.f32 %v1348_v59, %v1348_v59  ;;  %v2141_v10 = vmul.f32 %v1349_v38, %v1349_v38  ;;  %v2142_v58 = vmul.f32 %v1350_v60, %v1350_v60  ;;  %v12934_v31 = vld [vmem:[#allocation47_spill] sm:$0xff] }
 0x412   : > { %v3463_v56 = vmin.f32 %v3462_v34, %v3171_v6  ;;  %v2143_v32 = vmul.f32 %v1351_v51, %v1351_v51  ;;  %v2396_v17 = vmul.f32 %v1616_v36, %v1616_v36  ;;  %v2397_v54 = vmul.f32 %v1617_v30, %v1617_v30 }
 0x413   : > { %v2398_v62 = vmul.f32 %v1618_v1, %v1618_v1  ;;  %v2399_v8 = vmul.f32 %v1619_v46, %v1619_v46  ;;  %v2908_v22 = vmul.f32 %v1884_v27, %v1884_v27  ;;  %v2909_v49 = vmul.f32 %v1885_v33, %v1885_v33  ;;  %v12935_v46 = vld [vmem:[#allocation118_spill] sm:$0xff] }
 0x414   : > { %3464 = vmin.xlane.f32.xlu1 %v3463_v56  ;;  %v2652_v57 = vadd.f32 %v2396_v17, %v2140_v14  ;;  %v2653_v4 = vadd.f32 %v2397_v54, %v2141_v10  ;;  %v2910_v45 = vmul.f32 %v1886_v35, %v1886_v35  ;;  %v2911_v5 = vmul.f32 %v1887_v7, %v1887_v7 }
 0x415   : > { %v2654_v21 = vadd.f32 %v2398_v62, %v2142_v58  ;;  %v2655_v26 = vadd.f32 %v2399_v8, %v2143_v32  ;;  %v1368_v59 = vsub.f32 %v12934_v31, %v7904_v11  ;;  %v1369_v38 = vsub.f32 %v12934_v31, %v7906_v9 }
 0x416   : > { %v3164_v60 = vadd.f32 %v2908_v22, %v2652_v57  ;;  %v3165_v6 = vadd.f32 %v2909_v49, %v2653_v4  ;;  %v1370_v51 = vsub.f32 %v12934_v31, %v7908_v19  ;;  %v1371_v36 = vsub.f32 %v12934_v31, %v7910_v28 }
 0x417   : > { %v3166_v30 = vadd.f32 %v2910_v45, %v2654_v21  ;;  %v3167_v1 = vadd.f32 %v2911_v5, %v2655_v26  ;;  %v1636_v34 = vsub.f32 %v12935_v46, %v7912_v13  ;;  %v1637_v27 = vsub.f32 %v12935_v46, %v7914_v25  ;;  %v12936_v21 = vld [vmem:[#allocation171_spill] sm:$0xff] }
 0x418   : > { %v9108_v33 = vmin.f32 %v3632_v16, %v3164_v60  ;;  %v9110_v35 = vmin.f32 %v3701_v37, %v3165_v6  ;;  %v3456_v7 = vmin.f32 %v3164_v60, %v3165_v6  ;;  %v1638_v14 = vsub.f32 %v12935_v46, %v7916_v50 }
 0x419   : > { %v9114_v10 = vmin.f32 %v3770_v39, %v3166_v30  ;;  %v9116_v58 = vmin.f32 %v3839_v24, %v3167_v1  ;;  %v1639_v26 = vsub.f32 %v12935_v46, %v7918_v29  ;;  %v1904_v56 = vsub.f32 %v12936_v21, %v7936_v15 }
 0x41a   : > { %v3457_v32 = vmin.f32 %v3456_v7, %v3166_v30  ;;  %v1905_v16 = vsub.f32 %v12936_v21, %v7938_v0  ;;  %v1906_v37 = vsub.f32 %v12936_v21, %v7940_v2  ;;  %v1907_v17 = vsub.f32 %v12936_v21, %v7942_v63  ;;  %v12937_v21 = vld [vmem:[#allocation57_spill] sm:$0xff] }
 0x41b   : > { %v2160_v39 = vmul.f32 %v1368_v59, %v1368_v59  ;;  %v2161_v54 = vmul.f32 %v1369_v38, %v1369_v38  ;;  %v2162_v24 = vmul.f32 %v1370_v51, %v1370_v51  ;;  %v2163_v62 = vmul.f32 %v1371_v36, %v1371_v36 }
 0x41c   : > { %v3458_v8 = vmin.f32 %v3457_v32, %v3167_v1  ;;  %v2416_v22 = vmul.f32 %v1636_v34, %v1636_v34  ;;  %v2417_v49 = vmul.f32 %v1637_v27, %v1637_v27  ;;  %v2418_v57 = vmul.f32 %v1638_v14, %v1638_v14 }
 0x41d   : > { %v2419_v4 = vmul.f32 %v1639_v26, %v1639_v26  ;;  %v2928_v45 = vmul.f32 %v1904_v56, %v1904_v56  ;;  %v2929_v5 = vmul.f32 %v1905_v16, %v1905_v16  ;;  %v2930_v60 = vmul.f32 %v1906_v37, %v1906_v37  ;;  %v12938_v26 = vld [vmem:[#allocation116_spill] sm:$0xff] }
 0x41e   : > { %3459 = vmin.xlane.f32.xlu0 %v3458_v8  ;;  %v2672_v6 = vadd.f32 %v2416_v22, %v2160_v39  ;;  %v2673_v30 = vadd.f32 %v2417_v49, %v2161_v54  ;;  %v2674_v7 = vadd.f32 %v2418_v57, %v2162_v24  ;;  %v2931_v46 = vmul.f32 %v1907_v17, %v1907_v17 }
 0x41f   : > { %v2675_v31 = vadd.f32 %v2419_v4, %v2163_v62  ;;  %v1364_v59 = vsub.f32 %v12937_v21, %v7904_v11  ;;  %v1365_v38 = vsub.f32 %v12937_v21, %v7906_v9  ;;  %v1366_v51 = vsub.f32 %v12937_v21, %v7908_v19 }
 0x420   : > { %v3184_v36 = vadd.f32 %v2928_v45, %v2672_v6  ;;  %v3185_v1 = vadd.f32 %v2929_v5, %v2673_v30  ;;  %v3186_v34 = vadd.f32 %v2930_v60, %v2674_v7  ;;  %v1367_v27 = vsub.f32 %v12937_v21, %v7910_v28 }
 0x421   : > { %v3187_v14 = vadd.f32 %v2931_v46, %v2675_v31  ;;  %v1632_v56 = vsub.f32 %v12938_v26, %v7912_v13  ;;  %v1633_v32 = vsub.f32 %v12938_v26, %v7914_v25  ;;  %v1634_v16 = vsub.f32 %v12938_v26, %v7916_v50  ;;  %v12939_v46 = vld [vmem:[#allocation163_spill] sm:$0xff] }
 0x422   : > { %v3634_v37 = vmin.f32 %v9108_v33, %v3184_v36  ;;  %v3703_v17 = vmin.f32 %v9110_v35, %v3185_v1  ;;  %v3772_v39 = vmin.f32 %v9114_v10, %v3186_v34  ;;  %v3481_v54 = vmin.f32 %v3184_v36, %v3185_v1 }
 0x423   : > { %v3841_v24 = vmin.f32 %v9116_v58, %v3187_v14  ;;  %v1635_v31 = vsub.f32 %v12938_v26, %v7918_v29  ;;  %v1900_v62 = vsub.f32 %v12939_v46, %v7936_v15  ;;  %v1901_v8 = vsub.f32 %v12939_v46, %v7938_v0 }
 0x424   : > { %v3482_v22 = vmin.f32 %v3481_v54, %v3186_v34  ;;  %v1902_v33 = vsub.f32 %v12939_v46, %v7940_v2  ;;  %v1903_v35 = vsub.f32 %v12939_v46, %v7942_v63  ;;  %v2156_v10 = vmul.f32 %v1364_v59, %v1364_v59  ;;  %v12940_v59 = vld [vmem:[#allocation58_spill] sm:$0xff] }
 0x425   : > { %v2157_v49 = vmul.f32 %v1365_v38, %v1365_v38  ;;  %v2158_v57 = vmul.f32 %v1366_v51, %v1366_v51  ;;  %v2159_v58 = vmul.f32 %v1367_v27, %v1367_v27  ;;  %v2412_v4 = vmul.f32 %v1632_v56, %v1632_v56 }
 0x426   : > { %v3483_v45 = vmin.f32 %v3482_v22, %v3187_v14  ;;  %v2413_v5 = vmul.f32 %v1633_v32, %v1633_v32  ;;  %v2414_v60 = vmul.f32 %v1634_v16, %v1634_v16  ;;  %v2415_v6 = vmul.f32 %v1635_v31, %v1635_v31 }
 0x427   : > { %v2668_v30 = vadd.f32 %v2412_v4, %v2156_v10  ;;  %v2924_v7 = vmul.f32 %v1900_v62, %v1900_v62  ;;  %v2925_v36 = vmul.f32 %v1901_v8, %v1901_v8  ;;  %v2926_v1 = vmul.f32 %v1902_v33, %v1902_v33  ;;  %v12941_v62 = vld [vmem:[#allocation105_spill] sm:$0xff] }
 0x428   : > { %3484 = vmin.xlane.f32.xlu2 %v3483_v45  ;;  %v2669_v34 = vadd.f32 %v2413_v5, %v2157_v49  ;;  %v2670_v54 = vadd.f32 %v2414_v60, %v2158_v57  ;;  %v2671_v26 = vadd.f32 %v2415_v6, %v2159_v58  ;;  %v2927_v21 = vmul.f32 %v1903_v35, %v1903_v35 }
 0x429   : > { %v3180_v43 = vadd.f32 %v2924_v7, %v2668_v30  ;;  %v1360_v38 = vsub.f32 %v12940_v59, %v7904_v11  ;;  %v1361_v51 = vsub.f32 %v12940_v59, %v7906_v9  ;;  %v1362_v27 = vsub.f32 %v12940_v59, %v7908_v19 }
 0x42a   : > { %v3181_v14 = vadd.f32 %v2925_v36, %v2669_v34  ;;  %v3182_v56 = vadd.f32 %v2926_v1, %v2670_v54  ;;  %v3183_v32 = vadd.f32 %v2927_v21, %v2671_v26  ;;  %v1363_v16 = vsub.f32 %v12940_v59, %v7910_v28 }
 0x42b   : > { %v9164_v31 = vmin.f32 %v3634_v37, %v3180_v43  ;;  %v1628_v8 = vsub.f32 %v12941_v62, %v7912_v13  ;;  %v1629_v22 = vsub.f32 %v12941_v62, %v7914_v25  ;;  %v1630_v33 = vsub.f32 %v12941_v62, %v7916_v50  ;;  %v12942_v37 = vld [vmem:[#allocation173_spill] sm:$0xff] }
 0x42c   : > { %v9172_v35 = vmin.f32 %v3703_v17, %v3181_v14  ;;  %v9174_v10 = vmin.f32 %v3772_v39, %v3182_v56  ;;  %v9176_v49 = vmin.f32 %v3841_v24, %v3183_v32  ;;  %v3476_v21 = vmin.f32 %v3180_v43, %v3181_v14 }
 0x42d   : > { %v1631_v26 = vsub.f32 %v12941_v62, %v7918_v29  ;;  %v1896_v57 = vsub.f32 %v12942_v37, %v7936_v15  ;;  %v1897_v58 = vsub.f32 %v12942_v37, %v7938_v0  ;;  %v1898_v4 = vsub.f32 %v12942_v37, %v7940_v2 }
 0x42e   : > { %v3477_v45 = vmin.f32 %v3476_v21, %v3182_v56  ;;  %v1899_v17 = vsub.f32 %v12942_v37, %v7942_v63  ;;  %v2152_v39 = vmul.f32 %v1360_v38, %v1360_v38  ;;  %v2153_v24 = vmul.f32 %v1361_v51, %v1361_v51  ;;  %v12943_v37 = vld [vmem:[#allocation50_spill] sm:$0xff] }
 0x42f   : > { %v2154_v5 = vmul.f32 %v1362_v27, %v1362_v27  ;;  %v2155_v43 = vmul.f32 %v1363_v16, %v1363_v16  ;;  %v2408_v60 = vmul.f32 %v1628_v8, %v1628_v8  ;;  %v2409_v6 = vmul.f32 %v1629_v22, %v1629_v22 }
 0x430   : > { %v3478_v30 = vmin.f32 %v3477_v45, %v3183_v32  ;;  %v2410_v7 = vmul.f32 %v1630_v33, %v1630_v33  ;;  %v2411_v36 = vmul.f32 %v1631_v26, %v1631_v26  ;;  %v2920_v1 = vmul.f32 %v1896_v57, %v1896_v57  ;;  %v12944_v26 = vld [vmem:[#allocation121_spill] sm:$0xff] }
 0x431   : > { %v2664_v34 = vadd.f32 %v2408_v60, %v2152_v39  ;;  %v2665_v54 = vadd.f32 %v2409_v6, %v2153_v24  ;;  %v2921_v14 = vmul.f32 %v1897_v58, %v1897_v58  ;;  %v2922_v62 = vmul.f32 %v1898_v4, %v1898_v4 }
 0x432   : > { %3479 = vmin.xlane.f32.xlu1 %v3478_v30  ;;  %v2666_v59 = vadd.f32 %v2410_v7, %v2154_v5  ;;  %v2667_v56 = vadd.f32 %v2411_v36, %v2155_v43  ;;  %v2923_v21 = vmul.f32 %v1899_v17, %v1899_v17  ;;  %v1380_v38 = vsub.f32 %v12943_v37, %v7904_v11  ;;  %v12945_v43 = vld [vmem:[#allocation174_spill] sm:$0xff] }
 0x433   : > { %v3176_v51 = vadd.f32 %v2920_v1, %v2664_v34  ;;  %v3177_v27 = vadd.f32 %v2921_v14, %v2665_v54  ;;  %v1381_v16 = vsub.f32 %v12943_v37, %v7906_v9  ;;  %v1382_v32 = vsub.f32 %v12943_v37, %v7908_v19 }
 0x434   : > { %v3178_v8 = vadd.f32 %v2922_v62, %v2666_v59  ;;  %v3179_v22 = vadd.f32 %v2923_v21, %v2667_v56  ;;  %v1383_v33 = vsub.f32 %v12943_v37, %v7910_v28  ;;  %v1648_v57 = vsub.f32 %v12944_v26, %v7912_v13 }
 0x435   : > { %v3636_v58 = vmin.f32 %v9164_v31, %v3176_v51  ;;  %v3705_v4 = vmin.f32 %v9172_v35, %v3177_v27  ;;  %v3471_v45 = vmin.f32 %v3176_v51, %v3177_v27  ;;  %v1649_v17 = vsub.f32 %v12944_v26, %v7914_v25 }
 0x436   : > { %v3774_v39 = vmin.f32 %v9174_v10, %v3178_v8  ;;  %v3843_v24 = vmin.f32 %v9176_v49, %v3179_v22  ;;  %v1650_v59 = vsub.f32 %v12944_v26, %v7916_v50  ;;  %v1651_v62 = vsub.f32 %v12944_v26, %v7918_v29 }
 0x437   : > { %v3472_v5 = vmin.f32 %v3471_v45, %v3178_v8  ;;  %v1916_v31 = vsub.f32 %v12945_v43, %v7936_v15  ;;  %v1917_v35 = vsub.f32 %v12945_v43, %v7938_v0  ;;  %v1918_v60 = vsub.f32 %v12945_v43, %v7940_v2 }
 0x438   : > { %v1919_v10 = vsub.f32 %v12945_v43, %v7942_v63  ;;  %v2172_v49 = vmul.f32 %v1380_v38, %v1380_v38  ;;  %v2173_v6 = vmul.f32 %v1381_v16, %v1381_v16  ;;  %v2174_v30 = vmul.f32 %v1382_v32, %v1382_v32  ;;  %v12946_v43 = vld [vmem:[#allocation60_spill] sm:$0xff] }
 0x439   : > { %v3473_v7 = vmin.f32 %v3472_v5, %v3179_v22  ;;  %v2175_v36 = vmul.f32 %v1383_v33, %v1383_v33  ;;  %v2428_v1 = vmul.f32 %v1648_v57, %v1648_v57  ;;  %v2429_v34 = vmul.f32 %v1649_v17, %v1649_v17 }
 0x43a   : > { %v2430_v54 = vmul.f32 %v1650_v59, %v1650_v59  ;;  %v2431_v14 = vmul.f32 %v1651_v62, %v1651_v62  ;;  %v2940_v56 = vmul.f32 %v1916_v31, %v1916_v31  ;;  %v2941_v21 = vmul.f32 %v1917_v35, %v1917_v35  ;;  %v12947_v62 = vld [vmem:[#allocation119_spill] sm:$0xff] }
 0x43b   : > { %3474 = vmin.xlane.f32.xlu0 %v3473_v7  ;;  %v2684_v51 = vadd.f32 %v2428_v1, %v2172_v49  ;;  %v2685_v27 = vadd.f32 %v2429_v34, %v2173_v6  ;;  %v2942_v8 = vmul.f32 %v1918_v60, %v1918_v60  ;;  %v2943_v45 = vmul.f32 %v1919_v10, %v1919_v10 }
 0x43c   : > { %v2686_v26 = vadd.f32 %v2430_v54, %v2174_v30  ;;  %v2687_v37 = vadd.f32 %v2431_v14, %v2175_v36  ;;  %v1376_v38 = vsub.f32 %v12946_v43, %v7904_v11  ;;  %v1377_v16 = vsub.f32 %v12946_v43, %v7906_v9 }
 0x43d   : > { %v3196_v32 = vadd.f32 %v2940_v56, %v2684_v51  ;;  %v3197_v22 = vadd.f32 %v2941_v21, %v2685_v27  ;;  %v1378_v33 = vsub.f32 %v12946_v43, %v7908_v19  ;;  %v1379_v57 = vsub.f32 %v12946_v43, %v7910_v28 }
 0x43e   : > { %v3198_v17 = vadd.f32 %v2942_v8, %v2686_v26  ;;  %v3199_v59 = vadd.f32 %v2943_v45, %v2687_v37  ;;  %v1644_v5 = vsub.f32 %v12947_v62, %v7912_v13  ;;  %v1645_v31 = vsub.f32 %v12947_v62, %v7914_v25  ;;  %v12948_v26 = vld [vmem:[#allocation166_spill] sm:$0xff] }
 0x43f   : > { %v9228_v35 = vmin.f32 %v3636_v58, %v3196_v32  ;;  %v9230_v60 = vmin.f32 %v3705_v4, %v3197_v22  ;;  %v3496_v10 = vmin.f32 %v3196_v32, %v3197_v22  ;;  %v1646_v49 = vsub.f32 %v12947_v62, %v7916_v50 }
 0x440   : > { %v9234_v6 = vmin.f32 %v3774_v39, %v3198_v17  ;;  %v9236_v30 = vmin.f32 %v3843_v24, %v3199_v59  ;;  %v1647_v37 = vsub.f32 %v12947_v62, %v7918_v29  ;;  %v1912_v7 = vsub.f32 %v12948_v26, %v7936_v15 }
 0x441   : > { %v3497_v36 = vmin.f32 %v3496_v10, %v3198_v17  ;;  %v1913_v58 = vsub.f32 %v12948_v26, %v7938_v0  ;;  %v1914_v4 = vsub.f32 %v12948_v26, %v7940_v2  ;;  %v1915_v1 = vsub.f32 %v12948_v26, %v7942_v63  ;;  %v12949_v26 = vld [vmem:[#allocation61_spill] sm:$0xff] }
 0x442   : > { %v2168_v39 = vmul.f32 %v1376_v38, %v1376_v38  ;;  %v2169_v34 = vmul.f32 %v1377_v16, %v1377_v16  ;;  %v2170_v24 = vmul.f32 %v1378_v33, %v1378_v33  ;;  %v2171_v54 = vmul.f32 %v1379_v57, %v1379_v57 }
 0x443   : > { %v3498_v14 = vmin.f32 %v3497_v36, %v3199_v59  ;;  %v2424_v56 = vmul.f32 %v1644_v5, %v1644_v5  ;;  %v2425_v21 = vmul.f32 %v1645_v31, %v1645_v31  ;;  %v2426_v51 = vmul.f32 %v1646_v49, %v1646_v49 }
 0x444   : > { %v2427_v27 = vmul.f32 %v1647_v37, %v1647_v37  ;;  %v2936_v8 = vmul.f32 %v1912_v7, %v1912_v7  ;;  %v2937_v45 = vmul.f32 %v1913_v58, %v1913_v58  ;;  %v2938_v32 = vmul.f32 %v1914_v4, %v1914_v4  ;;  %v12950_v37 = vld [vmem:[#allocation108_spill] sm:$0xff] }
 0x445   : > { %3499 = vmin.xlane.f32.xlu2 %v3498_v14  ;;  %v2680_v22 = vadd.f32 %v2424_v56, %v2168_v39  ;;  %v2681_v17 = vadd.f32 %v2425_v21, %v2169_v34  ;;  %v2682_v10 = vadd.f32 %v2426_v51, %v2170_v24  ;;  %v2939_v62 = vmul.f32 %v1915_v1, %v1915_v1 }
 0x446   : > { %v2683_v43 = vadd.f32 %v2427_v27, %v2171_v54  ;;  %v1372_v38 = vsub.f32 %v12949_v26, %v7904_v11  ;;  %v1373_v16 = vsub.f32 %v12949_v26, %v7906_v9  ;;  %v1374_v33 = vsub.f32 %v12949_v26, %v7908_v19 }
 0x447   : > { %v3192_v57 = vadd.f32 %v2936_v8, %v2680_v22  ;;  %v3193_v59 = vadd.f32 %v2937_v45, %v2681_v17  ;;  %v3194_v5 = vadd.f32 %v2938_v32, %v2682_v10  ;;  %v1375_v31 = vsub.f32 %v12949_v26, %v7910_v28 }
 0x448   : > { %v3195_v49 = vadd.f32 %v2939_v62, %v2683_v43  ;;  %v1640_v7 = vsub.f32 %v12950_v37, %v7912_v13  ;;  %v1641_v36 = vsub.f32 %v12950_v37, %v7914_v25  ;;  %v1642_v58 = vsub.f32 %v12950_v37, %v7916_v50  ;;  %v12951_v62 = vld [vmem:[#allocation176_spill] sm:$0xff] }
 0x449   : > { %v3638_v4 = vmin.f32 %v9228_v35, %v3192_v57  ;;  %v3707_v1 = vmin.f32 %v9230_v60, %v3193_v59  ;;  %v3776_v39 = vmin.f32 %v9234_v6, %v3194_v5  ;;  %v3491_v34 = vmin.f32 %v3192_v57, %v3193_v59 }
 0x44a   : > { %v3845_v24 = vmin.f32 %v9236_v30, %v3195_v49  ;;  %v1643_v43 = vsub.f32 %v12950_v37, %v7918_v29  ;;  %v1908_v54 = vsub.f32 %v12951_v62, %v7936_v15  ;;  %v1909_v14 = vsub.f32 %v12951_v62, %v7938_v0 }
 0x44b   : > { %v3492_v56 = vmin.f32 %v3491_v34, %v3194_v5  ;;  %v1910_v35 = vsub.f32 %v12951_v62, %v7940_v2  ;;  %v1911_v60 = vsub.f32 %v12951_v62, %v7942_v63  ;;  %v2164_v6 = vmul.f32 %v1372_v38, %v1372_v38  ;;  %v12952_v38 = vld [vmem:[#allocation53_spill] sm:$0xff] }
 0x44c   : > { %v2165_v21 = vmul.f32 %v1373_v16, %v1373_v16  ;;  %v2166_v51 = vmul.f32 %v1374_v33, %v1374_v33  ;;  %v2167_v30 = vmul.f32 %v1375_v31, %v1375_v31  ;;  %v2420_v27 = vmul.f32 %v1640_v7, %v1640_v7 }
 0x44d   : > { %v3493_v8 = vmin.f32 %v3492_v56, %v3195_v49  ;;  %v2421_v45 = vmul.f32 %v1641_v36, %v1641_v36  ;;  %v2422_v32 = vmul.f32 %v1642_v58, %v1642_v58  ;;  %v2423_v22 = vmul.f32 %v1643_v43, %v1643_v43 }
 0x44e   : > { %v2676_v17 = vadd.f32 %v2420_v27, %v2164_v6  ;;  %v2932_v10 = vmul.f32 %v1908_v54, %v1908_v54  ;;  %v2933_v57 = vmul.f32 %v1909_v14, %v1909_v14  ;;  %v2934_v59 = vmul.f32 %v1910_v35, %v1910_v35  ;;  %v12953_v54 = vld [vmem:[#allocation124_spill] sm:$0xff] }
 0x44f   : > { %3494 = vmin.xlane.f32.xlu1 %v3493_v8  ;;  %v2677_v5 = vadd.f32 %v2421_v45, %v2165_v21  ;;  %v2678_v34 = vadd.f32 %v2422_v32, %v2166_v51  ;;  %v2679_v37 = vadd.f32 %v2423_v22, %v2167_v30  ;;  %v2935_v26 = vmul.f32 %v1911_v60, %v1911_v60 }
 0x450   : > { %v3188_v46 = vadd.f32 %v2932_v10, %v2676_v17  ;;  %v1392_v16 = vsub.f32 %v12952_v38, %v7904_v11  ;;  %v1393_v33 = vsub.f32 %v12952_v38, %v7906_v9  ;;  %v1394_v31 = vsub.f32 %v12952_v38, %v7908_v19 }
 0x451   : > { %v3189_v49 = vadd.f32 %v2933_v57, %v2677_v5  ;;  %v3190_v7 = vadd.f32 %v2934_v59, %v2678_v34  ;;  %v3191_v36 = vadd.f32 %v2935_v26, %v2679_v37  ;;  %v1395_v58 = vsub.f32 %v12952_v38, %v7910_v28 }
 0x452   : > { %v9284_v43 = vmin.f32 %v3638_v4, %v3188_v46  ;;  %v1660_v14 = vsub.f32 %v12953_v54, %v7912_v13  ;;  %v1661_v56 = vsub.f32 %v12953_v54, %v7914_v25  ;;  %v1662_v35 = vsub.f32 %v12953_v54, %v7916_v50  ;;  %v12954_v4 = vld [vmem:[#allocation177_spill] sm:$0xff] }
 0x453   : > { %v9292_v60 = vmin.f32 %v3707_v1, %v3189_v49  ;;  %v9294_v6 = vmin.f32 %v3776_v39, %v3190_v7  ;;  %v9296_v21 = vmin.f32 %v3845_v24, %v3191_v36  ;;  %v3486_v26 = vmin.f32 %v3188_v46, %v3189_v49 }
 0x454   : > { %v1663_v37 = vsub.f32 %v12953_v54, %v7918_v29  ;;  %v1928_v51 = vsub.f32 %v12954_v4, %v7936_v15  ;;  %v1929_v30 = vsub.f32 %v12954_v4, %v7938_v0  ;;  %v1930_v27 = vsub.f32 %v12954_v4, %v7940_v2 }
 0x455   : > { %v3487_v8 = vmin.f32 %v3486_v26, %v3190_v7  ;;  %v1931_v1 = vsub.f32 %v12954_v4, %v7942_v63  ;;  %v2184_v39 = vmul.f32 %v1392_v16, %v1392_v16  ;;  %v2185_v24 = vmul.f32 %v1393_v33, %v1393_v33  ;;  %v12955_v4 = vld [vmem:[#allocation63_spill] sm:$0xff] }
 0x456   : > { %v2186_v45 = vmul.f32 %v1394_v31, %v1394_v31  ;;  %v2187_v46 = vmul.f32 %v1395_v58, %v1395_v58  ;;  %v2440_v32 = vmul.f32 %v1660_v14, %v1660_v14  ;;  %v2441_v22 = vmul.f32 %v1661_v56, %v1661_v56 }
 0x457   : > { %v3488_v17 = vmin.f32 %v3487_v8, %v3191_v36  ;;  %v2442_v10 = vmul.f32 %v1662_v35, %v1662_v35  ;;  %v2443_v57 = vmul.f32 %v1663_v37, %v1663_v37  ;;  %v2952_v59 = vmul.f32 %v1928_v51, %v1928_v51  ;;  %v12956_v37 = vld [vmem:[#allocation122_spill] sm:$0xff] }
 0x458   : > { %v2696_v5 = vadd.f32 %v2440_v32, %v2184_v39  ;;  %v2697_v34 = vadd.f32 %v2441_v22, %v2185_v24  ;;  %v2953_v49 = vmul.f32 %v1929_v30, %v1929_v30  ;;  %v2954_v54 = vmul.f32 %v1930_v27, %v1930_v27 }
 0x459   : > { %3489 = vmin.xlane.f32.xlu0 %v3488_v17  ;;  %v2698_v38 = vadd.f32 %v2442_v10, %v2186_v45  ;;  %v2699_v7 = vadd.f32 %v2443_v57, %v2187_v46  ;;  %v2955_v26 = vmul.f32 %v1931_v1, %v1931_v1  ;;  %v1388_v16 = vsub.f32 %v12955_v4, %v7904_v11  ;;  %v12957_v46 = vld [vmem:[#allocation169_spill] sm:$0xff] }
 0x45a   : > { %v3208_v33 = vadd.f32 %v2952_v59, %v2696_v5  ;;  %v3209_v31 = vadd.f32 %v2953_v49, %v2697_v34  ;;  %v1389_v58 = vsub.f32 %v12955_v4, %v7906_v9  ;;  %v1390_v36 = vsub.f32 %v12955_v4, %v7908_v19 }
 0x45b   : > { %v3210_v14 = vadd.f32 %v2954_v54, %v2698_v38  ;;  %v3211_v56 = vadd.f32 %v2955_v26, %v2699_v7  ;;  %v1391_v35 = vsub.f32 %v12955_v4, %v7910_v28  ;;  %v1656_v51 = vsub.f32 %v12956_v37, %v7912_v13 }
 0x45c   : > { %v3640_v30 = vmin.f32 %v9284_v43, %v3208_v33  ;;  %v3709_v27 = vmin.f32 %v9292_v60, %v3209_v31  ;;  %v3511_v8 = vmin.f32 %v3208_v33, %v3209_v31  ;;  %v1657_v1 = vsub.f32 %v12956_v37, %v7914_v25 }
 0x45d   : > { %v3778_v39 = vmin.f32 %v9294_v6, %v3210_v14  ;;  %v3847_v24 = vmin.f32 %v9296_v21, %v3211_v56  ;;  %v1658_v38 = vsub.f32 %v12956_v37, %v7916_v50  ;;  %v1659_v54 = vsub.f32 %v12956_v37, %v7918_v29 }
 0x45e   : > { %v3512_v45 = vmin.f32 %v3511_v8, %v3210_v14  ;;  %v1924_v43 = vsub.f32 %v12957_v46, %v7936_v15  ;;  %v1925_v60 = vsub.f32 %v12957_v46, %v7938_v0  ;;  %v1926_v32 = vsub.f32 %v12957_v46, %v7940_v2 }
 0x45f   : > { %v1927_v6 = vsub.f32 %v12957_v46, %v7942_v63  ;;  %v2180_v21 = vmul.f32 %v1388_v16, %v1388_v16  ;;  %v2181_v22 = vmul.f32 %v1389_v58, %v1389_v58  ;;  %v2182_v17 = vmul.f32 %v1390_v36, %v1390_v36  ;;  %v12958_v46 = vld [vmem:[#allocation64_spill] sm:$0xff] }
 0x460   : > { %v3513_v10 = vmin.f32 %v3512_v45, %v3211_v56  ;;  %v2183_v57 = vmul.f32 %v1391_v35, %v1391_v35  ;;  %v2436_v59 = vmul.f32 %v1656_v51, %v1656_v51  ;;  %v2437_v5 = vmul.f32 %v1657_v1, %v1657_v1 }
 0x461   : > { %v2438_v34 = vmul.f32 %v1658_v38, %v1658_v38  ;;  %v2439_v49 = vmul.f32 %v1659_v54, %v1659_v54  ;;  %v2948_v7 = vmul.f32 %v1924_v43, %v1924_v43  ;;  %v2949_v26 = vmul.f32 %v1925_v60, %v1925_v60  ;;  %v12959_v54 = vld [vmem:[#allocation111_spill] sm:$0xff] }
 0x462   : > { %3514 = vmin.xlane.f32.xlu2 %v3513_v10  ;;  %v2692_v33 = vadd.f32 %v2436_v59, %v2180_v21  ;;  %v2693_v31 = vadd.f32 %v2437_v5, %v2181_v22  ;;  %v2950_v14 = vmul.f32 %v1926_v32, %v1926_v32  ;;  %v2951_v8 = vmul.f32 %v1927_v6, %v1927_v6 }
 0x463   : > { %v2694_v37 = vadd.f32 %v2438_v34, %v2182_v17  ;;  %v2695_v4 = vadd.f32 %v2439_v49, %v2183_v57  ;;  %v1384_v16 = vsub.f32 %v12958_v46, %v7904_v11  ;;  %v1385_v58 = vsub.f32 %v12958_v46, %v7906_v9 }
 0x464   : > { %v3204_v36 = vadd.f32 %v2948_v7, %v2692_v33  ;;  %v3205_v56 = vadd.f32 %v2949_v26, %v2693_v31  ;;  %v1386_v35 = vsub.f32 %v12958_v46, %v7908_v19  ;;  %v1387_v51 = vsub.f32 %v12958_v46, %v7910_v28 }
 0x465   : > { %v3206_v1 = vadd.f32 %v2950_v14, %v2694_v37  ;;  %v3207_v38 = vadd.f32 %v2951_v8, %v2695_v4  ;;  %v1652_v45 = vsub.f32 %v12959_v54, %v7912_v13  ;;  %v1653_v43 = vsub.f32 %v12959_v54, %v7914_v25  ;;  %v12960_v37 = vld [vmem:[#allocation179_spill] sm:$0xff] }
 0x466   : > { %v9348_v60 = vmin.f32 %v3640_v30, %v3204_v36  ;;  %v9350_v32 = vmin.f32 %v3709_v27, %v3205_v56  ;;  %v3506_v6 = vmin.f32 %v3204_v36, %v3205_v56  ;;  %v1654_v21 = vsub.f32 %v12959_v54, %v7916_v50 }
 0x467   : > { %v9354_v22 = vmin.f32 %v3778_v39, %v3206_v1  ;;  %v9356_v17 = vmin.f32 %v3847_v24, %v3207_v38  ;;  %v1655_v4 = vsub.f32 %v12959_v54, %v7918_v29  ;;  %v1920_v10 = vsub.f32 %v12960_v37, %v7936_v15 }
 0x468   : > { %v3507_v57 = vmin.f32 %v3506_v6, %v3206_v1  ;;  %v1921_v30 = vsub.f32 %v12960_v37, %v7938_v0  ;;  %v1922_v27 = vsub.f32 %v12960_v37, %v7940_v2  ;;  %v1923_v59 = vsub.f32 %v12960_v37, %v7942_v63  ;;  %v12961_v37 = vld [vmem:[#allocation56_spill] sm:$0xff] }
 0x469   : > { %v2176_v39 = vmul.f32 %v1384_v16, %v1384_v16  ;;  %v2177_v5 = vmul.f32 %v1385_v58, %v1385_v58  ;;  %v2178_v24 = vmul.f32 %v1386_v35, %v1386_v35  ;;  %v2179_v34 = vmul.f32 %v1387_v51, %v1387_v51 }
 0x46a   : > { %v3508_v49 = vmin.f32 %v3507_v57, %v3207_v38  ;;  %v2432_v7 = vmul.f32 %v1652_v45, %v1652_v45  ;;  %v2433_v26 = vmul.f32 %v1653_v43, %v1653_v43  ;;  %v2434_v33 = vmul.f32 %v1654_v21, %v1654_v21 }
 0x46b   : > { %v2435_v31 = vmul.f32 %v1655_v4, %v1655_v4  ;;  %v2944_v14 = vmul.f32 %v1920_v10, %v1920_v10  ;;  %v2945_v8 = vmul.f32 %v1921_v30, %v1921_v30  ;;  %v2946_v36 = vmul.f32 %v1922_v27, %v1922_v27  ;;  %v12962_v4 = vld [vmem:[#allocation127_spill] sm:$0xff] }
 0x46c   : > { %3509 = vmin.xlane.f32.xlu1 %v3508_v49  ;;  %v2688_v56 = vadd.f32 %v2432_v7, %v2176_v39  ;;  %v2689_v1 = vadd.f32 %v2433_v26, %v2177_v5  ;;  %v2690_v6 = vadd.f32 %v2434_v33, %v2178_v24  ;;  %v2947_v54 = vmul.f32 %v1923_v59, %v1923_v59 }
 0x46d   : > { %v2691_v46 = vadd.f32 %v2435_v31, %v2179_v34  ;;  %v1404_v16 = vsub.f32 %v12961_v37, %v7904_v11  ;;  %v1405_v58 = vsub.f32 %v12961_v37, %v7906_v9  ;;  %v1406_v35 = vsub.f32 %v12961_v37, %v7908_v19 }
 0x46e   : > { %v3200_v51 = vadd.f32 %v2944_v14, %v2688_v56  ;;  %v3201_v38 = vadd.f32 %v2945_v8, %v2689_v1  ;;  %v3202_v45 = vadd.f32 %v2946_v36, %v2690_v6  ;;  %v1407_v43 = vsub.f32 %v12961_v37, %v7910_v28 }
 0x46f   : > { %v3203_v21 = vadd.f32 %v2947_v54, %v2691_v46  ;;  %v1672_v10 = vsub.f32 %v12962_v4, %v7912_v13  ;;  %v1673_v57 = vsub.f32 %v12962_v4, %v7914_v25  ;;  %v1674_v30 = vsub.f32 %v12962_v4, %v7916_v50  ;;  %v12963_v54 = vld [vmem:[#allocation180_spill] sm:$0xff] }
 0x470   : > { %v3642_v27 = vmin.f32 %v9348_v60, %v3200_v51  ;;  %v3711_v59 = vmin.f32 %v9350_v32, %v3201_v38  ;;  %v3780_v39 = vmin.f32 %v9354_v22, %v3202_v45  ;;  %v3501_v5 = vmin.f32 %v3200_v51, %v3201_v38 }
 0x471   : > { %v3849_v24 = vmin.f32 %v9356_v17, %v3203_v21  ;;  %v1675_v46 = vsub.f32 %v12962_v4, %v7918_v29  ;;  %v1940_v34 = vsub.f32 %v12963_v54, %v7936_v15  ;;  %v1941_v49 = vsub.f32 %v12963_v54, %v7938_v0 }
 0x472   : > { %v3502_v7 = vmin.f32 %v3501_v5, %v3202_v45  ;;  %v1942_v60 = vsub.f32 %v12963_v54, %v7940_v2  ;;  %v1943_v32 = vsub.f32 %v12963_v54, %v7942_v63  ;;  %v2196_v22 = vmul.f32 %v1404_v16, %v1404_v16  ;;  %v12964_v16 = vld [vmem:[#allocation66_spill] sm:$0xff] }
 0x473   : > { %v2197_v26 = vmul.f32 %v1405_v58, %v1405_v58  ;;  %v2198_v33 = vmul.f32 %v1406_v35, %v1406_v35  ;;  %v2199_v17 = vmul.f32 %v1407_v43, %v1407_v43  ;;  %v2452_v31 = vmul.f32 %v1672_v10, %v1672_v10 }
 0x474   : > { %v3503_v14 = vmin.f32 %v3502_v7, %v3203_v21  ;;  %v2453_v8 = vmul.f32 %v1673_v57, %v1673_v57  ;;  %v2454_v36 = vmul.f32 %v1674_v30, %v1674_v30  ;;  %v2455_v56 = vmul.f32 %v1675_v46, %v1675_v46 }
 0x475   : > { %v2708_v1 = vadd.f32 %v2452_v31, %v2196_v22  ;;  %v2964_v6 = vmul.f32 %v1940_v34, %v1940_v34  ;;  %v2965_v51 = vmul.f32 %v1941_v49, %v1941_v49  ;;  %v2966_v38 = vmul.f32 %v1942_v60, %v1942_v60  ;;  %v12965_v34 = vld [vmem:[#allocation125_spill] sm:$0xff] }
 0x476   : > { %3504 = vmin.xlane.f32.xlu0 %v3503_v14  ;;  %v2709_v45 = vadd.f32 %v2453_v8, %v2197_v26  ;;  %v2710_v5 = vadd.f32 %v2454_v36, %v2198_v33  ;;  %v2711_v4 = vadd.f32 %v2455_v56, %v2199_v17  ;;  %v2967_v37 = vmul.f32 %v1943_v32, %v1943_v32 }
 0x477   : > { %v3220_v62 = vadd.f32 %v2964_v6, %v2708_v1  ;;  %v1400_v58 = vsub.f32 %v12964_v16, %v7904_v11  ;;  %v1401_v35 = vsub.f32 %v12964_v16, %v7906_v9  ;;  %v1402_v43 = vsub.f32 %v12964_v16, %v7908_v19 }
 0x478   : > { %v3221_v21 = vadd.f32 %v2965_v51, %v2709_v45  ;;  %v3222_v10 = vadd.f32 %v2966_v38, %v2710_v5  ;;  %v3223_v57 = vadd.f32 %v2967_v37, %v2711_v4  ;;  %v1403_v30 = vsub.f32 %v12964_v16, %v7910_v28 }
 0x479   : > { %v9404_v46 = vmin.f32 %v3642_v27, %v3220_v62  ;;  %v1668_v49 = vsub.f32 %v12965_v34, %v7912_v13  ;;  %v1669_v7 = vsub.f32 %v12965_v34, %v7914_v25  ;;  %v1670_v60 = vsub.f32 %v12965_v34, %v7916_v50  ;;  %v12966_v27 = vld [vmem:[#allocation172_spill] sm:$0xff] }
 0x47a   : > { %v9412_v32 = vmin.f32 %v3711_v59, %v3221_v21  ;;  %v9414_v22 = vmin.f32 %v3780_v39, %v3222_v10  ;;  %v9416_v26 = vmin.f32 %v3849_v24, %v3223_v57  ;;  %v3526_v37 = vmin.f32 %v3220_v62, %v3221_v21 }
 0x47b   : > { %v1671_v4 = vsub.f32 %v12965_v34, %v7918_v29  ;;  %v1936_v33 = vsub.f32 %v12966_v27, %v7936_v15  ;;  %v1937_v17 = vsub.f32 %v12966_v27, %v7938_v0  ;;  %v1938_v31 = vsub.f32 %v12966_v27, %v7940_v2 }
 0x47c   : > { %v3527_v14 = vmin.f32 %v3526_v37, %v3222_v10  ;;  %v1939_v59 = vsub.f32 %v12966_v27, %v7942_v63  ;;  %v2192_v39 = vmul.f32 %v1400_v58, %v1400_v58  ;;  %v2193_v24 = vmul.f32 %v1401_v35, %v1401_v35  ;;  %v12967_v27 = vld [vmem:[#allocation67_spill] sm:$0xff] }
 0x47d   : > { %v2194_v8 = vmul.f32 %v1402_v43, %v1402_v43  ;;  %v2195_v62 = vmul.f32 %v1403_v30, %v1403_v30  ;;  %v2448_v36 = vmul.f32 %v1668_v49, %v1668_v49  ;;  %v2449_v56 = vmul.f32 %v1669_v7, %v1669_v7 }
 0x47e   : > { %v3528_v1 = vmin.f32 %v3527_v14, %v3223_v57  ;;  %v2450_v6 = vmul.f32 %v1670_v60, %v1670_v60  ;;  %v2451_v51 = vmul.f32 %v1671_v4, %v1671_v4  ;;  %v2960_v38 = vmul.f32 %v1936_v33, %v1936_v33  ;;  %v12968_v4 = vld [vmem:[#allocation114_spill] sm:$0xff] }
 0x47f   : > { %v2704_v45 = vadd.f32 %v2448_v36, %v2192_v39  ;;  %v2705_v5 = vadd.f32 %v2449_v56, %v2193_v24  ;;  %v2961_v21 = vmul.f32 %v1937_v17, %v1937_v17  ;;  %v2962_v54 = vmul.f32 %v1938_v31, %v1938_v31 }
 0x480   : > { %3529 = vmin.xlane.f32.xlu2 %v3528_v1  ;;  %v2706_v34 = vadd.f32 %v2450_v6, %v2194_v8  ;;  %v2707_v10 = vadd.f32 %v2451_v51, %v2195_v62  ;;  %v2963_v37 = vmul.f32 %v1939_v59, %v1939_v59  ;;  %v1396_v58 = vsub.f32 %v12967_v27, %v7904_v11  ;;  %v12969_v62 = vld [vmem:[#allocation182_spill] sm:$0xff] }
 0x481   : > { %v3216_v35 = vadd.f32 %v2960_v38, %v2704_v45  ;;  %v3217_v43 = vadd.f32 %v2961_v21, %v2705_v5  ;;  %v1397_v30 = vsub.f32 %v12967_v27, %v7906_v9  ;;  %v1398_v57 = vsub.f32 %v12967_v27, %v7908_v19 }
 0x482   : > { %v3218_v49 = vadd.f32 %v2962_v54, %v2706_v34  ;;  %v3219_v7 = vadd.f32 %v2963_v37, %v2707_v10  ;;  %v1399_v60 = vsub.f32 %v12967_v27, %v7910_v28  ;;  %v1664_v33 = vsub.f32 %v12968_v4, %v7912_v13 }
 0x483   : > { %v3644_v17 = vmin.f32 %v9404_v46, %v3216_v35  ;;  %v3713_v31 = vmin.f32 %v9412_v32, %v3217_v43  ;;  %v3521_v14 = vmin.f32 %v3216_v35, %v3217_v43  ;;  %v1665_v59 = vsub.f32 %v12968_v4, %v7914_v25 }
 0x484   : > { %v3782_v39 = vmin.f32 %v9414_v22, %v3218_v49  ;;  %v3851_v24 = vmin.f32 %v9416_v26, %v3219_v7  ;;  %v1666_v54 = vsub.f32 %v12968_v4, %v7916_v50  ;;  %v1667_v34 = vsub.f32 %v12968_v4, %v7918_v29 }
 0x485   : > { %v3522_v8 = vmin.f32 %v3521_v14, %v3218_v49  ;;  %v1932_v46 = vsub.f32 %v12969_v62, %v7936_v15  ;;  %v1933_v32 = vsub.f32 %v12969_v62, %v7938_v0  ;;  %v1934_v36 = vsub.f32 %v12969_v62, %v7940_v2 }
 0x486   : > { %v1935_v22 = vsub.f32 %v12969_v62, %v7942_v63  ;;  %v2188_v26 = vmul.f32 %v1396_v58, %v1396_v58  ;;  %v2189_v56 = vmul.f32 %v1397_v30, %v1397_v30  ;;  %v2190_v1 = vmul.f32 %v1398_v57, %v1398_v57  ;;  %v12970_v62 = vld [vmem:[#allocation59_spill] sm:$0xff] }
 0x487   : > { %v3523_v6 = vmin.f32 %v3522_v8, %v3219_v7  ;;  %v2191_v51 = vmul.f32 %v1399_v60, %v1399_v60  ;;  %v2444_v38 = vmul.f32 %v1664_v33, %v1664_v33  ;;  %v2445_v45 = vmul.f32 %v1665_v59, %v1665_v59 }
 0x488   : > { %v2446_v5 = vmul.f32 %v1666_v54, %v1666_v54  ;;  %v2447_v21 = vmul.f32 %v1667_v34, %v1667_v34  ;;  %v2956_v10 = vmul.f32 %v1932_v46, %v1932_v46  ;;  %v2957_v37 = vmul.f32 %v1933_v32, %v1933_v32  ;;  %v12971_v34 = vld [vmem:[#allocation130_spill] sm:$0xff] }
 0x489   : > { %3524 = vmin.xlane.f32.xlu1 %v3523_v6  ;;  %v2700_v35 = vadd.f32 %v2444_v38, %v2188_v26  ;;  %v2701_v43 = vadd.f32 %v2445_v45, %v2189_v56  ;;  %v2958_v49 = vmul.f32 %v1934_v36, %v1934_v36  ;;  %v2959_v14 = vmul.f32 %v1935_v22, %v1935_v22 }
 0x48a   : > { %v2702_v4 = vadd.f32 %v2446_v5, %v2190_v1  ;;  %v2703_v27 = vadd.f32 %v2447_v21, %v2191_v51  ;;  %v1416_v58 = vsub.f32 %v12970_v62, %v7904_v11  ;;  %v1417_v30 = vsub.f32 %v12970_v62, %v7906_v9 }
 0x48b   : > { %v3212_v57 = vadd.f32 %v2956_v10, %v2700_v35  ;;  %v3213_v7 = vadd.f32 %v2957_v37, %v2701_v43  ;;  %v1418_v60 = vsub.f32 %v12970_v62, %v7908_v19  ;;  %v1419_v33 = vsub.f32 %v12970_v62, %v7910_v28 }
 0x48c   : > { %v3214_v59 = vadd.f32 %v2958_v49, %v2702_v4  ;;  %v3215_v54 = vadd.f32 %v2959_v14, %v2703_v27  ;;  %v1684_v8 = vsub.f32 %v12971_v34, %v7912_v13  ;;  %v1685_v46 = vsub.f32 %v12971_v34, %v7914_v25  ;;  %v12972_v4 = vld [vmem:[#allocation183_spill] sm:$0xff] }
 0x48d   : > { %v9468_v32 = vmin.f32 %v3644_v17, %v3212_v57  ;;  %v9470_v36 = vmin.f32 %v3713_v31, %v3213_v7  ;;  %v3516_v22 = vmin.f32 %v3212_v57, %v3213_v7  ;;  %v1686_v26 = vsub.f32 %v12971_v34, %v7916_v50 }
 0x48e   : > { %v9474_v56 = vmin.f32 %v3782_v39, %v3214_v59  ;;  %v9476_v1 = vmin.f32 %v3851_v24, %v3215_v54  ;;  %v1687_v27 = vsub.f32 %v12971_v34, %v7918_v29  ;;  %v1952_v6 = vsub.f32 %v12972_v4, %v7936_v15 }
 0x48f   : > { %v3517_v51 = vmin.f32 %v3516_v22, %v3214_v59  ;;  %v1953_v17 = vsub.f32 %v12972_v4, %v7938_v0  ;;  %v1954_v31 = vsub.f32 %v12972_v4, %v7940_v2  ;;  %v1955_v38 = vsub.f32 %v12972_v4, %v7942_v63  ;;  %v12973_v4 = vld [vmem:[#allocation69_spill] sm:$0xff] }
 0x490   : > { %v2208_v39 = vmul.f32 %v1416_v58, %v1416_v58  ;;  %v2209_v45 = vmul.f32 %v1417_v30, %v1417_v30  ;;  %v2210_v24 = vmul.f32 %v1418_v60, %v1418_v60  ;;  %v2211_v5 = vmul.f32 %v1419_v33, %v1419_v33 }
 0x491   : > { %v3518_v21 = vmin.f32 %v3517_v51, %v3215_v54  ;;  %v2464_v10 = vmul.f32 %v1684_v8, %v1684_v8  ;;  %v2465_v37 = vmul.f32 %v1685_v46, %v1685_v46  ;;  %v2466_v35 = vmul.f32 %v1686_v26, %v1686_v26 }
 0x492   : > { %v2467_v43 = vmul.f32 %v1687_v27, %v1687_v27  ;;  %v2976_v49 = vmul.f32 %v1952_v6, %v1952_v6  ;;  %v2977_v14 = vmul.f32 %v1953_v17, %v1953_v17  ;;  %v2978_v57 = vmul.f32 %v1954_v31, %v1954_v31  ;;  %v12974_v27 = vld [vmem:[#allocation128_spill] sm:$0xff] }
 0x493   : > { %3519 = vmin.xlane.f32.xlu0 %v3518_v21  ;;  %v2720_v7 = vadd.f32 %v2464_v10, %v2208_v39  ;;  %v2721_v59 = vadd.f32 %v2465_v37, %v2209_v45  ;;  %v2722_v22 = vadd.f32 %v2466_v35, %v2210_v24  ;;  %v2979_v34 = vmul.f32 %v1955_v38, %v1955_v38 }
 0x494   : > { %v2723_v62 = vadd.f32 %v2467_v43, %v2211_v5  ;;  %v1412_v58 = vsub.f32 %v12973_v4, %v7904_v11  ;;  %v1413_v30 = vsub.f32 %v12973_v4, %v7906_v9  ;;  %v1414_v60 = vsub.f32 %v12973_v4, %v7908_v19 }
 0x495   : > { %v3232_v33 = vadd.f32 %v2976_v49, %v2720_v7  ;;  %v3233_v54 = vadd.f32 %v2977_v14, %v2721_v59  ;;  %v3234_v8 = vadd.f32 %v2978_v57, %v2722_v22  ;;  %v1415_v46 = vsub.f32 %v12973_v4, %v7910_v28 }
 0x496   : > { %v3235_v26 = vadd.f32 %v2979_v34, %v2723_v62  ;;  %v1680_v6 = vsub.f32 %v12974_v27, %v7912_v13  ;;  %v1681_v51 = vsub.f32 %v12974_v27, %v7914_v25  ;;  %v1682_v17 = vsub.f32 %v12974_v27, %v7916_v50  ;;  %v12975_v34 = vld [vmem:[#allocation175_spill] sm:$0xff] }
 0x497   : > { %v3646_v31 = vmin.f32 %v9468_v32, %v3232_v33  ;;  %v3715_v38 = vmin.f32 %v9470_v36, %v3233_v54  ;;  %v3784_v39 = vmin.f32 %v9474_v56, %v3234_v8  ;;  %v3541_v45 = vmin.f32 %v3232_v33, %v3233_v54 }
 0x498   : > { %v3853_v24 = vmin.f32 %v9476_v1, %v3235_v26  ;;  %v1683_v62 = vsub.f32 %v12974_v27, %v7918_v29  ;;  %v1948_v5 = vsub.f32 %v12975_v34, %v7936_v15  ;;  %v1949_v21 = vsub.f32 %v12975_v34, %v7938_v0 }
 0x499   : > { %v3542_v10 = vmin.f32 %v3541_v45, %v3234_v8  ;;  %v1950_v32 = vsub.f32 %v12975_v34, %v7940_v2  ;;  %v1951_v36 = vsub.f32 %v12975_v34, %v7942_v63  ;;  %v2204_v56 = vmul.f32 %v1412_v58, %v1412_v58  ;;  %v12976_v58 = vld [vmem:[#allocation70_spill] sm:$0xff] }
 0x49a   : > { %v2205_v37 = vmul.f32 %v1413_v30, %v1413_v30  ;;  %v2206_v35 = vmul.f32 %v1414_v60, %v1414_v60  ;;  %v2207_v1 = vmul.f32 %v1415_v46, %v1415_v46  ;;  %v2460_v43 = vmul.f32 %v1680_v6, %v1680_v6 }
 0x49b   : > { %v3543_v49 = vmin.f32 %v3542_v10, %v3235_v26  ;;  %v2461_v14 = vmul.f32 %v1681_v51, %v1681_v51  ;;  %v2462_v57 = vmul.f32 %v1682_v17, %v1682_v17  ;;  %v2463_v7 = vmul.f32 %v1683_v62, %v1683_v62 }
 0x49c   : > { %v2716_v59 = vadd.f32 %v2460_v43, %v2204_v56  ;;  %v2972_v22 = vmul.f32 %v1948_v5, %v1948_v5  ;;  %v2973_v33 = vmul.f32 %v1949_v21, %v1949_v21  ;;  %v2974_v54 = vmul.f32 %v1950_v32, %v1950_v32  ;;  %v12977_v5 = vld [vmem:[#allocation117_spill] sm:$0xff] }
 0x49d   : > { %3544 = vmin.xlane.f32.xlu2 %v3543_v49  ;;  %v2717_v8 = vadd.f32 %v2461_v14, %v2205_v37  ;;  %v2718_v45 = vadd.f32 %v2462_v57, %v2206_v35  ;;  %v2719_v27 = vadd.f32 %v2463_v7, %v2207_v1  ;;  %v2975_v4 = vmul.f32 %v1951_v36, %v1951_v36 }
 0x49e   : > { %v3228_v16 = vadd.f32 %v2972_v22, %v2716_v59  ;;  %v1408_v30 = vsub.f32 %v12976_v58, %v7904_v11  ;;  %v1409_v60 = vsub.f32 %v12976_v58, %v7906_v9  ;;  %v1410_v46 = vsub.f32 %v12976_v58, %v7908_v19 }
 0x49f   : > { %v3229_v26 = vadd.f32 %v2973_v33, %v2717_v8  ;;  %v3230_v6 = vadd.f32 %v2974_v54, %v2718_v45  ;;  %v3231_v51 = vadd.f32 %v2975_v4, %v2719_v27  ;;  %v1411_v17 = vsub.f32 %v12976_v58, %v7910_v28 }
 0x4a0   : > { %v9524_v62 = vmin.f32 %v3646_v31, %v3228_v16  ;;  %v1676_v21 = vsub.f32 %v12977_v5, %v7912_v13  ;;  %v1677_v10 = vsub.f32 %v12977_v5, %v7914_v25  ;;  %v1678_v32 = vsub.f32 %v12977_v5, %v7916_v50  ;;  %v12978_v31 = vld [vmem:[#allocation185_spill] sm:$0xff] }
 0x4a1   : > { %v9532_v36 = vmin.f32 %v3715_v38, %v3229_v26  ;;  %v9534_v56 = vmin.f32 %v3784_v39, %v3230_v6  ;;  %v9536_v37 = vmin.f32 %v3853_v24, %v3231_v51  ;;  %v3536_v4 = vmin.f32 %v3228_v16, %v3229_v26 }
 0x4a2   : > { %v1679_v27 = vsub.f32 %v12977_v5, %v7918_v29  ;;  %v1944_v35 = vsub.f32 %v12978_v31, %v7936_v15  ;;  %v1945_v1 = vsub.f32 %v12978_v31, %v7938_v0  ;;  %v1946_v43 = vsub.f32 %v12978_v31, %v7940_v2 }
 0x4a3   : > { %v3537_v49 = vmin.f32 %v3536_v4, %v3230_v6  ;;  %v1947_v38 = vsub.f32 %v12978_v31, %v7942_v63  ;;  %v2200_v39 = vmul.f32 %v1408_v30, %v1408_v30  ;;  %v2201_v24 = vmul.f32 %v1409_v60, %v1409_v60  ;;  %v12979_v31 = vld [vmem:[#allocation62_spill] sm:$0xff] }
 0x4a4   : > { %v2202_v14 = vmul.f32 %v1410_v46, %v1410_v46  ;;  %v2203_v16 = vmul.f32 %v1411_v17, %v1411_v17  ;;  %v2456_v57 = vmul.f32 %v1676_v21, %v1676_v21  ;;  %v2457_v7 = vmul.f32 %v1677_v10, %v1677_v10 }
 0x4a5   : > { %v3538_v59 = vmin.f32 %v3537_v49, %v3231_v51  ;;  %v2458_v22 = vmul.f32 %v1678_v32, %v1678_v32  ;;  %v2459_v33 = vmul.f32 %v1679_v27, %v1679_v27  ;;  %v2968_v54 = vmul.f32 %v1944_v35, %v1944_v35  ;;  %v12980_v27 = vld [vmem:[#allocation132_spill] sm:$0xff] }
 0x4a6   : > { %v2712_v8 = vadd.f32 %v2456_v57, %v2200_v39  ;;  %v2713_v45 = vadd.f32 %v2457_v7, %v2201_v24  ;;  %v2969_v26 = vmul.f32 %v1945_v1, %v1945_v1  ;;  %v2970_v5 = vmul.f32 %v1946_v43, %v1946_v43 }
 0x4a7   : > { %3539 = vmin.xlane.f32.xlu1 %v3538_v59  ;;  %v2714_v58 = vadd.f32 %v2458_v22, %v2202_v14  ;;  %v2715_v6 = vadd.f32 %v2459_v33, %v2203_v16  ;;  %v2971_v4 = vmul.f32 %v1947_v38, %v1947_v38  ;;  %v1428_v30 = vsub.f32 %v12979_v31, %v7904_v11  ;;  %v12981_v16 = vld [vmem:[#allocation186_spill] sm:$0xff] }
 0x4a8   : > { %v3224_v60 = vadd.f32 %v2968_v54, %v2712_v8  ;;  %v3225_v46 = vadd.f32 %v2969_v26, %v2713_v45  ;;  %v1429_v17 = vsub.f32 %v12979_v31, %v7906_v9  ;;  %v1430_v51 = vsub.f32 %v12979_v31, %v7908_v19 }
 0x4a9   : > { %v3226_v21 = vadd.f32 %v2970_v5, %v2714_v58  ;;  %v3227_v10 = vadd.f32 %v2971_v4, %v2715_v6  ;;  %v1431_v32 = vsub.f32 %v12979_v31, %v7910_v28  ;;  %v1696_v35 = vsub.f32 %v12980_v27, %v7912_v13 }
 0x4aa   : > { %v3648_v1 = vmin.f32 %v9524_v62, %v3224_v60  ;;  %v3717_v43 = vmin.f32 %v9532_v36, %v3225_v46  ;;  %v3531_v49 = vmin.f32 %v3224_v60, %v3225_v46  ;;  %v1697_v38 = vsub.f32 %v12980_v27, %v7914_v25 }
 0x4ab   : > { %v3786_v39 = vmin.f32 %v9534_v56, %v3226_v21  ;;  %v3855_v24 = vmin.f32 %v9536_v37, %v3227_v10  ;;  %v1698_v58 = vsub.f32 %v12980_v27, %v7916_v50  ;;  %v1699_v5 = vsub.f32 %v12980_v27, %v7918_v29 }
 0x4ac   : > { %v3532_v14 = vmin.f32 %v3531_v49, %v3226_v21  ;;  %v1964_v62 = vsub.f32 %v12981_v16, %v7936_v15  ;;  %v1965_v36 = vsub.f32 %v12981_v16, %v7938_v0  ;;  %v1966_v57 = vsub.f32 %v12981_v16, %v7940_v2 }
 0x4ad   : > { %v1967_v56 = vsub.f32 %v12981_v16, %v7942_v63  ;;  %v2220_v37 = vmul.f32 %v1428_v30, %v1428_v30  ;;  %v2221_v7 = vmul.f32 %v1429_v17, %v1429_v17  ;;  %v2222_v59 = vmul.f32 %v1430_v51, %v1430_v51  ;;  %v12982_v16 = vld [vmem:[#allocation71_spill] sm:$0xff] }
 0x4ae   : > { %v3533_v22 = vmin.f32 %v3532_v14, %v3227_v10  ;;  %v2223_v33 = vmul.f32 %v1431_v32, %v1431_v32  ;;  %v2476_v54 = vmul.f32 %v1696_v35, %v1696_v35  ;;  %v2477_v8 = vmul.f32 %v1697_v38, %v1697_v38 }
 0x4af   : > { %v2478_v45 = vmul.f32 %v1698_v58, %v1698_v58  ;;  %v2479_v26 = vmul.f32 %v1699_v5, %v1699_v5  ;;  %v2988_v6 = vmul.f32 %v1964_v62, %v1964_v62  ;;  %v2989_v4 = vmul.f32 %v1965_v36, %v1965_v36  ;;  %v12983_v5 = vld [vmem:[#allocation131_spill] sm:$0xff] }
 0x4b0   : > { %3534 = vmin.xlane.f32.xlu0 %v3533_v22  ;;  %v2732_v60 = vadd.f32 %v2476_v54, %v2220_v37  ;;  %v2733_v46 = vadd.f32 %v2477_v8, %v2221_v7  ;;  %v2990_v21 = vmul.f32 %v1966_v57, %v1966_v57  ;;  %v2991_v49 = vmul.f32 %v1967_v56, %v1967_v56 }
 0x4b1   : > { %v2734_v27 = vadd.f32 %v2478_v45, %v2222_v59  ;;  %v2735_v31 = vadd.f32 %v2479_v26, %v2223_v33  ;;  %v1424_v30 = vsub.f32 %v12982_v16, %v7904_v11  ;;  %v1425_v17 = vsub.f32 %v12982_v16, %v7906_v9 }
 0x4b2   : > { %v3244_v51 = vadd.f32 %v2988_v6, %v2732_v60  ;;  %v3245_v10 = vadd.f32 %v2989_v4, %v2733_v46  ;;  %v1426_v32 = vsub.f32 %v12982_v16, %v7908_v19  ;;  %v1427_v35 = vsub.f32 %v12982_v16, %v7910_v28 }
 0x4b3   : > { %v3246_v38 = vadd.f32 %v2990_v21, %v2734_v27  ;;  %v3247_v58 = vadd.f32 %v2991_v49, %v2735_v31  ;;  %v1692_v14 = vsub.f32 %v12983_v5, %v7912_v13  ;;  %v1693_v62 = vsub.f32 %v12983_v5, %v7914_v25  ;;  %v12984_v27 = vld [vmem:[#allocation178_spill] sm:$0xff] }
 0x4b4   : > { %v9588_v36 = vmin.f32 %v3648_v1, %v3244_v51  ;;  %v9590_v57 = vmin.f32 %v3717_v43, %v3245_v10  ;;  %v3556_v56 = vmin.f32 %v3244_v51, %v3245_v10  ;;  %v1694_v37 = vsub.f32 %v12983_v5, %v7916_v50 }
 0x4b5   : > { %v9594_v7 = vmin.f32 %v3786_v39, %v3246_v38  ;;  %v9596_v59 = vmin.f32 %v3855_v24, %v3247_v58  ;;  %v1695_v31 = vsub.f32 %v12983_v5, %v7918_v29  ;;  %v1960_v22 = vsub.f32 %v12984_v27, %v7936_v15 }
 0x4b6   : > { %v3557_v33 = vmin.f32 %v3556_v56, %v3246_v38  ;;  %v1961_v1 = vsub.f32 %v12984_v27, %v7938_v0  ;;  %v1962_v43 = vsub.f32 %v12984_v27, %v7940_v2  ;;  %v1963_v54 = vsub.f32 %v12984_v27, %v7942_v63  ;;  %v12985_v27 = vld [vmem:[#allocation72_spill] sm:$0xff] }
 0x4b7   : > { %v2216_v39 = vmul.f32 %v1424_v30, %v1424_v30  ;;  %v2217_v8 = vmul.f32 %v1425_v17, %v1425_v17  ;;  %v2218_v24 = vmul.f32 %v1426_v32, %v1426_v32  ;;  %v2219_v45 = vmul.f32 %v1427_v35, %v1427_v35 }
 0x4b8   : > { %v3558_v26 = vmin.f32 %v3557_v33, %v3247_v58  ;;  %v2472_v6 = vmul.f32 %v1692_v14, %v1692_v14  ;;  %v2473_v4 = vmul.f32 %v1693_v62, %v1693_v62  ;;  %v2474_v60 = vmul.f32 %v1694_v37, %v1694_v37 }
 0x4b9   : > { %v2475_v46 = vmul.f32 %v1695_v31, %v1695_v31  ;;  %v2984_v21 = vmul.f32 %v1960_v22, %v1960_v22  ;;  %v2985_v49 = vmul.f32 %v1961_v1, %v1961_v1  ;;  %v2986_v51 = vmul.f32 %v1962_v43, %v1962_v43  ;;  %v12986_v31 = vld [vmem:[#allocation120_spill] sm:$0xff] }
 0x4ba   : > { %3559 = vmin.xlane.f32.xlu2 %v3558_v26  ;;  %v2728_v10 = vadd.f32 %v2472_v6, %v2216_v39  ;;  %v2729_v38 = vadd.f32 %v2473_v4, %v2217_v8  ;;  %v2730_v56 = vadd.f32 %v2474_v60, %v2218_v24  ;;  %v2987_v5 = vmul.f32 %v1963_v54, %v1963_v54 }
 0x4bb   : > { %v2731_v16 = vadd.f32 %v2475_v46, %v2219_v45  ;;  %v1420_v30 = vsub.f32 %v12985_v27, %v7904_v11  ;;  %v1421_v17 = vsub.f32 %v12985_v27, %v7906_v9  ;;  %v1422_v32 = vsub.f32 %v12985_v27, %v7908_v19 }
 0x4bc   : > { %v3240_v35 = vadd.f32 %v2984_v21, %v2728_v10  ;;  %v3241_v58 = vadd.f32 %v2985_v49, %v2729_v38  ;;  %v3242_v14 = vadd.f32 %v2986_v51, %v2730_v56  ;;  %v1423_v62 = vsub.f32 %v12985_v27, %v7910_v28 }
 0x4bd   : > { %v3243_v37 = vadd.f32 %v2987_v5, %v2731_v16  ;;  %v1688_v22 = vsub.f32 %v12986_v31, %v7912_v13  ;;  %v1689_v33 = vsub.f32 %v12986_v31, %v7914_v25  ;;  %v1690_v1 = vsub.f32 %v12986_v31, %v7916_v50  ;;  %v12987_v5 = vld [vmem:[#allocation187_spill] sm:$0xff] }
 0x4be   : > { %v3650_v43 = vmin.f32 %v9588_v36, %v3240_v35  ;;  %v3719_v54 = vmin.f32 %v9590_v57, %v3241_v58  ;;  %v3788_v39 = vmin.f32 %v9594_v7, %v3242_v14  ;;  %v3551_v8 = vmin.f32 %v3240_v35, %v3241_v58 }
 0x4bf   : > { %v3857_v24 = vmin.f32 %v9596_v59, %v3243_v37  ;;  %v1691_v16 = vsub.f32 %v12986_v31, %v7918_v29  ;;  %v1956_v45 = vsub.f32 %v12987_v5, %v7936_v15  ;;  %v1957_v26 = vsub.f32 %v12987_v5, %v7938_v0 }
 0x4c0   : > { %v3552_v6 = vmin.f32 %v3551_v8, %v3242_v14  ;;  %v1958_v36 = vsub.f32 %v12987_v5, %v7940_v2  ;;  %v1959_v57 = vsub.f32 %v12987_v5, %v7942_v63  ;;  %v2212_v7 = vmul.f32 %v1420_v30, %v1420_v30  ;;  %v12988_v30 = vld [vmem:[#allocation65_spill] sm:$0xff] }
 0x4c1   : > { %v2213_v4 = vmul.f32 %v1421_v17, %v1421_v17  ;;  %v2214_v60 = vmul.f32 %v1422_v32, %v1422_v32  ;;  %v2215_v59 = vmul.f32 %v1423_v62, %v1423_v62  ;;  %v2468_v46 = vmul.f32 %v1688_v22, %v1688_v22 }
 0x4c2   : > { %v3553_v21 = vmin.f32 %v3552_v6, %v3243_v37  ;;  %v2469_v49 = vmul.f32 %v1689_v33, %v1689_v33  ;;  %v2470_v51 = vmul.f32 %v1690_v1, %v1690_v1  ;;  %v2471_v10 = vmul.f32 %v1691_v16, %v1691_v16 }
 0x4c3   : > { %v2724_v38 = vadd.f32 %v2468_v46, %v2212_v7  ;;  %v2980_v56 = vmul.f32 %v1956_v45, %v1956_v45  ;;  %v2981_v35 = vmul.f32 %v1957_v26, %v1957_v26  ;;  %v2982_v58 = vmul.f32 %v1958_v36, %v1958_v36  ;;  %v12989_v45 = vld [vmem:[#allocation135_spill] sm:$0xff] }
 0x4c4   : > { %3554 = vmin.xlane.f32.xlu1 %v3553_v21  ;;  %v2725_v14 = vadd.f32 %v2469_v49, %v2213_v4  ;;  %v2726_v8 = vadd.f32 %v2470_v51, %v2214_v60  ;;  %v2727_v31 = vadd.f32 %v2471_v10, %v2215_v59  ;;  %v2983_v27 = vmul.f32 %v1959_v57, %v1959_v57 }
 0x4c5   : > { %v3236_v34 = vadd.f32 %v2980_v56, %v2724_v38  ;;  %v1440_v17 = vsub.f32 %v12988_v30, %v7904_v11  ;;  %v1441_v32 = vsub.f32 %v12988_v30, %v7906_v9  ;;  %v1442_v62 = vsub.f32 %v12988_v30, %v7908_v19 }
 0x4c6   : > { %v3237_v37 = vadd.f32 %v2981_v35, %v2725_v14  ;;  %v3238_v22 = vadd.f32 %v2982_v58, %v2726_v8  ;;  %v3239_v33 = vadd.f32 %v2983_v27, %v2727_v31  ;;  %v1443_v1 = vsub.f32 %v12988_v30, %v7910_v28 }
 0x4c7   : > { %v9644_v16 = vmin.f32 %v3650_v43, %v3236_v34  ;;  %v1708_v26 = vsub.f32 %v12989_v45, %v7912_v13  ;;  %v1709_v6 = vsub.f32 %v12989_v45, %v7914_v25  ;;  %v1710_v36 = vsub.f32 %v12989_v45, %v7916_v50  ;;  %v12990_v43 = vld [vmem:[#allocation188_spill] sm:$0xff] }
 0x4c8   : > { %v9652_v57 = vmin.f32 %v3719_v54, %v3237_v37  ;;  %v9654_v7 = vmin.f32 %v3788_v39, %v3238_v22  ;;  %v9656_v4 = vmin.f32 %v3857_v24, %v3239_v33  ;;  %v3546_v27 = vmin.f32 %v3236_v34, %v3237_v37 }
 0x4c9   : > { %v1711_v31 = vsub.f32 %v12989_v45, %v7918_v29  ;;  %v1976_v60 = vsub.f32 %v12990_v43, %v7936_v15  ;;  %v1977_v59 = vsub.f32 %v12990_v43, %v7938_v0  ;;  %v1978_v46 = vsub.f32 %v12990_v43, %v7940_v2 }
 0x4ca   : > { %v3547_v21 = vmin.f32 %v3546_v27, %v3238_v22  ;;  %v1979_v54 = vsub.f32 %v12990_v43, %v7942_v63  ;;  %v2232_v39 = vmul.f32 %v1440_v17, %v1440_v17  ;;  %v2233_v24 = vmul.f32 %v1441_v32, %v1441_v32  ;;  %v12991_v43 = vld [vmem:[#allocation74_spill] sm:$0xff] }
 0x4cb   : > { %v2234_v49 = vmul.f32 %v1442_v62, %v1442_v62  ;;  %v2235_v34 = vmul.f32 %v1443_v1, %v1443_v1  ;;  %v2488_v51 = vmul.f32 %v1708_v26, %v1708_v26  ;;  %v2489_v10 = vmul.f32 %v1709_v6, %v1709_v6 }
 0x4cc   : > { %v3548_v38 = vmin.f32 %v3547_v21, %v3239_v33  ;;  %v2490_v56 = vmul.f32 %v1710_v36, %v1710_v36  ;;  %v2491_v35 = vmul.f32 %v1711_v31, %v1711_v31  ;;  %v3000_v58 = vmul.f32 %v1976_v60, %v1976_v60  ;;  %v12992_v31 = vld [vmem:[#allocation133_spill] sm:$0xff] }
 0x4cd   : > { %v2744_v14 = vadd.f32 %v2488_v51, %v2232_v39  ;;  %v2745_v8 = vadd.f32 %v2489_v10, %v2233_v24  ;;  %v3001_v37 = vmul.f32 %v1977_v59, %v1977_v59  ;;  %v3002_v45 = vmul.f32 %v1978_v46, %v1978_v46 }
 0x4ce   : > { %3549 = vmin.xlane.f32.xlu0 %v3548_v38  ;;  %v2746_v30 = vadd.f32 %v2490_v56, %v2234_v49  ;;  %v2747_v22 = vadd.f32 %v2491_v35, %v2235_v34  ;;  %v3003_v27 = vmul.f32 %v1979_v54, %v1979_v54  ;;  %v1436_v17 = vsub.f32 %v12991_v43, %v7904_v11 }
 0x4cf   : > { %v3256_v32 = vadd.f32 %v3000_v58, %v2744_v14  ;;  %v3257_v62 = vadd.f32 %v3001_v37, %v2745_v8  ;;  %v1437_v1 = vsub.f32 %v12991_v43, %v7906_v9  ;;  %v1438_v33 = vsub.f32 %v12991_v43, %v7908_v19 }
 0x4d0   : > { %v3258_v26 = vadd.f32 %v3002_v45, %v2746_v30  ;;  %v9674_v6 = vadd.f32 %v3003_v27, %v2747_v22  ;;  %v1439_v36 = vsub.f32 %v12991_v43, %v7910_v28  ;;  %v1704_v60 = vsub.f32 %v12992_v31, %v7912_v13 }
 0x4d1   : > { %v3652_v59 = vmin.f32 %v9644_v16, %v3256_v32  ;;  %v3721_v46 = vmin.f32 %v9652_v57, %v3257_v62  ;;  %v3571_v21 = vmin.f32 %v3256_v32, %v3257_v62  ;;  %v1705_v54 = vsub.f32 %v12992_v31, %v7914_v25  ;;  %v12993_v16 = vld [vmem:[#allocation181_spill] sm:$0xff] }
 0x4d2   : > { %v3790_v39 = vmin.f32 %v9654_v7, %v3258_v26  ;;  %v1706_v45 = vsub.f32 %v12992_v31, %v7916_v50  ;;  %v1707_v24 = vsub.f32 %v12992_v31, %v7918_v29  ;;  %v1972_v34 = vsub.f32 %v12993_v16, %v7936_v15 }
 0x4d3   : > { %v3572_v49 = vmin.f32 %v3571_v21, %v3258_v26  ;;  %v1973_v57 = vsub.f32 %v12993_v16, %v7938_v0  ;;  %v1974_v51 = vsub.f32 %v12993_v16, %v7940_v2  ;;  %v1975_v7 = vsub.f32 %v12993_v16, %v7942_v63 }
 0x4d4   : > { %v2228_v10 = vmul.f32 %v1436_v17, %v1436_v17  ;;  %v2229_v38 = vmul.f32 %v1437_v1, %v1437_v1  ;;  %v2230_v56 = vmul.f32 %v1438_v33, %v1438_v33  ;;  %v2231_v58 = vmul.f32 %v1439_v36, %v1439_v36  ;;  %v12994_v17 = vld [vmem:[#allocation75_spill] sm:$0xff] }
 0x4d5   : > { %v3573_v35 = vmin.f32 %v3572_v49, %v9674_v6  ;;  %v2484_v14 = vmul.f32 %v1704_v60, %v1704_v60  ;;  %v2485_v8 = vmul.f32 %v1705_v54, %v1705_v54  ;;  %v2486_v37 = vmul.f32 %v1706_v45, %v1706_v45 }
 0x4d6   : > { %v2487_v22 = vmul.f32 %v1707_v24, %v1707_v24  ;;  %v2996_v27 = vmul.f32 %v1972_v34, %v1972_v34  ;;  %v2997_v32 = vmul.f32 %v1973_v57, %v1973_v57  ;;  %v2998_v21 = vmul.f32 %v1974_v51, %v1974_v51  ;;  %v12995_v34 = vld [vmem:[#allocation123_spill] sm:$0xff] }
 0x4d7   : > { %3574 = vmin.xlane.f32.xlu2 %v3573_v35  ;;  %v2740_v62 = vadd.f32 %v2484_v14, %v2228_v10  ;;  %v2741_v26 = vadd.f32 %v2485_v8, %v2229_v38  ;;  %v2999_v30 = vmul.f32 %v1975_v7, %v1975_v7  ;;  %v2742_v31 = vadd.f32 %v2486_v37, %v2230_v56 }
 0x4d8   : > { %v2743_v43 = vadd.f32 %v2487_v22, %v2231_v58  ;;  %v1432_v1 = vsub.f32 %v12994_v17, %v7904_v11  ;;  %v1433_v33 = vsub.f32 %v12994_v17, %v7906_v9  ;;  %v1434_v54 = vsub.f32 %v12994_v17, %v7908_v19 }
 0x4d9   : > { %v3252_v36 = vadd.f32 %v2996_v27, %v2740_v62  ;;  %v3253_v60 = vadd.f32 %v2997_v32, %v2741_v26  ;;  %v1435_v45 = vsub.f32 %v12994_v17, %v7910_v28  ;;  %v3254_v24 = vadd.f32 %v2998_v21, %v2742_v31 }
 0x4da   : > { %v3255_v49 = vadd.f32 %v2999_v30, %v2743_v43  ;;  %v1700_v57 = vsub.f32 %v12995_v34, %v7912_v13  ;;  %v1701_v51 = vsub.f32 %v12995_v34, %v7914_v25  ;;  %v1702_v56 = vsub.f32 %v12995_v34, %v7916_v50  ;;  %v12996_v43 = vld [vmem:[#allocation189_spill] sm:$0xff] }
 0x4db   : > { %v9712_v7 = vmin.f32 %v3652_v59, %v3252_v36  ;;  %v9714_v10 = vmin.f32 %v3721_v46, %v3253_v60  ;;  %v3566_v38 = vmin.f32 %v3252_v36, %v3253_v60  ;;  %v9718_v35 = vmin.f32 %v3790_v39, %v3254_v24 }
 0x4dc   : > { %v1703_v31 = vsub.f32 %v12995_v34, %v7918_v29  ;;  %v1968_v30 = vsub.f32 %v12996_v43, %v7936_v15  ;;  %v1969_v14 = vsub.f32 %v12996_v43, %v7938_v0  ;;  %v1970_v59 = vsub.f32 %v12996_v43, %v7940_v2 }
 0x4dd   : > { %v3567_v58 = vmin.f32 %v3566_v38, %v3254_v24  ;;  %v1971_v46 = vsub.f32 %v12996_v43, %v7942_v63  ;;  %v2224_v8 = vmul.f32 %v1432_v1, %v1432_v1  ;;  %v2225_v37 = vmul.f32 %v1433_v33, %v1433_v33 }
 0x4de   : > { %v2226_v39 = vmul.f32 %v1434_v54, %v1434_v54  ;;  %v2227_v22 = vmul.f32 %v1435_v45, %v1435_v45  ;;  %v2480_v32 = vmul.f32 %v1700_v57, %v1700_v57  ;;  %v2481_v62 = vmul.f32 %v1701_v51, %v1701_v51  ;;  %v12998_v54 = vld [vmem:[#allocation68_spill] sm:$0xff] }
 0x4df   : > { %v3568_v27 = vmin.f32 %v3567_v58, %v3255_v49  ;;  %v2482_v26 = vmul.f32 %v1702_v56, %v1702_v56  ;;  %v2483_v21 = vmul.f32 %v1703_v31, %v1703_v31  ;;  %v2992_v36 = vmul.f32 %v1968_v30, %v1968_v30 }
 0x4e0   : > { %v2993_v60 = vmul.f32 %v1969_v14, %v1969_v14  ;;  %v2994_v24 = vmul.f32 %v1970_v59, %v1970_v59  ;;  %v2736_v38 = vadd.f32 %v2480_v32, %v2224_v8  ;;  %v2737_v34 = vadd.f32 %v2481_v62, %v2225_v37  ;;  %v13000_v8 = vld [vmem:[#allocation190_spill] sm:$0xff] }
 0x4e1   : > { %3569 = vmin.xlane.f32.xlu1 %v3568_v27  ;;  %v2738_v17 = vadd.f32 %v2482_v26, %v2226_v39  ;;  %v2995_v16 = vmul.f32 %v1971_v46, %v1971_v46  ;;  %v12997_v43 = vmin.f32 %v9656_v4, %v9674_v6  ;;  %v2739_v33 = vadd.f32 %v2483_v21, %v2227_v22  ;;  %v12999_v6 = vld [vmem:[#allocation138_spill] sm:$0xff] }
 0x4e2   : > { %v1452_v45 = vsub.f32 %v12998_v54, %v7904_v11  ;;  %v1453_v57 = vsub.f32 %v12998_v54, %v7906_v9  ;;  %v3248_v51 = vadd.f32 %v2992_v36, %v2736_v38  ;;  %v3249_v56 = vadd.f32 %v2993_v60, %v2737_v34 }
 0x4e3   : > { %v9733_v1 = vmin.f32 %v12997_v43, %v3255_v49  ;;  %v3250_v31 = vadd.f32 %v2994_v24, %v2738_v17  ;;  %v1454_v30 = vsub.f32 %v12998_v54, %v7908_v19  ;;  %v9741_v58 = vadd.f32 %v2995_v16, %v2739_v33 }
 0x4e4   : > { %v1455_v4 = vsub.f32 %v12998_v54, %v7910_v28  ;;  %v1720_v49 = vsub.f32 %v12999_v6, %v7912_v13  ;;  %v1721_v43 = vsub.f32 %v12999_v6, %v7914_v25  ;;  %v3654_v14 = vmin.f32 %v9712_v7, %v3248_v51 }
 0x4e5   : > { %v3723_v59 = vmin.f32 %v9714_v10, %v3249_v56  ;;  %v3561_v34 = vmin.f32 %v3248_v51, %v3249_v56  ;;  %v1722_v17 = vsub.f32 %v12999_v6, %v7916_v50  ;;  %v3792_v16 = vmin.f32 %v9718_v35, %v3250_v31 }
 0x4e6   : > { %v1723_v46 = vsub.f32 %v12999_v6, %v7918_v29  ;;  %v1988_v37 = vsub.f32 %v13000_v8, %v7936_v15  ;;  %v1989_v39 = vsub.f32 %v13000_v8, %v7938_v0  ;;  %v1990_v7 = vsub.f32 %v13000_v8, %v7940_v2 }
 0x4e7   : > { %v3562_v22 = vmin.f32 %v3561_v34, %v3250_v31  ;;  %v1991_v10 = vsub.f32 %v13000_v8, %v7942_v63  ;;  %v2244_v27 = vmul.f32 %v1452_v45, %v1452_v45  ;;  %v2245_v32 = vmul.f32 %v1453_v57, %v1453_v57 }
 0x4e8   : > { %v2246_v62 = vmul.f32 %v1454_v30, %v1454_v30  ;;  %v2247_v35 = vmul.f32 %v1455_v4, %v1455_v4  ;;  %v2500_v26 = vmul.f32 %v1720_v49, %v1720_v49  ;;  %v2501_v36 = vmul.f32 %v1721_v43, %v1721_v43  ;;  %v13001_v30 = vld [vmem:[#allocation77_spill] sm:$0xff] }
 0x4e9   : > { %v3563_v21 = vmin.f32 %v3562_v22, %v9741_v58  ;;  %v2502_v60 = vmul.f32 %v1722_v17, %v1722_v17  ;;  %v2503_v24 = vmul.f32 %v1723_v46, %v1723_v46  ;;  %v3012_v33 = vmul.f32 %v1988_v37, %v1988_v37 }
 0x4ea   : > { %v2756_v38 = vadd.f32 %v2500_v26, %v2244_v27  ;;  %v3013_v51 = vmul.f32 %v1989_v39, %v1989_v39  ;;  %v3014_v56 = vmul.f32 %v1990_v7, %v1990_v7  ;;  %v2757_v31 = vadd.f32 %v2501_v36, %v2245_v32 }
 0x4eb   : > { %3564 = vmin.xlane.f32.xlu0 %v3563_v21  ;;  %v2758_v34 = vadd.f32 %v2502_v60, %v2246_v62  ;;  %v2759_v6 = vadd.f32 %v2503_v24, %v2247_v35  ;;  %v3015_v54 = vmul.f32 %v1991_v10, %v1991_v10  ;;  %v3861_v45 = vmin.f32 %v9733_v1, %v9741_v58  ;;  %v13002_v1 = vld [vmem:[#allocation136_spill] sm:$0xff] }
 0x4ec   : > { %v3268_v57 = vadd.f32 %v3012_v33, %v2756_v38  ;;  %v1448_v4 = vsub.f32 %v13001_v30, %v7904_v11  ;;  %v1449_v49 = vsub.f32 %v13001_v30, %v7906_v9  ;;  %v3269_v43 = vadd.f32 %v3013_v51, %v2757_v31 }
 0x4ed   : > { %v3270_v17 = vadd.f32 %v3014_v56, %v2758_v34  ;;  %v3271_v46 = vadd.f32 %v3015_v54, %v2759_v6  ;;  %v1450_v37 = vsub.f32 %v13001_v30, %v7908_v19  ;;  %v1451_v22 = vsub.f32 %v13001_v30, %v7910_v28 }
 0x4ee   : > { %v9773_v39 = vmin.f32 %v3654_v14, %v3268_v57  ;;  %v1716_v58 = vsub.f32 %v13002_v1, %v7912_v13  ;;  %v1717_v7 = vsub.f32 %v13002_v1, %v7914_v25  ;;  %v9781_v10 = vmin.f32 %v3723_v59, %v3269_v43  ;;  %v13003_v14 = vld [vmem:[#allocation184_spill] sm:$0xff] }
 0x4ef   : > { %v9783_v27 = vmin.f32 %v3792_v16, %v3270_v17  ;;  %v3586_v32 = vmin.f32 %v3268_v57, %v3269_v43  ;;  %v1718_v54 = vsub.f32 %v13002_v1, %v7916_v50  ;;  %v1719_v6 = vsub.f32 %v13002_v1, %v7918_v29 }
 0x4f0   : > { %v1984_v62 = vsub.f32 %v13003_v14, %v7936_v15  ;;  %v1985_v35 = vsub.f32 %v13003_v14, %v7938_v0  ;;  %v1986_v26 = vsub.f32 %v13003_v14, %v7940_v2  ;;  %v1987_v16 = vsub.f32 %v13003_v14, %v7942_v63 }
 0x4f1   : > { %v3587_v59 = vmin.f32 %v3586_v32, %v3270_v17  ;;  %v2240_v21 = vmul.f32 %v1448_v4, %v1448_v4  ;;  %v2241_v36 = vmul.f32 %v1449_v49, %v1449_v49  ;;  %v2242_v60 = vmul.f32 %v1450_v37, %v1450_v37  ;;  %v13004_v37 = vld [vmem:[#allocation78_spill] sm:$0xff] }
 0x4f2   : > { %v2243_v24 = vmul.f32 %v1451_v22, %v1451_v22  ;;  %v2496_v38 = vmul.f32 %v1716_v58, %v1716_v58  ;;  %v2497_v33 = vmul.f32 %v1717_v7, %v1717_v7  ;;  %v2498_v56 = vmul.f32 %v1718_v54, %v1718_v54 }
 0x4f3   : > { %v3588_v51 = vmin.f32 %v3587_v59, %v3271_v46  ;;  %v2499_v31 = vmul.f32 %v1719_v6, %v1719_v6  ;;  %v3008_v34 = vmul.f32 %v1984_v62, %v1984_v62  ;;  %v3009_v8 = vmul.f32 %v1985_v35, %v1985_v35 }
 0x4f4   : > { %v2752_v57 = vadd.f32 %v2496_v38, %v2240_v21  ;;  %v2753_v43 = vadd.f32 %v2497_v33, %v2241_v36  ;;  %v3010_v1 = vmul.f32 %v1986_v26, %v1986_v26  ;;  %v9797_v30 = vmin.f32 %v3861_v45, %v3271_v46 }
 0x4f5   : > { %3589 = vmin.xlane.f32.xlu2 %v3588_v51  ;;  %v2754_v17 = vadd.f32 %v2498_v56, %v2242_v60  ;;  %v2755_v32 = vadd.f32 %v2499_v31, %v2243_v24  ;;  %v3011_v14 = vmul.f32 %v1987_v16, %v1987_v16  ;;  %v1444_v22 = vsub.f32 %v13004_v37, %v7904_v11 }
 0x4f6   : > { %v3264_v4 = vadd.f32 %v3008_v34, %v2752_v57  ;;  %v3265_v49 = vadd.f32 %v3009_v8, %v2753_v43  ;;  %v1445_v58 = vsub.f32 %v13004_v37, %v7906_v9  ;;  %v1446_v6 = vsub.f32 %v13004_v37, %v7908_v19  ;;  %v13005_v8 = vld [vmem:[#allocation126_spill] sm:$0xff]  ;;  %v6905_v57 = vld [vmem:[%s7112_s29 + $0x10] sm:$0x77] }
 0x4f7   : > { %v3266_v7 = vadd.f32 %v3010_v1, %v2754_v17  ;;  %v9803_v54 = vadd.f32 %v3011_v14, %v2755_v32  ;;  %v1447_v45 = vsub.f32 %v13004_v37, %v7910_v28  ;;  %v1712_v35 = vsub.f32 %v13005_v8, %v7912_v13 }
 0x4f8   : > { %v3656_v46 = vmin.f32 %v9773_v39, %v3264_v4  ;;  %v3581_v62 = vmin.f32 %v3264_v4, %v3265_v49  ;;  %v1713_v26 = vsub.f32 %v13005_v8, %v7914_v25  ;;  %v3725_v59 = vmin.f32 %v9781_v10, %v3265_v49  ;;  %v13006_v39 = vld [vmem:[#allocation191_spill] sm:$0xff]  ;;  %v6906_v49 = vld [vmem:[%s7112_s29 + $0x18] sm:$0x77] }
 0x4f9   : > { %v3794_v1 = vmin.f32 %v9783_v27, %v3266_v7  ;;  %v1714_v14 = vsub.f32 %v13005_v8, %v7916_v50  ;;  %v1715_v16 = vsub.f32 %v13005_v8, %v7918_v29  ;;  %v1980_v36 = vsub.f32 %v13006_v39, %v7936_v15 }
 0x4fa   : > { %v3582_v21 = vmin.f32 %v3581_v62, %v3266_v7  ;;  %v1981_v60 = vsub.f32 %v13006_v39, %v7938_v0  ;;  %v1982_v10 = vsub.f32 %v13006_v39, %v7940_v2  ;;  %v1983_v27 = vsub.f32 %v13006_v39, %v7942_v63 }
 0x4fb   : > { %v2236_v24 = vmul.f32 %v1444_v22, %v1444_v22  ;;  %v2237_v38 = vmul.f32 %v1445_v58, %v1445_v58  ;;  %v2238_v33 = vmul.f32 %v1446_v6, %v1446_v6  ;;  %v2239_v56 = vmul.f32 %v1447_v45, %v1447_v45 }
 0x4fc   : > { %v3583_v51 = vmin.f32 %v3582_v21, %v9803_v54  ;;  %v2492_v31 = vmul.f32 %v1712_v35, %v1712_v35  ;;  %v2493_v34 = vmul.f32 %v1713_v26, %v1713_v26  ;;  %v2494_v43 = vmul.f32 %v1714_v14, %v1714_v14 }
 0x4fd   : > { %v2495_v17 = vmul.f32 %v1715_v16, %v1715_v16  ;;  %v3004_v32 = vmul.f32 %v1980_v36, %v1980_v36  ;;  %v3005_v4 = vmul.f32 %v1981_v60, %v1981_v60  ;;  %v3006_v8 = vmul.f32 %v1982_v10, %v1982_v10 }
 0x4fe   : > { %3584 = vmin.xlane.f32.xlu1 %v3583_v51  ;;  %v2748_v7 = vadd.f32 %v2492_v31, %v2236_v24  ;;  %v2749_v62 = vadd.f32 %v2493_v34, %v2237_v38  ;;  %v3007_v37 = vmul.f32 %v1983_v27, %v1983_v27  ;;  %v2750_v39 = vadd.f32 %v2494_v43, %v2238_v33 }
 0x4ff   : > { %v2751_v22 = vadd.f32 %v2495_v17, %v2239_v56  ;;  %v3898_v58 = vperm.slane %v6905_v57, 0  ;;  %v3899_v6 = vperm.slane %v6905_v57, 4  ;;  %v3900_v45 = vperm.slane %v6906_v49, 0 }
 0x500   : > { %v3260_v5 = vadd.f32 %v3004_v32, %v2748_v7  ;;  %v3261_v21 = vadd.f32 %v3005_v4, %v2749_v62  ;;  %v3901_v35 = vperm.slane %v6906_v49, 4  ;;  %v3262_v14 = vadd.f32 %v3006_v8, %v2750_v39 }
 0x501   : > { %v9833_v16 = vperm.slane %v3898_v58, 0  ;;  %v9835_v36 = vperm.slane %v3899_v6, 0  ;;  %v9839_v10 = vadd.f32 %v3007_v37, %v2751_v22  ;;  %v9841_v24 = vperm.slane %v3900_v45, 0 }
 0x502   : > { %v9837_v60 = vmin.f32 %v3656_v46, %v3260_v5  ;;  %v3576_v27 = vmin.f32 %v3260_v5, %v3261_v21  ;;  %v9843_v38 = vmin.f32 %v3725_v59, %v3261_v21  ;;  %v9845_v33 = vmin.f32 %v3794_v1, %v3262_v14 }
 0x503   : > { %v9847_v51 = vperm.slane %v3901_v35, 0  ;;  %v3914_v8 = vsub.f32 %v12846_v18, %v9833_v16  ;;  %v3915_v56 = vsub.f32 %v12846_v18, %v9835_v36  ;;  %v3916_v37 = vsub.f32 %v12846_v18, %v9841_v24 }
 0x504   : > { %v3577_v39 = vmin.f32 %v3576_v27, %v3262_v14  ;;  %v4166_v46 = vperm.slane %v6905_v57, 1  ;;  %v4167_v59 = vperm.slane %v6905_v57, 5  ;;  %v4168_v31 = vperm.slane %v6906_v49, 1 }
 0x505   : > { %v3917_v5 = vsub.f32 %v12846_v18, %v9847_v51  ;;  %v4169_v1 = vperm.slane %v6906_v49, 5  ;;  %v4434_v17 = vperm.slane %v6905_v57, 2  ;;  %v4435_v32 = vperm.slane %v6905_v57, 6 }
 0x506   : > { %v3578_v34 = vmin.f32 %v3577_v39, %v9839_v10  ;;  %v9858_v43 = vperm.slane %v4166_v46, 1  ;;  %v9860_v4 = vperm.slane %v4167_v59, 1  ;;  %v9862_v7 = vperm.slane %v4168_v31, 1 }
 0x507   : > { %v9864_v62 = vperm.slane %v4169_v1, 1  ;;  %v4436_v22 = vperm.slane %v6906_v49, 2  ;;  %v4437_v58 = vperm.slane %v6906_v49, 6  ;;  %v9868_v6 = vperm.slane %v4434_v17, 2 }
 0x508   : > { %3579 = vmin.xlane.f32.xlu0 %v3578_v34  ;;  %v4182_v18 = vsub.f32 %v12847_v3, %v9858_v43  ;;  %v9870_v21 = vperm.slane %v4435_v32, 2  ;;  %v4183_v45 = vsub.f32 %v12847_v3, %v9860_v4  ;;  %v4184_v57 = vsub.f32 %v12847_v3, %v9862_v7 }
 0x509   : > { %v4185_v35 = vsub.f32 %v12847_v3, %v9864_v62  ;;  %v9878_v14 = vperm.slane %v4436_v22, 2  ;;  %v9880_v27 = vperm.slane %v4437_v58, 2  ;;  %v4450_v49 = vsub.f32 %v7763_v42, %v9868_v6 }
 0x50a   : > { %v4451_v39 = vsub.f32 %v7763_v42, %v9870_v21  ;;  %v4706_v46 = vmul.f32 %v3914_v8, %v3914_v8  ;;  %v4707_v31 = vmul.f32 %v3915_v56, %v3915_v56  ;;  %v4708_v1 = vmul.f32 %v3916_v37, %v3916_v37 }
 0x50b   : > { %13007 = vst [vmem:[#allocation11_spill] sm:$0xff] %v9878_v14  ;;  %v4452_v59 = vsub.f32 %v7763_v42, %v9878_v14  ;;  %v4709_v34 = vmul.f32 %v3917_v5, %v3917_v5  ;;  %v4453_v3 = vsub.f32 %v7763_v42, %v9880_v27  ;;  %v4962_v17 = vmul.f32 %v4182_v18, %v4182_v18 }
 0x50c   : > { %v4963_v32 = vmul.f32 %v4183_v45, %v4183_v45  ;;  %v4964_v22 = vmul.f32 %v4184_v57, %v4184_v57  ;;  %v4965_v58 = vmul.f32 %v4185_v35, %v4185_v35  ;;  %v5474_v26 = vmul.f32 %v4450_v49, %v4450_v49  ;;  %v13009_v49 = vld [vmem:[#allocation82_spill] sm:$0xff] }
 0x50d   : > { %v5475_v23 = vmul.f32 %v4451_v39, %v4451_v39  ;;  %v5476_v48 = vmul.f32 %v4452_v59, %v4452_v59  ;;  %v5218_v55 = vadd.f32 %v4962_v17, %v4706_v46  ;;  %v5477_v8 = vmul.f32 %v4453_v3, %v4453_v3 }
 0x50e   : > { %v5219_v44 = vadd.f32 %v4963_v32, %v4707_v31  ;;  %v5220_v61 = vadd.f32 %v4964_v22, %v4708_v1  ;;  %v5221_v12 = vadd.f32 %v4965_v58, %v4709_v34  ;;  %v3910_v56 = vsub.f32 %v13008_v40, %v9833_v16 }
 0x50f   : > { %v3911_v37 = vsub.f32 %v13008_v40, %v9835_v36  ;;  %v3912_v42 = vsub.f32 %v13008_v40, %v9841_v24  ;;  %v9896_v5 = vadd.f32 %v5474_v26, %v5218_v55  ;;  %v3913_v57 = vsub.f32 %v13008_v40, %v9847_v51  ;;  %v13010_v55 = vld [vmem:[#allocation140_spill] sm:$0xff] }
 0x510   : > { %v9898_v18 = vadd.f32 %v5475_v23, %v5219_v44  ;;  %v9900_v45 = vadd.f32 %v5476_v48, %v5220_v61  ;;  %v9904_v35 = vadd.f32 %v5477_v8, %v5221_v12  ;;  %v4178_v39 = vsub.f32 %v13009_v49, %v9858_v43 }
 0x511   : > { %v4179_v46 = vsub.f32 %v13009_v49, %v9860_v4  ;;  %v4180_v59 = vsub.f32 %v13009_v49, %v9862_v7  ;;  %v4181_v48 = vsub.f32 %v13009_v49, %v9864_v62  ;;  %v4446_v40 = vsub.f32 %v13010_v55, %v9868_v6 }
 0x512   : > { %v5987_v44 = vmin.f32 %v9896_v5, %v9898_v18  ;;  %v4447_v12 = vsub.f32 %v13010_v55, %v9870_v21  ;;  %v4448_v61 = vsub.f32 %v13010_v55, %v9878_v14  ;;  %v4449_v23 = vsub.f32 %v13010_v55, %v9880_v27 }
 0x513   : > { %v4702_v26 = vmul.f32 %v3910_v56, %v3910_v56  ;;  %v4703_v31 = vmul.f32 %v3911_v37, %v3911_v37  ;;  %v4704_v34 = vmul.f32 %v3912_v42, %v3912_v42  ;;  %v4705_v3 = vmul.f32 %v3913_v57, %v3913_v57  ;;  %v13011_v37 = vld [vmem:[#allocation80_spill] sm:$0xff] }
 0x514   : > { %v5988_v1 = vmin.f32 %v5987_v44, %v9900_v45  ;;  %v4958_v17 = vmul.f32 %v4178_v39, %v4178_v39  ;;  %v4959_v32 = vmul.f32 %v4179_v46, %v4179_v46  ;;  %v4960_v22 = vmul.f32 %v4180_v59, %v4180_v59 }
 0x515   : > { %v4961_v58 = vmul.f32 %v4181_v48, %v4181_v48  ;;  %v5470_v8 = vmul.f32 %v4446_v40, %v4446_v40  ;;  %v5471_v53 = vmul.f32 %v4447_v12, %v4447_v12  ;;  %v5472_v52 = vmul.f32 %v4448_v61, %v4448_v61 }
 0x516   : > { %v5989_v49 = vmin.f32 %v5988_v1, %v9904_v35  ;;  %v5214_v41 = vadd.f32 %v4958_v17, %v4702_v26  ;;  %v5215_v20 = vadd.f32 %v4959_v32, %v4703_v31  ;;  %v5216_v47 = vadd.f32 %v4960_v22, %v4704_v34 }
 0x517   : > { %v5217_v14 = vadd.f32 %v4961_v58, %v4705_v3  ;;  %v5473_v55 = vmul.f32 %v4449_v23, %v4449_v23  ;;  %v1456_v42 = vsub.f32 %v13011_v37, %v7904_v11  ;;  %v1457_v57 = vsub.f32 %v13011_v37, %v7906_v9  ;;  %v13012_v11 = vld [vmem:[#allocation129_spill] sm:$0xff] }
 0x518   : > { %5990 = vmin.xlane.f32.xlu2 %v5989_v49  ;;  %v9926_v56 = vadd.f32 %v5470_v8, %v5214_v41  ;;  %v1458_v39 = vsub.f32 %v13011_v37, %v7908_v19  ;;  %v9934_v46 = vadd.f32 %v5471_v53, %v5215_v20  ;;  %v9936_v59 = vadd.f32 %v5472_v52, %v5216_v47  ;;  %v13022_v19 = vld [vmem:[#allocation10_spill] sm:$0xff] }
 0x519   : > { %v9938_v44 = vadd.f32 %v5473_v55, %v5217_v14  ;;  %v1459_v48 = vsub.f32 %v13011_v37, %v7910_v28  ;;  %v1724_v40 = vsub.f32 %v13012_v11, %v7912_v13  ;;  %v1725_v9 = vsub.f32 %v13012_v11, %v7914_v25  ;;  %v13013_v25 = vld [vmem:[#allocation192_spill] sm:$0xff] }
 0x51a   : > { %v6366_v41 = vmin.f32 %v9926_v56, %v9896_v5  ;;  %v1726_v53 = vsub.f32 %v13012_v11, %v7916_v50  ;;  %v5982_v47 = vmin.f32 %v9926_v56, %v9934_v46  ;;  %v6435_v52 = vmin.f32 %v9934_v46, %v9898_v18 }
 0x51b   : > { %v1727_v13 = vsub.f32 %v13012_v11, %v7918_v29  ;;  %v1992_v20 = vsub.f32 %v13013_v25, %v7936_v15  ;;  %v1993_v50 = vsub.f32 %v13013_v25, %v7938_v0  ;;  %v1994_v14 = vsub.f32 %v13013_v25, %v7940_v2 }
 0x51c   : > { %v5983_v12 = vmin.f32 %v5982_v47, %v9936_v59  ;;  %v1995_v61 = vsub.f32 %v13013_v25, %v7942_v63  ;;  %v2248_v23 = vmul.f32 %v1456_v42, %v1456_v42  ;;  %v2249_v26 = vmul.f32 %v1457_v57, %v1457_v57 }
 0x51d   : > { %v2250_v31 = vmul.f32 %v1458_v39, %v1458_v39  ;;  %v2251_v1 = vmul.f32 %v1459_v48, %v1459_v48  ;;  %v2504_v34 = vmul.f32 %v1724_v40, %v1724_v40  ;;  %v2505_v29 = vmul.f32 %v1725_v9, %v1725_v9 }
 0x51e   : > { %v5984_v3 = vmin.f32 %v5983_v12, %v9938_v44  ;;  %v2506_v15 = vmul.f32 %v1726_v53, %v1726_v53  ;;  %v2507_v17 = vmul.f32 %v1727_v13, %v1727_v13  ;;  %v3016_v32 = vmul.f32 %v1992_v20, %v1992_v20  ;;  %v13015_v20 = vld [vmem:[#allocation3_spill] sm:$0xff] }
 0x51f   : > { %v2760_v0 = vadd.f32 %v2504_v34, %v2248_v23  ;;  %v2761_v22 = vadd.f32 %v2505_v29, %v2249_v26  ;;  %v3017_v58 = vmul.f32 %v1993_v50, %v1993_v50  ;;  %v3018_v2 = vmul.f32 %v1994_v14, %v1994_v14 }
 0x520   : > { %v13014_v8 = vmin.f32 %v9797_v30, %v9803_v54  ;;  %5985 = vmin.xlane.f32.xlu1 %v5984_v3  ;;  %v2762_v49 = vadd.f32 %v2506_v15, %v2250_v31  ;;  %v2763_v55 = vadd.f32 %v2507_v17, %v2251_v1  ;;  %v3019_v42 = vmul.f32 %v1995_v61, %v1995_v61  ;;  %v13016_v31 = vld [vmem:[#allocation76_spill] sm:$0xff] }
 0x521   : > { %v3272_v57 = vadd.f32 %v3016_v32, %v2760_v0  ;;  %v3273_v39 = vadd.f32 %v3017_v58, %v2761_v22  ;;  %v3888_v9 = vlaneseq  ;;  %v3926_v50 = vsub.f32 %v13015_v20, %v9833_v16  ;;  %v13017_v22 = vld [vmem:[#allocation137_spill] sm:$0xff] }
 0x522   : > { %v3864_v63 = vmin.f32 %v13014_v8, %v9839_v10  ;;  %v3274_v48 = vadd.f32 %v3018_v2, %v2762_v49  ;;  %v3275_v40 = vadd.f32 %v3019_v42, %v2763_v55  ;;  %v3927_v10 = vsub.f32 %v13015_v20, %v9835_v36  ;;  %v13018_v49 = vld [vmem:[#allocation11_spill] sm:$0xff] }
 0x523   : > { %v3658_v53 = vmin.f32 %v9837_v60, %v3272_v57  ;;  %v3727_v47 = vmin.f32 %v9843_v38, %v3273_v39  ;;  %v3591_v13 = vmin.f32 %v3272_v57, %v3273_v39  ;;  %v3928_v14 = vsub.f32 %v13015_v20, %v9841_v24 }
 0x524   : > { %v3796_v30 = vmin.f32 %v9845_v33, %v3274_v48  ;;  %v3865_v54 = vmin.f32 %v3864_v63, %v3275_v40  ;;  %v3929_v60 = vsub.f32 %v13015_v20, %v9847_v51  ;;  %v4194_v1 = vsub.f32 %v13016_v31, %v9858_v43 }
 0x525   : > { %v3592_v12 = vmin.f32 %v3591_v13, %v3274_v48  ;;  %v3659_v61 = vrot.slane %v3658_v53, 4  ;;  %v3728_v23 = vrot.slane %v3727_v47, 4  ;;  %v4195_v33 = vsub.f32 %v13016_v31, %v9860_v4 }
 0x526   : > { %v3797_v38 = vrot.slane %v3796_v30, 4  ;;  %v3866_v26 = vrot.slane %v3865_v54, 4  ;;  %v4196_v15 = vsub.f32 %v13016_v31, %v9862_v7  ;;  %v4197_v0 = vsub.f32 %v13016_v31, %v9864_v62 }
 0x527   : > { %v3593_v34 = vmin.f32 %v3592_v12, %v3275_v40  ;;  %v3660_v29 = vmin.f32 %v3658_v53, %v3659_v61  ;;  %v3729_v3 = vmin.f32 %v3727_v47, %v3728_v23  ;;  %v4462_v58 = vsub.f32 %v13017_v22, %v9868_v6 }
 0x528   : > { %v3798_v17 = vmin.f32 %v3796_v30, %v3797_v38  ;;  %v3867_v32 = vmin.f32 %v3865_v54, %v3866_v26  ;;  %v4463_v63 = vsub.f32 %v13017_v22, %v9870_v21  ;;  %v4464_v55 = vsub.f32 %v13017_v22, %v13018_v49 }
 0x529   : > { %v3661_v2 = vrot.slane %v3660_v29, 2  ;;  %v3730_v8 = vrot.slane %v3729_v3, 2  ;;  %3594 = vmin.xlane.f32.xlu0 %v3593_v34  ;;  %vm3884_vm3 = vcmask 1041408   ;;  %v4465_v39 = vsub.f32 %v13017_v22, %v9880_v27 }
 0x52a   : > { %v3799_v42 = vrot.slane %v3798_v17, 2  ;;  %v3868_v57 = vrot.slane %v3867_v32, 2  ;;  %v4718_v48 = vmul.f32 %v3926_v50, %v3926_v50  ;;  %v4719_v47 = vmul.f32 %v3927_v10, %v3927_v10 }
 0x52b   : > { %v3662_v40 = vmin.f32 %v3660_v29, %v3661_v2  ;;  %v3731_v53 = vmin.f32 %v3729_v3, %v3730_v8  ;;  %v4720_v13 = vmul.f32 %v3928_v14, %v3928_v14  ;;  %v4721_v54 = vmul.f32 %v3929_v60, %v3929_v60 }
 0x52c   : > { %v3800_v20 = vmin.f32 %v3798_v17, %v3799_v42  ;;  %v3869_v30 = vmin.f32 %v3867_v32, %v3868_v57  ;;  %v4974_v12 = vmul.f32 %v4194_v1, %v4194_v1  ;;  %vm10001_vm4 = vcmp.lt.s32.totalorder %v3888_v9, 512 }
 0x52d   : > { %v3663_v61 = vrot.slane %v3662_v40, 1  ;;  %v3732_v23 = vrot.slane %v3731_v53, 1  ;;  %v13019_v38 = vmov 0  ;;  %v4975_v26 = vmul.f32 %v4195_v33, %v4195_v33 }
 0x52e   : > { %v13020_v38 = vsel %vm10001_vm4, 4294967295, %v13019_v38  ;;  %v4976_v31 = vmul.f32 %v4196_v15, %v4196_v15  ;;  %v3801_v34 = vrot.slane %v3800_v20, 1  ;;  %v3870_v28 = vrot.slane %v3869_v30, 1 }
 0x52f   : > { %13021 = vst [vmem:[#allocation73_spill] sm:$0xff] %v13020_v38  ;;  %v4977_v22 = vmul.f32 %v4197_v0, %v4197_v0  ;;  %v5230_v50 = vadd.f32 %v4974_v12, %v4718_v48  ;;  %v3664_v29 = vmin.f32 %v3662_v40, %v3663_v61  ;;  %v3733_v10 = vmin.f32 %v3731_v53, %v3732_v23  ;;  %v3872_v48 = vld [vmem:[%s7141_s25] sm:$0xf]  ;;  %v13025_v23 = vld [vmem:[#allocation84_spill] sm:$0xff] }
 0x530   : > { %v5231_v14 = vadd.f32 %v4975_v26, %v4719_v47  ;;  %v5232_v3 = vadd.f32 %v4976_v31, %v4720_v13  ;;  %v3802_v17 = vmin.f32 %v3800_v20, %v3801_v34  ;;  %v3871_v60 = vmin.f32 %v3869_v30, %v3870_v28 }
 0x531   : > { %v5233_v1 = vadd.f32 %v4977_v22, %v4721_v54  ;;  %v5486_v32 = vmul.f32 %v4462_v58, %v4462_v58  ;;  %v3877_v2 = vrot.slane %v3733_v10, 7  ;;  %v5487_v9 = vmul.f32 %v4463_v63, %v4463_v63 }
 0x532   : > { %v5488_v8 = vmul.f32 %v4464_v55, %v4464_v55  ;;  %v5489_v42 = vmul.f32 %v4465_v39, %v4465_v39  ;;  %v3878_v57 = vrot.slane %v3802_v17, 6  ;;  %v3879_v33 = vrot.slane %v3871_v60, 5 }
 0x533   : > { %v5742_v15 = vadd.f32 %v5486_v32, %v5230_v50  ;;  %v3922_v0 = vsub.f32 %v13022_v19, %v9833_v16  ;;  %v3881_v40 = vsel %vm3880_vm1, %v3664_v29, %v3877_v2  ;;  %v5743_v53 = vadd.f32 %v5487_v9, %v5231_v14 }
 0x534   : > { %v5744_v47 = vadd.f32 %v5488_v8, %v5232_v3  ;;  %v5745_v13 = vadd.f32 %v5489_v42, %v5233_v1  ;;  %v3883_v28 = vsel %vm3882_vm2, %v3878_v57, %v3879_v33  ;;  %v3923_v63 = vsub.f32 %v13022_v19, %v9835_v36 }
 0x535   : > { %v10013_v58 = vmin.f32 %v6366_v41, %v5742_v15  ;;  %v3924_v55 = vsub.f32 %v13022_v19, %v9841_v24  ;;  %v3885_v39 = vsel %vm3884_vm3, %v3881_v40, %v3883_v28  ;;  %v10023_v20 = vmin.f32 %v6435_v52, %v5743_v53 }
 0x536   : > { %v13023_v30 = vmin.f32 %v9936_v59, %v9900_v45  ;;  %v13024_v56 = vmin.f32 %v9938_v44, %v9904_v35  ;;  %v3887_v54 = vmin.f32 %v3872_v48, %v3885_v39  ;;  %v6002_v12 = vmin.f32 %v5742_v15, %v5743_v53  ;;  %v13026_v35 = vld [vmem:[#allocation144_spill] sm:$0xff]  ;;  %v13027_v15 = vld [vmem:[#allocation7_spill] sm:$0xff] }
 0x537   : > { %v3925_v61 = vsub.f32 %v13022_v19, %v9847_v51  ;;  %v4190_v18 = vsub.f32 %v13025_v23, %v9858_v43  ;;  %v4191_v46 = vsub.f32 %v13025_v23, %v9860_v4  ;;  %v4192_v45 = vsub.f32 %v13025_v23, %v9862_v7 }
 0x538   : > { %v10028_v5 = vmin.f32 %v13023_v30, %v5744_v47  ;;  %v10033_v41 = vmin.f32 %v13024_v56, %v5745_v13  ;;  %v4193_v59 = vsub.f32 %v13025_v23, %v9864_v62  ;;  %v4458_v44 = vsub.f32 %v13026_v35, %v9868_v6  ;;  %3892 = vst.msk [vmem:[%s7141_s25] sm:$0xf] %vm10001_vm4, %v3887_v54 }
 0x539   : > { %v6003_v52 = vmin.f32 %v6002_v12, %v5744_v47  ;;  %v4459_v19 = vsub.f32 %v13026_v35, %v9870_v21  ;;  %v4460_v26 = vsub.f32 %v13026_v35, %v13018_v49  ;;  %v4461_v31 = vsub.f32 %v13026_v35, %v9880_v27 }
 0x53a   : > { %v4714_v34 = vmul.f32 %v3922_v0, %v3922_v0  ;;  %v4715_v22 = vmul.f32 %v3923_v63, %v3923_v63  ;;  %v4716_v50 = vmul.f32 %v3924_v55, %v3924_v55  ;;  %v4717_v29 = vmul.f32 %v3925_v61, %v3925_v61  ;;  %v13028_v55 = vld [vmem:[#allocation85_spill] sm:$0xff] }
 0x53b   : > { %v6004_v10 = vmin.f32 %v6003_v52, %v5745_v13  ;;  %v4970_v14 = vmul.f32 %v4190_v18, %v4190_v18  ;;  %v4971_v3 = vmul.f32 %v4191_v46, %v4191_v46  ;;  %v4972_v17 = vmul.f32 %v4192_v45, %v4192_v45  ;;  %v13029_v45 = vld [vmem:[#allocation134_spill] sm:$0xff] }
 0x53c   : > { %v4973_v60 = vmul.f32 %v4193_v59, %v4193_v59  ;;  %v5482_v1 = vmul.f32 %v4458_v44, %v4458_v44  ;;  %v5483_v32 = vmul.f32 %v4459_v19, %v4459_v19  ;;  %v5484_v2 = vmul.f32 %v4460_v26, %v4460_v26 }
 0x53d   : > { %6005 = vmin.xlane.f32.xlu2 %v6004_v10  ;;  %v5226_v9 = vadd.f32 %v4970_v14, %v4714_v34  ;;  %v5227_v8 = vadd.f32 %v4971_v3, %v4715_v22  ;;  %v5228_v42 = vadd.f32 %v4972_v17, %v4716_v50  ;;  %v5485_v57 = vmul.f32 %v4461_v31, %v4461_v31 }
 0x53e   : > { %v5229_v33 = vadd.f32 %v4973_v60, %v4717_v29  ;;  %v3918_v0 = vsub.f32 %v13027_v15, %v9833_v16  ;;  %v3919_v48 = vsub.f32 %v13027_v15, %v9835_v36  ;;  %v3920_v40 = vsub.f32 %v13027_v15, %v9841_v24 }
 0x53f   : > { %v5738_v53 = vadd.f32 %v5482_v1, %v5226_v9  ;;  %v5739_v47 = vadd.f32 %v5483_v32, %v5227_v8  ;;  %v5740_v13 = vadd.f32 %v5484_v2, %v5228_v42  ;;  %v3921_v28 = vsub.f32 %v13027_v15, %v9847_v51  ;;  %v13030_v9 = vld [vmem:[#allocation13_spill] sm:$0xff] }
 0x540   : > { %v5741_v63 = vadd.f32 %v5485_v57, %v5229_v33  ;;  %v4186_v39 = vsub.f32 %v13028_v55, %v9858_v43  ;;  %v4187_v30 = vsub.f32 %v13028_v55, %v9860_v4  ;;  %v4188_v56 = vsub.f32 %v13028_v55, %v9862_v7 }
 0x541   : > { %v6368_v54 = vmin.f32 %v10013_v58, %v5738_v53  ;;  %v6437_v12 = vmin.f32 %v10023_v20, %v5739_v47  ;;  %v6506_v61 = vmin.f32 %v10028_v5, %v5740_v13  ;;  %v5997_v23 = vmin.f32 %v5738_v53, %v5739_v47  ;;  %v13031_v53 = vld [vmem:[#allocation88_spill] sm:$0xff] }
 0x542   : > { %v6575_v18 = vmin.f32 %v10033_v41, %v5741_v63  ;;  %v4189_v46 = vsub.f32 %v13028_v55, %v9864_v62  ;;  %v4454_v59 = vsub.f32 %v13029_v45, %v9868_v6  ;;  %v4455_v35 = vsub.f32 %v13029_v45, %v9870_v21 }
 0x543   : > { %v5998_v44 = vmin.f32 %v5997_v23, %v5740_v13  ;;  %v4456_v58 = vsub.f32 %v13029_v45, %v13018_v49  ;;  %v4457_v20 = vsub.f32 %v13029_v45, %v9880_v27  ;;  %v4710_v5 = vmul.f32 %v3918_v0, %v3918_v0 }
 0x544   : > { %v4711_v52 = vmul.f32 %v3919_v48, %v3919_v48  ;;  %v4712_v19 = vmul.f32 %v3920_v40, %v3920_v40  ;;  %v4713_v41 = vmul.f32 %v3921_v28, %v3921_v28  ;;  %v4966_v26 = vmul.f32 %v4186_v39, %v4186_v39 }
 0x545   : > { %v5999_v31 = vmin.f32 %v5998_v44, %v5741_v63  ;;  %v4967_v34 = vmul.f32 %v4187_v30, %v4187_v30  ;;  %v4968_v22 = vmul.f32 %v4188_v56, %v4188_v56  ;;  %v4969_v50 = vmul.f32 %v4189_v46, %v4189_v46 }
 0x546   : > { %v5222_v29 = vadd.f32 %v4966_v26, %v4710_v5  ;;  %v5478_v10 = vmul.f32 %v4454_v59, %v4454_v59  ;;  %v5479_v14 = vmul.f32 %v4455_v35, %v4455_v35  ;;  %v5480_v3 = vmul.f32 %v4456_v58, %v4456_v58 }
 0x547   : > { %6000 = vmin.xlane.f32.xlu1 %v5999_v31  ;;  %v5223_v17 = vadd.f32 %v4967_v34, %v4711_v52  ;;  %v5224_v60 = vadd.f32 %v4968_v22, %v4712_v19  ;;  %v5225_v1 = vadd.f32 %v4969_v50, %v4713_v41  ;;  %v5481_v32 = vmul.f32 %v4457_v20, %v4457_v20 }
 0x548   : > { %v5734_v2 = vadd.f32 %v5478_v10, %v5222_v29  ;;  %v3938_v8 = vsub.f32 %v13030_v9, %v9833_v16  ;;  %v3939_v42 = vsub.f32 %v13030_v9, %v9835_v36  ;;  %v3940_v57 = vsub.f32 %v13030_v9, %v9841_v24 }
 0x549   : > { %v5735_v33 = vadd.f32 %v5479_v14, %v5223_v17  ;;  %v5736_v15 = vadd.f32 %v5480_v3, %v5224_v60  ;;  %v5737_v0 = vadd.f32 %v5481_v32, %v5225_v1  ;;  %v3941_v48 = vsub.f32 %v13030_v9, %v9847_v51  ;;  %v13033_v14 = vld [vmem:[#allocation14_spill] sm:$0xff] }
 0x54a   : > { %v10092_v40 = vmin.f32 %v6368_v54, %v5734_v2  ;;  %v4206_v47 = vsub.f32 %v13031_v53, %v9858_v43  ;;  %v4207_v13 = vsub.f32 %v13031_v53, %v9860_v4  ;;  %v4208_v28 = vsub.f32 %v13031_v53, %v9862_v7  ;;  %v13032_v54 = vld [vmem:[#allocation139_spill] sm:$0xff] }
 0x54b   : > { %v10100_v63 = vmin.f32 %v6437_v12, %v5735_v33  ;;  %v10102_v55 = vmin.f32 %v6506_v61, %v5736_v15  ;;  %v10104_v39 = vmin.f32 %v6575_v18, %v5737_v0  ;;  %v5992_v30 = vmin.f32 %v5734_v2, %v5735_v33 }
 0x54c   : > { %v4209_v56 = vsub.f32 %v13031_v53, %v9864_v62  ;;  %v4474_v23 = vsub.f32 %v13032_v54, %v9868_v6  ;;  %v4475_v46 = vsub.f32 %v13032_v54, %v9870_v21  ;;  %v4476_v45 = vsub.f32 %v13032_v54, %v13018_v49 }
 0x54d   : > { %v5993_v59 = vmin.f32 %v5992_v30, %v5736_v15  ;;  %v4477_v12 = vsub.f32 %v13032_v54, %v9880_v27  ;;  %v4730_v61 = vmul.f32 %v3938_v8, %v3938_v8  ;;  %v4731_v18 = vmul.f32 %v3939_v42, %v3939_v42  ;;  %v13034_v42 = vld [vmem:[#allocation79_spill] sm:$0xff] }
 0x54e   : > { %v4732_v35 = vmul.f32 %v3940_v57, %v3940_v57  ;;  %v4733_v44 = vmul.f32 %v3941_v48, %v3941_v48  ;;  %v4986_v58 = vmul.f32 %v4206_v47, %v4206_v47  ;;  %v4987_v20 = vmul.f32 %v4207_v13, %v4207_v13 }
 0x54f   : > { %v5994_v5 = vmin.f32 %v5993_v59, %v5737_v0  ;;  %v4988_v52 = vmul.f32 %v4208_v28, %v4208_v28  ;;  %v4989_v19 = vmul.f32 %v4209_v56, %v4209_v56  ;;  %v5498_v41 = vmul.f32 %v4474_v23, %v4474_v23  ;;  %v13035_v56 = vld [vmem:[#allocation147_spill] sm:$0xff] }
 0x550   : > { %v5242_v26 = vadd.f32 %v4986_v58, %v4730_v61  ;;  %v5243_v31 = vadd.f32 %v4987_v20, %v4731_v18  ;;  %v5499_v34 = vmul.f32 %v4475_v46, %v4475_v46  ;;  %v5500_v22 = vmul.f32 %v4476_v45, %v4476_v45 }
 0x551   : > { %5995 = vmin.xlane.f32.xlu0 %v5994_v5  ;;  %v5244_v50 = vadd.f32 %v4988_v52, %v4732_v35  ;;  %v5245_v29 = vadd.f32 %v4989_v19, %v4733_v44  ;;  %v5501_v10 = vmul.f32 %v4477_v12, %v4477_v12  ;;  %v3934_v3 = vsub.f32 %v13033_v14, %v9833_v16 }
 0x552   : > { %v5754_v17 = vadd.f32 %v5498_v41, %v5242_v26  ;;  %v5755_v60 = vadd.f32 %v5499_v34, %v5243_v31  ;;  %v3935_v1 = vsub.f32 %v13033_v14, %v9835_v36  ;;  %v3936_v32 = vsub.f32 %v13033_v14, %v9841_v24  ;;  %v13036_v31 = vld [vmem:[#allocation4_spill] sm:$0xff] }
 0x553   : > { %v5756_v2 = vadd.f32 %v5500_v22, %v5244_v50  ;;  %v5757_v9 = vadd.f32 %v5501_v10, %v5245_v29  ;;  %v3937_v8 = vsub.f32 %v13033_v14, %v9847_v51  ;;  %v4202_v57 = vsub.f32 %v13034_v42, %v9858_v43 }
 0x554   : > { %v6370_v33 = vmin.f32 %v10092_v40, %v5754_v17  ;;  %v6439_v15 = vmin.f32 %v10100_v63, %v5755_v60  ;;  %v6017_v0 = vmin.f32 %v5754_v17, %v5755_v60  ;;  %v4203_v48 = vsub.f32 %v13034_v42, %v9860_v4  ;;  %v13037_v60 = vld [vmem:[#allocation87_spill] sm:$0xff] }
 0x555   : > { %v6508_v53 = vmin.f32 %v10102_v55, %v5756_v2  ;;  %v6577_v47 = vmin.f32 %v10104_v39, %v5757_v9  ;;  %v4204_v13 = vsub.f32 %v13034_v42, %v9862_v7  ;;  %v4205_v28 = vsub.f32 %v13034_v42, %v9864_v62 }
 0x556   : > { %v6018_v30 = vmin.f32 %v6017_v0, %v5756_v2  ;;  %v4470_v40 = vsub.f32 %v13035_v56, %v9868_v6  ;;  %v4471_v63 = vsub.f32 %v13035_v56, %v9870_v21  ;;  %v4472_v54 = vsub.f32 %v13035_v56, %v13018_v49 }
 0x557   : > { %v4473_v55 = vsub.f32 %v13035_v56, %v9880_v27  ;;  %v4726_v39 = vmul.f32 %v3934_v3, %v3934_v3  ;;  %v4727_v23 = vmul.f32 %v3935_v1, %v3935_v1  ;;  %v4728_v46 = vmul.f32 %v3936_v32, %v3936_v32 }
 0x558   : > { %v6019_v45 = vmin.f32 %v6018_v30, %v5757_v9  ;;  %v4729_v59 = vmul.f32 %v3937_v8, %v3937_v8  ;;  %v4982_v12 = vmul.f32 %v4202_v57, %v4202_v57  ;;  %v4983_v61 = vmul.f32 %v4203_v48, %v4203_v48 }
 0x559   : > { %v4984_v18 = vmul.f32 %v4204_v13, %v4204_v13  ;;  %v4985_v35 = vmul.f32 %v4205_v28, %v4205_v28  ;;  %v5494_v44 = vmul.f32 %v4470_v40, %v4470_v40  ;;  %v5495_v58 = vmul.f32 %v4471_v63, %v4471_v63  ;;  %v13038_v13 = vld [vmem:[#allocation142_spill] sm:$0xff] }
 0x55a   : > { %6020 = vmin.xlane.f32.xlu2 %v6019_v45  ;;  %v5238_v20 = vadd.f32 %v4982_v12, %v4726_v39  ;;  %v5239_v5 = vadd.f32 %v4983_v61, %v4727_v23  ;;  %v5496_v52 = vmul.f32 %v4472_v54, %v4472_v54  ;;  %v5497_v19 = vmul.f32 %v4473_v55, %v4473_v55 }
 0x55b   : > { %v5240_v41 = vadd.f32 %v4984_v18, %v4728_v46  ;;  %v5241_v26 = vadd.f32 %v4985_v35, %v4729_v59  ;;  %v3930_v34 = vsub.f32 %v13036_v31, %v9833_v16  ;;  %v3931_v22 = vsub.f32 %v13036_v31, %v9835_v36 }
 0x55c   : > { %v5750_v50 = vadd.f32 %v5494_v44, %v5238_v20  ;;  %v5751_v29 = vadd.f32 %v5495_v58, %v5239_v5  ;;  %v3932_v10 = vsub.f32 %v13036_v31, %v9841_v24  ;;  %v3933_v14 = vsub.f32 %v13036_v31, %v9847_v51  ;;  %v13039_v20 = vld [vmem:[#allocation17_spill] sm:$0xff] }
 0x55d   : > { %v5752_v3 = vadd.f32 %v5496_v52, %v5240_v41  ;;  %v5753_v17 = vadd.f32 %v5497_v19, %v5241_v26  ;;  %v4198_v1 = vsub.f32 %v13037_v60, %v9858_v43  ;;  %v4199_v32 = vsub.f32 %v13037_v60, %v9860_v4 }
 0x55e   : > { %v10156_v2 = vmin.f32 %v6370_v33, %v5750_v50  ;;  %v10158_v9 = vmin.f32 %v6439_v15, %v5751_v29  ;;  %v6012_v8 = vmin.f32 %v5750_v50, %v5751_v29  ;;  %v4200_v42 = vsub.f32 %v13037_v60, %v9862_v7  ;;  %v13040_v50 = vld [vmem:[#allocation91_spill] sm:$0xff] }
 0x55f   : > { %v10162_v57 = vmin.f32 %v6508_v53, %v5752_v3  ;;  %v10164_v0 = vmin.f32 %v6577_v47, %v5753_v17  ;;  %v4201_v48 = vsub.f32 %v13037_v60, %v9864_v62  ;;  %v4466_v28 = vsub.f32 %v13038_v13, %v9868_v6 }
 0x560   : > { %v6013_v30 = vmin.f32 %v6012_v8, %v5752_v3  ;;  %v4467_v33 = vsub.f32 %v13038_v13, %v9870_v21  ;;  %v4468_v15 = vsub.f32 %v13038_v13, %v13018_v49  ;;  %v4469_v56 = vsub.f32 %v13038_v13, %v9880_v27 }
 0x561   : > { %v4722_v53 = vmul.f32 %v3930_v34, %v3930_v34  ;;  %v4723_v40 = vmul.f32 %v3931_v22, %v3931_v22  ;;  %v4724_v47 = vmul.f32 %v3932_v10, %v3932_v10  ;;  %v4725_v63 = vmul.f32 %v3933_v14, %v3933_v14 }
 0x562   : > { %v6014_v54 = vmin.f32 %v6013_v30, %v5753_v17  ;;  %v4978_v55 = vmul.f32 %v4198_v1, %v4198_v1  ;;  %v4979_v39 = vmul.f32 %v4199_v32, %v4199_v32  ;;  %v4980_v23 = vmul.f32 %v4200_v42, %v4200_v42  ;;  %v13041_v42 = vld [vmem:[#allocation141_spill] sm:$0xff] }
 0x563   : > { %v4981_v46 = vmul.f32 %v4201_v48, %v4201_v48  ;;  %v5490_v45 = vmul.f32 %v4466_v28, %v4466_v28  ;;  %v5491_v59 = vmul.f32 %v4467_v33, %v4467_v33  ;;  %v5492_v12 = vmul.f32 %v4468_v15, %v4468_v15 }
 0x564   : > { %6015 = vmin.xlane.f32.xlu1 %v6014_v54  ;;  %v5234_v61 = vadd.f32 %v4978_v55, %v4722_v53  ;;  %v5235_v18 = vadd.f32 %v4979_v39, %v4723_v40  ;;  %v5236_v35 = vadd.f32 %v4980_v23, %v4724_v47  ;;  %v5493_v44 = vmul.f32 %v4469_v56, %v4469_v56 }
 0x565   : > { %v5237_v58 = vadd.f32 %v4981_v46, %v4725_v63  ;;  %v3950_v5 = vsub.f32 %v13039_v20, %v9833_v16  ;;  %v3951_v52 = vsub.f32 %v13039_v20, %v9835_v36  ;;  %v3952_v19 = vsub.f32 %v13039_v20, %v9841_v24 }
 0x566   : > { %v5746_v41 = vadd.f32 %v5490_v45, %v5234_v61  ;;  %v5747_v26 = vadd.f32 %v5491_v59, %v5235_v18  ;;  %v5748_v31 = vadd.f32 %v5492_v12, %v5236_v35  ;;  %v3953_v34 = vsub.f32 %v13039_v20, %v9847_v51  ;;  %v13042_v61 = vld [vmem:[#allocation18_spill] sm:$0xff] }
 0x567   : > { %v5749_v22 = vadd.f32 %v5493_v44, %v5237_v58  ;;  %v4218_v29 = vsub.f32 %v13040_v50, %v9858_v43  ;;  %v4219_v10 = vsub.f32 %v13040_v50, %v9860_v4  ;;  %v4220_v14 = vsub.f32 %v13040_v50, %v9862_v7 }
 0x568   : > { %v6372_v3 = vmin.f32 %v10156_v2, %v5746_v41  ;;  %v6441_v17 = vmin.f32 %v10158_v9, %v5747_v26  ;;  %v6510_v60 = vmin.f32 %v10162_v57, %v5748_v31  ;;  %v6007_v1 = vmin.f32 %v5746_v41, %v5747_v26  ;;  %v13043_v41 = vld [vmem:[#allocation81_spill] sm:$0xff] }
 0x569   : > { %v6579_v32 = vmin.f32 %v10164_v0, %v5749_v22  ;;  %v4221_v8 = vsub.f32 %v13040_v50, %v9864_v62  ;;  %v4486_v48 = vsub.f32 %v13041_v42, %v9868_v6  ;;  %v4487_v13 = vsub.f32 %v13041_v42, %v9870_v21 }
 0x56a   : > { %v6008_v28 = vmin.f32 %v6007_v1, %v5748_v31  ;;  %v4488_v2 = vsub.f32 %v13041_v42, %v13018_v49  ;;  %v4489_v9 = vsub.f32 %v13041_v42, %v9880_v27  ;;  %v4742_v57 = vmul.f32 %v3950_v5, %v3950_v5 }
 0x56b   : > { %v4743_v30 = vmul.f32 %v3951_v52, %v3951_v52  ;;  %v4744_v33 = vmul.f32 %v3952_v19, %v3952_v19  ;;  %v4745_v0 = vmul.f32 %v3953_v34, %v3953_v34  ;;  %v4998_v15 = vmul.f32 %v4218_v29, %v4218_v29 }
 0x56c   : > { %v6009_v56 = vmin.f32 %v6008_v28, %v5749_v22  ;;  %v4999_v53 = vmul.f32 %v4219_v10, %v4219_v10  ;;  %v5000_v40 = vmul.f32 %v4220_v14, %v4220_v14  ;;  %v5001_v47 = vmul.f32 %v4221_v8, %v4221_v8 }
 0x56d   : > { %v5254_v63 = vadd.f32 %v4998_v15, %v4742_v57  ;;  %v5510_v54 = vmul.f32 %v4486_v48, %v4486_v48  ;;  %v5511_v55 = vmul.f32 %v4487_v13, %v4487_v13  ;;  %v5512_v39 = vmul.f32 %v4488_v2, %v4488_v2 }
 0x56e   : > { %6010 = vmin.xlane.f32.xlu0 %v6009_v56  ;;  %v5255_v23 = vadd.f32 %v4999_v53, %v4743_v30  ;;  %v5256_v46 = vadd.f32 %v5000_v40, %v4744_v33  ;;  %v5257_v45 = vadd.f32 %v5001_v47, %v4745_v0  ;;  %v5513_v59 = vmul.f32 %v4489_v9, %v4489_v9 }
 0x56f   : > { %v5766_v12 = vadd.f32 %v5510_v54, %v5254_v63  ;;  %v3946_v18 = vsub.f32 %v13042_v61, %v9833_v16  ;;  %v3947_v35 = vsub.f32 %v13042_v61, %v9835_v36  ;;  %v3948_v44 = vsub.f32 %v13042_v61, %v9841_v24 }
 0x570   : > { %v5767_v58 = vadd.f32 %v5511_v55, %v5255_v23  ;;  %v5768_v20 = vadd.f32 %v5512_v39, %v5256_v46  ;;  %v5769_v5 = vadd.f32 %v5513_v59, %v5257_v45  ;;  %v3949_v52 = vsub.f32 %v13042_v61, %v9847_v51  ;;  %v13045_v55 = vld [vmem:[#allocation5_spill] sm:$0xff] }
 0x571   : > { %v10212_v19 = vmin.f32 %v6372_v3, %v5766_v12  ;;  %v4214_v26 = vsub.f32 %v13043_v41, %v9858_v43  ;;  %v4215_v31 = vsub.f32 %v13043_v41, %v9860_v4  ;;  %v4216_v34 = vsub.f32 %v13043_v41, %v9862_v7  ;;  %v13044_v3 = vld [vmem:[#allocation149_spill] sm:$0xff] }
 0x572   : > { %v10220_v22 = vmin.f32 %v6441_v17, %v5767_v58  ;;  %v10222_v50 = vmin.f32 %v6510_v60, %v5768_v20  ;;  %v10224_v29 = vmin.f32 %v6579_v32, %v5769_v5  ;;  %v6032_v10 = vmin.f32 %v5766_v12, %v5767_v58 }
 0x573   : > { %v4217_v14 = vsub.f32 %v13043_v41, %v9864_v62  ;;  %v4482_v1 = vsub.f32 %v13044_v3, %v9868_v6  ;;  %v4483_v8 = vsub.f32 %v13044_v3, %v9870_v21  ;;  %v4484_v42 = vsub.f32 %v13044_v3, %v13018_v49 }
 0x574   : > { %v6033_v48 = vmin.f32 %v6032_v10, %v5768_v20  ;;  %v4485_v17 = vsub.f32 %v13044_v3, %v9880_v27  ;;  %v4738_v60 = vmul.f32 %v3946_v18, %v3946_v18  ;;  %v4739_v32 = vmul.f32 %v3947_v35, %v3947_v35  ;;  %v13046_v35 = vld [vmem:[#allocation90_spill] sm:$0xff] }
 0x575   : > { %v4740_v13 = vmul.f32 %v3948_v44, %v3948_v44  ;;  %v4741_v28 = vmul.f32 %v3949_v52, %v3949_v52  ;;  %v4994_v2 = vmul.f32 %v4214_v26, %v4214_v26  ;;  %v4995_v9 = vmul.f32 %v4215_v31, %v4215_v31 }
 0x576   : > { %v6034_v57 = vmin.f32 %v6033_v48, %v5769_v5  ;;  %v4996_v30 = vmul.f32 %v4216_v34, %v4216_v34  ;;  %v4997_v33 = vmul.f32 %v4217_v14, %v4217_v14  ;;  %v5506_v0 = vmul.f32 %v4482_v1, %v4482_v1  ;;  %v13047_v14 = vld [vmem:[#allocation145_spill] sm:$0xff] }
 0x577   : > { %v5250_v15 = vadd.f32 %v4994_v2, %v4738_v60  ;;  %v5251_v56 = vadd.f32 %v4995_v9, %v4739_v32  ;;  %v5507_v53 = vmul.f32 %v4483_v8, %v4483_v8  ;;  %v5508_v40 = vmul.f32 %v4484_v42, %v4484_v42 }
 0x578   : > { %6035 = vmin.xlane.f32.xlu2 %v6034_v57  ;;  %v5252_v47 = vadd.f32 %v4996_v30, %v4740_v13  ;;  %v5253_v63 = vadd.f32 %v4997_v33, %v4741_v28  ;;  %v5509_v54 = vmul.f32 %v4485_v17, %v4485_v17  ;;  %v3942_v39 = vsub.f32 %v13045_v55, %v9833_v16 }
 0x579   : > { %v5762_v23 = vadd.f32 %v5506_v0, %v5250_v15  ;;  %v5763_v46 = vadd.f32 %v5507_v53, %v5251_v56  ;;  %v3943_v45 = vsub.f32 %v13045_v55, %v9835_v36  ;;  %v3944_v59 = vsub.f32 %v13045_v55, %v9841_v24  ;;  %v13048_v56 = vld [vmem:[#allocation23_spill] sm:$0xff] }
 0x57a   : > { %v5764_v12 = vadd.f32 %v5508_v40, %v5252_v47  ;;  %v5765_v61 = vadd.f32 %v5509_v54, %v5253_v63  ;;  %v3945_v18 = vsub.f32 %v13045_v55, %v9847_v51  ;;  %v4210_v44 = vsub.f32 %v13046_v35, %v9858_v43 }
 0x57b   : > { %v6374_v58 = vmin.f32 %v10212_v19, %v5762_v23  ;;  %v6443_v20 = vmin.f32 %v10220_v22, %v5763_v46  ;;  %v6027_v5 = vmin.f32 %v5762_v23, %v5763_v46  ;;  %v4211_v52 = vsub.f32 %v13046_v35, %v9860_v4  ;;  %v13049_v46 = vld [vmem:[#allocation94_spill] sm:$0xff] }
 0x57c   : > { %v6512_v41 = vmin.f32 %v10222_v50, %v5764_v12  ;;  %v6581_v26 = vmin.f32 %v10224_v29, %v5765_v61  ;;  %v4212_v31 = vsub.f32 %v13046_v35, %v9862_v7  ;;  %v4213_v34 = vsub.f32 %v13046_v35, %v9864_v62 }
 0x57d   : > { %v6028_v10 = vmin.f32 %v6027_v5, %v5764_v12  ;;  %v4478_v19 = vsub.f32 %v13047_v14, %v9868_v6  ;;  %v4479_v22 = vsub.f32 %v13047_v14, %v9870_v21  ;;  %v4480_v3 = vsub.f32 %v13047_v14, %v13018_v49 }
 0x57e   : > { %v4481_v50 = vsub.f32 %v13047_v14, %v9880_v27  ;;  %v4734_v29 = vmul.f32 %v3942_v39, %v3942_v39  ;;  %v4735_v1 = vmul.f32 %v3943_v45, %v3943_v45  ;;  %v4736_v8 = vmul.f32 %v3944_v59, %v3944_v59 }
 0x57f   : > { %v6029_v42 = vmin.f32 %v6028_v10, %v5765_v61  ;;  %v4737_v48 = vmul.f32 %v3945_v18, %v3945_v18  ;;  %v4990_v17 = vmul.f32 %v4210_v44, %v4210_v44  ;;  %v4991_v60 = vmul.f32 %v4211_v52, %v4211_v52 }
 0x580   : > { %v4992_v32 = vmul.f32 %v4212_v31, %v4212_v31  ;;  %v4993_v13 = vmul.f32 %v4213_v34, %v4213_v34  ;;  %v5502_v28 = vmul.f32 %v4478_v19, %v4478_v19  ;;  %v5503_v2 = vmul.f32 %v4479_v22, %v4479_v22  ;;  %v13050_v31 = vld [vmem:[#allocation143_spill] sm:$0xff] }
 0x581   : > { %6030 = vmin.xlane.f32.xlu1 %v6029_v42  ;;  %v5246_v9 = vadd.f32 %v4990_v17, %v4734_v29  ;;  %v5247_v57 = vadd.f32 %v4991_v60, %v4735_v1  ;;  %v5504_v30 = vmul.f32 %v4480_v3, %v4480_v3  ;;  %v5505_v33 = vmul.f32 %v4481_v50, %v4481_v50 }
 0x582   : > { %v5248_v0 = vadd.f32 %v4992_v32, %v4736_v8  ;;  %v5249_v15 = vadd.f32 %v4993_v13, %v4737_v48  ;;  %v3962_v53 = vsub.f32 %v13048_v56, %v9833_v16  ;;  %v3963_v40 = vsub.f32 %v13048_v56, %v9835_v36 }
 0x583   : > { %v5758_v47 = vadd.f32 %v5502_v28, %v5246_v9  ;;  %v5759_v63 = vadd.f32 %v5503_v2, %v5247_v57  ;;  %v3964_v54 = vsub.f32 %v13048_v56, %v9841_v24  ;;  %v3965_v55 = vsub.f32 %v13048_v56, %v9847_v51  ;;  %v13051_v9 = vld [vmem:[#allocation24_spill] sm:$0xff] }
 0x584   : > { %v5760_v39 = vadd.f32 %v5504_v30, %v5248_v0  ;;  %v5761_v23 = vadd.f32 %v5505_v33, %v5249_v15  ;;  %v4230_v45 = vsub.f32 %v13049_v46, %v9858_v43  ;;  %v4231_v59 = vsub.f32 %v13049_v46, %v9860_v4 }
 0x585   : > { %v10276_v12 = vmin.f32 %v6374_v58, %v5758_v47  ;;  %v10278_v61 = vmin.f32 %v6443_v20, %v5759_v63  ;;  %v6022_v18 = vmin.f32 %v5758_v47, %v5759_v63  ;;  %v4232_v35 = vsub.f32 %v13049_v46, %v9862_v7  ;;  %v13052_v47 = vld [vmem:[#allocation83_spill] sm:$0xff] }
 0x586   : > { %v10282_v44 = vmin.f32 %v6512_v41, %v5760_v39  ;;  %v10284_v5 = vmin.f32 %v6581_v26, %v5761_v23  ;;  %v4233_v52 = vsub.f32 %v13049_v46, %v9864_v62  ;;  %v4498_v34 = vsub.f32 %v13050_v31, %v9868_v6 }
 0x587   : > { %v6023_v10 = vmin.f32 %v6022_v18, %v5760_v39  ;;  %v4499_v58 = vsub.f32 %v13050_v31, %v9870_v21  ;;  %v4500_v20 = vsub.f32 %v13050_v31, %v13018_v49  ;;  %v4501_v14 = vsub.f32 %v13050_v31, %v9880_v27 }
 0x588   : > { %v4754_v41 = vmul.f32 %v3962_v53, %v3962_v53  ;;  %v4755_v19 = vmul.f32 %v3963_v40, %v3963_v40  ;;  %v4756_v26 = vmul.f32 %v3964_v54, %v3964_v54  ;;  %v4757_v22 = vmul.f32 %v3965_v55, %v3965_v55 }
 0x589   : > { %v6024_v3 = vmin.f32 %v6023_v10, %v5761_v23  ;;  %v5010_v50 = vmul.f32 %v4230_v45, %v4230_v45  ;;  %v5011_v29 = vmul.f32 %v4231_v59, %v4231_v59  ;;  %v5012_v1 = vmul.f32 %v4232_v35, %v4232_v35  ;;  %v13053_v35 = vld [vmem:[#allocation21_spill] sm:$0xff] }
 0x58a   : > { %v5013_v8 = vmul.f32 %v4233_v52, %v4233_v52  ;;  %v5522_v42 = vmul.f32 %v4498_v34, %v4498_v34  ;;  %v5523_v48 = vmul.f32 %v4499_v58, %v4499_v58  ;;  %v5524_v17 = vmul.f32 %v4500_v20, %v4500_v20 }
 0x58b   : > { %6025 = vmin.xlane.f32.xlu0 %v6024_v3  ;;  %v5266_v60 = vadd.f32 %v5010_v50, %v4754_v41  ;;  %v5267_v32 = vadd.f32 %v5011_v29, %v4755_v19  ;;  %v5268_v13 = vadd.f32 %v5012_v1, %v4756_v26  ;;  %v5525_v28 = vmul.f32 %v4501_v14, %v4501_v14 }
 0x58c   : > { %v5269_v2 = vadd.f32 %v5013_v8, %v4757_v22  ;;  %v3958_v57 = vsub.f32 %v13051_v9, %v9833_v16  ;;  %v3959_v30 = vsub.f32 %v13051_v9, %v9835_v36  ;;  %v3960_v33 = vsub.f32 %v13051_v9, %v9841_v24 }
 0x58d   : > { %v5778_v0 = vadd.f32 %v5522_v42, %v5266_v60  ;;  %v5779_v15 = vadd.f32 %v5523_v48, %v5267_v32  ;;  %v5780_v56 = vadd.f32 %v5524_v17, %v5268_v13  ;;  %v3961_v53 = vsub.f32 %v13051_v9, %v9847_v51  ;;  %v13054_v60 = vld [vmem:[#allocation6_spill] sm:$0xff] }
 0x58e   : > { %v5781_v40 = vadd.f32 %v5525_v28, %v5269_v2  ;;  %v4226_v63 = vsub.f32 %v13052_v47, %v9858_v43  ;;  %v4227_v54 = vsub.f32 %v13052_v47, %v9860_v4  ;;  %v4228_v55 = vsub.f32 %v13052_v47, %v9862_v7 }
 0x58f   : > { %v6376_v39 = vmin.f32 %v10276_v12, %v5778_v0  ;;  %v6445_v23 = vmin.f32 %v10278_v61, %v5779_v15  ;;  %v6514_v46 = vmin.f32 %v10282_v44, %v5780_v56  ;;  %v6047_v45 = vmin.f32 %v5778_v0, %v5779_v15  ;;  %v13055_v0 = vld [vmem:[#allocation93_spill] sm:$0xff] }
 0x590   : > { %v6583_v59 = vmin.f32 %v10284_v5, %v5781_v40  ;;  %v4229_v18 = vsub.f32 %v13052_v47, %v9864_v62  ;;  %v4494_v52 = vsub.f32 %v13053_v35, %v9868_v6  ;;  %v4495_v31 = vsub.f32 %v13053_v35, %v9870_v21 }
 0x591   : > { %v6048_v34 = vmin.f32 %v6047_v45, %v5780_v56  ;;  %v4496_v12 = vsub.f32 %v13053_v35, %v13018_v49  ;;  %v4497_v61 = vsub.f32 %v13053_v35, %v9880_v27  ;;  %v4750_v44 = vmul.f32 %v3958_v57, %v3958_v57 }
 0x592   : > { %v4751_v10 = vmul.f32 %v3959_v30, %v3959_v30  ;;  %v4752_v58 = vmul.f32 %v3960_v33, %v3960_v33  ;;  %v4753_v5 = vmul.f32 %v3961_v53, %v3961_v53  ;;  %v5006_v20 = vmul.f32 %v4226_v63, %v4226_v63 }
 0x593   : > { %v6049_v14 = vmin.f32 %v6048_v34, %v5781_v40  ;;  %v5007_v41 = vmul.f32 %v4227_v54, %v4227_v54  ;;  %v5008_v19 = vmul.f32 %v4228_v55, %v4228_v55  ;;  %v5009_v26 = vmul.f32 %v4229_v18, %v4229_v18 }
 0x594   : > { %v5262_v22 = vadd.f32 %v5006_v20, %v4750_v44  ;;  %v5518_v3 = vmul.f32 %v4494_v52, %v4494_v52  ;;  %v5519_v50 = vmul.f32 %v4495_v31, %v4495_v31  ;;  %v5520_v29 = vmul.f32 %v4496_v12, %v4496_v12 }
 0x595   : > { %6050 = vmin.xlane.f32.xlu2 %v6049_v14  ;;  %v5263_v1 = vadd.f32 %v5007_v41, %v4751_v10  ;;  %v5264_v8 = vadd.f32 %v5008_v19, %v4752_v58  ;;  %v5265_v42 = vadd.f32 %v5009_v26, %v4753_v5  ;;  %v5521_v48 = vmul.f32 %v4497_v61, %v4497_v61 }
 0x596   : > { %v5774_v17 = vadd.f32 %v5518_v3, %v5262_v22  ;;  %v3954_v32 = vsub.f32 %v13054_v60, %v9833_v16  ;;  %v3955_v13 = vsub.f32 %v13054_v60, %v9835_v36  ;;  %v3956_v28 = vsub.f32 %v13054_v60, %v9841_v24 }
 0x597   : > { %v5775_v2 = vadd.f32 %v5519_v50, %v5263_v1  ;;  %v5776_v9 = vadd.f32 %v5520_v29, %v5264_v8  ;;  %v5777_v57 = vadd.f32 %v5521_v48, %v5265_v42  ;;  %v3957_v30 = vsub.f32 %v13054_v60, %v9847_v51  ;;  %v13057_v50 = vld [vmem:[#allocation29_spill] sm:$0xff] }
 0x598   : > { %v10332_v33 = vmin.f32 %v6376_v39, %v5774_v17  ;;  %v4222_v15 = vsub.f32 %v13055_v0, %v9858_v43  ;;  %v4223_v56 = vsub.f32 %v13055_v0, %v9860_v4  ;;  %v4224_v53 = vsub.f32 %v13055_v0, %v9862_v7  ;;  %v13056_v39 = vld [vmem:[#allocation148_spill] sm:$0xff] }
 0x599   : > { %v10340_v40 = vmin.f32 %v6445_v23, %v5775_v2  ;;  %v10342_v47 = vmin.f32 %v6514_v46, %v5776_v9  ;;  %v10344_v63 = vmin.f32 %v6583_v59, %v5777_v57  ;;  %v6042_v54 = vmin.f32 %v5774_v17, %v5775_v2 }
 0x59a   : > { %v4225_v55 = vsub.f32 %v13055_v0, %v9864_v62  ;;  %v4490_v45 = vsub.f32 %v13056_v39, %v9868_v6  ;;  %v4491_v18 = vsub.f32 %v13056_v39, %v9870_v21  ;;  %v4492_v35 = vsub.f32 %v13056_v39, %v13018_v49 }
 0x59b   : > { %v6043_v52 = vmin.f32 %v6042_v54, %v5776_v9  ;;  %v4493_v23 = vsub.f32 %v13056_v39, %v9880_v27  ;;  %v4746_v46 = vmul.f32 %v3954_v32, %v3954_v32  ;;  %v4747_v59 = vmul.f32 %v3955_v13, %v3955_v13  ;;  %v13058_v13 = vld [vmem:[#allocation96_spill] sm:$0xff] }
 0x59c   : > { %v4748_v31 = vmul.f32 %v3956_v28, %v3956_v28  ;;  %v4749_v34 = vmul.f32 %v3957_v30, %v3957_v30  ;;  %v5002_v12 = vmul.f32 %v4222_v15, %v4222_v15  ;;  %v5003_v61 = vmul.f32 %v4223_v56, %v4223_v56 }
 0x59d   : > { %v6044_v44 = vmin.f32 %v6043_v52, %v5777_v57  ;;  %v5004_v10 = vmul.f32 %v4224_v53, %v4224_v53  ;;  %v5005_v58 = vmul.f32 %v4225_v55, %v4225_v55  ;;  %v5514_v5 = vmul.f32 %v4490_v45, %v4490_v45  ;;  %v13059_v55 = vld [vmem:[#allocation146_spill] sm:$0xff] }
 0x59e   : > { %v5258_v20 = vadd.f32 %v5002_v12, %v4746_v46  ;;  %v5259_v14 = vadd.f32 %v5003_v61, %v4747_v59  ;;  %v5515_v41 = vmul.f32 %v4491_v18, %v4491_v18  ;;  %v5516_v19 = vmul.f32 %v4492_v35, %v4492_v35 }
 0x59f   : > { %6045 = vmin.xlane.f32.xlu1 %v6044_v44  ;;  %v5260_v26 = vadd.f32 %v5004_v10, %v4748_v31  ;;  %v5261_v22 = vadd.f32 %v5005_v58, %v4749_v34  ;;  %v5517_v3 = vmul.f32 %v4493_v23, %v4493_v23  ;;  %v3974_v29 = vsub.f32 %v13057_v50, %v9833_v16 }
 0x5a0   : > { %v5770_v1 = vadd.f32 %v5514_v5, %v5258_v20  ;;  %v5771_v8 = vadd.f32 %v5515_v41, %v5259_v14  ;;  %v3975_v42 = vsub.f32 %v13057_v50, %v9835_v36  ;;  %v3976_v48 = vsub.f32 %v13057_v50, %v9841_v24  ;;  %v13060_v14 = vld [vmem:[#allocation30_spill] sm:$0xff] }
 0x5a1   : > { %v5772_v17 = vadd.f32 %v5516_v19, %v5260_v26  ;;  %v5773_v60 = vadd.f32 %v5517_v3, %v5261_v22  ;;  %v3977_v32 = vsub.f32 %v13057_v50, %v9847_v51  ;;  %v4242_v28 = vsub.f32 %v13058_v13, %v9858_v43 }
 0x5a2   : > { %v6378_v2 = vmin.f32 %v10332_v33, %v5770_v1  ;;  %v6447_v9 = vmin.f32 %v10340_v40, %v5771_v8  ;;  %v6037_v57 = vmin.f32 %v5770_v1, %v5771_v8  ;;  %v4243_v30 = vsub.f32 %v13058_v13, %v9860_v4  ;;  %v13061_v8 = vld [vmem:[#allocation86_spill] sm:$0xff] }
 0x5a3   : > { %v6516_v0 = vmin.f32 %v10342_v47, %v5772_v17  ;;  %v6585_v15 = vmin.f32 %v10344_v63, %v5773_v60  ;;  %v4244_v56 = vsub.f32 %v13058_v13, %v9862_v7  ;;  %v4245_v53 = vsub.f32 %v13058_v13, %v9864_v62 }
 0x5a4   : > { %v6038_v54 = vmin.f32 %v6037_v57, %v5772_v17  ;;  %v4510_v33 = vsub.f32 %v13059_v55, %v9868_v6  ;;  %v4511_v40 = vsub.f32 %v13059_v55, %v9870_v21  ;;  %v4512_v39 = vsub.f32 %v13059_v55, %v13018_v49 }
 0x5a5   : > { %v4513_v47 = vsub.f32 %v13059_v55, %v9880_v27  ;;  %v4766_v63 = vmul.f32 %v3974_v29, %v3974_v29  ;;  %v4767_v45 = vmul.f32 %v3975_v42, %v3975_v42  ;;  %v4768_v18 = vmul.f32 %v3976_v48, %v3976_v48 }
 0x5a6   : > { %v6039_v35 = vmin.f32 %v6038_v54, %v5773_v60  ;;  %v4769_v52 = vmul.f32 %v3977_v32, %v3977_v32  ;;  %v5022_v23 = vmul.f32 %v4242_v28, %v4242_v28  ;;  %v5023_v46 = vmul.f32 %v4243_v30, %v4243_v30 }
 0x5a7   : > { %v5024_v59 = vmul.f32 %v4244_v56, %v4244_v56  ;;  %v5025_v31 = vmul.f32 %v4245_v53, %v4245_v53  ;;  %v5534_v34 = vmul.f32 %v4510_v33, %v4510_v33  ;;  %v5535_v12 = vmul.f32 %v4511_v40, %v4511_v40  ;;  %v13062_v56 = vld [vmem:[#allocation27_spill] sm:$0xff] }
 0x5a8   : > { %6040 = vmin.xlane.f32.xlu0 %v6039_v35  ;;  %v5278_v61 = vadd.f32 %v5022_v23, %v4766_v63  ;;  %v5279_v44 = vadd.f32 %v5023_v46, %v4767_v45  ;;  %v5536_v10 = vmul.f32 %v4512_v39, %v4512_v39  ;;  %v5537_v58 = vmul.f32 %v4513_v47, %v4513_v47 }
 0x5a9   : > { %v5280_v5 = vadd.f32 %v5024_v59, %v4768_v18  ;;  %v5281_v20 = vadd.f32 %v5025_v31, %v4769_v52  ;;  %v3970_v41 = vsub.f32 %v13060_v14, %v9833_v16  ;;  %v3971_v19 = vsub.f32 %v13060_v14, %v9835_v36 }
 0x5aa   : > { %v5790_v26 = vadd.f32 %v5534_v34, %v5278_v61  ;;  %v5791_v22 = vadd.f32 %v5535_v12, %v5279_v44  ;;  %v3972_v3 = vsub.f32 %v13060_v14, %v9841_v24  ;;  %v3973_v50 = vsub.f32 %v13060_v14, %v9847_v51  ;;  %v13063_v61 = vld [vmem:[#allocation9_spill] sm:$0xff] }
 0x5ab   : > { %v5792_v29 = vadd.f32 %v5536_v10, %v5280_v5  ;;  %v5793_v1 = vadd.f32 %v5537_v58, %v5281_v20  ;;  %v4238_v42 = vsub.f32 %v13061_v8, %v9858_v43  ;;  %v4239_v48 = vsub.f32 %v13061_v8, %v9860_v4 }
 0x5ac   : > { %v10396_v17 = vmin.f32 %v6378_v2, %v5790_v26  ;;  %v10398_v60 = vmin.f32 %v6447_v9, %v5791_v22  ;;  %v6062_v32 = vmin.f32 %v5790_v26, %v5791_v22  ;;  %v4240_v13 = vsub.f32 %v13061_v8, %v9862_v7  ;;  %v13064_v26 = vld [vmem:[#allocation95_spill] sm:$0xff] }
 0x5ad   : > { %v10402_v28 = vmin.f32 %v6516_v0, %v5792_v29  ;;  %v10404_v57 = vmin.f32 %v6585_v15, %v5793_v1  ;;  %v4241_v30 = vsub.f32 %v13061_v8, %v9864_v62  ;;  %v4506_v53 = vsub.f32 %v13062_v56, %v9868_v6 }
 0x5ae   : > { %v6063_v54 = vmin.f32 %v6062_v32, %v5792_v29  ;;  %v4507_v2 = vsub.f32 %v13062_v56, %v9870_v21  ;;  %v4508_v9 = vsub.f32 %v13062_v56, %v13018_v49  ;;  %v4509_v55 = vsub.f32 %v13062_v56, %v9880_v27 }
 0x5af   : > { %v4762_v0 = vmul.f32 %v3970_v41, %v3970_v41  ;;  %v4763_v33 = vmul.f32 %v3971_v19, %v3971_v19  ;;  %v4764_v15 = vmul.f32 %v3972_v3, %v3972_v3  ;;  %v4765_v40 = vmul.f32 %v3973_v50, %v3973_v50 }
 0x5b0   : > { %v6064_v39 = vmin.f32 %v6063_v54, %v5793_v1  ;;  %v5018_v47 = vmul.f32 %v4238_v42, %v4238_v42  ;;  %v5019_v63 = vmul.f32 %v4239_v48, %v4239_v48  ;;  %v5020_v45 = vmul.f32 %v4240_v13, %v4240_v13  ;;  %v13065_v13 = vld [vmem:[#allocation150_spill] sm:$0xff] }
 0x5b1   : > { %v5021_v18 = vmul.f32 %v4241_v30, %v4241_v30  ;;  %v5530_v35 = vmul.f32 %v4506_v53, %v4506_v53  ;;  %v5531_v52 = vmul.f32 %v4507_v2, %v4507_v2  ;;  %v5532_v23 = vmul.f32 %v4508_v9, %v4508_v9 }
 0x5b2   : > { %6065 = vmin.xlane.f32.xlu2 %v6064_v39  ;;  %v5274_v46 = vadd.f32 %v5018_v47, %v4762_v0  ;;  %v5275_v59 = vadd.f32 %v5019_v63, %v4763_v33  ;;  %v5276_v31 = vadd.f32 %v5020_v45, %v4764_v15  ;;  %v5533_v34 = vmul.f32 %v4509_v55, %v4509_v55 }
 0x5b3   : > { %v5277_v12 = vadd.f32 %v5021_v18, %v4765_v40  ;;  %v3966_v44 = vsub.f32 %v13063_v61, %v9833_v16  ;;  %v3967_v10 = vsub.f32 %v13063_v61, %v9835_v36  ;;  %v3968_v58 = vsub.f32 %v13063_v61, %v9841_v24 }
 0x5b4   : > { %v5786_v5 = vadd.f32 %v5530_v35, %v5274_v46  ;;  %v5787_v20 = vadd.f32 %v5531_v52, %v5275_v59  ;;  %v5788_v14 = vadd.f32 %v5532_v23, %v5276_v31  ;;  %v3969_v41 = vsub.f32 %v13063_v61, %v9847_v51  ;;  %v13066_v46 = vld [vmem:[#allocation35_spill] sm:$0xff] }
 0x5b5   : > { %v5789_v19 = vadd.f32 %v5533_v34, %v5277_v12  ;;  %v4234_v22 = vsub.f32 %v13064_v26, %v9858_v43  ;;  %v4235_v3 = vsub.f32 %v13064_v26, %v9860_v4  ;;  %v4236_v50 = vsub.f32 %v13064_v26, %v9862_v7 }
 0x5b6   : > { %v6380_v29 = vmin.f32 %v10396_v17, %v5786_v5  ;;  %v6449_v1 = vmin.f32 %v10398_v60, %v5787_v20  ;;  %v6518_v8 = vmin.f32 %v10402_v28, %v5788_v14  ;;  %v6057_v42 = vmin.f32 %v5786_v5, %v5787_v20  ;;  %v13067_v5 = vld [vmem:[#allocation97_spill] sm:$0xff] }
 0x5b7   : > { %v6587_v48 = vmin.f32 %v10404_v57, %v5789_v19  ;;  %v4237_v32 = vsub.f32 %v13064_v26, %v9864_v62  ;;  %v4502_v30 = vsub.f32 %v13065_v13, %v9868_v6  ;;  %v4503_v56 = vsub.f32 %v13065_v13, %v9870_v21 }
 0x5b8   : > { %v6058_v53 = vmin.f32 %v6057_v42, %v5788_v14  ;;  %v4504_v17 = vsub.f32 %v13065_v13, %v13018_v49  ;;  %v4505_v60 = vsub.f32 %v13065_v13, %v9880_v27  ;;  %v4758_v28 = vmul.f32 %v3966_v44, %v3966_v44 }
 0x5b9   : > { %v4759_v54 = vmul.f32 %v3967_v10, %v3967_v10  ;;  %v4760_v2 = vmul.f32 %v3968_v58, %v3968_v58  ;;  %v4761_v57 = vmul.f32 %v3969_v41, %v3969_v41  ;;  %v5014_v9 = vmul.f32 %v4234_v22, %v4234_v22 }
 0x5ba   : > { %v6059_v55 = vmin.f32 %v6058_v53, %v5789_v19  ;;  %v5015_v0 = vmul.f32 %v4235_v3, %v4235_v3  ;;  %v5016_v33 = vmul.f32 %v4236_v50, %v4236_v50  ;;  %v5017_v15 = vmul.f32 %v4237_v32, %v4237_v32 }
 0x5bb   : > { %v5270_v40 = vadd.f32 %v5014_v9, %v4758_v28  ;;  %v5526_v39 = vmul.f32 %v4502_v30, %v4502_v30  ;;  %v5527_v47 = vmul.f32 %v4503_v56, %v4503_v56  ;;  %v5528_v63 = vmul.f32 %v4504_v17, %v4504_v17 }
 0x5bc   : > { %6060 = vmin.xlane.f32.xlu1 %v6059_v55  ;;  %v5271_v45 = vadd.f32 %v5015_v0, %v4759_v54  ;;  %v5272_v18 = vadd.f32 %v5016_v33, %v4760_v2  ;;  %v5273_v35 = vadd.f32 %v5017_v15, %v4761_v57  ;;  %v5529_v52 = vmul.f32 %v4505_v60, %v4505_v60 }
 0x5bd   : > { %v5782_v23 = vadd.f32 %v5526_v39, %v5270_v40  ;;  %v3986_v59 = vsub.f32 %v13066_v46, %v9833_v16  ;;  %v3987_v31 = vsub.f32 %v13066_v46, %v9835_v36  ;;  %v3988_v34 = vsub.f32 %v13066_v46, %v9841_v24 }
 0x5be   : > { %v5783_v12 = vadd.f32 %v5527_v47, %v5271_v45  ;;  %v5784_v61 = vadd.f32 %v5528_v63, %v5272_v18  ;;  %v5785_v44 = vadd.f32 %v5529_v52, %v5273_v35  ;;  %v3989_v10 = vsub.f32 %v13066_v46, %v9847_v51  ;;  %v13069_v47 = vld [vmem:[#allocation36_spill] sm:$0xff] }
 0x5bf   : > { %v10452_v58 = vmin.f32 %v6380_v29, %v5782_v23  ;;  %v4254_v20 = vsub.f32 %v13067_v5, %v9858_v43  ;;  %v4255_v14 = vsub.f32 %v13067_v5, %v9860_v4  ;;  %v4256_v41 = vsub.f32 %v13067_v5, %v9862_v7  ;;  %v13068_v29 = vld [vmem:[#allocation15_spill] sm:$0xff] }
 0x5c0   : > { %v10460_v19 = vmin.f32 %v6449_v1, %v5783_v12  ;;  %v10462_v26 = vmin.f32 %v6518_v8, %v5784_v61  ;;  %v10464_v22 = vmin.f32 %v6587_v48, %v5785_v44  ;;  %v6052_v3 = vmin.f32 %v5782_v23, %v5783_v12 }
 0x5c1   : > { %v4257_v50 = vsub.f32 %v13067_v5, %v9864_v62  ;;  %v4522_v42 = vsub.f32 %v13068_v29, %v9868_v6  ;;  %v4523_v32 = vsub.f32 %v13068_v29, %v9870_v21  ;;  %v4524_v13 = vsub.f32 %v13068_v29, %v13018_v49 }
 0x5c2   : > { %v6053_v30 = vmin.f32 %v6052_v3, %v5784_v61  ;;  %v4525_v1 = vsub.f32 %v13068_v29, %v9880_v27  ;;  %v4778_v8 = vmul.f32 %v3986_v59, %v3986_v59  ;;  %v4779_v48 = vmul.f32 %v3987_v31, %v3987_v31  ;;  %v13070_v31 = vld [vmem:[#allocation89_spill] sm:$0xff] }
 0x5c3   : > { %v4780_v56 = vmul.f32 %v3988_v34, %v3988_v34  ;;  %v4781_v53 = vmul.f32 %v3989_v10, %v3989_v10  ;;  %v5034_v17 = vmul.f32 %v4254_v20, %v4254_v20  ;;  %v5035_v60 = vmul.f32 %v4255_v14, %v4255_v14 }
 0x5c4   : > { %v6054_v28 = vmin.f32 %v6053_v30, %v5785_v44  ;;  %v5036_v54 = vmul.f32 %v4256_v41, %v4256_v41  ;;  %v5037_v2 = vmul.f32 %v4257_v50, %v4257_v50  ;;  %v5546_v57 = vmul.f32 %v4522_v42, %v4522_v42  ;;  %v13071_v50 = vld [vmem:[#allocation153_spill] sm:$0xff] }
 0x5c5   : > { %v5290_v9 = vadd.f32 %v5034_v17, %v4778_v8  ;;  %v5291_v55 = vadd.f32 %v5035_v60, %v4779_v48  ;;  %v5547_v0 = vmul.f32 %v4523_v32, %v4523_v32  ;;  %v5548_v33 = vmul.f32 %v4524_v13, %v4524_v13 }
 0x5c6   : > { %6055 = vmin.xlane.f32.xlu0 %v6054_v28  ;;  %v5292_v15 = vadd.f32 %v5036_v54, %v4780_v56  ;;  %v5293_v40 = vadd.f32 %v5037_v2, %v4781_v53  ;;  %v5549_v39 = vmul.f32 %v4525_v1, %v4525_v1  ;;  %v3982_v63 = vsub.f32 %v13069_v47, %v9833_v16 }
 0x5c7   : > { %v5802_v45 = vadd.f32 %v5546_v57, %v5290_v9  ;;  %v5803_v18 = vadd.f32 %v5547_v0, %v5291_v55  ;;  %v3983_v35 = vsub.f32 %v13069_v47, %v9835_v36  ;;  %v3984_v52 = vsub.f32 %v13069_v47, %v9841_v24  ;;  %v13072_v55 = vld [vmem:[#allocation12_spill] sm:$0xff] }
 0x5c8   : > { %v5804_v23 = vadd.f32 %v5548_v33, %v5292_v15  ;;  %v5805_v46 = vadd.f32 %v5549_v39, %v5293_v40  ;;  %v3985_v59 = vsub.f32 %v13069_v47, %v9847_v51  ;;  %v4250_v34 = vsub.f32 %v13070_v31, %v9858_v43 }
 0x5c9   : > { %v6382_v12 = vmin.f32 %v10452_v58, %v5802_v45  ;;  %v6451_v61 = vmin.f32 %v10460_v19, %v5803_v18  ;;  %v6077_v44 = vmin.f32 %v5802_v45, %v5803_v18  ;;  %v4251_v10 = vsub.f32 %v13070_v31, %v9860_v4  ;;  %v13073_v18 = vld [vmem:[#allocation32_spill] sm:$0xff] }
 0x5ca   : > { %v6520_v5 = vmin.f32 %v10462_v26, %v5804_v23  ;;  %v6589_v20 = vmin.f32 %v10464_v22, %v5805_v46  ;;  %v4252_v14 = vsub.f32 %v13070_v31, %v9862_v7  ;;  %v4253_v41 = vsub.f32 %v13070_v31, %v9864_v62 }
 0x5cb   : > { %v6078_v3 = vmin.f32 %v6077_v44, %v5804_v23  ;;  %v4518_v58 = vsub.f32 %v13071_v50, %v9868_v6  ;;  %v4519_v19 = vsub.f32 %v13071_v50, %v9870_v21  ;;  %v4520_v29 = vsub.f32 %v13071_v50, %v13018_v49 }
 0x5cc   : > { %v4521_v26 = vsub.f32 %v13071_v50, %v9880_v27  ;;  %v4774_v22 = vmul.f32 %v3982_v63, %v3982_v63  ;;  %v4775_v42 = vmul.f32 %v3983_v35, %v3983_v35  ;;  %v4776_v32 = vmul.f32 %v3984_v52, %v3984_v52 }
 0x5cd   : > { %v6079_v13 = vmin.f32 %v6078_v3, %v5805_v46  ;;  %v4777_v30 = vmul.f32 %v3985_v59, %v3985_v59  ;;  %v5030_v1 = vmul.f32 %v4250_v34, %v4250_v34  ;;  %v5031_v8 = vmul.f32 %v4251_v10, %v4251_v10 }
 0x5ce   : > { %v5032_v48 = vmul.f32 %v4252_v14, %v4252_v14  ;;  %v5033_v56 = vmul.f32 %v4253_v41, %v4253_v41  ;;  %v5542_v53 = vmul.f32 %v4518_v58, %v4518_v58  ;;  %v5543_v17 = vmul.f32 %v4519_v19, %v4519_v19  ;;  %v13074_v14 = vld [vmem:[#allocation151_spill] sm:$0xff] }
 0x5cf   : > { %6080 = vmin.xlane.f32.xlu2 %v6079_v13  ;;  %v5286_v60 = vadd.f32 %v5030_v1, %v4774_v22  ;;  %v5287_v28 = vadd.f32 %v5031_v8, %v4775_v42  ;;  %v5544_v54 = vmul.f32 %v4520_v29, %v4520_v29  ;;  %v5545_v2 = vmul.f32 %v4521_v26, %v4521_v26 }
 0x5d0   : > { %v5288_v57 = vadd.f32 %v5032_v48, %v4776_v32  ;;  %v5289_v9 = vadd.f32 %v5033_v56, %v4777_v30  ;;  %v3978_v0 = vsub.f32 %v13072_v55, %v9833_v16  ;;  %v3979_v33 = vsub.f32 %v13072_v55, %v9835_v36 }
 0x5d1   : > { %v5798_v15 = vadd.f32 %v5542_v53, %v5286_v60  ;;  %v5799_v40 = vadd.f32 %v5543_v17, %v5287_v28  ;;  %v3980_v39 = vsub.f32 %v13072_v55, %v9841_v24  ;;  %v3981_v47 = vsub.f32 %v13072_v55, %v9847_v51  ;;  %v13075_v60 = vld [vmem:[#allocation39_spill] sm:$0xff] }
 0x5d2   : > { %v5800_v63 = vadd.f32 %v5544_v54, %v5288_v57  ;;  %v5801_v45 = vadd.f32 %v5545_v2, %v5289_v9  ;;  %v4246_v35 = vsub.f32 %v13073_v18, %v9858_v43  ;;  %v4247_v52 = vsub.f32 %v13073_v18, %v9860_v4 }
 0x5d3   : > { %v10516_v23 = vmin.f32 %v6382_v12, %v5798_v15  ;;  %v10518_v46 = vmin.f32 %v6451_v61, %v5799_v40  ;;  %v6072_v59 = vmin.f32 %v5798_v15, %v5799_v40  ;;  %v4248_v31 = vsub.f32 %v13073_v18, %v9862_v7  ;;  %v13076_v15 = vld [vmem:[#allocation99_spill] sm:$0xff] }
 0x5d4   : > { %v10522_v34 = vmin.f32 %v6520_v5, %v5800_v63  ;;  %v10524_v44 = vmin.f32 %v6589_v20, %v5801_v45  ;;  %v4249_v10 = vsub.f32 %v13073_v18, %v9864_v62  ;;  %v4514_v41 = vsub.f32 %v13074_v14, %v9868_v6 }
 0x5d5   : > { %v6073_v3 = vmin.f32 %v6072_v59, %v5800_v63  ;;  %v4515_v12 = vsub.f32 %v13074_v14, %v9870_v21  ;;  %v4516_v61 = vsub.f32 %v13074_v14, %v13018_v49  ;;  %v4517_v50 = vsub.f32 %v13074_v14, %v9880_v27 }
 0x5d6   : > { %v4770_v5 = vmul.f32 %v3978_v0, %v3978_v0  ;;  %v4771_v58 = vmul.f32 %v3979_v33, %v3979_v33  ;;  %v4772_v20 = vmul.f32 %v3980_v39, %v3980_v39  ;;  %v4773_v19 = vmul.f32 %v3981_v47, %v3981_v47 }
 0x5d7   : > { %v6074_v29 = vmin.f32 %v6073_v3, %v5801_v45  ;;  %v5026_v26 = vmul.f32 %v4246_v35, %v4246_v35  ;;  %v5027_v22 = vmul.f32 %v4247_v52, %v4247_v52  ;;  %v5028_v42 = vmul.f32 %v4248_v31, %v4248_v31  ;;  %v13077_v31 = vld [vmem:[#allocation20_spill] sm:$0xff] }
 0x5d8   : > { %v5029_v32 = vmul.f32 %v4249_v10, %v4249_v10  ;;  %v5538_v13 = vmul.f32 %v4514_v41, %v4514_v41  ;;  %v5539_v30 = vmul.f32 %v4515_v12, %v4515_v12  ;;  %v5540_v1 = vmul.f32 %v4516_v61, %v4516_v61 }
 0x5d9   : > { %6075 = vmin.xlane.f32.xlu1 %v6074_v29  ;;  %v5282_v8 = vadd.f32 %v5026_v26, %v4770_v5  ;;  %v5283_v48 = vadd.f32 %v5027_v22, %v4771_v58  ;;  %v5284_v56 = vadd.f32 %v5028_v42, %v4772_v20  ;;  %v5541_v53 = vmul.f32 %v4517_v50, %v4517_v50 }
 0x5da   : > { %v5285_v17 = vadd.f32 %v5029_v32, %v4773_v19  ;;  %v3998_v28 = vsub.f32 %v13075_v60, %v9833_v16  ;;  %v3999_v54 = vsub.f32 %v13075_v60, %v9835_v36  ;;  %v4000_v2 = vsub.f32 %v13075_v60, %v9841_v24 }
 0x5db   : > { %v5794_v57 = vadd.f32 %v5538_v13, %v5282_v8  ;;  %v5795_v9 = vadd.f32 %v5539_v30, %v5283_v48  ;;  %v5796_v55 = vadd.f32 %v5540_v1, %v5284_v56  ;;  %v4001_v0 = vsub.f32 %v13075_v60, %v9847_v51  ;;  %v13078_v8 = vld [vmem:[#allocation40_spill] sm:$0xff] }
 0x5dc   : > { %v5797_v33 = vadd.f32 %v5541_v53, %v5285_v17  ;;  %v4266_v40 = vsub.f32 %v13076_v15, %v9858_v43  ;;  %v4267_v39 = vsub.f32 %v13076_v15, %v9860_v4  ;;  %v4268_v47 = vsub.f32 %v13076_v15, %v9862_v7 }
 0x5dd   : > { %v6384_v63 = vmin.f32 %v10516_v23, %v5794_v57  ;;  %v6453_v45 = vmin.f32 %v10518_v46, %v5795_v9  ;;  %v6522_v18 = vmin.f32 %v10522_v34, %v5796_v55  ;;  %v6067_v35 = vmin.f32 %v5794_v57, %v5795_v9  ;;  %v13079_v57 = vld [vmem:[#allocation92_spill] sm:$0xff] }
 0x5de   : > { %v6591_v52 = vmin.f32 %v10524_v44, %v5797_v33  ;;  %v4269_v59 = vsub.f32 %v13076_v15, %v9864_v62  ;;  %v4534_v10 = vsub.f32 %v13077_v31, %v9868_v6  ;;  %v4535_v14 = vsub.f32 %v13077_v31, %v9870_v21 }
 0x5df   : > { %v6068_v41 = vmin.f32 %v6067_v35, %v5796_v55  ;;  %v4536_v23 = vsub.f32 %v13077_v31, %v13018_v49  ;;  %v4537_v46 = vsub.f32 %v13077_v31, %v9880_v27  ;;  %v4790_v34 = vmul.f32 %v3998_v28, %v3998_v28 }
 0x5e0   : > { %v4791_v3 = vmul.f32 %v3999_v54, %v3999_v54  ;;  %v4792_v12 = vmul.f32 %v4000_v2, %v4000_v2  ;;  %v4793_v44 = vmul.f32 %v4001_v0, %v4001_v0  ;;  %v5046_v61 = vmul.f32 %v4266_v40, %v4266_v40 }
 0x5e1   : > { %v6069_v50 = vmin.f32 %v6068_v41, %v5797_v33  ;;  %v5047_v5 = vmul.f32 %v4267_v39, %v4267_v39  ;;  %v5048_v58 = vmul.f32 %v4268_v47, %v4268_v47  ;;  %v5049_v20 = vmul.f32 %v4269_v59, %v4269_v59 }
 0x5e2   : > { %v5302_v19 = vadd.f32 %v5046_v61, %v4790_v34  ;;  %v5558_v29 = vmul.f32 %v4534_v10, %v4534_v10  ;;  %v5559_v26 = vmul.f32 %v4535_v14, %v4535_v14  ;;  %v5560_v22 = vmul.f32 %v4536_v23, %v4536_v23 }
 0x5e3   : > { %6070 = vmin.xlane.f32.xlu0 %v6069_v50  ;;  %v5303_v42 = vadd.f32 %v5047_v5, %v4791_v3  ;;  %v5304_v32 = vadd.f32 %v5048_v58, %v4792_v12  ;;  %v5305_v13 = vadd.f32 %v5049_v20, %v4793_v44  ;;  %v5561_v30 = vmul.f32 %v4537_v46, %v4537_v46 }
 0x5e4   : > { %v5814_v1 = vadd.f32 %v5558_v29, %v5302_v19  ;;  %v3994_v48 = vsub.f32 %v13078_v8, %v9833_v16  ;;  %v3995_v56 = vsub.f32 %v13078_v8, %v9835_v36  ;;  %v3996_v53 = vsub.f32 %v13078_v8, %v9841_v24 }
 0x5e5   : > { %v5815_v17 = vadd.f32 %v5559_v26, %v5303_v42  ;;  %v5816_v60 = vadd.f32 %v5560_v22, %v5304_v32  ;;  %v5817_v28 = vadd.f32 %v5561_v30, %v5305_v13  ;;  %v3997_v54 = vsub.f32 %v13078_v8, %v9847_v51  ;;  %v13081_v26 = vld [vmem:[#allocation16_spill] sm:$0xff]  ;;  %v10604_v8 = vpop.xlane.xlu1 %3289 }
 0x5e6   : > { %v10572_v2 = vmin.f32 %v6384_v63, %v5814_v1  ;;  %v4262_v9 = vsub.f32 %v13079_v57, %v9858_v43  ;;  %v4263_v55 = vsub.f32 %v13079_v57, %v9860_v4  ;;  %v4264_v0 = vsub.f32 %v13079_v57, %v9862_v7  ;;  %v13080_v63 = vld [vmem:[#allocation155_spill] sm:$0xff] }
 0x5e7   : > { %v10580_v33 = vmin.f32 %v6453_v45, %v5815_v17  ;;  %v10582_v15 = vmin.f32 %v6522_v18, %v5816_v60  ;;  %v10584_v40 = vmin.f32 %v6591_v52, %v5817_v28  ;;  %v6092_v39 = vmin.f32 %v5814_v1, %v5815_v17  ;;  %v10602_v1 = vpop.xlane.xlu2 %3299  ;;  %v13082_v17 = vld [vmem:[#allocation98_spill] sm:$0xff] }
 0x5e8   : > { %v4265_v47 = vsub.f32 %v13079_v57, %v9864_v62  ;;  %v4530_v35 = vsub.f32 %v13080_v63, %v9868_v6  ;;  %v4531_v59 = vsub.f32 %v13080_v63, %v9870_v21  ;;  %v4532_v31 = vsub.f32 %v13080_v63, %v13018_v49 }
 0x5e9   : > { %v6093_v10 = vmin.f32 %v6092_v39, %v5816_v60  ;;  %v4533_v45 = vsub.f32 %v13080_v63, %v9880_v27  ;;  %v4786_v18 = vmul.f32 %v3994_v48, %v3994_v48  ;;  %v4787_v52 = vmul.f32 %v3995_v56, %v3995_v56 }
 0x5ea   : > { %v4788_v14 = vmul.f32 %v3996_v53, %v3996_v53  ;;  %v4789_v41 = vmul.f32 %v3997_v54, %v3997_v54  ;;  %v5042_v23 = vmul.f32 %v4262_v9, %v4262_v9  ;;  %v5043_v46 = vmul.f32 %v4263_v55, %v4263_v55 }
 0x5eb   : > { %v6094_v34 = vmin.f32 %v6093_v10, %v5817_v28  ;;  %v5044_v3 = vmul.f32 %v4264_v0, %v4264_v0  ;;  %v5045_v12 = vmul.f32 %v4265_v47, %v4265_v47  ;;  %v5554_v44 = vmul.f32 %v4530_v35, %v4530_v35  ;;  %v13083_v35 = vld [vmem:[#allocation152_spill] sm:$0xff] }
 0x5ec   : > { %v5298_v61 = vadd.f32 %v5042_v23, %v4786_v18  ;;  %v5299_v50 = vadd.f32 %v5043_v46, %v4787_v52  ;;  %v5555_v5 = vmul.f32 %v4531_v59, %v4531_v59  ;;  %v5556_v58 = vmul.f32 %v4532_v31, %v4532_v31 }
 0x5ed   : > { %6095 = vmin.xlane.f32.xlu2 %v6094_v34  ;;  %v5300_v20 = vadd.f32 %v5044_v3, %v4788_v14  ;;  %v5301_v19 = vadd.f32 %v5045_v12, %v4789_v41  ;;  %v5557_v29 = vmul.f32 %v4533_v45, %v4533_v45  ;;  %v3990_v22 = vsub.f32 %v13081_v26, %v9833_v16 }
 0x5ee   : > { %v5810_v42 = vadd.f32 %v5554_v44, %v5298_v61  ;;  %v5811_v32 = vadd.f32 %v5555_v5, %v5299_v50  ;;  %v3991_v13 = vsub.f32 %v13081_v26, %v9835_v36  ;;  %v3992_v30 = vsub.f32 %v13081_v26, %v9841_v24 }
 0x5ef   : > { %v5812_v48 = vadd.f32 %v5556_v58, %v5300_v20  ;;  %v5813_v56 = vadd.f32 %v5557_v29, %v5301_v19  ;;  %v3993_v53 = vsub.f32 %v13081_v26, %v9847_v51  ;;  %v4258_v60 = vsub.f32 %v13082_v17, %v9858_v43  ;;  %v13084_v58 = vld [vmem:[#allocation42_spill] sm:$0xff] }
 0x5f0   : > { %v6386_v28 = vmin.f32 %v10572_v2, %v5810_v42  ;;  %v6455_v54 = vmin.f32 %v10580_v33, %v5811_v32  ;;  %v6087_v57 = vmin.f32 %v5810_v42, %v5811_v32  ;;  %v4259_v9 = vsub.f32 %v13082_v17, %v9860_v4  ;;  %v10636_v32 = vpop.xlane.xlu2 %3304 }
 0x5f1   : > { %v6524_v55 = vmin.f32 %v10582_v15, %v5812_v48  ;;  %v6593_v0 = vmin.f32 %v10584_v40, %v5813_v56  ;;  %v4260_v39 = vsub.f32 %v13082_v17, %v9862_v7  ;;  %v4261_v47 = vsub.f32 %v13082_v17, %v9864_v62 }
 0x5f2   : > { %v6088_v63 = vmin.f32 %v6087_v57, %v5812_v48  ;;  %v4526_v2 = vsub.f32 %v13083_v35, %v9868_v6  ;;  %v4527_v33 = vsub.f32 %v13083_v35, %v9870_v21  ;;  %v4528_v59 = vsub.f32 %v13083_v35, %v13018_v49 }
 0x5f3   : > { %v4529_v15 = vsub.f32 %v13083_v35, %v9880_v27  ;;  %v4782_v40 = vmul.f32 %v3990_v22, %v3990_v22  ;;  %v4783_v31 = vmul.f32 %v3991_v13, %v3991_v13  ;;  %v4784_v10 = vmul.f32 %v3992_v30, %v3992_v30  ;;  %v10638_v13 = vpop.xlane.xlu1 %3294 }
 0x5f4   : > { %v6089_v45 = vmin.f32 %v6088_v63, %v5813_v56  ;;  %v4785_v18 = vmul.f32 %v3993_v53, %v3993_v53  ;;  %v5038_v52 = vmul.f32 %v4258_v60, %v4258_v60  ;;  %v5039_v14 = vmul.f32 %v4259_v9, %v4259_v9  ;;  %v13085_v56 = vld [vmem:[#allocation101_spill] sm:$0xff] }
 0x5f5   : > { %v5040_v41 = vmul.f32 %v4260_v39, %v4260_v39  ;;  %v5041_v23 = vmul.f32 %v4261_v47, %v4261_v47  ;;  %v5550_v46 = vmul.f32 %v4526_v2, %v4526_v2  ;;  %v5551_v34 = vmul.f32 %v4527_v33, %v4527_v33  ;;  %v13086_v2 = vld [vmem:[#allocation26_spill] sm:$0xff] }
 0x5f6   : > { %6090 = vmin.xlane.f32.xlu1 %v6089_v45  ;;  %v5294_v3 = vadd.f32 %v5038_v52, %v4782_v40  ;;  %v5295_v12 = vadd.f32 %v5039_v14, %v4783_v31  ;;  %v5552_v44 = vmul.f32 %v4528_v59, %v4528_v59  ;;  %v5553_v61 = vmul.f32 %v4529_v15, %v4529_v15 }
 0x5f7   : > { %v5296_v50 = vadd.f32 %v5040_v41, %v4784_v10  ;;  %v5297_v5 = vadd.f32 %v5041_v23, %v4785_v18  ;;  %v4010_v20 = vsub.f32 %v13084_v58, %v9833_v16  ;;  %v4011_v19 = vsub.f32 %v13084_v58, %v9835_v36 }
 0x5f8   : > { %v5806_v29 = vadd.f32 %v5550_v46, %v5294_v3  ;;  %v5807_v26 = vadd.f32 %v5551_v34, %v5295_v12  ;;  %v4012_v22 = vsub.f32 %v13084_v58, %v9841_v24  ;;  %v4013_v42 = vsub.f32 %v13084_v58, %v9847_v51 }
 0x5f9   : > { %v5808_v30 = vadd.f32 %v5552_v44, %v5296_v50  ;;  %v5809_v48 = vadd.f32 %v5553_v61, %v5297_v5  ;;  %v4278_v53 = vsub.f32 %v13085_v56, %v9858_v43  ;;  %v4279_v17 = vsub.f32 %v13085_v56, %v9860_v4  ;;  %v13087_v50 = vld [vmem:[#allocation43_spill] sm:$0xff] }
 0x5fa   : > { %v10644_v60 = vmin.f32 %v6386_v28, %v5806_v29  ;;  %v10646_v57 = vmin.f32 %v6455_v54, %v5807_v26  ;;  %v6082_v9 = vmin.f32 %v5806_v29, %v5807_v26  ;;  %v4280_v39 = vsub.f32 %v13085_v56, %v9862_v7 }
 0x5fb   : > { %v10650_v47 = vmin.f32 %v6524_v55, %v5808_v30  ;;  %v10652_v63 = vmin.f32 %v6593_v0, %v5809_v48  ;;  %v4281_v35 = vsub.f32 %v13085_v56, %v9864_v62  ;;  %v4546_v33 = vsub.f32 %v13086_v2, %v9868_v6 }
 0x5fc   : > { %v6083_v59 = vmin.f32 %v6082_v9, %v5808_v30  ;;  %v4547_v28 = vsub.f32 %v13086_v2, %v9870_v21  ;;  %v4548_v54 = vsub.f32 %v13086_v2, %v13018_v49  ;;  %v4549_v15 = vsub.f32 %v13086_v2, %v9880_v27  ;;  %v10674_v30 = vpop.xlane.xlu2 %3319 }
 0x5fd   : > { %v4802_v55 = vmul.f32 %v4010_v20, %v4010_v20  ;;  %v4803_v40 = vmul.f32 %v4011_v19, %v4011_v19  ;;  %v4804_v0 = vmul.f32 %v4012_v22, %v4012_v22  ;;  %v4805_v31 = vmul.f32 %v4013_v42, %v4013_v42  ;;  %v10670_v19 = vpop.xlane.xlu0 %3279 }
 0x5fe   : > { %v6084_v10 = vmin.f32 %v6083_v59, %v5809_v48  ;;  %v5058_v45 = vmul.f32 %v4278_v53, %v4278_v53  ;;  %v5059_v18 = vmul.f32 %v4279_v17, %v4279_v17  ;;  %v5060_v52 = vmul.f32 %v4280_v39, %v4280_v39  ;;  %v10676_v48 = vpop.xlane.xlu1 %3314  ;;  %v13088_v53 = vld [vmem:[#allocation19_spill] sm:$0xff] }
 0x5ff   : > { %v5061_v14 = vmul.f32 %v4281_v35, %v4281_v35  ;;  %v5570_v41 = vmul.f32 %v4546_v33, %v4546_v33  ;;  %v5571_v23 = vmul.f32 %v4547_v28, %v4547_v28  ;;  %v5572_v46 = vmul.f32 %v4548_v54, %v4548_v54 }
 0x600   : > { %6085 = vmin.xlane.f32.xlu0 %v6084_v10  ;;  %v5314_v34 = vadd.f32 %v5058_v45, %v4802_v55  ;;  %v5315_v3 = vadd.f32 %v5059_v18, %v4803_v40  ;;  %v5316_v12 = vadd.f32 %v5060_v52, %v4804_v0  ;;  %v5573_v44 = vmul.f32 %v4549_v15, %v4549_v15  ;;  %v13089_v15 = vld [vmem:[#allocation158_spill] sm:$0xff] }
 0x601   : > { %v5317_v61 = vadd.f32 %v5061_v14, %v4805_v31  ;;  %v4006_v5 = vsub.f32 %v13087_v50, %v9833_v16  ;;  %v4007_v58 = vsub.f32 %v13087_v50, %v9835_v36  ;;  %v4008_v20 = vsub.f32 %v13087_v50, %v9841_v24 }
 0x602   : > { %v5826_v29 = vadd.f32 %v5570_v41, %v5314_v34  ;;  %v5827_v26 = vadd.f32 %v5571_v23, %v5315_v3  ;;  %v5828_v22 = vadd.f32 %v5572_v46, %v5316_v12  ;;  %v4009_v42 = vsub.f32 %v13087_v50, %v9847_v51 }
 0x603   : > { %v5829_v56 = vadd.f32 %v5573_v44, %v5317_v61  ;;  %v4274_v17 = vsub.f32 %v13088_v53, %v9858_v43  ;;  %v4275_v9 = vsub.f32 %v13088_v53, %v9860_v4  ;;  %v4276_v39 = vsub.f32 %v13088_v53, %v9862_v7 }
 0x604   : > { %v6388_v35 = vmin.f32 %v10644_v60, %v5826_v29  ;;  %v6457_v2 = vmin.f32 %v10646_v57, %v5827_v26  ;;  %v6526_v33 = vmin.f32 %v10650_v47, %v5828_v22  ;;  %v6107_v59 = vmin.f32 %v5826_v29, %v5827_v26 }
 0x605   : > { %v6595_v28 = vmin.f32 %v10652_v63, %v5829_v56  ;;  %v4277_v54 = vsub.f32 %v13088_v53, %v9864_v62  ;;  %v4542_v55 = vsub.f32 %v13089_v15, %v9868_v6  ;;  %v4543_v40 = vsub.f32 %v13089_v15, %v9870_v21 }
 0x606   : > { %v6108_v0 = vmin.f32 %v6107_v59, %v5828_v22  ;;  %v4544_v60 = vsub.f32 %v13089_v15, %v13018_v49  ;;  %v4545_v57 = vsub.f32 %v13089_v15, %v9880_v27  ;;  %v4798_v47 = vmul.f32 %v4006_v5, %v4006_v5  ;;  %v13090_v5 = vld [vmem:[#allocation22_spill] sm:$0xff]  ;;  %v10704_v22 = vpop.xlane.xlu0 %3284 }
 0x607   : > { %v4799_v31 = vmul.f32 %v4007_v58, %v4007_v58  ;;  %v4800_v10 = vmul.f32 %v4008_v20, %v4008_v20  ;;  %v4801_v63 = vmul.f32 %v4009_v42, %v4009_v42  ;;  %v5054_v45 = vmul.f32 %v4274_v17, %v4274_v17 }
 0x608   : > { %v6109_v18 = vmin.f32 %v6108_v0, %v5829_v56  ;;  %v5055_v52 = vmul.f32 %v4275_v9, %v4275_v9  ;;  %v5056_v14 = vmul.f32 %v4276_v39, %v4276_v39  ;;  %v5057_v41 = vmul.f32 %v4277_v54, %v4277_v54  ;;  %v10708_v9 = vpop.xlane.xlu2 %3334  ;;  %v10710_v39 = vpop.xlane.xlu1 %3329  ;;  %v13091_v54 = vld [vmem:[#allocation100_spill] sm:$0xff] }
 0x609   : > { %v5310_v23 = vadd.f32 %v5054_v45, %v4798_v47  ;;  %v5566_v46 = vmul.f32 %v4542_v55, %v4542_v55  ;;  %v5567_v34 = vmul.f32 %v4543_v40, %v4543_v40  ;;  %v5568_v3 = vmul.f32 %v4544_v60, %v4544_v60 }
 0x60a   : > { %6110 = vmin.xlane.f32.xlu2 %v6109_v18  ;;  %v5311_v12 = vadd.f32 %v5055_v52, %v4799_v31  ;;  %v5312_v44 = vadd.f32 %v5056_v14, %v4800_v10  ;;  %v5313_v61 = vadd.f32 %v5057_v41, %v4801_v63  ;;  %v5569_v50 = vmul.f32 %v4545_v57, %v4545_v57  ;;  %v13092_v31 = vld [vmem:[#allocation154_spill] sm:$0xff] }
 0x60b   : > { %v5822_v29 = vadd.f32 %v5566_v46, %v5310_v23  ;;  %v4002_v58 = vsub.f32 %v13090_v5, %v9833_v16  ;;  %v4003_v20 = vsub.f32 %v13090_v5, %v9835_v36  ;;  %v4004_v26 = vsub.f32 %v13090_v5, %v9841_v24 }
 0x60c   : > { %v5823_v42 = vadd.f32 %v5567_v34, %v5311_v12  ;;  %v5824_v56 = vadd.f32 %v5568_v3, %v5312_v44  ;;  %v5825_v53 = vadd.f32 %v5569_v50, %v5313_v61  ;;  %v4005_v17 = vsub.f32 %v13090_v5, %v9847_v51 }
 0x60d   : > { %v10712_v59 = vmin.f32 %v6388_v35, %v5822_v29  ;;  %v4270_v15 = vsub.f32 %v13091_v54, %v9858_v43  ;;  %v4271_v55 = vsub.f32 %v13091_v54, %v9860_v4  ;;  %v4272_v40 = vsub.f32 %v13091_v54, %v9862_v7 }
 0x60e   : > { %v10720_v0 = vmin.f32 %v6457_v2, %v5823_v42  ;;  %v10722_v60 = vmin.f32 %v6526_v33, %v5824_v56  ;;  %v10724_v57 = vmin.f32 %v6595_v28, %v5825_v53  ;;  %v6102_v47 = vmin.f32 %v5822_v29, %v5823_v42 }
 0x60f   : > { %v4273_v35 = vsub.f32 %v13091_v54, %v9864_v62  ;;  %v4538_v10 = vsub.f32 %v13092_v31, %v9868_v6  ;;  %v4539_v63 = vsub.f32 %v13092_v31, %v9870_v21  ;;  %v4540_v45 = vsub.f32 %v13092_v31, %v13018_v49  ;;  %v13093_v54 = vld [vmem:[#allocation45_spill] sm:$0xff] }
 0x610   : > { %v6103_v18 = vmin.f32 %v6102_v47, %v5824_v56  ;;  %v4541_v2 = vsub.f32 %v13092_v31, %v9880_v27  ;;  %v4794_v33 = vmul.f32 %v4002_v58, %v4002_v58  ;;  %v4795_v28 = vmul.f32 %v4003_v20, %v4003_v20 }
 0x611   : > { %v4796_v52 = vmul.f32 %v4004_v26, %v4004_v26  ;;  %v4797_v14 = vmul.f32 %v4005_v17, %v4005_v17  ;;  %v5050_v41 = vmul.f32 %v4270_v15, %v4270_v15  ;;  %v5051_v23 = vmul.f32 %v4271_v55, %v4271_v55  ;;  %v10742_v15 = vpop.xlane.xlu0 %3309 }
 0x612   : > { %v6104_v46 = vmin.f32 %v6103_v18, %v5825_v53  ;;  %v5052_v34 = vmul.f32 %v4272_v40, %v4272_v40  ;;  %v5053_v3 = vmul.f32 %v4273_v35, %v4273_v35  ;;  %v5562_v12 = vmul.f32 %v4538_v10, %v4538_v10  ;;  %v13094_v35 = vld [vmem:[#allocation104_spill] sm:$0xff]  ;;  %v10748_v10 = vpop.xlane.xlu2 %3349 }
 0x613   : > { %v5306_v44 = vadd.f32 %v5050_v41, %v4794_v33  ;;  %v5307_v61 = vadd.f32 %v5051_v23, %v4795_v28  ;;  %v5563_v50 = vmul.f32 %v4539_v63, %v4539_v63  ;;  %v5564_v29 = vmul.f32 %v4540_v45, %v4540_v45  ;;  %13095 = vst [vmem:[#allocation8_spill] sm:$0xff] %v10748_v10  ;;  %v10750_v63 = vpop.xlane.xlu1 %3344 }
 0x614   : > { %6105 = vmin.xlane.f32.xlu1 %v6104_v46  ;;  %v5308_v5 = vadd.f32 %v5052_v34, %v4796_v52  ;;  %v5309_v42 = vadd.f32 %v5053_v3, %v4797_v14  ;;  %v5565_v56 = vmul.f32 %v4541_v2, %v4541_v2  ;;  %v4022_v58 = vsub.f32 %v13093_v54, %v9833_v16  ;;  %v13096_v46 = vld [vmem:[#allocation33_spill] sm:$0xff] }
 0x615   : > { %v5818_v20 = vadd.f32 %v5562_v12, %v5306_v44  ;;  %v5819_v26 = vadd.f32 %v5563_v50, %v5307_v61  ;;  %v4023_v17 = vsub.f32 %v13093_v54, %v9835_v36  ;;  %v4024_v53 = vsub.f32 %v13093_v54, %v9841_v24 }
 0x616   : > { %v5820_v55 = vadd.f32 %v5564_v29, %v5308_v5  ;;  %v5821_v40 = vadd.f32 %v5565_v56, %v5309_v42  ;;  %v4025_v47 = vsub.f32 %v13093_v54, %v9847_v51  ;;  %v4290_v31 = vsub.f32 %v13094_v35, %v9858_v43 }
 0x617   : > { %v6390_v45 = vmin.f32 %v10712_v59, %v5818_v20  ;;  %v6459_v18 = vmin.f32 %v10720_v0, %v5819_v26  ;;  %v6097_v2 = vmin.f32 %v5818_v20, %v5819_v26  ;;  %v4291_v33 = vsub.f32 %v13094_v35, %v9860_v4 }
 0x618   : > { %v6528_v28 = vmin.f32 %v10722_v60, %v5820_v55  ;;  %v6597_v52 = vmin.f32 %v10724_v57, %v5821_v40  ;;  %v4292_v14 = vsub.f32 %v13094_v35, %v9862_v7  ;;  %v4293_v41 = vsub.f32 %v13094_v35, %v9864_v62 }
 0x619   : > { %v6098_v23 = vmin.f32 %v6097_v2, %v5820_v55  ;;  %v4558_v59 = vsub.f32 %v13096_v46, %v9868_v6  ;;  %v4559_v0 = vsub.f32 %v13096_v46, %v9870_v21  ;;  %v4560_v34 = vsub.f32 %v13096_v46, %v13018_v49 }
 0x61a   : > { %v4561_v60 = vsub.f32 %v13096_v46, %v9880_v27  ;;  %v4814_v57 = vmul.f32 %v4022_v58, %v4022_v58  ;;  %v4815_v3 = vmul.f32 %v4023_v17, %v4023_v17  ;;  %v4816_v12 = vmul.f32 %v4024_v53, %v4024_v53  ;;  %v13097_v46 = vld [vmem:[#allocation46_spill] sm:$0xff] }
 0x61b   : > { %v6099_v44 = vmin.f32 %v6098_v23, %v5821_v40  ;;  %v4817_v61 = vmul.f32 %v4025_v47, %v4025_v47  ;;  %v5070_v50 = vmul.f32 %v4290_v31, %v4290_v31  ;;  %v5071_v29 = vmul.f32 %v4291_v33, %v4291_v33  ;;  %v10778_v33 = vpop.xlane.xlu0 %3324  ;;  %v13098_v23 = vld [vmem:[#allocation25_spill] sm:$0xff] }
 0x61c   : > { %v5072_v5 = vmul.f32 %v4292_v14, %v4292_v14  ;;  %v5073_v42 = vmul.f32 %v4293_v41, %v4293_v41  ;;  %v5582_v56 = vmul.f32 %v4558_v59, %v4558_v59  ;;  %v5583_v54 = vmul.f32 %v4559_v0, %v4559_v0 }
 0x61d   : > { %6100 = vmin.xlane.f32.xlu0 %v6099_v44  ;;  %v5326_v20 = vadd.f32 %v5070_v50, %v4814_v57  ;;  %v5327_v26 = vadd.f32 %v5071_v29, %v4815_v3  ;;  %v5584_v55 = vmul.f32 %v4560_v34, %v4560_v34  ;;  %v5585_v35 = vmul.f32 %v4561_v60, %v4561_v60  ;;  %v10784_v34 = vpop.xlane.xlu2 %3364  ;;  %v10786_v60 = vpop.xlane.xlu1 %3359  ;;  %v13100_v29 = vld [vmem:[#allocation161_spill] sm:$0xff] }
 0x61e   : > { %v5328_v2 = vadd.f32 %v5072_v5, %v4816_v12  ;;  %v5329_v38 = vadd.f32 %v5073_v42, %v4817_v61  ;;  %v4018_v58 = vsub.f32 %v13097_v46, %v9833_v16  ;;  %v4019_v17 = vsub.f32 %v13097_v46, %v9835_v36  ;;  %13099 = vst [vmem:[#allocation82_spill] sm:$0xff] %v10784_v34 }
 0x61f   : > { %v5838_v53 = vadd.f32 %v5582_v56, %v5326_v20  ;;  %v5839_v40 = vadd.f32 %v5583_v54, %v5327_v26  ;;  %v4020_v47 = vsub.f32 %v13097_v46, %v9841_v24  ;;  %v4021_v31 = vsub.f32 %v13097_v46, %v9847_v51 }
 0x620   : > { %v5840_v14 = vadd.f32 %v5584_v55, %v5328_v2  ;;  %v5841_v41 = vadd.f32 %v5585_v35, %v5329_v38  ;;  %v4286_v59 = vsub.f32 %v13098_v23, %v9858_v43  ;;  %v4287_v0 = vsub.f32 %v13098_v23, %v9860_v4 }
 0x621   : > { %v10788_v57 = vmin.f32 %v6390_v45, %v5838_v53  ;;  %v10790_v3 = vmin.f32 %v6459_v18, %v5839_v40  ;;  %v6122_v12 = vmin.f32 %v5838_v53, %v5839_v40  ;;  %v4288_v44 = vsub.f32 %v13098_v23, %v9862_v7 }
 0x622   : > { %v10794_v61 = vmin.f32 %v6528_v28, %v5840_v14  ;;  %v10796_v38 = vmin.f32 %v6597_v52, %v5841_v41  ;;  %v4289_v50 = vsub.f32 %v13098_v23, %v9864_v62  ;;  %v4554_v5 = vsub.f32 %v13100_v29, %v9868_v6 }
 0x623   : > { %v6123_v42 = vmin.f32 %v6122_v12, %v5840_v14  ;;  %v4555_v45 = vsub.f32 %v13100_v29, %v9870_v21  ;;  %v4556_v18 = vsub.f32 %v13100_v29, %v13018_v49  ;;  %v4557_v56 = vsub.f32 %v13100_v29, %v9880_v27  ;;  %v13101_v29 = vld [vmem:[#allocation28_spill] sm:$0xff] }
 0x624   : > { %v4810_v28 = vmul.f32 %v4018_v58, %v4018_v58  ;;  %v4811_v54 = vmul.f32 %v4019_v17, %v4019_v17  ;;  %v4812_v52 = vmul.f32 %v4020_v47, %v4020_v47  ;;  %v4813_v20 = vmul.f32 %v4021_v31, %v4021_v31 }
 0x625   : > { %v6124_v26 = vmin.f32 %v6123_v42, %v5841_v41  ;;  %v5066_v55 = vmul.f32 %v4286_v59, %v4286_v59  ;;  %v5067_v35 = vmul.f32 %v4287_v0, %v4287_v0  ;;  %v5068_v2 = vmul.f32 %v4288_v44, %v4288_v44  ;;  %v10816_v44 = vpop.xlane.xlu0 %3339 }
 0x626   : > { %v5069_v46 = vmul.f32 %v4289_v50, %v4289_v50  ;;  %v5578_v53 = vmul.f32 %v4554_v5, %v4554_v5  ;;  %v5579_v40 = vmul.f32 %v4555_v45, %v4555_v45  ;;  %v5580_v14 = vmul.f32 %v4556_v18, %v4556_v18  ;;  %v13102_v5 = vld [vmem:[#allocation103_spill] sm:$0xff] }
 0x627   : > { %6125 = vmin.xlane.f32.xlu2 %v6124_v26  ;;  %v5322_v23 = vadd.f32 %v5066_v55, %v4810_v28  ;;  %v5323_v12 = vadd.f32 %v5067_v35, %v4811_v54  ;;  %v5324_v25 = vadd.f32 %v5068_v2, %v4812_v52  ;;  %v5581_v11 = vmul.f32 %v4557_v56, %v4557_v56  ;;  %v10824_v56 = vpop.xlane.xlu2 %3379  ;;  %v10826_v28 = vpop.xlane.xlu1 %3374  ;;  %v13105_v26 = vld [vmem:[#allocation156_spill] sm:$0xff] }
 0x628   : > { %v5325_v37 = vadd.f32 %v5069_v46, %v4813_v20  ;;  %v4014_v58 = vsub.f32 %v13101_v29, %v9833_v16  ;;  %v4015_v17 = vsub.f32 %v13101_v29, %v9835_v36  ;;  %v4016_v47 = vsub.f32 %v13101_v29, %v9841_v24  ;;  %13103 = vst [vmem:[#allocation140_spill] sm:$0xff] %v10824_v56 }
 0x629   : > { %v5834_v31 = vadd.f32 %v5578_v53, %v5322_v23  ;;  %v5835_v41 = vadd.f32 %v5579_v40, %v5323_v12  ;;  %v5836_v59 = vadd.f32 %v5580_v14, %v5324_v25  ;;  %v4017_v0 = vsub.f32 %v13101_v29, %v9847_v51  ;;  %13104 = vst [vmem:[#allocation3_spill] sm:$0xff] %v10826_v28 }
 0x62a   : > { %v5837_v50 = vadd.f32 %v5581_v11, %v5325_v37  ;;  %v4282_v42 = vsub.f32 %v13102_v5, %v9858_v43  ;;  %v4283_v45 = vsub.f32 %v13102_v5, %v9860_v4  ;;  %v4284_v18 = vsub.f32 %v13102_v5, %v9862_v7 }
 0x62b   : > { %v6392_v25 = vmin.f32 %v10788_v57, %v5834_v31  ;;  %v6461_v54 = vmin.f32 %v10790_v3, %v5835_v41  ;;  %v6530_v52 = vmin.f32 %v10794_v61, %v5836_v59  ;;  %v6117_v37 = vmin.f32 %v5834_v31, %v5835_v41 }
 0x62c   : > { %v6599_v11 = vmin.f32 %v10796_v38, %v5837_v50  ;;  %v4285_v20 = vsub.f32 %v13102_v5, %v9864_v62  ;;  %v4550_v55 = vsub.f32 %v13105_v26, %v9868_v6  ;;  %v4551_v35 = vsub.f32 %v13105_v26, %v9870_v21 }
 0x62d   : > { %v6118_v2 = vmin.f32 %v6117_v37, %v5836_v59  ;;  %v4552_v57 = vsub.f32 %v13105_v26, %v13018_v49  ;;  %v4553_v3 = vsub.f32 %v13105_v26, %v9880_v27  ;;  %v4806_v61 = vmul.f32 %v4014_v58, %v4014_v58  ;;  %v13106_v58 = vld [vmem:[#allocation48_spill] sm:$0xff] }
 0x62e   : > { %v4807_v46 = vmul.f32 %v4015_v17, %v4015_v17  ;;  %v4808_v53 = vmul.f32 %v4016_v47, %v4016_v47  ;;  %v4809_v38 = vmul.f32 %v4017_v0, %v4017_v0  ;;  %v5062_v40 = vmul.f32 %v4282_v42, %v4282_v42 }
 0x62f   : > { %v6119_v14 = vmin.f32 %v6118_v2, %v5837_v50  ;;  %v5063_v23 = vmul.f32 %v4283_v45, %v4283_v45  ;;  %v5064_v12 = vmul.f32 %v4284_v18, %v4284_v18  ;;  %v5065_v29 = vmul.f32 %v4285_v20, %v4285_v20  ;;  %v10850_v20 = vpop.xlane.xlu0 %3354 }
 0x630   : > { %v5318_v31 = vadd.f32 %v5062_v40, %v4806_v61  ;;  %v5574_v41 = vmul.f32 %v4550_v55, %v4550_v55  ;;  %v5575_v5 = vmul.f32 %v4551_v35, %v4551_v35  ;;  %v5576_v56 = vmul.f32 %v4552_v57, %v4552_v57  ;;  %13107 = vst [vmem:[#allocation76_spill] sm:$0xff] %v10850_v20  ;;  %v13108_v55 = vld [vmem:[#allocation107_spill] sm:$0xff] }
 0x631   : > { %6120 = vmin.xlane.f32.xlu1 %v6119_v14  ;;  %v5319_v59 = vadd.f32 %v5063_v23, %v4807_v46  ;;  %v5320_v37 = vadd.f32 %v5064_v12, %v4808_v53  ;;  %v5321_v34 = vadd.f32 %v5065_v29, %v4809_v38  ;;  %v5577_v28 = vmul.f32 %v4553_v3, %v4553_v3  ;;  %v10860_v3 = vpop.xlane.xlu2 %3394  ;;  %v13111_v53 = vld [vmem:[#allocation37_spill] sm:$0xff] }
 0x632   : > { %v5830_v10 = vadd.f32 %v5574_v41, %v5318_v31  ;;  %v4034_v17 = vsub.f32 %v13106_v58, %v9833_v16  ;;  %v4035_v47 = vsub.f32 %v13106_v58, %v9835_v36  ;;  %v4036_v0 = vsub.f32 %v13106_v58, %v9841_v24  ;;  %13109 = vst [vmem:[#allocation137_spill] sm:$0xff] %v10860_v3 }
 0x633   : > { %v5831_v50 = vadd.f32 %v5575_v5, %v5319_v59  ;;  %v5832_v42 = vadd.f32 %v5576_v56, %v5320_v37  ;;  %v5833_v45 = vadd.f32 %v5577_v28, %v5321_v34  ;;  %v4037_v18 = vsub.f32 %v13106_v58, %v9847_v51  ;;  %v10862_v56 = vpop.xlane.xlu1 %3389 }
 0x634   : > { %v10852_v26 = vmin.f32 %v6392_v25, %v5830_v10  ;;  %v4302_v35 = vsub.f32 %v13108_v55, %v9858_v43  ;;  %v4303_v2 = vsub.f32 %v13108_v55, %v9860_v4  ;;  %v4304_v57 = vsub.f32 %v13108_v55, %v9862_v7  ;;  %13110 = vst [vmem:[#allocation11_spill] sm:$0xff] %v10862_v56 }
 0x635   : > { %v10864_v34 = vmin.f32 %v6461_v54, %v5831_v50  ;;  %v10866_v28 = vmin.f32 %v6530_v52, %v5832_v42  ;;  %v10868_v61 = vmin.f32 %v6599_v11, %v5833_v45  ;;  %v6112_v25 = vmin.f32 %v5830_v10, %v5831_v50 }
 0x636   : > { %v4305_v46 = vsub.f32 %v13108_v55, %v9864_v62  ;;  %v4570_v38 = vsub.f32 %v13111_v53, %v9868_v6  ;;  %v4571_v40 = vsub.f32 %v13111_v53, %v9870_v21  ;;  %v4572_v14 = vsub.f32 %v13111_v53, %v13018_v49 }
 0x637   : > { %v6113_v23 = vmin.f32 %v6112_v25, %v5832_v42  ;;  %v4573_v54 = vsub.f32 %v13111_v53, %v9880_v27  ;;  %v4826_v52 = vmul.f32 %v4034_v17, %v4034_v17  ;;  %v4827_v11 = vmul.f32 %v4035_v47, %v4035_v47  ;;  %v13112_v53 = vld [vmem:[#allocation49_spill] sm:$0xff] }
 0x638   : > { %v4828_v12 = vmul.f32 %v4036_v0, %v4036_v0  ;;  %v4829_v10 = vmul.f32 %v4037_v18, %v4037_v18  ;;  %v5082_v29 = vmul.f32 %v4302_v35, %v4302_v35  ;;  %v5083_v31 = vmul.f32 %v4303_v2, %v4303_v2 }
 0x639   : > { %v6114_v41 = vmin.f32 %v6113_v23, %v5833_v45  ;;  %v5084_v5 = vmul.f32 %v4304_v57, %v4304_v57  ;;  %v5085_v59 = vmul.f32 %v4305_v46, %v4305_v46  ;;  %v5594_v37 = vmul.f32 %v4570_v38, %v4570_v38  ;;  %v13113_v46 = vld [vmem:[#allocation31_spill] sm:$0xff] }
 0x63a   : > { %v5338_v58 = vadd.f32 %v5082_v29, %v4826_v52  ;;  %v5339_v50 = vadd.f32 %v5083_v31, %v4827_v11  ;;  %v5595_v55 = vmul.f32 %v4571_v40, %v4571_v40  ;;  %v5596_v3 = vmul.f32 %v4572_v14, %v4572_v14  ;;  %v10890_v40 = vpop.xlane.xlu0 %3369  ;;  %v10896_v11 = vpop.xlane.xlu2 %3409 }
 0x63b   : > { %6115 = vmin.xlane.f32.xlu0 %v6114_v41  ;;  %v5340_v56 = vadd.f32 %v5084_v5, %v4828_v12  ;;  %v5341_v42 = vadd.f32 %v5085_v59, %v4829_v10  ;;  %v5597_v25 = vmul.f32 %v4573_v54, %v4573_v54  ;;  %v4030_v17 = vsub.f32 %v13112_v53, %v9833_v16 }
 0x63c   : > { %v5850_v47 = vadd.f32 %v5594_v37, %v5338_v58  ;;  %v5851_v0 = vadd.f32 %v5595_v55, %v5339_v50  ;;  %v4031_v18 = vsub.f32 %v13112_v53, %v9835_v36  ;;  %v4032_v45 = vsub.f32 %v13112_v53, %v9841_v24  ;;  %13114 = vst [vmem:[#allocation10_spill] sm:$0xff] %v10890_v40 }
 0x63d   : > { %v5852_v35 = vadd.f32 %v5596_v3, %v5340_v56  ;;  %v5853_v2 = vadd.f32 %v5597_v25, %v5341_v42  ;;  %v4033_v57 = vsub.f32 %v13112_v53, %v9847_v51  ;;  %v4298_v38 = vsub.f32 %v13113_v46, %v9858_v43  ;;  %13115 = vst [vmem:[#allocation84_spill] sm:$0xff] %v10896_v11  ;;  %v10898_v3 = vpop.xlane.xlu1 %3404 }
 0x63e   : > { %v6394_v14 = vmin.f32 %v10852_v26, %v5850_v47  ;;  %v6463_v23 = vmin.f32 %v10864_v34, %v5851_v0  ;;  %v6137_v54 = vmin.f32 %v5850_v47, %v5851_v0  ;;  %v4299_v52 = vsub.f32 %v13113_v46, %v9860_v4  ;;  %13116 = vst [vmem:[#allocation144_spill] sm:$0xff] %v10898_v3  ;;  %v13117_v34 = vld [vmem:[#allocation164_spill] sm:$0xff] }
 0x63f   : > { %v6532_v56 = vmin.f32 %v10866_v28, %v5852_v35  ;;  %v6601_v12 = vmin.f32 %v10868_v61, %v5853_v2  ;;  %v4300_v10 = vsub.f32 %v13113_v46, %v9862_v7  ;;  %v4301_v26 = vsub.f32 %v13113_v46, %v9864_v62 }
 0x640   : > { %v6138_v29 = vmin.f32 %v6137_v54, %v5852_v35  ;;  %v4566_v31 = vsub.f32 %v13117_v34, %v9868_v6  ;;  %v4567_v41 = vsub.f32 %v13117_v34, %v9870_v21  ;;  %v4568_v5 = vsub.f32 %v13117_v34, %v13018_v49 }
 0x641   : > { %v4569_v28 = vsub.f32 %v13117_v34, %v9880_v27  ;;  %v4822_v61 = vmul.f32 %v4030_v17, %v4030_v17  ;;  %v4823_v59 = vmul.f32 %v4031_v18, %v4031_v18  ;;  %v4824_v37 = vmul.f32 %v4032_v45, %v4032_v45  ;;  %v13118_v34 = vld [vmem:[#allocation34_spill] sm:$0xff] }
 0x642   : > { %v6139_v58 = vmin.f32 %v6138_v29, %v5853_v2  ;;  %v4825_v50 = vmul.f32 %v4033_v57, %v4033_v57  ;;  %v5078_v55 = vmul.f32 %v4298_v38, %v4298_v38  ;;  %v5079_v42 = vmul.f32 %v4299_v52, %v4299_v52 }
 0x643   : > { %v5080_v25 = vmul.f32 %v4300_v10, %v4300_v10  ;;  %v5081_v53 = vmul.f32 %v4301_v26, %v4301_v26  ;;  %v5590_v47 = vmul.f32 %v4566_v31, %v4566_v31  ;;  %v5591_v0 = vmul.f32 %v4567_v41, %v4567_v41  ;;  %v13119_v26 = vld [vmem:[#allocation106_spill] sm:$0xff]  ;;  %v10926_v41 = vpop.xlane.xlu0 %3384 }
 0x644   : > { %6140 = vmin.xlane.f32.xlu2 %v6139_v58  ;;  %v5334_v35 = vadd.f32 %v5078_v55, %v4822_v61  ;;  %v5335_v46 = vadd.f32 %v5079_v42, %v4823_v59  ;;  %v5592_v54 = vmul.f32 %v4568_v5, %v4568_v5  ;;  %v5593_v11 = vmul.f32 %v4569_v28, %v4569_v28 }
 0x645   : > { %v5336_v3 = vadd.f32 %v5080_v25, %v4824_v37  ;;  %v5337_v40 = vadd.f32 %v5081_v53, %v4825_v50  ;;  %v4026_v17 = vsub.f32 %v13118_v34, %v9833_v16  ;;  %v4027_v18 = vsub.f32 %v13118_v34, %v9835_v36  ;;  %13120 = vst [vmem:[#allocation7_spill] sm:$0xff] %v10926_v41  ;;  %v10934_v37 = vpop.xlane.xlu2 %3424 }
 0x646   : > { %v5846_v45 = vadd.f32 %v5590_v47, %v5334_v35  ;;  %v5847_v2 = vadd.f32 %v5591_v0, %v5335_v46  ;;  %v4028_v57 = vsub.f32 %v13118_v34, %v9841_v24  ;;  %v4029_v38 = vsub.f32 %v13118_v34, %v9847_v51  ;;  %13121 = vst [vmem:[#allocation85_spill] sm:$0xff] %v10934_v37 }
 0x647   : > { %v5848_v52 = vadd.f32 %v5592_v54, %v5336_v3  ;;  %v5849_v10 = vadd.f32 %v5593_v11, %v5337_v40  ;;  %v4294_v29 = vsub.f32 %v13119_v26, %v9858_v43  ;;  %v4295_v31 = vsub.f32 %v13119_v26, %v9860_v4  ;;  %v10936_v3 = vpop.xlane.xlu1 %3419 }
 0x648   : > { %v10928_v5 = vmin.f32 %v6394_v14, %v5846_v45  ;;  %v10930_v28 = vmin.f32 %v6463_v23, %v5847_v2  ;;  %v6132_v61 = vmin.f32 %v5846_v45, %v5847_v2  ;;  %v4296_v59 = vsub.f32 %v13119_v26, %v9862_v7  ;;  %13122 = vst [vmem:[#allocation134_spill] sm:$0xff] %v10936_v3  ;;  %v13123_v14 = vld [vmem:[#allocation159_spill] sm:$0xff] }
 0x649   : > { %v10938_v40 = vmin.f32 %v6532_v56, %v5848_v52  ;;  %v10940_v11 = vmin.f32 %v6601_v12, %v5849_v10  ;;  %v4297_v58 = vsub.f32 %v13119_v26, %v9864_v62  ;;  %v4562_v50 = vsub.f32 %v13123_v14, %v9868_v6 }
 0x64a   : > { %v6133_v23 = vmin.f32 %v6132_v61, %v5848_v52  ;;  %v4563_v55 = vsub.f32 %v13123_v14, %v9870_v21  ;;  %v4564_v42 = vsub.f32 %v13123_v14, %v13018_v49  ;;  %v4565_v25 = vsub.f32 %v13123_v14, %v9880_v27  ;;  %v13124_v14 = vld [vmem:[#allocation51_spill] sm:$0xff] }
 0x64b   : > { %v4818_v56 = vmul.f32 %v4026_v17, %v4026_v17  ;;  %v4819_v53 = vmul.f32 %v4027_v18, %v4027_v18  ;;  %v4820_v12 = vmul.f32 %v4028_v57, %v4028_v57  ;;  %v4821_v47 = vmul.f32 %v4029_v38, %v4029_v38 }
 0x64c   : > { %v6134_v0 = vmin.f32 %v6133_v23, %v5849_v10  ;;  %v5074_v35 = vmul.f32 %v4294_v29, %v4294_v29  ;;  %v5075_v46 = vmul.f32 %v4295_v31, %v4295_v31  ;;  %v5076_v54 = vmul.f32 %v4296_v59, %v4296_v59 }
 0x64d   : > { %v5077_v34 = vmul.f32 %v4297_v58, %v4297_v58  ;;  %v5586_v45 = vmul.f32 %v4562_v50, %v4562_v50  ;;  %v5587_v2 = vmul.f32 %v4563_v55, %v4563_v55  ;;  %v5588_v52 = vmul.f32 %v4564_v42, %v4564_v42  ;;  %v13125_v58 = vld [vmem:[#allocation110_spill] sm:$0xff]  ;;  %v10966_v42 = vpop.xlane.xlu0 %3399 }
 0x64e   : > { %6135 = vmin.xlane.f32.xlu1 %v6134_v0  ;;  %v5330_v26 = vadd.f32 %v5074_v35, %v4818_v56  ;;  %v5331_v61 = vadd.f32 %v5075_v46, %v4819_v53  ;;  %v5332_v37 = vadd.f32 %v5076_v54, %v4820_v12  ;;  %v5589_v3 = vmul.f32 %v4565_v25, %v4565_v25  ;;  %v10971_v12 = vpop.xlane.xlu2 %3439  ;;  %v13129_v0 = vld [vmem:[#allocation157_spill] sm:$0xff] }
 0x64f   : > { %v5333_v41 = vadd.f32 %v5077_v34, %v4821_v47  ;;  %v4046_v17 = vsub.f32 %v13124_v14, %v9833_v16  ;;  %v4047_v18 = vsub.f32 %v13124_v14, %v9835_v36  ;;  %v4048_v57 = vsub.f32 %v13124_v14, %v9841_v24  ;;  %13126 = vst [vmem:[#allocation13_spill] sm:$0xff] %v10966_v42 }
 0x650   : > { %v5842_v38 = vadd.f32 %v5586_v45, %v5330_v26  ;;  %v5843_v10 = vadd.f32 %v5587_v2, %v5331_v61  ;;  %v5844_v29 = vadd.f32 %v5588_v52, %v5332_v37  ;;  %v4049_v31 = vsub.f32 %v13124_v14, %v9847_v51  ;;  %13127 = vst [vmem:[#allocation88_spill] sm:$0xff] %v10971_v12 }
 0x651   : > { %v5845_v59 = vadd.f32 %v5589_v3, %v5333_v41  ;;  %v4314_v50 = vsub.f32 %v13125_v58, %v9858_v43  ;;  %v4315_v23 = vsub.f32 %v13125_v58, %v9860_v4  ;;  %v4316_v55 = vsub.f32 %v13125_v58, %v9862_v7  ;;  %v10973_v41 = vpop.xlane.xlu1 %3434 }
 0x652   : > { %v6396_v25 = vmin.f32 %v10928_v5, %v5842_v38  ;;  %v6465_v56 = vmin.f32 %v10930_v28, %v5843_v10  ;;  %v6534_v37 = vmin.f32 %v10938_v40, %v5844_v29  ;;  %v6127_v53 = vmin.f32 %v5842_v38, %v5843_v10  ;;  %13128 = vst [vmem:[#allocation139_spill] sm:$0xff] %v10973_v41 }
 0x653   : > { %v6603_v3 = vmin.f32 %v10940_v11, %v5845_v59  ;;  %v4317_v47 = vsub.f32 %v13125_v58, %v9864_v62  ;;  %v4582_v35 = vsub.f32 %v13129_v0, %v9868_v6  ;;  %v4583_v5 = vsub.f32 %v13129_v0, %v9870_v21 }
 0x654   : > { %v6128_v46 = vmin.f32 %v6127_v53, %v5844_v29  ;;  %v4584_v28 = vsub.f32 %v13129_v0, %v13018_v49  ;;  %v4585_v40 = vsub.f32 %v13129_v0, %v9880_v27  ;;  %v4838_v54 = vmul.f32 %v4046_v17, %v4046_v17  ;;  %v13130_v17 = vld [vmem:[#allocation52_spill] sm:$0xff]  ;;  %v13131_v0 = vld [vmem:[#allocation2_spill] sm:$0xff] }
 0x655   : > { %v4839_v34 = vmul.f32 %v4047_v18, %v4047_v18  ;;  %v4840_v45 = vmul.f32 %v4048_v57, %v4048_v57  ;;  %v4841_v11 = vmul.f32 %v4049_v31, %v4049_v31  ;;  %v5094_v2 = vmul.f32 %v4314_v50, %v4314_v50 }
 0x656   : > { %v6129_v52 = vmin.f32 %v6128_v46, %v5845_v59  ;;  %v5095_v26 = vmul.f32 %v4315_v23, %v4315_v23  ;;  %v5096_v61 = vmul.f32 %v4316_v55, %v4316_v55  ;;  %v5097_v14 = vmul.f32 %v4317_v47, %v4317_v47 }
 0x657   : > { %v5350_v38 = vadd.f32 %v5094_v2, %v4838_v54  ;;  %v5606_v10 = vmul.f32 %v4582_v35, %v4582_v35  ;;  %v5607_v58 = vmul.f32 %v4583_v5, %v4583_v5  ;;  %v5608_v12 = vmul.f32 %v4584_v28, %v4584_v28  ;;  %v11002_v28 = vpop.xlane.xlu0 %3414 }
 0x658   : > { %6130 = vmin.xlane.f32.xlu0 %v6129_v52  ;;  %v5351_v29 = vadd.f32 %v5095_v26, %v4839_v34  ;;  %v5352_v53 = vadd.f32 %v5096_v61, %v4840_v45  ;;  %v5353_v41 = vadd.f32 %v5097_v14, %v4841_v11  ;;  %v5609_v42 = vmul.f32 %v4585_v40, %v4585_v40  ;;  %v13135_v45 = vld [vmem:[#allocation167_spill] sm:$0xff] }
 0x659   : > { %v5862_v20 = vadd.f32 %v5606_v10, %v5350_v38  ;;  %v4042_v18 = vsub.f32 %v13130_v17, %v9833_v16  ;;  %v4043_v57 = vsub.f32 %v13130_v17, %v9835_v36  ;;  %v4044_v31 = vsub.f32 %v13130_v17, %v9841_v24  ;;  %13132 = vst [vmem:[#allocation14_spill] sm:$0xff] %v11002_v28  ;;  %v11012_v54 = vpop.xlane.xlu1 %3449 }
 0x65a   : > { %v5863_v59 = vadd.f32 %v5607_v58, %v5351_v29  ;;  %v5864_v50 = vadd.f32 %v5608_v12, %v5352_v53  ;;  %v5865_v23 = vadd.f32 %v5609_v42, %v5353_v41  ;;  %v4045_v55 = vsub.f32 %v13130_v17, %v9847_v51  ;;  %13134 = vst [vmem:[#allocation147_spill] sm:$0xff] %v11012_v54 }
 0x65b   : > { %v10994_v47 = vmin.f32 %v6396_v25, %v5862_v20  ;;  %v4310_v35 = vsub.f32 %v13131_v0, %v9858_v43  ;;  %v4311_v5 = vsub.f32 %v13131_v0, %v9860_v4  ;;  %v4312_v46 = vsub.f32 %v13131_v0, %v9862_v7  ;;  %v11010_v25 = vpop.xlane.xlu2 %3454 }
 0x65c   : > { %v11004_v40 = vmin.f32 %v6465_v56, %v5863_v59  ;;  %v11006_v12 = vmin.f32 %v6534_v37, %v5864_v50  ;;  %v11008_v42 = vmin.f32 %v6603_v3, %v5865_v23  ;;  %v6152_v41 = vmin.f32 %v5862_v20, %v5863_v59  ;;  %13133 = vst [vmem:[#allocation79_spill] sm:$0xff] %v11010_v25 }
 0x65d   : > { %v4313_v34 = vsub.f32 %v13131_v0, %v9864_v62  ;;  %v4578_v11 = vsub.f32 %v13135_v45, %v9868_v6  ;;  %v4579_v2 = vsub.f32 %v13135_v45, %v9870_v21  ;;  %v4580_v56 = vsub.f32 %v13135_v45, %v13018_v49 }
 0x65e   : > { %v6153_v37 = vmin.f32 %v6152_v41, %v5864_v50  ;;  %v4581_v20 = vsub.f32 %v13135_v45, %v9880_v27  ;;  %v4834_v3 = vmul.f32 %v4042_v18, %v4042_v18  ;;  %v4835_v52 = vmul.f32 %v4043_v57, %v4043_v57  ;;  %v13136_v45 = vld [vmem:[#allocation38_spill] sm:$0xff] }
 0x65f   : > { %v4836_v26 = vmul.f32 %v4044_v31, %v4044_v31  ;;  %v4837_v61 = vmul.f32 %v4045_v55, %v4045_v55  ;;  %v5090_v14 = vmul.f32 %v4310_v35, %v4310_v35  ;;  %v5091_v38 = vmul.f32 %v4311_v5, %v4311_v5 }
 0x660   : > { %v6154_v10 = vmin.f32 %v6153_v37, %v5865_v23  ;;  %v5092_v58 = vmul.f32 %v4312_v46, %v4312_v46  ;;  %v5093_v29 = vmul.f32 %v4313_v34, %v4313_v34  ;;  %v5602_v53 = vmul.f32 %v4578_v11, %v4578_v11  ;;  %v13137_v34 = vld [vmem:[#allocation109_spill] sm:$0xff] }
 0x661   : > { %v5346_v17 = vadd.f32 %v5090_v14, %v4834_v3  ;;  %v5347_v59 = vadd.f32 %v5091_v38, %v4835_v52  ;;  %v5603_v0 = vmul.f32 %v4579_v2, %v4579_v2  ;;  %v5604_v25 = vmul.f32 %v4580_v56, %v4580_v56  ;;  %v11038_v3 = vpop.xlane.xlu0 %3429  ;;  %v13141_v14 = vld [vmem:[#allocation162_spill] sm:$0xff] }
 0x662   : > { %6155 = vmin.xlane.f32.xlu2 %v6154_v10  ;;  %v5348_v54 = vadd.f32 %v5092_v58, %v4836_v26  ;;  %v5349_v50 = vadd.f32 %v5093_v29, %v4837_v61  ;;  %v5605_v41 = vmul.f32 %v4581_v20, %v4581_v20  ;;  %v4038_v18 = vsub.f32 %v13136_v45, %v9833_v16 }
 0x663   : > { %v5858_v57 = vadd.f32 %v5602_v53, %v5346_v17  ;;  %v5859_v31 = vadd.f32 %v5603_v0, %v5347_v59  ;;  %v4039_v55 = vsub.f32 %v13136_v45, %v9835_v36  ;;  %v4040_v23 = vsub.f32 %v13136_v45, %v9841_v24  ;;  %13138 = vst [vmem:[#allocation4_spill] sm:$0xff] %v11038_v3  ;;  %v11046_v61 = vpop.xlane.xlu2 %3469 }
 0x664   : > { %v5860_v35 = vadd.f32 %v5604_v25, %v5348_v54  ;;  %v5861_v5 = vadd.f32 %v5605_v41, %v5349_v50  ;;  %v4041_v46 = vsub.f32 %v13136_v45, %v9847_v51  ;;  %v4306_v11 = vsub.f32 %v13137_v34, %v9858_v43  ;;  %13139 = vst [vmem:[#allocation87_spill] sm:$0xff] %v11046_v61 }
 0x665   : > { %v6398_v2 = vmin.f32 %v10994_v47, %v5858_v57  ;;  %v6467_v56 = vmin.f32 %v11004_v40, %v5859_v31  ;;  %v6147_v37 = vmin.f32 %v5858_v57, %v5859_v31  ;;  %v4307_v20 = vsub.f32 %v13137_v34, %v9860_v4  ;;  %v11048_v47 = vpop.xlane.xlu1 %3464 }
 0x666   : > { %v6536_v52 = vmin.f32 %v11006_v12, %v5860_v35  ;;  %v6605_v25 = vmin.f32 %v11008_v42, %v5861_v5  ;;  %v4308_v54 = vsub.f32 %v13137_v34, %v9862_v7  ;;  %v4309_v26 = vsub.f32 %v13137_v34, %v9864_v62  ;;  %13140 = vst [vmem:[#allocation142_spill] sm:$0xff] %v11048_v47 }
 0x667   : > { %v6148_v40 = vmin.f32 %v6147_v37, %v5860_v35  ;;  %v4574_v38 = vsub.f32 %v13141_v14, %v9868_v6  ;;  %v4575_v10 = vsub.f32 %v13141_v14, %v9870_v21  ;;  %v4576_v12 = vsub.f32 %v13141_v14, %v13018_v49 }
 0x668   : > { %v4577_v42 = vsub.f32 %v13141_v14, %v9880_v27  ;;  %v4830_v58 = vmul.f32 %v4038_v18, %v4038_v18  ;;  %v4831_v29 = vmul.f32 %v4039_v55, %v4039_v55  ;;  %v4832_v53 = vmul.f32 %v4040_v23, %v4040_v23  ;;  %v13142_v14 = vld [vmem:[#allocation54_spill] sm:$0xff] }
 0x669   : > { %v6149_v17 = vmin.f32 %v6148_v40, %v5861_v5  ;;  %v4833_v59 = vmul.f32 %v4041_v46, %v4041_v46  ;;  %v5086_v0 = vmul.f32 %v4306_v11, %v4306_v11  ;;  %v5087_v50 = vmul.f32 %v4307_v20, %v4307_v20 }
 0x66a   : > { %v5088_v41 = vmul.f32 %v4308_v54, %v4308_v54  ;;  %v5089_v45 = vmul.f32 %v4309_v26, %v4309_v26  ;;  %v5598_v57 = vmul.f32 %v4574_v38, %v4574_v38  ;;  %v5599_v31 = vmul.f32 %v4575_v10, %v4575_v10  ;;  %v13143_v26 = vld [vmem:[#allocation113_spill] sm:$0xff] }
 0x66b   : > { %6150 = vmin.xlane.f32.xlu1 %v6149_v17  ;;  %v5342_v35 = vadd.f32 %v5086_v0, %v4830_v58  ;;  %v5343_v34 = vadd.f32 %v5087_v50, %v4831_v29  ;;  %v5600_v37 = vmul.f32 %v4576_v12, %v4576_v12  ;;  %v5601_v61 = vmul.f32 %v4577_v42, %v4577_v42  ;;  %v11076_v29 = vpop.xlane.xlu0 %3444 }
 0x66c   : > { %v5344_v47 = vadd.f32 %v5088_v41, %v4832_v53  ;;  %v5345_v3 = vadd.f32 %v5089_v45, %v4833_v59  ;;  %v4058_v18 = vsub.f32 %v13142_v14, %v9833_v16  ;;  %v4059_v55 = vsub.f32 %v13142_v14, %v9835_v36  ;;  %13144 = vst [vmem:[#allocation17_spill] sm:$0xff] %v11076_v29 }
 0x66d   : > { %v5854_v23 = vadd.f32 %v5598_v57, %v5342_v35  ;;  %v5855_v5 = vadd.f32 %v5599_v31, %v5343_v34  ;;  %v4060_v46 = vsub.f32 %v13142_v14, %v9841_v24  ;;  %v4061_v11 = vsub.f32 %v13142_v14, %v9847_v51 }
 0x66e   : > { %v5856_v20 = vadd.f32 %v5600_v37, %v5344_v47  ;;  %v5857_v54 = vadd.f32 %v5601_v61, %v5345_v3  ;;  %v4326_v40 = vsub.f32 %v13143_v26, %v9858_v43  ;;  %v4327_v38 = vsub.f32 %v13143_v26, %v9860_v4  ;;  %v13145_v61 = vld [vmem:[#allocation160_spill] sm:$0xff] }
 0x66f   : > { %v11070_v10 = vmin.f32 %v6398_v2, %v5854_v23  ;;  %v11072_v12 = vmin.f32 %v6467_v56, %v5855_v5  ;;  %v6142_v42 = vmin.f32 %v5854_v23, %v5855_v5  ;;  %v4328_v58 = vsub.f32 %v13143_v26, %v9862_v7  ;;  %v11086_v2 = vpop.xlane.xlu2 %3484  ;;  %v11088_v56 = vpop.xlane.xlu1 %3479 }
 0x670   : > { %v11078_v53 = vmin.f32 %v6536_v52, %v5856_v20  ;;  %v11080_v47 = vmin.f32 %v6605_v25, %v5857_v54  ;;  %v4329_v3 = vsub.f32 %v13143_v26, %v9864_v62  ;;  %v4594_v17 = vsub.f32 %v13145_v61, %v9868_v6  ;;  %13146 = vst [vmem:[#allocation91_spill] sm:$0xff] %v11086_v2 }
 0x671   : > { %13147 = vst [vmem:[#allocation141_spill] sm:$0xff] %v11088_v56  ;;  %v6143_v59 = vmin.f32 %v6142_v42, %v5856_v20  ;;  %v4595_v0 = vsub.f32 %v13145_v61, %v9870_v21  ;;  %v4596_v52 = vsub.f32 %v13145_v61, %v13018_v49  ;;  %v4597_v25 = vsub.f32 %v13145_v61, %v9880_v27  ;;  %v13148_v61 = vld [vmem:[#allocation55_spill] sm:$0xff] }
 0x672   : > { %v4850_v50 = vmul.f32 %v4058_v18, %v4058_v18  ;;  %v4851_v41 = vmul.f32 %v4059_v55, %v4059_v55  ;;  %v4852_v45 = vmul.f32 %v4060_v46, %v4060_v46  ;;  %v4853_v57 = vmul.f32 %v4061_v11, %v4061_v11 }
 0x673   : > { %v6144_v31 = vmin.f32 %v6143_v59, %v5857_v54  ;;  %v5106_v35 = vmul.f32 %v4326_v40, %v4326_v40  ;;  %v5107_v34 = vmul.f32 %v4327_v38, %v4327_v38  ;;  %v5108_v37 = vmul.f32 %v4328_v58, %v4328_v58 }
 0x674   : > { %v5109_v14 = vmul.f32 %v4329_v3, %v4329_v3  ;;  %v5618_v23 = vmul.f32 %v4594_v17, %v4594_v17  ;;  %v5619_v5 = vmul.f32 %v4595_v0, %v4595_v0  ;;  %v5620_v20 = vmul.f32 %v4596_v52, %v4596_v52  ;;  %v13149_v3 = vld [vmem:[#allocation102_spill] sm:$0xff] }
 0x675   : > { %6145 = vmin.xlane.f32.xlu0 %v6144_v31  ;;  %v5362_v26 = vadd.f32 %v5106_v35, %v4850_v50  ;;  %v5363_v42 = vadd.f32 %v5107_v34, %v4851_v41  ;;  %v5364_v2 = vadd.f32 %v5108_v37, %v4852_v45  ;;  %v5621_v56 = vmul.f32 %v4597_v25, %v4597_v25  ;;  %v11113_v41 = vpop.xlane.xlu0 %3459  ;;  %v13151_v45 = vld [vmem:[#allocation170_spill] sm:$0xff] }
 0x676   : > { %v5365_v29 = vadd.f32 %v5109_v14, %v4853_v57  ;;  %v4054_v18 = vsub.f32 %v13148_v61, %v9833_v16  ;;  %v4055_v55 = vsub.f32 %v13148_v61, %v9835_v36  ;;  %v4056_v46 = vsub.f32 %v13148_v61, %v9841_v24  ;;  %13150 = vst [vmem:[#allocation18_spill] sm:$0xff] %v11113_v41 }
 0x677   : > { %v5874_v11 = vadd.f32 %v5618_v23, %v5362_v26  ;;  %v5875_v54 = vadd.f32 %v5619_v5, %v5363_v42  ;;  %v5876_v40 = vadd.f32 %v5620_v20, %v5364_v2  ;;  %v4057_v38 = vsub.f32 %v13148_v61, %v9847_v51  ;;  %v11122_v35 = vpop.xlane.xlu2 %3499 }
 0x678   : > { %v5877_v58 = vadd.f32 %v5621_v56, %v5365_v29  ;;  %v4322_v17 = vsub.f32 %v13149_v3, %v9858_v43  ;;  %v4323_v59 = vsub.f32 %v13149_v3, %v9860_v4  ;;  %v4324_v0 = vsub.f32 %v13149_v3, %v9862_v7  ;;  %13152 = vst [vmem:[#allocation81_spill] sm:$0xff] %v11122_v35 }
 0x679   : > { %v6400_v52 = vmin.f32 %v11070_v10, %v5874_v11  ;;  %v6469_v25 = vmin.f32 %v11072_v12, %v5875_v54  ;;  %v6538_v50 = vmin.f32 %v11078_v53, %v5876_v40  ;;  %v6167_v2 = vmin.f32 %v5874_v11, %v5875_v54  ;;  %v11124_v10 = vpop.xlane.xlu1 %3494 }
 0x67a   : > { %v6607_v29 = vmin.f32 %v11080_v47, %v5877_v58  ;;  %v4325_v56 = vsub.f32 %v13149_v3, %v9864_v62  ;;  %v4590_v57 = vsub.f32 %v13151_v45, %v9868_v6  ;;  %v4591_v31 = vsub.f32 %v13151_v45, %v9870_v21  ;;  %13153 = vst [vmem:[#allocation149_spill] sm:$0xff] %v11124_v10 }
 0x67b   : > { %v6168_v12 = vmin.f32 %v6167_v2, %v5876_v40  ;;  %v4592_v53 = vsub.f32 %v13151_v45, %v13018_v49  ;;  %v4593_v47 = vsub.f32 %v13151_v45, %v9880_v27  ;;  %v4846_v34 = vmul.f32 %v4054_v18, %v4054_v18  ;;  %v13154_v18 = vld [vmem:[#allocation41_spill] sm:$0xff]  ;;  %v13155_v45 = vld [vmem:[#allocation112_spill] sm:$0xff] }
 0x67c   : > { %v4847_v37 = vmul.f32 %v4055_v55, %v4055_v55  ;;  %v4848_v14 = vmul.f32 %v4056_v46, %v4056_v46  ;;  %v4849_v23 = vmul.f32 %v4057_v38, %v4057_v38  ;;  %v5102_v5 = vmul.f32 %v4322_v17, %v4322_v17 }
 0x67d   : > { %v6169_v20 = vmin.f32 %v6168_v12, %v5877_v58  ;;  %v5103_v26 = vmul.f32 %v4323_v59, %v4323_v59  ;;  %v5104_v42 = vmul.f32 %v4324_v0, %v4324_v0  ;;  %v5105_v61 = vmul.f32 %v4325_v56, %v4325_v56 }
 0x67e   : > { %v5358_v11 = vadd.f32 %v5102_v5, %v4846_v34  ;;  %v5614_v54 = vmul.f32 %v4590_v57, %v4590_v57  ;;  %v5615_v3 = vmul.f32 %v4591_v31, %v4591_v31  ;;  %v5616_v35 = vmul.f32 %v4592_v53, %v4592_v53  ;;  %v13156_v34 = vld [vmem:[#allocation165_spill] sm:$0xff] }
 0x67f   : > { %6170 = vmin.xlane.f32.xlu2 %v6169_v20  ;;  %v5359_v40 = vadd.f32 %v5103_v26, %v4847_v37  ;;  %v5360_v2 = vadd.f32 %v5104_v42, %v4848_v14  ;;  %v5361_v10 = vadd.f32 %v5105_v61, %v4849_v23  ;;  %v5617_v41 = vmul.f32 %v4593_v47, %v4593_v47  ;;  %v11162_v23 = vpop.xlane.xlu2 %3514 }
 0x680   : > { %v5870_v28 = vadd.f32 %v5614_v54, %v5358_v11  ;;  %v4050_v55 = vsub.f32 %v13154_v18, %v9833_v16  ;;  %v4051_v46 = vsub.f32 %v13154_v18, %v9835_v36  ;;  %v4052_v38 = vsub.f32 %v13154_v18, %v9841_v24  ;;  %13157 = vst [vmem:[#allocation5_spill] sm:$0xff] %v11162_v23 }
 0x681   : > { %v5871_v58 = vadd.f32 %v5615_v3, %v5359_v40  ;;  %v5872_v17 = vadd.f32 %v5616_v35, %v5360_v2  ;;  %v5873_v59 = vadd.f32 %v5617_v41, %v5361_v10  ;;  %v4053_v0 = vsub.f32 %v13154_v18, %v9847_v51  ;;  %v11152_v10 = vpop.xlane.xlu0 %3474 }
 0x682   : > { %v11138_v56 = vmin.f32 %v6400_v52, %v5870_v28  ;;  %v4318_v57 = vsub.f32 %v13155_v45, %v9858_v43  ;;  %v4319_v31 = vsub.f32 %v13155_v45, %v9860_v4  ;;  %v4320_v12 = vsub.f32 %v13155_v45, %v9862_v7 }
 0x683   : > { %v11146_v53 = vmin.f32 %v6469_v25, %v5871_v58  ;;  %v11148_v47 = vmin.f32 %v6538_v50, %v5872_v17  ;;  %v11150_v35 = vmin.f32 %v6607_v29, %v5873_v59  ;;  %v6162_v41 = vmin.f32 %v5870_v28, %v5871_v58  ;;  %v11164_v50 = vpop.xlane.xlu1 %3509 }
 0x684   : > { %v4321_v52 = vsub.f32 %v13155_v45, %v9864_v62  ;;  %v4586_v37 = vsub.f32 %v13156_v34, %v9868_v6  ;;  %v4587_v14 = vsub.f32 %v13156_v34, %v9870_v21  ;;  %v4588_v25 = vsub.f32 %v13156_v34, %v13018_v49  ;;  %13158 = vst [vmem:[#allocation90_spill] sm:$0xff] %v11164_v50 }
 0x685   : > { %v6163_v29 = vmin.f32 %v6162_v41, %v5872_v17  ;;  %v4589_v28 = vsub.f32 %v13156_v34, %v9880_v27  ;;  %v4842_v5 = vmul.f32 %v4050_v55, %v4050_v55  ;;  %v4843_v20 = vmul.f32 %v4051_v46, %v4051_v46  ;;  %v13159_v34 = vld [vmem:[#allocation57_spill] sm:$0xff] }
 0x686   : > { %v4844_v26 = vmul.f32 %v4052_v38, %v4052_v38  ;;  %v4845_v42 = vmul.f32 %v4053_v0, %v4053_v0  ;;  %v5098_v61 = vmul.f32 %v4318_v57, %v4318_v57  ;;  %v5099_v11 = vmul.f32 %v4319_v31, %v4319_v31 }
 0x687   : > { %v6164_v54 = vmin.f32 %v6163_v29, %v5873_v59  ;;  %v5100_v3 = vmul.f32 %v4320_v12, %v4320_v12  ;;  %v5101_v40 = vmul.f32 %v4321_v52, %v4321_v52  ;;  %v5610_v2 = vmul.f32 %v4586_v37, %v4586_v37  ;;  %v13160_v52 = vld [vmem:[#allocation116_spill] sm:$0xff] }
 0x688   : > { %v5354_v18 = vadd.f32 %v5098_v61, %v4842_v5  ;;  %v5355_v58 = vadd.f32 %v5099_v11, %v4843_v20  ;;  %v5611_v45 = vmul.f32 %v4587_v14, %v4587_v14  ;;  %v5612_v23 = vmul.f32 %v4588_v25, %v4588_v25  ;;  %v11196_v11 = vpop.xlane.xlu2 %3529 }
 0x689   : > { %6165 = vmin.xlane.f32.xlu1 %v6164_v54  ;;  %v5356_v50 = vadd.f32 %v5100_v3, %v4844_v26  ;;  %v5357_v17 = vadd.f32 %v5101_v40, %v4845_v42  ;;  %v5613_v41 = vmul.f32 %v4589_v28, %v4589_v28  ;;  %v4070_v55 = vsub.f32 %v13159_v34, %v9833_v16  ;;  %v11188_v26 = vpop.xlane.xlu0 %3489 }
 0x68a   : > { %v5866_v46 = vadd.f32 %v5610_v2, %v5354_v18  ;;  %v5867_v38 = vadd.f32 %v5611_v45, %v5355_v58  ;;  %v4071_v0 = vsub.f32 %v13159_v34, %v9835_v36  ;;  %v4072_v59 = vsub.f32 %v13159_v34, %v9841_v24  ;;  %13161 = vst [vmem:[#allocation145_spill] sm:$0xff] %v11188_v26 }
 0x68b   : > { %v5868_v57 = vadd.f32 %v5612_v23, %v5356_v50  ;;  %v5869_v31 = vadd.f32 %v5613_v41, %v5357_v17  ;;  %v4073_v12 = vsub.f32 %v13159_v34, %v9847_v51  ;;  %v4338_v37 = vsub.f32 %v13160_v52, %v9858_v43  ;;  %13163 = vst [vmem:[#allocation23_spill] sm:$0xff] %v11196_v11 }
 0x68c   : > { %v6402_v14 = vmin.f32 %v11138_v56, %v5866_v46  ;;  %v6471_v25 = vmin.f32 %v11146_v53, %v5867_v38  ;;  %v6157_v29 = vmin.f32 %v5866_v46, %v5867_v38  ;;  %v4339_v28 = vsub.f32 %v13160_v52, %v9860_v4  ;;  %v13162_v56 = vld [vmem:[#allocation163_spill] sm:$0xff] }
 0x68d   : > { %v6540_v5 = vmin.f32 %v11148_v47, %v5868_v57  ;;  %v6609_v20 = vmin.f32 %v11150_v35, %v5869_v31  ;;  %v4340_v23 = vsub.f32 %v13160_v52, %v9862_v7  ;;  %v4341_v50 = vsub.f32 %v13160_v52, %v9864_v62  ;;  %v11198_v35 = vpop.xlane.xlu1 %3524 }
 0x68e   : > { %v6158_v42 = vmin.f32 %v6157_v29, %v5868_v57  ;;  %v4606_v53 = vsub.f32 %v13162_v56, %v9868_v6  ;;  %v4607_v61 = vsub.f32 %v13162_v56, %v9870_v21  ;;  %v4608_v47 = vsub.f32 %v13162_v56, %v13018_v49  ;;  %13164 = vst [vmem:[#allocation94_spill] sm:$0xff] %v11198_v35 }
 0x68f   : > { %v4609_v54 = vsub.f32 %v13162_v56, %v9880_v27  ;;  %v4862_v3 = vmul.f32 %v4070_v55, %v4070_v55  ;;  %v4863_v40 = vmul.f32 %v4071_v0, %v4071_v0  ;;  %v4864_v2 = vmul.f32 %v4072_v59, %v4072_v59  ;;  %v13165_v56 = vld [vmem:[#allocation58_spill] sm:$0xff] }
 0x690   : > { %v6159_v18 = vmin.f32 %v6158_v42, %v5869_v31  ;;  %v4865_v58 = vmul.f32 %v4073_v12, %v4073_v12  ;;  %v5118_v45 = vmul.f32 %v4338_v37, %v4338_v37  ;;  %v5119_v17 = vmul.f32 %v4339_v28, %v4339_v28 }
 0x691   : > { %v5120_v41 = vmul.f32 %v4340_v23, %v4340_v23  ;;  %v5121_v34 = vmul.f32 %v4341_v50, %v4341_v50  ;;  %v5630_v46 = vmul.f32 %v4606_v53, %v4606_v53  ;;  %v5631_v38 = vmul.f32 %v4607_v61, %v4607_v61  ;;  %v13166_v50 = vld [vmem:[#allocation105_spill] sm:$0xff] }
 0x692   : > { %6160 = vmin.xlane.f32.xlu0 %v6159_v18  ;;  %v5374_v57 = vadd.f32 %v5118_v45, %v4862_v3  ;;  %v5375_v52 = vadd.f32 %v5119_v17, %v4863_v40  ;;  %v5632_v29 = vmul.f32 %v4608_v47, %v4608_v47  ;;  %v5633_v11 = vmul.f32 %v4609_v54, %v4609_v54  ;;  %v11228_v18 = vpop.xlane.xlu0 %3504 }
 0x693   : > { %v5376_v35 = vadd.f32 %v5120_v41, %v4864_v2  ;;  %v5377_v26 = vadd.f32 %v5121_v34, %v4865_v58  ;;  %v4066_v55 = vsub.f32 %v13165_v56, %v9833_v16  ;;  %v4067_v0 = vsub.f32 %v13165_v56, %v9835_v36  ;;  %13168 = vst [vmem:[#allocation143_spill] sm:$0xff] %v11228_v18 }
 0x694   : > { %v5886_v59 = vadd.f32 %v5630_v46, %v5374_v57  ;;  %v5887_v31 = vadd.f32 %v5631_v38, %v5375_v52  ;;  %v4068_v12 = vsub.f32 %v13165_v56, %v9841_v24  ;;  %v4069_v37 = vsub.f32 %v13165_v56, %v9847_v51 }
 0x695   : > { %v5888_v28 = vadd.f32 %v5632_v29, %v5376_v35  ;;  %v5889_v23 = vadd.f32 %v5633_v11, %v5377_v26  ;;  %v4334_v42 = vsub.f32 %v13166_v50, %v9858_v43  ;;  %v4335_v53 = vsub.f32 %v13166_v50, %v9860_v4  ;;  %v13167_v11 = vld [vmem:[#allocation173_spill] sm:$0xff]  ;;  %v11238_v45 = vpop.xlane.xlu1 %3539 }
 0x696   : > { %v11214_v61 = vmin.f32 %v6402_v14, %v5886_v59  ;;  %v11216_v47 = vmin.f32 %v6471_v25, %v5887_v31  ;;  %v6182_v54 = vmin.f32 %v5886_v59, %v5887_v31  ;;  %v4336_v3 = vsub.f32 %v13166_v50, %v9862_v7  ;;  %13170 = vst [vmem:[#allocation83_spill] sm:$0xff] %v11238_v45  ;;  %v13171_v45 = vld [vmem:[#allocation44_spill] sm:$0xff] }
 0x697   : > { %v11220_v40 = vmin.f32 %v6540_v5, %v5888_v28  ;;  %v11222_v2 = vmin.f32 %v6609_v20, %v5889_v23  ;;  %v4337_v26 = vsub.f32 %v13166_v50, %v9864_v62  ;;  %v4602_v35 = vsub.f32 %v13167_v11, %v9868_v6  ;;  %v11236_v20 = vpop.xlane.xlu2 %3544 }
 0x698   : > { %v6183_v14 = vmin.f32 %v6182_v54, %v5888_v28  ;;  %v4603_v25 = vsub.f32 %v13167_v11, %v9870_v21  ;;  %v4604_v58 = vsub.f32 %v13167_v11, %v13018_v49  ;;  %v4605_v5 = vsub.f32 %v13167_v11, %v9880_v27  ;;  %13169 = vst [vmem:[#allocation24_spill] sm:$0xff] %v11236_v20 }
 0x699   : > { %v4858_v17 = vmul.f32 %v4066_v55, %v4066_v55  ;;  %v4859_v41 = vmul.f32 %v4067_v0, %v4067_v0  ;;  %v4860_v34 = vmul.f32 %v4068_v12, %v4068_v12  ;;  %v4861_v46 = vmul.f32 %v4069_v37, %v4069_v37 }
 0x69a   : > { %v6184_v38 = vmin.f32 %v6183_v14, %v5889_v23  ;;  %v5114_v57 = vmul.f32 %v4334_v42, %v4334_v42  ;;  %v5115_v52 = vmul.f32 %v4335_v53, %v4335_v53  ;;  %v5116_v29 = vmul.f32 %v4336_v3, %v4336_v3 }
 0x69b   : > { %v5117_v56 = vmul.f32 %v4337_v26, %v4337_v26  ;;  %v5626_v59 = vmul.f32 %v4602_v35, %v4602_v35  ;;  %v5627_v31 = vmul.f32 %v4603_v25, %v4603_v25  ;;  %v5628_v28 = vmul.f32 %v4604_v58, %v4604_v58  ;;  %v13172_v26 = vld [vmem:[#allocation115_spill] sm:$0xff] }
 0x69c   : > { %6185 = vmin.xlane.f32.xlu2 %v6184_v38  ;;  %v5370_v50 = vadd.f32 %v5114_v57, %v4858_v17  ;;  %v5371_v54 = vadd.f32 %v5115_v52, %v4859_v41  ;;  %v5372_v11 = vadd.f32 %v5116_v29, %v4860_v34  ;;  %v5629_v18 = vmul.f32 %v4605_v5, %v4605_v5  ;;  %v11264_v38 = vpop.xlane.xlu0 %3519 }
 0x69d   : > { %v5373_v20 = vadd.f32 %v5117_v56, %v4861_v46  ;;  %v4062_v55 = vsub.f32 %v13171_v45, %v9833_v16  ;;  %v4063_v0 = vsub.f32 %v13171_v45, %v9835_v36  ;;  %v4064_v12 = vsub.f32 %v13171_v45, %v9841_v24  ;;  %13174 = vst [vmem:[#allocation21_spill] sm:$0xff] %v11264_v38  ;;  %v11272_v52 = vpop.xlane.xlu1 %3554 }
 0x69e   : > { %v5882_v37 = vadd.f32 %v5626_v59, %v5370_v50  ;;  %v5883_v23 = vadd.f32 %v5627_v31, %v5371_v54  ;;  %v5884_v42 = vadd.f32 %v5628_v28, %v5372_v11  ;;  %v4065_v53 = vsub.f32 %v13171_v45, %v9847_v51  ;;  %13176 = vst [vmem:[#allocation93_spill] sm:$0xff] %v11272_v52  ;;  %v13177_v52 = vld [vmem:[#allocation60_spill] sm:$0xff] }
 0x69f   : > { %v5885_v3 = vadd.f32 %v5629_v18, %v5373_v20  ;;  %v4330_v35 = vsub.f32 %v13172_v26, %v9858_v43  ;;  %v4331_v14 = vsub.f32 %v13172_v26, %v9860_v4  ;;  %v4332_v25 = vsub.f32 %v13172_v26, %v9862_v7  ;;  %v13173_v20 = vld [vmem:[#allocation168_spill] sm:$0xff] }
 0x6a0   : > { %v6404_v58 = vmin.f32 %v11214_v61, %v5882_v37  ;;  %v6473_v5 = vmin.f32 %v11216_v47, %v5883_v23  ;;  %v6542_v17 = vmin.f32 %v11220_v40, %v5884_v42  ;;  %v6177_v41 = vmin.f32 %v5882_v37, %v5883_v23 }
 0x6a1   : > { %v6611_v34 = vmin.f32 %v11222_v2, %v5885_v3  ;;  %v4333_v18 = vsub.f32 %v13172_v26, %v9864_v62  ;;  %v4598_v45 = vsub.f32 %v13173_v20, %v9868_v6  ;;  %v4599_v46 = vsub.f32 %v13173_v20, %v9870_v21  ;;  %v11270_v2 = vpop.xlane.xlu2 %3559 }
 0x6a2   : > { %v6178_v57 = vmin.f32 %v6177_v41, %v5884_v42  ;;  %v4600_v61 = vsub.f32 %v13173_v20, %v13018_v49  ;;  %v4601_v47 = vsub.f32 %v13173_v20, %v9880_v27  ;;  %v4854_v40 = vmul.f32 %v4062_v55, %v4062_v55  ;;  %13175 = vst [vmem:[#allocation6_spill] sm:$0xff] %v11270_v2 }
 0x6a3   : > { %v4855_v29 = vmul.f32 %v4063_v0, %v4063_v0  ;;  %v4856_v56 = vmul.f32 %v4064_v12, %v4064_v12  ;;  %v4857_v59 = vmul.f32 %v4065_v53, %v4065_v53  ;;  %v5110_v31 = vmul.f32 %v4330_v35, %v4330_v35 }
 0x6a4   : > { %v6179_v28 = vmin.f32 %v6178_v57, %v5885_v3  ;;  %v5111_v50 = vmul.f32 %v4331_v14, %v4331_v14  ;;  %v5112_v54 = vmul.f32 %v4332_v25, %v4332_v25  ;;  %v5113_v11 = vmul.f32 %v4333_v18, %v4333_v18 }
 0x6a5   : > { %v5366_v37 = vadd.f32 %v5110_v31, %v4854_v40  ;;  %v5622_v23 = vmul.f32 %v4598_v45, %v4598_v45  ;;  %v5623_v42 = vmul.f32 %v4599_v46, %v4599_v46  ;;  %v5624_v26 = vmul.f32 %v4600_v61, %v4600_v61  ;;  %v13178_v45 = vld [vmem:[#allocation119_spill] sm:$0xff] }
 0x6a6   : > { %6180 = vmin.xlane.f32.xlu1 %v6179_v28  ;;  %v5367_v41 = vadd.f32 %v5111_v50, %v4855_v29  ;;  %v5368_v20 = vadd.f32 %v5112_v54, %v4856_v56  ;;  %v5369_v55 = vadd.f32 %v5113_v11, %v4857_v59  ;;  %v5625_v38 = vmul.f32 %v4601_v47, %v4601_v47  ;;  %v11304_v28 = vpop.xlane.xlu0 %3534  ;;  %v11310_v54 = vpop.xlane.xlu1 %3569 }
 0x6a7   : > { %v5878_v2 = vadd.f32 %v5622_v23, %v5366_v37  ;;  %v4082_v0 = vsub.f32 %v13177_v52, %v9833_v16  ;;  %v4083_v12 = vsub.f32 %v13177_v52, %v9835_v36  ;;  %v4084_v53 = vsub.f32 %v13177_v52, %v9841_v24  ;;  %13180 = vst [vmem:[#allocation148_spill] sm:$0xff] %v11304_v28 }
 0x6a8   : > { %v5879_v3 = vadd.f32 %v5623_v42, %v5367_v41  ;;  %v5880_v35 = vadd.f32 %v5624_v26, %v5368_v20  ;;  %v5881_v14 = vadd.f32 %v5625_v38, %v5369_v55  ;;  %v4085_v25 = vsub.f32 %v13177_v52, %v9847_v51  ;;  %v13179_v52 = vld [vmem:[#allocation166_spill] sm:$0xff]  ;;  %13182 = vst [vmem:[#allocation96_spill] sm:$0xff] %v11310_v54 }
 0x6a9   : > { %v11282_v18 = vmin.f32 %v6404_v58, %v5878_v2  ;;  %v4350_v46 = vsub.f32 %v13178_v45, %v9858_v43  ;;  %v4351_v57 = vsub.f32 %v13178_v45, %v9860_v4  ;;  %v4352_v61 = vsub.f32 %v13178_v45, %v9862_v7  ;;  %v11308_v50 = vpop.xlane.xlu2 %3574 }
 0x6aa   : > { %v11290_v47 = vmin.f32 %v6473_v5, %v5879_v3  ;;  %v11292_v40 = vmin.f32 %v6542_v17, %v5880_v35  ;;  %v11294_v29 = vmin.f32 %v6611_v34, %v5881_v14  ;;  %v6172_v38 = vmin.f32 %v5878_v2, %v5879_v3  ;;  %13181 = vst [vmem:[#allocation29_spill] sm:$0xff] %v11308_v50  ;;  %v13183_v50 = vld [vmem:[#allocation61_spill] sm:$0xff] }
 0x6ab   : > { %v4353_v58 = vsub.f32 %v13178_v45, %v9864_v62  ;;  %v4618_v56 = vsub.f32 %v13179_v52, %v9868_v6  ;;  %v4619_v59 = vsub.f32 %v13179_v52, %v9870_v21  ;;  %v4620_v31 = vsub.f32 %v13179_v52, %v13018_v49 }
 0x6ac   : > { %v6173_v5 = vmin.f32 %v6172_v38, %v5880_v35  ;;  %v4621_v17 = vsub.f32 %v13179_v52, %v9880_v27  ;;  %v4874_v34 = vmul.f32 %v4082_v0, %v4082_v0  ;;  %v4875_v2 = vmul.f32 %v4083_v12, %v4083_v12 }
 0x6ad   : > { %v4876_v11 = vmul.f32 %v4084_v53, %v4084_v53  ;;  %v4877_v37 = vmul.f32 %v4085_v25, %v4085_v25  ;;  %v5130_v23 = vmul.f32 %v4350_v46, %v4350_v46  ;;  %v5131_v42 = vmul.f32 %v4351_v57, %v4351_v57 }
 0x6ae   : > { %v6174_v26 = vmin.f32 %v6173_v5, %v5881_v14  ;;  %v5132_v41 = vmul.f32 %v4352_v61, %v4352_v61  ;;  %v5133_v20 = vmul.f32 %v4353_v58, %v4353_v58  ;;  %v5642_v55 = vmul.f32 %v4618_v56, %v4618_v56  ;;  %v13184_v58 = vld [vmem:[#allocation108_spill] sm:$0xff] }
 0x6af   : > { %v5386_v3 = vadd.f32 %v5130_v23, %v4874_v34  ;;  %v5387_v45 = vadd.f32 %v5131_v42, %v4875_v2  ;;  %v5643_v35 = vmul.f32 %v4619_v59, %v4619_v59  ;;  %v5644_v38 = vmul.f32 %v4620_v31, %v4620_v31  ;;  %v13185_v23 = vld [vmem:[#allocation176_spill] sm:$0xff]  ;;  %v11338_v42 = vpop.xlane.xlu0 %3549 }
 0x6b0   : > { %6175 = vmin.xlane.f32.xlu0 %v6174_v26  ;;  %v5388_v52 = vadd.f32 %v5132_v41, %v4876_v11  ;;  %v5389_v0 = vadd.f32 %v5133_v20, %v4877_v37  ;;  %v5645_v12 = vmul.f32 %v4621_v17, %v4621_v17  ;;  %v4078_v28 = vsub.f32 %v13183_v50, %v9833_v16 }
 0x6b1   : > { %v5898_v54 = vadd.f32 %v5642_v55, %v5386_v3  ;;  %v5899_v53 = vadd.f32 %v5643_v35, %v5387_v45  ;;  %v4079_v25 = vsub.f32 %v13183_v50, %v9835_v36  ;;  %v4080_v14 = vsub.f32 %v13183_v50, %v9841_v24  ;;  %13186 = vst [vmem:[#allocation146_spill] sm:$0xff] %v11338_v42  ;;  %v11342_v20 = vpop.xlane.xlu2 %3589  ;;  %v11344_v55 = vpop.xlane.xlu1 %3584 }
 0x6b2   : > { %v5900_v46 = vadd.f32 %v5644_v38, %v5388_v52  ;;  %v5901_v57 = vadd.f32 %v5645_v12, %v5389_v0  ;;  %v4081_v61 = vsub.f32 %v13183_v50, %v9847_v51  ;;  %v4346_v56 = vsub.f32 %v13184_v58, %v9858_v43  ;;  %13187 = vst [vmem:[#allocation30_spill] sm:$0xff] %v11342_v20 }
 0x6b3   : > { %v6406_v59 = vmin.f32 %v11282_v18, %v5898_v54  ;;  %v6475_v31 = vmin.f32 %v11290_v47, %v5899_v53  ;;  %v6197_v5 = vmin.f32 %v5898_v54, %v5899_v53  ;;  %v4347_v17 = vsub.f32 %v13184_v58, %v9860_v4  ;;  %13188 = vst [vmem:[#allocation86_spill] sm:$0xff] %v11344_v55 }
 0x6b4   : > { %v6544_v34 = vmin.f32 %v11292_v40, %v5900_v46  ;;  %v6613_v2 = vmin.f32 %v11294_v29, %v5901_v57  ;;  %v4348_v11 = vsub.f32 %v13184_v58, %v9862_v7  ;;  %v4349_v50 = vsub.f32 %v13184_v58, %v9864_v62 }
 0x6b5   : > { %v6198_v37 = vmin.f32 %v6197_v5, %v5900_v46  ;;  %v4614_v18 = vsub.f32 %v13185_v23, %v9868_v6  ;;  %v4615_v47 = vsub.f32 %v13185_v23, %v9870_v21  ;;  %v4616_v54 = vsub.f32 %v13185_v23, %v13018_v49 }
 0x6b6   : > { %v4617_v40 = vsub.f32 %v13185_v23, %v9880_v27  ;;  %v4870_v29 = vmul.f32 %v4078_v28, %v4078_v28  ;;  %v4871_v26 = vmul.f32 %v4079_v25, %v4079_v25  ;;  %v4872_v41 = vmul.f32 %v4080_v14, %v4080_v14  ;;  %v13189_v14 = vld [vmem:[#allocation47_spill] sm:$0xff] }
 0x6b7   : > { %v6199_v3 = vmin.f32 %v6198_v37, %v5901_v57  ;;  %v4873_v45 = vmul.f32 %v4081_v61, %v4081_v61  ;;  %v5126_v35 = vmul.f32 %v4346_v56, %v4346_v56  ;;  %v5127_v38 = vmul.f32 %v4347_v17, %v4347_v17 }
 0x6b8   : > { %v5128_v52 = vmul.f32 %v4348_v11, %v4348_v11  ;;  %v5129_v0 = vmul.f32 %v4349_v50, %v4349_v50  ;;  %v5638_v12 = vmul.f32 %v4614_v18, %v4614_v18  ;;  %v5639_v53 = vmul.f32 %v4615_v47, %v4615_v47  ;;  %v13190_v18 = vld [vmem:[#allocation118_spill] sm:$0xff] }
 0x6b9   : > { %6200 = vmin.xlane.f32.xlu2 %v6199_v3  ;;  %v5382_v46 = vadd.f32 %v5126_v35, %v4870_v29  ;;  %v5383_v58 = vadd.f32 %v5127_v38, %v4871_v26  ;;  %v5640_v5 = vmul.f32 %v4616_v54, %v4616_v54  ;;  %v5641_v23 = vmul.f32 %v4617_v40, %v4617_v40  ;;  %v13191_v38 = vld [vmem:[#allocation171_spill] sm:$0xff] }
 0x6ba   : > { %v5384_v28 = vadd.f32 %v5128_v52, %v4872_v41  ;;  %v5385_v25 = vadd.f32 %v5129_v0, %v4873_v45  ;;  %v4074_v20 = vsub.f32 %v13189_v14, %v9833_v16  ;;  %v4075_v57 = vsub.f32 %v13189_v14, %v9835_v36 }
 0x6bb   : > { %v5894_v61 = vadd.f32 %v5638_v12, %v5382_v46  ;;  %v5895_v56 = vadd.f32 %v5639_v53, %v5383_v58  ;;  %v4076_v17 = vsub.f32 %v13189_v14, %v9841_v24  ;;  %v4077_v11 = vsub.f32 %v13189_v14, %v9847_v51  ;;  %v5991_v14 = vpop.xlane.xlu2 %5990 }
 0x6bc   : > { %v5896_v50 = vadd.f32 %v5640_v5, %v5384_v28  ;;  %v5897_v37 = vadd.f32 %v5641_v23, %v5385_v25  ;;  %v4342_v47 = vsub.f32 %v13190_v18, %v9858_v43  ;;  %v4343_v54 = vsub.f32 %v13190_v18, %v9860_v4 }
 0x6bd   : > { %v11358_v40 = vmin.f32 %v6406_v59, %v5894_v61  ;;  %v11360_v29 = vmin.f32 %v6475_v31, %v5895_v56  ;;  %v6192_v26 = vmin.f32 %v5894_v61, %v5895_v56  ;;  %v4344_v41 = vsub.f32 %v13190_v18, %v9862_v7  ;;  %v5986_v61 = vpop.xlane.xlu1 %5985 }
 0x6be   : > { %v11364_v3 = vmin.f32 %v6544_v34, %v5896_v50  ;;  %v11366_v45 = vmin.f32 %v6613_v2, %v5897_v37  ;;  %v4345_v35 = vsub.f32 %v13190_v18, %v9864_v62  ;;  %v4610_v52 = vsub.f32 %v13191_v38, %v9868_v6  ;;  %v11378_v34 = vpop.xlane.xlu0 %3564 }
 0x6bf   : > { %v6193_v0 = vmin.f32 %v6192_v26, %v5896_v50  ;;  %v4611_v59 = vsub.f32 %v13191_v38, %v9870_v21  ;;  %v4612_v31 = vsub.f32 %v13191_v38, %v13018_v49  ;;  %v4613_v12 = vsub.f32 %v13191_v38, %v9880_v27  ;;  %13192 = vst [vmem:[#allocation27_spill] sm:$0xff] %v11378_v34 }
 0x6c0   : > { %v4866_v2 = vmul.f32 %v4074_v20, %v4074_v20  ;;  %v4867_v53 = vmul.f32 %v4075_v57, %v4075_v57  ;;  %v4868_v46 = vmul.f32 %v4076_v17, %v4076_v17  ;;  %v4869_v58 = vmul.f32 %v4077_v11, %v4077_v11 }
 0x6c1   : > { %v6194_v5 = vmin.f32 %v6193_v0, %v5897_v37  ;;  %v5122_v23 = vmul.f32 %v4342_v47, %v4342_v47  ;;  %v5123_v28 = vmul.f32 %v4343_v54, %v4343_v54  ;;  %v5124_v25 = vmul.f32 %v4344_v41, %v4344_v41  ;;  %v13193_v54 = vld [vmem:[#allocation63_spill] sm:$0xff] }
 0x6c2   : > { %v5125_v56 = vmul.f32 %v4345_v35, %v4345_v35  ;;  %v5634_v50 = vmul.f32 %v4610_v52, %v4610_v52  ;;  %v5635_v18 = vmul.f32 %v4611_v59, %v4611_v59  ;;  %v5636_v26 = vmul.f32 %v4612_v31, %v4612_v31 }
 0x6c3   : > { %6195 = vmin.xlane.f32.xlu1 %v6194_v5  ;;  %v5378_v55 = vadd.f32 %v5122_v23, %v4866_v2  ;;  %v5379_v38 = vadd.f32 %v5123_v28, %v4867_v53  ;;  %v5380_v42 = vadd.f32 %v5124_v25, %v4868_v46  ;;  %v5637_v34 = vmul.f32 %v4613_v12, %v4613_v12  ;;  %v13194_v12 = vld [vmem:[#allocation122_spill] sm:$0xff] }
 0x6c4   : > { %v5381_v20 = vadd.f32 %v5125_v56, %v4869_v58  ;;  %vm6657_vm5 = vcmask 7168   ;;  %v6303_v57 = vmin.f32 %v10704_v22, %v5991_v14  ;;  %v6302_v17 = vmin.f32 %v10670_v19, %v5986_v61 }
 0x6c5   : > { %v5890_v11 = vadd.f32 %v5634_v50, %v5378_v55  ;;  %v5891_v37 = vadd.f32 %v5635_v18, %v5379_v38  ;;  %v5892_v47 = vadd.f32 %v5636_v26, %v5380_v42  ;;  %v4094_v41 = vsub.f32 %v13193_v54, %v9833_v16 }
 0x6c6   : > { %v5893_v35 = vadd.f32 %v5637_v34, %v5381_v20  ;;  %6659 = vst.msk [vmem:[%s7123_s11 + $0x8] sm:$0xff] %vm6657_vm5, %v6303_v57  ;;  %v4095_v52 = vsub.f32 %v13193_v54, %v9835_v36  ;;  %v4096_v0 = vsub.f32 %v13193_v54, %v9841_v24  ;;  %v4097_v22 = vsub.f32 %v13193_v54, %v9847_v51  ;;  %v11414_v25 = vpop.xlane.xlu0 %3579 }
 0x6c7   : > { %v6408_v19 = vmin.f32 %v11358_v40, %v5890_v11  ;;  %v6477_v55 = vmin.f32 %v11360_v29, %v5891_v37  ;;  %v6546_v42 = vmin.f32 %v11364_v3, %v5892_v47  ;;  %v6187_v59 = vmin.f32 %v5890_v11, %v5891_v37  ;;  %6658 = vst.msk [vmem:[%s7123_s11] sm:$0xff] %vm6657_vm5, %v6302_v17  ;;  %v13195_v29 = vld [vmem:[#allocation169_spill] sm:$0xff] }
 0x6c8   : > { %v6615_v31 = vmin.f32 %v11366_v45, %v5893_v35  ;;  %v4362_v34 = vsub.f32 %v13194_v12, %v9858_v43  ;;  %v4363_v2 = vsub.f32 %v13194_v12, %v9860_v4  ;;  %v4364_v53 = vsub.f32 %v13194_v12, %v9862_v7 }
 0x6c9   : > { %v6188_v46 = vmin.f32 %v6187_v59, %v5892_v47  ;;  %v4365_v40 = vsub.f32 %v13194_v12, %v9864_v62  ;;  %v4630_v3 = vsub.f32 %v13195_v29, %v9868_v6  ;;  %v4631_v58 = vsub.f32 %v13195_v29, %v9870_v21 }
 0x6ca   : > { %v4632_v45 = vsub.f32 %v13195_v29, %v13018_v49  ;;  %v4633_v5 = vsub.f32 %v13195_v29, %v9880_v27  ;;  %v4886_v23 = vmul.f32 %v4094_v41, %v4094_v41  ;;  %v4887_v28 = vmul.f32 %v4095_v52, %v4095_v52  ;;  %v13196_v41 = vld [vmem:[#allocation64_spill] sm:$0xff] }
 0x6cb   : > { %v6189_v14 = vmin.f32 %v6188_v46, %v5893_v35  ;;  %v4888_v61 = vmul.f32 %v4096_v0, %v4096_v0  ;;  %v4889_v56 = vmul.f32 %v4097_v22, %v4097_v22  ;;  %v5142_v50 = vmul.f32 %v4362_v34, %v4362_v34  ;;  %v13197_v46 = vld [vmem:[#allocation111_spill] sm:$0xff] }
 0x6cc   : > { %v5143_v18 = vmul.f32 %v4363_v2, %v4363_v2  ;;  %v5144_v26 = vmul.f32 %v4364_v53, %v4364_v53  ;;  %v5145_v38 = vmul.f32 %v4365_v40, %v4365_v40  ;;  %v5654_v20 = vmul.f32 %v4630_v3, %v4630_v3 }
 0x6cd   : > { %6190 = vmin.xlane.f32.xlu0 %v6189_v14  ;;  %v5398_v57 = vadd.f32 %v5142_v50, %v4886_v23  ;;  %v5655_v17 = vmul.f32 %v4631_v58, %v4631_v58  ;;  %v5656_v11 = vmul.f32 %v4632_v45, %v4632_v45  ;;  %v5657_v37 = vmul.f32 %v4633_v5, %v4633_v5 }
 0x6ce   : > { %v5399_v47 = vadd.f32 %v5143_v18, %v4887_v28  ;;  %v5400_v54 = vadd.f32 %v5144_v26, %v4888_v61  ;;  %v5401_v59 = vadd.f32 %v5145_v38, %v4889_v56  ;;  %v4090_v52 = vsub.f32 %v13196_v41, %v9833_v16  ;;  %v13198_v61 = vld [vmem:[#allocation179_spill] sm:$0xff] }
 0x6cf   : > { %v5910_v12 = vadd.f32 %v5654_v20, %v5398_v57  ;;  %v4091_v35 = vsub.f32 %v13196_v41, %v9835_v36  ;;  %v4092_v0 = vsub.f32 %v13196_v41, %v9841_v24  ;;  %v4093_v22 = vsub.f32 %v13196_v41, %v9847_v51  ;;  %v11448_v20 = vpop.xlane.xlu0 %3594 }
 0x6d0   : > { %v5911_v34 = vadd.f32 %v5655_v17, %v5399_v47  ;;  %v5912_v2 = vadd.f32 %v5656_v11, %v5400_v54  ;;  %v5913_v53 = vadd.f32 %v5657_v37, %v5401_v59  ;;  %v4358_v40 = vsub.f32 %v13197_v46, %v9858_v43 }
 0x6d1   : > { %v11426_v29 = vmin.f32 %v6408_v19, %v5910_v12  ;;  %v4359_v3 = vsub.f32 %v13197_v46, %v9860_v4  ;;  %v4360_v58 = vsub.f32 %v13197_v46, %v9862_v7  ;;  %v4361_v45 = vsub.f32 %v13197_v46, %v9864_v62 }
 0x6d2   : > { %v11434_v5 = vmin.f32 %v6477_v55, %v5911_v34  ;;  %v11436_v23 = vmin.f32 %v6546_v42, %v5912_v2  ;;  %v11438_v28 = vmin.f32 %v6615_v31, %v5913_v53  ;;  %v6212_v14 = vmin.f32 %v5910_v12, %v5911_v34 }
 0x6d3   : > { %v4626_v19 = vsub.f32 %v13198_v61, %v9868_v6  ;;  %v4627_v56 = vsub.f32 %v13198_v61, %v9870_v21  ;;  %v4628_v50 = vsub.f32 %v13198_v61, %v13018_v49  ;;  %v4629_v18 = vsub.f32 %v13198_v61, %v9880_v27 }
 0x6d4   : > { %v6213_v26 = vmin.f32 %v6212_v14, %v5912_v2  ;;  %v4882_v55 = vmul.f32 %v4090_v52, %v4090_v52  ;;  %v4883_v38 = vmul.f32 %v4091_v35, %v4091_v35  ;;  %v4884_v42 = vmul.f32 %v4092_v0, %v4092_v0  ;;  %v13199_v52 = vld [vmem:[#allocation50_spill] sm:$0xff]  ;;  %v13200_v14 = vld [vmem:[#allocation121_spill] sm:$0xff] }
 0x6d5   : > { %v4885_v31 = vmul.f32 %v4093_v22, %v4093_v22  ;;  %v5138_v57 = vmul.f32 %v4358_v40, %v4358_v40  ;;  %v5139_v17 = vmul.f32 %v4359_v3, %v4359_v3  ;;  %v5140_v11 = vmul.f32 %v4360_v58, %v4360_v58 }
 0x6d6   : > { %v6214_v37 = vmin.f32 %v6213_v26, %v5913_v53  ;;  %v5141_v47 = vmul.f32 %v4361_v45, %v4361_v45  ;;  %v5650_v54 = vmul.f32 %v4626_v19, %v4626_v19  ;;  %v5651_v59 = vmul.f32 %v4627_v56, %v4627_v56 }
 0x6d7   : > { %v5394_v41 = vadd.f32 %v5138_v57, %v4882_v55  ;;  %v5395_v12 = vadd.f32 %v5139_v17, %v4883_v38  ;;  %v5396_v34 = vadd.f32 %v5140_v11, %v4884_v42  ;;  %v5652_v46 = vmul.f32 %v4628_v50, %v4628_v50  ;;  %v13201_v57 = vld [vmem:[#allocation174_spill] sm:$0xff] }
 0x6d8   : > { %6215 = vmin.xlane.f32.xlu2 %v6214_v37  ;;  %v5397_v61 = vadd.f32 %v5141_v47, %v4885_v31  ;;  %v5653_v2 = vmul.f32 %v4629_v18, %v4629_v18  ;;  %v4086_v35 = vsub.f32 %v13199_v52, %v9833_v16  ;;  %v4087_v0 = vsub.f32 %v13199_v52, %v9835_v36 }
 0x6d9   : > { %v5906_v22 = vadd.f32 %v5650_v54, %v5394_v41  ;;  %v5907_v40 = vadd.f32 %v5651_v59, %v5395_v12  ;;  %v5908_v3 = vadd.f32 %v5652_v46, %v5396_v34  ;;  %v4088_v53 = vsub.f32 %v13199_v52, %v9841_v24  ;;  %v6006_v59 = vpop.xlane.xlu2 %6005 }
 0x6da   : > { %v5909_v58 = vadd.f32 %v5653_v2, %v5397_v61  ;;  %v4089_v45 = vsub.f32 %v13199_v52, %v9847_v51  ;;  %v4354_v19 = vsub.f32 %v13200_v14, %v9858_v43  ;;  %v4355_v56 = vsub.f32 %v13200_v14, %v9860_v4  ;;  %v6001_v61 = vpop.xlane.xlu1 %6000  ;;  %v5996_v2 = vpop.xlane.xlu0 %5995 }
 0x6db   : > { %v6410_v50 = vmin.f32 %v11426_v29, %v5906_v22  ;;  %v6479_v18 = vmin.f32 %v11434_v5, %v5907_v40  ;;  %v6548_v26 = vmin.f32 %v11436_v23, %v5908_v3  ;;  %v6207_v55 = vmin.f32 %v5906_v22, %v5907_v40 }
 0x6dc   : > { %v6617_v38 = vmin.f32 %v11438_v28, %v5909_v58  ;;  %v4356_v42 = vsub.f32 %v13200_v14, %v9862_v7  ;;  %v4357_v31 = vsub.f32 %v13200_v14, %v9864_v62  ;;  %v4622_v17 = vsub.f32 %v13201_v57, %v9868_v6 }
 0x6dd   : > { %v6208_v11 = vmin.f32 %v6207_v55, %v5908_v3  ;;  %v4623_v29 = vsub.f32 %v13201_v57, %v9870_v21  ;;  %v4624_v5 = vsub.f32 %v13201_v57, %v13018_v49  ;;  %v4625_v23 = vsub.f32 %v13201_v57, %v9880_v27 }
 0x6de   : > { %v4878_v28 = vmul.f32 %v4086_v35, %v4086_v35  ;;  %v4879_v37 = vmul.f32 %v4087_v0, %v4087_v0  ;;  %v4880_v47 = vmul.f32 %v4088_v53, %v4088_v53  ;;  %v4881_v54 = vmul.f32 %v4089_v45, %v4089_v45 }
 0x6df   : > { %v6209_v41 = vmin.f32 %v6208_v11, %v5909_v58  ;;  %v5134_v12 = vmul.f32 %v4354_v19, %v4354_v19  ;;  %v5135_v34 = vmul.f32 %v4355_v56, %v4355_v56  ;;  %v5136_v46 = vmul.f32 %v4356_v42, %v4356_v42 }
 0x6e0   : > { %v5137_v52 = vmul.f32 %v4357_v31, %v4357_v31  ;;  %v5646_v22 = vmul.f32 %v4622_v17, %v4622_v17  ;;  %v5647_v40 = vmul.f32 %v4623_v29, %v4623_v29  ;;  %v5648_v3 = vmul.f32 %v4624_v5, %v4624_v5  ;;  %v13202_v31 = vld [vmem:[#allocation66_spill] sm:$0xff] }
 0x6e1   : > { %6210 = vmin.xlane.f32.xlu1 %v6209_v41  ;;  %v5390_v14 = vadd.f32 %v5134_v12, %v4878_v28  ;;  %v5391_v55 = vadd.f32 %v5135_v34, %v4879_v37  ;;  %v5392_v57 = vadd.f32 %v5136_v46, %v4880_v47  ;;  %v5649_v35 = vmul.f32 %v4625_v23, %v4625_v23  ;;  %v13203_v47 = vld [vmem:[#allocation125_spill] sm:$0xff]  ;;  %v13204_v41 = vld [vmem:[#allocation172_spill] sm:$0xff] }
 0x6e2   : > { %v5393_v0 = vadd.f32 %v5137_v52, %v4881_v54  ;;  %v6306_v53 = vmin.f32 %v10602_v1, %v6006_v59  ;;  %v6305_v58 = vmin.f32 %v10638_v13, %v6001_v61  ;;  %v6304_v45 = vmin.f32 %v10604_v8, %v5996_v2 }
 0x6e3   : > { %v5902_v19 = vadd.f32 %v5646_v22, %v5390_v14  ;;  %v5903_v56 = vadd.f32 %v5647_v40, %v5391_v55  ;;  %v5904_v42 = vadd.f32 %v5648_v3, %v5392_v57  ;;  %v4106_v17 = vsub.f32 %v13202_v31, %v9833_v16 }
 0x6e4   : > { %v5905_v11 = vadd.f32 %v5649_v35, %v5393_v0  ;;  %6662 = vst.msk [vmem:[%s7123_s11 + $0x20] sm:$0xff] %vm6657_vm5, %v6306_v53  ;;  %v4107_v29 = vsub.f32 %v13202_v31, %v9835_v36  ;;  %v4108_v1 = vsub.f32 %v13202_v31, %v9841_v24  ;;  %v4109_v13 = vsub.f32 %v13202_v31, %v9847_v51  ;;  %v13205_v31 = vld [vmem:[#allocation67_spill] sm:$0xff] }
 0x6e5   : > { %v11491_v8 = vmin.f32 %v6410_v50, %v5902_v19  ;;  %v11493_v5 = vmin.f32 %v6479_v18, %v5903_v56  ;;  %v11495_v23 = vmin.f32 %v6548_v26, %v5904_v42  ;;  %v6202_v28 = vmin.f32 %v5902_v19, %v5903_v56  ;;  %6661 = vst.msk [vmem:[%s7123_s11 + $0x18] sm:$0xff] %vm6657_vm5, %v6305_v58 }
 0x6e6   : > { %v11499_v37 = vmin.f32 %v6617_v38, %v5905_v11  ;;  %6660 = vst.msk [vmem:[%s7123_s11 + $0x10] sm:$0xff] %vm6657_vm5, %v6304_v45  ;;  %v4374_v54 = vsub.f32 %v13203_v47, %v9858_v43  ;;  %v4375_v59 = vsub.f32 %v13203_v47, %v9860_v4  ;;  %v4376_v50 = vsub.f32 %v13203_v47, %v9862_v7 }
 0x6e7   : > { %v6203_v18 = vmin.f32 %v6202_v28, %v5904_v42  ;;  %v4377_v26 = vsub.f32 %v13203_v47, %v9864_v62  ;;  %v4642_v12 = vsub.f32 %v13204_v41, %v9868_v6  ;;  %v4643_v38 = vsub.f32 %v13204_v41, %v9870_v21 }
 0x6e8   : > { %v4644_v34 = vsub.f32 %v13204_v41, %v13018_v49  ;;  %v4645_v46 = vsub.f32 %v13204_v41, %v9880_v27  ;;  %v4898_v61 = vmul.f32 %v4106_v17, %v4106_v17  ;;  %v4899_v2 = vmul.f32 %v4107_v29, %v4107_v29 }
 0x6e9   : > { %v6204_v52 = vmin.f32 %v6203_v18, %v5905_v11  ;;  %v4900_v22 = vmul.f32 %v4108_v1, %v4108_v1  ;;  %v4901_v40 = vmul.f32 %v4109_v13, %v4109_v13  ;;  %v5154_v3 = vmul.f32 %v4374_v54, %v4374_v54 }
 0x6ea   : > { %v5155_v14 = vmul.f32 %v4375_v59, %v4375_v59  ;;  %v5156_v55 = vmul.f32 %v4376_v50, %v4376_v50  ;;  %v5157_v57 = vmul.f32 %v4377_v26, %v4377_v26  ;;  %v5666_v35 = vmul.f32 %v4642_v12, %v4642_v12  ;;  %v13206_v59 = vld [vmem:[#allocation114_spill] sm:$0xff] }
 0x6eb   : > { %6205 = vmin.xlane.f32.xlu0 %v6204_v52  ;;  %v5410_v0 = vadd.f32 %v5154_v3, %v4898_v61  ;;  %v5667_v53 = vmul.f32 %v4643_v38, %v4643_v38  ;;  %v5668_v58 = vmul.f32 %v4644_v34, %v4644_v34  ;;  %v5669_v45 = vmul.f32 %v4645_v46, %v4645_v46 }
 0x6ec   : > { %v5411_v19 = vadd.f32 %v5155_v14, %v4899_v2  ;;  %v5412_v56 = vadd.f32 %v5156_v55, %v4900_v22  ;;  %v5413_v42 = vadd.f32 %v5157_v57, %v4901_v40  ;;  %v4102_v17 = vsub.f32 %v13205_v31, %v9833_v16  ;;  %v13207_v2 = vld [vmem:[#allocation182_spill] sm:$0xff] }
 0x6ed   : > { %v5922_v29 = vadd.f32 %v5666_v35, %v5410_v0  ;;  %v4103_v11 = vsub.f32 %v13205_v31, %v9835_v36  ;;  %v4104_v1 = vsub.f32 %v13205_v31, %v9841_v24  ;;  %v4105_v13 = vsub.f32 %v13205_v31, %v9847_v51 }
 0x6ee   : > { %v5923_v28 = vadd.f32 %v5667_v53, %v5411_v19  ;;  %v5924_v47 = vadd.f32 %v5668_v58, %v5412_v56  ;;  %v5925_v54 = vadd.f32 %v5669_v45, %v5413_v42  ;;  %v4370_v50 = vsub.f32 %v13206_v59, %v9858_v43 }
 0x6ef   : > { %v6412_v18 = vmin.f32 %v11491_v8, %v5922_v29  ;;  %v4371_v26 = vsub.f32 %v13206_v59, %v9860_v4  ;;  %v4372_v41 = vsub.f32 %v13206_v59, %v9862_v7  ;;  %v4373_v12 = vsub.f32 %v13206_v59, %v9864_v62 }
 0x6f0   : > { %v6481_v38 = vmin.f32 %v11493_v5, %v5923_v28  ;;  %v6550_v34 = vmin.f32 %v11495_v23, %v5924_v47  ;;  %v6619_v46 = vmin.f32 %v11499_v37, %v5925_v54  ;;  %v6227_v61 = vmin.f32 %v5922_v29, %v5923_v28 }
 0x6f1   : > { %v4638_v52 = vsub.f32 %v13207_v2, %v9868_v6  ;;  %v4639_v8 = vsub.f32 %v13207_v2, %v9870_v21  ;;  %v4640_v22 = vsub.f32 %v13207_v2, %v13018_v49  ;;  %v4641_v40 = vsub.f32 %v13207_v2, %v9880_v27 }
 0x6f2   : > { %v6228_v3 = vmin.f32 %v6227_v61, %v5924_v47  ;;  %v4894_v14 = vmul.f32 %v4102_v17, %v4102_v17  ;;  %v4895_v5 = vmul.f32 %v4103_v11, %v4103_v11  ;;  %v4896_v55 = vmul.f32 %v4104_v1, %v4104_v1  ;;  %v13208_v47 = vld [vmem:[#allocation53_spill] sm:$0xff] }
 0x6f3   : > { %v4897_v23 = vmul.f32 %v4105_v13, %v4105_v13  ;;  %v5150_v57 = vmul.f32 %v4370_v50, %v4370_v50  ;;  %v5151_v37 = vmul.f32 %v4371_v26, %v4371_v26  ;;  %v5152_v35 = vmul.f32 %v4372_v41, %v4372_v41  ;;  %v13209_v41 = vld [vmem:[#allocation124_spill] sm:$0xff] }
 0x6f4   : > { %v6229_v0 = vmin.f32 %v6228_v3, %v5925_v54  ;;  %v5153_v53 = vmul.f32 %v4373_v12, %v4373_v12  ;;  %v5662_v58 = vmul.f32 %v4638_v52, %v4638_v52  ;;  %v5663_v45 = vmul.f32 %v4639_v8, %v4639_v8 }
 0x6f5   : > { %v5406_v19 = vadd.f32 %v5150_v57, %v4894_v14  ;;  %v5407_v56 = vadd.f32 %v5151_v37, %v4895_v5  ;;  %v5408_v42 = vadd.f32 %v5152_v35, %v4896_v55  ;;  %v5664_v31 = vmul.f32 %v4640_v22, %v4640_v22  ;;  %v13210_v5 = vld [vmem:[#allocation177_spill] sm:$0xff] }
 0x6f6   : > { %6230 = vmin.xlane.f32.xlu2 %v6229_v0  ;;  %v5409_v29 = vadd.f32 %v5153_v53, %v4897_v23  ;;  %v5665_v28 = vmul.f32 %v4641_v40, %v4641_v40  ;;  %v4098_v17 = vsub.f32 %v13208_v47, %v9833_v16  ;;  %v4099_v11 = vsub.f32 %v13208_v47, %v9835_v36  ;;  %v6021_v0 = vpop.xlane.xlu2 %6020 }
 0x6f7   : > { %v5918_v1 = vadd.f32 %v5662_v58, %v5406_v19  ;;  %v5919_v13 = vadd.f32 %v5663_v45, %v5407_v56  ;;  %v5920_v59 = vadd.f32 %v5664_v31, %v5408_v42  ;;  %v4100_v54 = vsub.f32 %v13208_v47, %v9841_v24  ;;  %v6016_v56 = vpop.xlane.xlu1 %6015  ;;  %v6011_v42 = vpop.xlane.xlu0 %6010 }
 0x6f8   : > { %v5921_v50 = vadd.f32 %v5665_v28, %v5409_v29  ;;  %v4101_v26 = vsub.f32 %v13208_v47, %v9847_v51  ;;  %v4366_v12 = vsub.f32 %v13209_v41, %v9858_v43  ;;  %v4367_v61 = vsub.f32 %v13209_v41, %v9860_v4 }
 0x6f9   : > { %v11559_v2 = vmin.f32 %v6412_v18, %v5918_v1  ;;  %v11561_v52 = vmin.f32 %v6481_v38, %v5919_v13  ;;  %v11563_v8 = vmin.f32 %v6550_v34, %v5920_v59  ;;  %v6222_v22 = vmin.f32 %v5918_v1, %v5919_v13 }
 0x6fa   : > { %v11565_v40 = vmin.f32 %v6619_v46, %v5921_v50  ;;  %v4368_v3 = vsub.f32 %v13209_v41, %v9862_v7  ;;  %v4369_v14 = vsub.f32 %v13209_v41, %v9864_v62  ;;  %v4634_v55 = vsub.f32 %v13210_v5, %v9868_v6 }
 0x6fb   : > { %v6223_v23 = vmin.f32 %v6222_v22, %v5920_v59  ;;  %v4635_v18 = vsub.f32 %v13210_v5, %v9870_v21  ;;  %v4636_v38 = vsub.f32 %v13210_v5, %v13018_v49  ;;  %v4637_v34 = vsub.f32 %v13210_v5, %v9880_v27  ;;  %v13211_v22 = vld [vmem:[#allocation69_spill] sm:$0xff] }
 0x6fc   : > { %v4890_v46 = vmul.f32 %v4098_v17, %v4098_v17  ;;  %v4891_v57 = vmul.f32 %v4099_v11, %v4099_v11  ;;  %v4892_v37 = vmul.f32 %v4100_v54, %v4100_v54  ;;  %v4893_v35 = vmul.f32 %v4101_v26, %v4101_v26 }
 0x6fd   : > { %v6224_v53 = vmin.f32 %v6223_v23, %v5921_v50  ;;  %v5146_v58 = vmul.f32 %v4366_v12, %v4366_v12  ;;  %v5147_v45 = vmul.f32 %v4367_v61, %v4367_v61  ;;  %v5148_v19 = vmul.f32 %v4368_v3, %v4368_v3 }
 0x6fe   : > { %v5149_v31 = vmul.f32 %v4369_v14, %v4369_v14  ;;  %v5658_v29 = vmul.f32 %v4634_v55, %v4634_v55  ;;  %v5659_v28 = vmul.f32 %v4635_v18, %v4635_v18  ;;  %v5660_v47 = vmul.f32 %v4636_v38, %v4636_v38 }
 0x6ff   : > { %6225 = vmin.xlane.f32.xlu1 %v6224_v53  ;;  %v5402_v1 = vadd.f32 %v5146_v58, %v4890_v46  ;;  %v5403_v13 = vadd.f32 %v5147_v45, %v4891_v57  ;;  %v5404_v59 = vadd.f32 %v5148_v19, %v4892_v37  ;;  %v5661_v17 = vmul.f32 %v4637_v34, %v4637_v34  ;;  %v13212_v34 = vld [vmem:[#allocation128_spill] sm:$0xff] }
 0x700   : > { %v5405_v11 = vadd.f32 %v5149_v31, %v4893_v35  ;;  %v6309_v54 = vmin.f32 %v10676_v48, %v6021_v0  ;;  %v6308_v50 = vmin.f32 %v10742_v15, %v6016_v56  ;;  %v6307_v26 = vmin.f32 %v10636_v32, %v6011_v42 }
 0x701   : > { %v5914_v41 = vadd.f32 %v5658_v29, %v5402_v1  ;;  %v5915_v12 = vadd.f32 %v5659_v28, %v5403_v13  ;;  %v5916_v61 = vadd.f32 %v5660_v47, %v5404_v59  ;;  %v4118_v3 = vsub.f32 %v13211_v22, %v9833_v16 }
 0x702   : > { %v5917_v14 = vadd.f32 %v5661_v17, %v5405_v11  ;;  %6665 = vst.msk [vmem:[%s7123_s11 + $0x38] sm:$0xff] %vm6657_vm5, %v6309_v54  ;;  %v4119_v5 = vsub.f32 %v13211_v22, %v9835_v36  ;;  %v4120_v48 = vsub.f32 %v13211_v22, %v9841_v24  ;;  %v4121_v15 = vsub.f32 %v13211_v22, %v9847_v51 }
 0x703   : > { %v6414_v32 = vmin.f32 %v11559_v2, %v5914_v41  ;;  %v6483_v55 = vmin.f32 %v11561_v52, %v5915_v12  ;;  %v6552_v23 = vmin.f32 %v11563_v8, %v5916_v61  ;;  %v6217_v18 = vmin.f32 %v5914_v41, %v5915_v12  ;;  %6664 = vst.msk [vmem:[%s7123_s11 + $0x30] sm:$0xff] %vm6657_vm5, %v6308_v50  ;;  %v13213_v8 = vld [vmem:[#allocation175_spill] sm:$0xff]  ;;  %v13214_v41 = vld [vmem:[#allocation70_spill] sm:$0xff] }
 0x704   : > { %v6621_v38 = vmin.f32 %v11565_v40, %v5917_v14  ;;  %6663 = vst.msk [vmem:[%s7123_s11 + $0x28] sm:$0xff] %vm6657_vm5, %v6307_v26  ;;  %v4386_v46 = vsub.f32 %v13212_v34, %v9858_v43  ;;  %v4387_v57 = vsub.f32 %v13212_v34, %v9860_v4  ;;  %v4388_v2 = vsub.f32 %v13212_v34, %v9862_v7 }
 0x705   : > { %v6218_v37 = vmin.f32 %v6217_v18, %v5916_v61  ;;  %v4389_v52 = vsub.f32 %v13212_v34, %v9864_v62  ;;  %v4654_v35 = vsub.f32 %v13213_v8, %v9868_v6  ;;  %v4655_v40 = vsub.f32 %v13213_v8, %v9870_v21  ;;  %v13215_v18 = vld [vmem:[#allocation117_spill] sm:$0xff] }
 0x706   : > { %v4656_v0 = vsub.f32 %v13213_v8, %v13018_v49  ;;  %v4657_v53 = vsub.f32 %v13213_v8, %v9880_v27  ;;  %v4910_v58 = vmul.f32 %v4118_v3, %v4118_v3  ;;  %v4911_v45 = vmul.f32 %v4119_v5, %v4119_v5 }
 0x707   : > { %v6219_v19 = vmin.f32 %v6218_v37, %v5917_v14  ;;  %v4912_v56 = vmul.f32 %v4120_v48, %v4120_v48  ;;  %v4913_v42 = vmul.f32 %v4121_v15, %v4121_v15  ;;  %v5166_v31 = vmul.f32 %v4386_v46, %v4386_v46 }
 0x708   : > { %v5167_v29 = vmul.f32 %v4387_v57, %v4387_v57  ;;  %v5168_v28 = vmul.f32 %v4388_v2, %v4388_v2  ;;  %v5169_v47 = vmul.f32 %v4389_v52, %v4389_v52  ;;  %v5678_v1 = vmul.f32 %v4654_v35, %v4654_v35 }
 0x709   : > { %6220 = vmin.xlane.f32.xlu0 %v6219_v19  ;;  %v5422_v13 = vadd.f32 %v5166_v31, %v4910_v58  ;;  %v5679_v59 = vmul.f32 %v4655_v40, %v4655_v40  ;;  %v5680_v17 = vmul.f32 %v4656_v0, %v4656_v0  ;;  %v5681_v11 = vmul.f32 %v4657_v53, %v4657_v53  ;;  %v13216_v0 = vld [vmem:[#allocation185_spill] sm:$0xff] }
 0x70a   : > { %v5423_v54 = vadd.f32 %v5167_v29, %v4911_v45  ;;  %v5424_v50 = vadd.f32 %v5168_v28, %v4912_v56  ;;  %v5425_v26 = vadd.f32 %v5169_v47, %v4913_v42  ;;  %v4114_v12 = vsub.f32 %v13214_v41, %v9833_v16 }
 0x70b   : > { %v5934_v61 = vadd.f32 %v5678_v1, %v5422_v13  ;;  %v4115_v22 = vsub.f32 %v13214_v41, %v9835_v36  ;;  %v4116_v3 = vsub.f32 %v13214_v41, %v9841_v24  ;;  %v4117_v14 = vsub.f32 %v13214_v41, %v9847_v51  ;;  %v13217_v41 = vld [vmem:[#allocation56_spill] sm:$0xff] }
 0x70c   : > { %v5935_v5 = vadd.f32 %v5679_v59, %v5423_v54  ;;  %v5936_v48 = vadd.f32 %v5680_v17, %v5424_v50  ;;  %v5937_v15 = vadd.f32 %v5681_v11, %v5425_v26  ;;  %v4382_v34 = vsub.f32 %v13215_v18, %v9858_v43 }
 0x70d   : > { %v11626_v46 = vmin.f32 %v6414_v32, %v5934_v61  ;;  %v4383_v57 = vsub.f32 %v13215_v18, %v9860_v4  ;;  %v4384_v2 = vsub.f32 %v13215_v18, %v9862_v7  ;;  %v4385_v37 = vsub.f32 %v13215_v18, %v9864_v62  ;;  %v13218_v18 = vld [vmem:[#allocation127_spill] sm:$0xff] }
 0x70e   : > { %v11634_v52 = vmin.f32 %v6483_v55, %v5935_v5  ;;  %v11636_v8 = vmin.f32 %v6552_v23, %v5936_v48  ;;  %v11638_v35 = vmin.f32 %v6621_v38, %v5937_v15  ;;  %v6242_v40 = vmin.f32 %v5934_v61, %v5935_v5 }
 0x70f   : > { %v4650_v32 = vsub.f32 %v13216_v0, %v9868_v6  ;;  %v4651_v53 = vsub.f32 %v13216_v0, %v9870_v21  ;;  %v4652_v58 = vsub.f32 %v13216_v0, %v13018_v49  ;;  %v4653_v45 = vsub.f32 %v13216_v0, %v9880_v27 }
 0x710   : > { %v6243_v19 = vmin.f32 %v6242_v40, %v5936_v48  ;;  %v4906_v55 = vmul.f32 %v4114_v12, %v4114_v12  ;;  %v4907_v56 = vmul.f32 %v4115_v22, %v4115_v22  ;;  %v4908_v23 = vmul.f32 %v4116_v3, %v4116_v3 }
 0x711   : > { %v4909_v42 = vmul.f32 %v4117_v14, %v4117_v14  ;;  %v5162_v38 = vmul.f32 %v4382_v34, %v4382_v34  ;;  %v5163_v31 = vmul.f32 %v4383_v57, %v4383_v57  ;;  %v5164_v29 = vmul.f32 %v4384_v2, %v4384_v2 }
 0x712   : > { %v6244_v28 = vmin.f32 %v6243_v19, %v5937_v15  ;;  %v5165_v47 = vmul.f32 %v4385_v37, %v4385_v37  ;;  %v5674_v1 = vmul.f32 %v4650_v32, %v4650_v32  ;;  %v5675_v13 = vmul.f32 %v4651_v53, %v4651_v53 }
 0x713   : > { %v5418_v59 = vadd.f32 %v5162_v38, %v4906_v55  ;;  %v5419_v17 = vadd.f32 %v5163_v31, %v4907_v56  ;;  %v5420_v11 = vadd.f32 %v5164_v29, %v4908_v23  ;;  %v5676_v54 = vmul.f32 %v4652_v58, %v4652_v58  ;;  %v6036_v38 = vpop.xlane.xlu2 %6035 }
 0x714   : > { %6245 = vmin.xlane.f32.xlu2 %v6244_v28  ;;  %v5421_v50 = vadd.f32 %v5165_v47, %v4909_v42  ;;  %v5677_v26 = vmul.f32 %v4653_v45, %v4653_v45  ;;  %v4110_v12 = vsub.f32 %v13217_v41, %v9833_v16  ;;  %v4111_v61 = vsub.f32 %v13217_v41, %v9835_v36  ;;  %v13219_v45 = vld [vmem:[#allocation180_spill] sm:$0xff] }
 0x715   : > { %v5930_v22 = vadd.f32 %v5674_v1, %v5418_v59  ;;  %v5931_v3 = vadd.f32 %v5675_v13, %v5419_v17  ;;  %v5932_v14 = vadd.f32 %v5676_v54, %v5420_v11  ;;  %v4112_v5 = vsub.f32 %v13217_v41, %v9841_v24  ;;  %v6031_v1 = vpop.xlane.xlu1 %6030  ;;  %v6026_v13 = vpop.xlane.xlu0 %6025 }
 0x716   : > { %v5933_v48 = vadd.f32 %v5677_v26, %v5421_v50  ;;  %v4113_v15 = vsub.f32 %v13217_v41, %v9847_v51  ;;  %v4378_v34 = vsub.f32 %v13218_v18, %v9858_v43  ;;  %v4379_v57 = vsub.f32 %v13218_v18, %v9860_v4 }
 0x717   : > { %v6416_v2 = vmin.f32 %v11626_v46, %v5930_v22  ;;  %v6485_v37 = vmin.f32 %v11634_v52, %v5931_v3  ;;  %v6554_v40 = vmin.f32 %v11636_v8, %v5932_v14  ;;  %v6237_v0 = vmin.f32 %v5930_v22, %v5931_v3 }
 0x718   : > { %v6623_v32 = vmin.f32 %v11638_v35, %v5933_v48  ;;  %v4380_v53 = vsub.f32 %v13218_v18, %v9862_v7  ;;  %v4381_v58 = vsub.f32 %v13218_v18, %v9864_v62  ;;  %v4646_v19 = vsub.f32 %v13219_v45, %v9868_v6  ;;  %v13220_v18 = vld [vmem:[#allocation71_spill] sm:$0xff] }
 0x719   : > { %v6238_v55 = vmin.f32 %v6237_v0, %v5932_v14  ;;  %v4647_v46 = vsub.f32 %v13219_v45, %v9870_v21  ;;  %v4648_v52 = vsub.f32 %v13219_v45, %v13018_v49  ;;  %v4649_v8 = vsub.f32 %v13219_v45, %v9880_v27 }
 0x71a   : > { %v4902_v35 = vmul.f32 %v4110_v12, %v4110_v12  ;;  %v4903_v56 = vmul.f32 %v4111_v61, %v4111_v61  ;;  %v4904_v23 = vmul.f32 %v4112_v5, %v4112_v5  ;;  %v4905_v42 = vmul.f32 %v4113_v15, %v4113_v15 }
 0x71b   : > { %v6239_v31 = vmin.f32 %v6238_v55, %v5933_v48  ;;  %v5158_v29 = vmul.f32 %v4378_v34, %v4378_v34  ;;  %v5159_v28 = vmul.f32 %v4379_v57, %v4379_v57  ;;  %v5160_v47 = vmul.f32 %v4380_v53, %v4380_v53  ;;  %v13221_v55 = vld [vmem:[#allocation131_spill] sm:$0xff] }
 0x71c   : > { %v5161_v59 = vmul.f32 %v4381_v58, %v4381_v58  ;;  %v5670_v17 = vmul.f32 %v4646_v19, %v4646_v19  ;;  %v5671_v11 = vmul.f32 %v4647_v46, %v4647_v46  ;;  %v5672_v54 = vmul.f32 %v4648_v52, %v4648_v52 }
 0x71d   : > { %6240 = vmin.xlane.f32.xlu1 %v6239_v31  ;;  %v5414_v50 = vadd.f32 %v5158_v29, %v4902_v35  ;;  %v5415_v26 = vadd.f32 %v5159_v28, %v4903_v56  ;;  %v5416_v41 = vadd.f32 %v5160_v47, %v4904_v23  ;;  %v5673_v12 = vmul.f32 %v4649_v8, %v4649_v8  ;;  %v13222_v8 = vld [vmem:[#allocation178_spill] sm:$0xff] }
 0x71e   : > { %v5417_v61 = vadd.f32 %v5161_v59, %v4905_v42  ;;  %v6312_v22 = vmin.f32 %v10710_v39, %v6036_v38  ;;  %v6311_v3 = vmin.f32 %v10778_v33, %v6031_v1  ;;  %v6310_v14 = vmin.f32 %v10674_v30, %v6026_v13 }
 0x71f   : > { %v5926_v5 = vadd.f32 %v5670_v17, %v5414_v50  ;;  %v5927_v48 = vadd.f32 %v5671_v11, %v5415_v26  ;;  %v5928_v15 = vadd.f32 %v5672_v54, %v5416_v41  ;;  %v4130_v34 = vsub.f32 %v13220_v18, %v9833_v16 }
 0x720   : > { %v5929_v57 = vadd.f32 %v5673_v12, %v5417_v61  ;;  %6668 = vst.msk [vmem:[%s7123_s11 + $0x50] sm:$0xff] %vm6657_vm5, %v6312_v22  ;;  %v4131_v0 = vsub.f32 %v13220_v18, %v9835_v36  ;;  %v4132_v39 = vsub.f32 %v13220_v18, %v9841_v24  ;;  %v4133_v33 = vsub.f32 %v13220_v18, %v9847_v51  ;;  %v13223_v22 = vld [vmem:[#allocation72_spill] sm:$0xff] }
 0x721   : > { %v11689_v30 = vmin.f32 %v6416_v2, %v5926_v5  ;;  %v11691_v53 = vmin.f32 %v6485_v37, %v5927_v48  ;;  %v11693_v58 = vmin.f32 %v6554_v40, %v5928_v15  ;;  %v6232_v45 = vmin.f32 %v5926_v5, %v5927_v48  ;;  %6667 = vst.msk [vmem:[%s7123_s11 + $0x48] sm:$0xff] %vm6657_vm5, %v6311_v3 }
 0x722   : > { %v11697_v19 = vmin.f32 %v6623_v32, %v5929_v57  ;;  %6666 = vst.msk [vmem:[%s7123_s11 + $0x40] sm:$0xff] %vm6657_vm5, %v6310_v14  ;;  %v4398_v46 = vsub.f32 %v13221_v55, %v9858_v43  ;;  %v4399_v52 = vsub.f32 %v13221_v55, %v9860_v4  ;;  %v4400_v2 = vsub.f32 %v13221_v55, %v9862_v7 }
 0x723   : > { %v6233_v37 = vmin.f32 %v6232_v45, %v5928_v15  ;;  %v4401_v40 = vsub.f32 %v13221_v55, %v9864_v62  ;;  %v4666_v35 = vsub.f32 %v13222_v8, %v9868_v6  ;;  %v4667_v32 = vsub.f32 %v13222_v8, %v9870_v21 }
 0x724   : > { %v4668_v56 = vsub.f32 %v13222_v8, %v13018_v49  ;;  %v4669_v23 = vsub.f32 %v13222_v8, %v9880_v27  ;;  %v4922_v42 = vmul.f32 %v4130_v34, %v4130_v34  ;;  %v4923_v38 = vmul.f32 %v4131_v0, %v4131_v0  ;;  %v13224_v0 = vld [vmem:[#allocation120_spill] sm:$0xff]  ;;  %v13225_v8 = vld [vmem:[#allocation187_spill] sm:$0xff] }
 0x725   : > { %v6234_v31 = vmin.f32 %v6233_v37, %v5929_v57  ;;  %v4924_v29 = vmul.f32 %v4132_v39, %v4132_v39  ;;  %v4925_v28 = vmul.f32 %v4133_v33, %v4133_v33  ;;  %v5178_v47 = vmul.f32 %v4398_v46, %v4398_v46 }
 0x726   : > { %v5179_v1 = vmul.f32 %v4399_v52, %v4399_v52  ;;  %v5180_v13 = vmul.f32 %v4400_v2, %v4400_v2  ;;  %v5181_v59 = vmul.f32 %v4401_v40, %v4401_v40  ;;  %v5690_v17 = vmul.f32 %v4666_v35, %v4666_v35 }
 0x727   : > { %6235 = vmin.xlane.f32.xlu0 %v6234_v31  ;;  %v5434_v11 = vadd.f32 %v5178_v47, %v4922_v42  ;;  %v5691_v54 = vmul.f32 %v4667_v32, %v4667_v32  ;;  %v5692_v50 = vmul.f32 %v4668_v56, %v4668_v56  ;;  %v5693_v26 = vmul.f32 %v4669_v23, %v4669_v23 }
 0x728   : > { %v5435_v41 = vadd.f32 %v5179_v1, %v4923_v38  ;;  %v5436_v12 = vadd.f32 %v5180_v13, %v4924_v29  ;;  %v5437_v61 = vadd.f32 %v5181_v59, %v4925_v28  ;;  %v4126_v3 = vsub.f32 %v13223_v22, %v9833_v16 }
 0x729   : > { %v5946_v14 = vadd.f32 %v5690_v17, %v5434_v11  ;;  %v4127_v5 = vsub.f32 %v13223_v22, %v9835_v36  ;;  %v4128_v48 = vsub.f32 %v13223_v22, %v9841_v24  ;;  %v4129_v15 = vsub.f32 %v13223_v22, %v9847_v51 }
 0x72a   : > { %v5947_v18 = vadd.f32 %v5691_v54, %v5435_v41  ;;  %v5948_v34 = vadd.f32 %v5692_v50, %v5436_v12  ;;  %v5949_v57 = vadd.f32 %v5693_v26, %v5437_v61  ;;  %v4394_v39 = vsub.f32 %v13224_v0, %v9858_v43  ;;  %v13226_v41 = vld [vmem:[#allocation59_spill] sm:$0xff] }
 0x72b   : > { %v6418_v33 = vmin.f32 %v11689_v30, %v5946_v14  ;;  %v4395_v45 = vsub.f32 %v13224_v0, %v9860_v4  ;;  %v4396_v55 = vsub.f32 %v13224_v0, %v9862_v7  ;;  %v4397_v46 = vsub.f32 %v13224_v0, %v9864_v62 }
 0x72c   : > { %v6487_v52 = vmin.f32 %v11691_v53, %v5947_v18  ;;  %v6556_v2 = vmin.f32 %v11693_v58, %v5948_v34  ;;  %v6625_v37 = vmin.f32 %v11697_v19, %v5949_v57  ;;  %v6257_v40 = vmin.f32 %v5946_v14, %v5947_v18  ;;  %v13227_v18 = vld [vmem:[#allocation130_spill] sm:$0xff] }
 0x72d   : > { %v4662_v35 = vsub.f32 %v13225_v8, %v9868_v6  ;;  %v4663_v30 = vsub.f32 %v13225_v8, %v9870_v21  ;;  %v4664_v32 = vsub.f32 %v13225_v8, %v13018_v49  ;;  %v4665_v56 = vsub.f32 %v13225_v8, %v9880_v27 }
 0x72e   : > { %v6258_v23 = vmin.f32 %v6257_v40, %v5948_v34  ;;  %v4918_v42 = vmul.f32 %v4126_v3, %v4126_v3  ;;  %v4919_v53 = vmul.f32 %v4127_v5, %v4127_v5  ;;  %v4920_v38 = vmul.f32 %v4128_v48, %v4128_v48 }
 0x72f   : > { %v4921_v58 = vmul.f32 %v4129_v15, %v4129_v15  ;;  %v5174_v31 = vmul.f32 %v4394_v39, %v4394_v39  ;;  %v5175_v19 = vmul.f32 %v4395_v45, %v4395_v45  ;;  %v5176_v29 = vmul.f32 %v4396_v55, %v4396_v55 }
 0x730   : > { %v6259_v28 = vmin.f32 %v6258_v23, %v5949_v57  ;;  %v5177_v47 = vmul.f32 %v4397_v46, %v4397_v46  ;;  %v5686_v1 = vmul.f32 %v4662_v35, %v4662_v35  ;;  %v5687_v13 = vmul.f32 %v4663_v30, %v4663_v30  ;;  %v13228_v35 = vld [vmem:[#allocation183_spill] sm:$0xff] }
 0x731   : > { %v5430_v59 = vadd.f32 %v5174_v31, %v4918_v42  ;;  %v5431_v17 = vadd.f32 %v5175_v19, %v4919_v53  ;;  %v5432_v11 = vadd.f32 %v5176_v29, %v4920_v38  ;;  %v5688_v54 = vmul.f32 %v4664_v32, %v4664_v32  ;;  %v6051_v53 = vpop.xlane.xlu2 %6050  ;;  %v6046_v29 = vpop.xlane.xlu1 %6045 }
 0x732   : > { %6260 = vmin.xlane.f32.xlu2 %v6259_v28  ;;  %v5433_v50 = vadd.f32 %v5177_v47, %v4921_v58  ;;  %v5689_v26 = vmul.f32 %v4665_v56, %v4665_v56  ;;  %v4122_v12 = vsub.f32 %v13226_v41, %v9833_v16  ;;  %v4123_v61 = vsub.f32 %v13226_v41, %v9835_v36  ;;  %v6041_v28 = vpop.xlane.xlu0 %6040 }
 0x733   : > { %v5942_v22 = vadd.f32 %v5686_v1, %v5430_v59  ;;  %v5943_v3 = vadd.f32 %v5687_v13, %v5431_v17  ;;  %v5944_v14 = vadd.f32 %v5688_v54, %v5432_v11  ;;  %v4124_v5 = vsub.f32 %v13226_v41, %v9841_v24 }
 0x734   : > { %v5945_v48 = vadd.f32 %v5689_v26, %v5433_v50  ;;  %v4125_v15 = vsub.f32 %v13226_v41, %v9847_v51  ;;  %v4390_v34 = vsub.f32 %v13227_v18, %v9858_v43  ;;  %v4391_v57 = vsub.f32 %v13227_v18, %v9860_v4 }
 0x735   : > { %v11757_v0 = vmin.f32 %v6418_v33, %v5942_v22  ;;  %v11759_v39 = vmin.f32 %v6487_v52, %v5943_v3  ;;  %v11761_v45 = vmin.f32 %v6556_v2, %v5944_v14  ;;  %v6252_v55 = vmin.f32 %v5942_v22, %v5943_v3 }
 0x736   : > { %v11763_v46 = vmin.f32 %v6625_v37, %v5945_v48  ;;  %v4392_v40 = vsub.f32 %v13227_v18, %v9862_v7  ;;  %v4393_v8 = vsub.f32 %v13227_v18, %v9864_v62  ;;  %v4658_v30 = vsub.f32 %v13228_v35, %v9868_v6 }
 0x737   : > { %v6253_v32 = vmin.f32 %v6252_v55, %v5944_v14  ;;  %v4659_v33 = vsub.f32 %v13228_v35, %v9870_v21  ;;  %v4660_v52 = vsub.f32 %v13228_v35, %v13018_v49  ;;  %v4661_v2 = vsub.f32 %v13228_v35, %v9880_v27 }
 0x738   : > { %v4914_v37 = vmul.f32 %v4122_v12, %v4122_v12  ;;  %v4915_v56 = vmul.f32 %v4123_v61, %v4123_v61  ;;  %v4916_v23 = vmul.f32 %v4124_v5, %v4124_v5  ;;  %v4917_v42 = vmul.f32 %v4125_v15, %v4125_v15  ;;  %v13229_v5 = vld [vmem:[#allocation74_spill] sm:$0xff] }
 0x739   : > { %v6254_v38 = vmin.f32 %v6253_v32, %v5945_v48  ;;  %v5170_v58 = vmul.f32 %v4390_v34, %v4390_v34  ;;  %v5171_v31 = vmul.f32 %v4391_v57, %v4391_v57  ;;  %v5172_v19 = vmul.f32 %v4392_v40, %v4392_v40 }
 0x73a   : > { %v5173_v47 = vmul.f32 %v4393_v8, %v4393_v8  ;;  %v5682_v1 = vmul.f32 %v4658_v30, %v4658_v30  ;;  %v5683_v13 = vmul.f32 %v4659_v33, %v4659_v33  ;;  %v5684_v59 = vmul.f32 %v4660_v52, %v4660_v52  ;;  %v13230_v8 = vld [vmem:[#allocation133_spill] sm:$0xff] }
 0x73b   : > { %6255 = vmin.xlane.f32.xlu1 %v6254_v38  ;;  %v5426_v17 = vadd.f32 %v5170_v58, %v4914_v37  ;;  %v5427_v11 = vadd.f32 %v5171_v31, %v4915_v56  ;;  %v5428_v54 = vadd.f32 %v5172_v19, %v4916_v23  ;;  %v5685_v50 = vmul.f32 %v4661_v2, %v4661_v2 }
 0x73c   : > { %v5429_v26 = vadd.f32 %v5173_v47, %v4917_v42  ;;  %v6315_v41 = vmin.f32 %v10750_v63, %v6051_v53  ;;  %v6314_v12 = vmin.f32 %v10816_v44, %v6046_v29  ;;  %v6313_v61 = vmin.f32 %v10708_v9, %v6041_v28 }
 0x73d   : > { %v5938_v22 = vadd.f32 %v5682_v1, %v5426_v17  ;;  %v5939_v3 = vadd.f32 %v5683_v13, %v5427_v11  ;;  %v5940_v14 = vadd.f32 %v5684_v59, %v5428_v54  ;;  %v4142_v48 = vsub.f32 %v13229_v5, %v9833_v16  ;;  %v13232_v54 = vld [vmem:[#allocation75_spill] sm:$0xff] }
 0x73e   : > { %v5941_v15 = vadd.f32 %v5685_v50, %v5429_v26  ;;  %6671 = vst.msk [vmem:[%s7123_s11 + $0x68] sm:$0xff] %vm6657_vm5, %v6315_v41  ;;  %v4143_v18 = vsub.f32 %v13229_v5, %v9835_v36  ;;  %v4144_v63 = vsub.f32 %v13229_v5, %v9841_v24  ;;  %v4145_v44 = vsub.f32 %v13229_v5, %v9847_v51  ;;  %v13233_v5 = vld [vmem:[#allocation123_spill] sm:$0xff] }
 0x73f   : > { %v6420_v9 = vmin.f32 %v11757_v0, %v5938_v22  ;;  %v6489_v34 = vmin.f32 %v11759_v39, %v5939_v3  ;;  %v6558_v57 = vmin.f32 %v11761_v45, %v5940_v14  ;;  %v6247_v55 = vmin.f32 %v5938_v22, %v5939_v3  ;;  %6670 = vst.msk [vmem:[%s7123_s11 + $0x60] sm:$0xff] %vm6657_vm5, %v6314_v12  ;;  %v13231_v45 = vld [vmem:[#allocation181_spill] sm:$0xff] }
 0x740   : > { %v6627_v40 = vmin.f32 %v11763_v46, %v5941_v15  ;;  %6669 = vst.msk [vmem:[%s7123_s11 + $0x58] sm:$0xff] %vm6657_vm5, %v6313_v61  ;;  %v4410_v35 = vsub.f32 %v13230_v8, %v9858_v43  ;;  %v4411_v30 = vsub.f32 %v13230_v8, %v9860_v4  ;;  %v4412_v0 = vsub.f32 %v13230_v8, %v9862_v7 }
 0x741   : > { %v6248_v32 = vmin.f32 %v6247_v55, %v5940_v14  ;;  %v4413_v39 = vsub.f32 %v13230_v8, %v9864_v62  ;;  %v4678_v33 = vsub.f32 %v13231_v45, %v9868_v6  ;;  %v4679_v46 = vsub.f32 %v13231_v45, %v9870_v21 }
 0x742   : > { %v4680_v52 = vsub.f32 %v13231_v45, %v13018_v49  ;;  %v4681_v2 = vsub.f32 %v13231_v45, %v9880_v27  ;;  %v4934_v37 = vmul.f32 %v4142_v48, %v4142_v48  ;;  %v4935_v56 = vmul.f32 %v4143_v18, %v4143_v18 }
 0x743   : > { %v6249_v23 = vmin.f32 %v6248_v32, %v5941_v15  ;;  %v4936_v42 = vmul.f32 %v4144_v63, %v4144_v63  ;;  %v4937_v53 = vmul.f32 %v4145_v44, %v4145_v44  ;;  %v5190_v38 = vmul.f32 %v4410_v35, %v4410_v35 }
 0x744   : > { %v5191_v58 = vmul.f32 %v4411_v30, %v4411_v30  ;;  %v5192_v31 = vmul.f32 %v4412_v0, %v4412_v0  ;;  %v5193_v19 = vmul.f32 %v4413_v39, %v4413_v39  ;;  %v5702_v29 = vmul.f32 %v4678_v33, %v4678_v33  ;;  %v13234_v0 = vld [vmem:[#allocation189_spill] sm:$0xff] }
 0x745   : > { %6250 = vmin.xlane.f32.xlu0 %v6249_v23  ;;  %v5446_v28 = vadd.f32 %v5190_v38, %v4934_v37  ;;  %v5703_v47 = vmul.f32 %v4679_v46, %v4679_v46  ;;  %v5704_v1 = vmul.f32 %v4680_v52, %v4680_v52  ;;  %v5705_v13 = vmul.f32 %v4681_v2, %v4681_v2 }
 0x746   : > { %v5447_v59 = vadd.f32 %v5191_v58, %v4935_v56  ;;  %v5448_v17 = vadd.f32 %v5192_v31, %v4936_v42  ;;  %v5449_v11 = vadd.f32 %v5193_v19, %v4937_v53  ;;  %v4138_v50 = vsub.f32 %v13232_v54, %v9833_v16 }
 0x747   : > { %v5958_v26 = vadd.f32 %v5702_v29, %v5446_v28  ;;  %v4139_v41 = vsub.f32 %v13232_v54, %v9835_v36  ;;  %v4140_v12 = vsub.f32 %v13232_v54, %v9841_v24  ;;  %v4141_v61 = vsub.f32 %v13232_v54, %v9847_v51 }
 0x748   : > { %v5959_v22 = vadd.f32 %v5703_v47, %v5447_v59  ;;  %v5960_v3 = vadd.f32 %v5704_v1, %v5448_v17  ;;  %v5961_v14 = vadd.f32 %v5705_v13, %v5449_v11  ;;  %v4406_v48 = vsub.f32 %v13233_v5, %v9858_v43  ;;  %v13235_v47 = vld [vmem:[#allocation62_spill] sm:$0xff] }
 0x749   : > { %v11824_v15 = vmin.f32 %v6420_v9, %v5958_v26  ;;  %v4407_v18 = vsub.f32 %v13233_v5, %v9860_v4  ;;  %v4408_v63 = vsub.f32 %v13233_v5, %v9862_v7  ;;  %v4409_v44 = vsub.f32 %v13233_v5, %v9864_v62 }
 0x74a   : > { %v11832_v55 = vmin.f32 %v6489_v34, %v5959_v22  ;;  %v11834_v8 = vmin.f32 %v6558_v57, %v5960_v3  ;;  %v11836_v35 = vmin.f32 %v6627_v40, %v5961_v14  ;;  %v6272_v30 = vmin.f32 %v5958_v26, %v5959_v22 }
 0x74b   : > { %v4674_v9 = vsub.f32 %v13234_v0, %v9868_v6  ;;  %v4675_v32 = vsub.f32 %v13234_v0, %v9870_v21  ;;  %v4676_v39 = vsub.f32 %v13234_v0, %v13018_v49  ;;  %v4677_v45 = vsub.f32 %v13234_v0, %v9880_v27 }
 0x74c   : > { %v6273_v33 = vmin.f32 %v6272_v30, %v5960_v3  ;;  %v4930_v34 = vmul.f32 %v4138_v50, %v4138_v50  ;;  %v4931_v46 = vmul.f32 %v4139_v41, %v4139_v41  ;;  %v4932_v57 = vmul.f32 %v4140_v12, %v4140_v12  ;;  %v13236_v41 = vld [vmem:[#allocation132_spill] sm:$0xff] }
 0x74d   : > { %v4933_v52 = vmul.f32 %v4141_v61, %v4141_v61  ;;  %v5186_v40 = vmul.f32 %v4406_v48, %v4406_v48  ;;  %v5187_v2 = vmul.f32 %v4407_v18, %v4407_v18  ;;  %v5188_v37 = vmul.f32 %v4408_v63, %v4408_v63 }
 0x74e   : > { %v6274_v56 = vmin.f32 %v6273_v33, %v5961_v14  ;;  %v5189_v23 = vmul.f32 %v4409_v44, %v4409_v44  ;;  %v5698_v42 = vmul.f32 %v4674_v9, %v4674_v9  ;;  %v5699_v53 = vmul.f32 %v4675_v32, %v4675_v32  ;;  %v13237_v44 = vld [vmem:[#allocation186_spill] sm:$0xff] }
 0x74f   : > { %v5442_v38 = vadd.f32 %v5186_v40, %v4930_v34  ;;  %v5443_v58 = vadd.f32 %v5187_v2, %v4931_v46  ;;  %v5444_v31 = vadd.f32 %v5188_v37, %v4932_v57  ;;  %v5700_v19 = vmul.f32 %v4676_v39, %v4676_v39  ;;  %v6056_v40 = vpop.xlane.xlu0 %6055 }
 0x750   : > { %6275 = vmin.xlane.f32.xlu2 %v6274_v56  ;;  %v5445_v29 = vadd.f32 %v5189_v23, %v4933_v52  ;;  %v5701_v28 = vmul.f32 %v4677_v45, %v4677_v45  ;;  %v4134_v1 = vsub.f32 %v13235_v47, %v9833_v16  ;;  %v4135_v13 = vsub.f32 %v13235_v47, %v9835_v36  ;;  %v6066_v45 = vpop.xlane.xlu2 %6065  ;;  %v6061_v52 = vpop.xlane.xlu1 %6060 }
 0x751   : > { %v5954_v59 = vadd.f32 %v5698_v42, %v5442_v38  ;;  %v5955_v17 = vadd.f32 %v5699_v53, %v5443_v58  ;;  %v5956_v11 = vadd.f32 %v5700_v19, %v5444_v31  ;;  %v4136_v54 = vsub.f32 %v13235_v47, %v9841_v24 }
 0x752   : > { %v5957_v50 = vadd.f32 %v5701_v28, %v5445_v29  ;;  %v4137_v26 = vsub.f32 %v13235_v47, %v9847_v51  ;;  %v4402_v12 = vsub.f32 %v13236_v41, %v9858_v43  ;;  %v4403_v61 = vsub.f32 %v13236_v41, %v9860_v4  ;;  %v13238_v29 = vld [vmem:[#allocation76_spill] sm:$0xff] }
 0x753   : > { %v6422_v22 = vmin.f32 %v11824_v15, %v5954_v59  ;;  %v6491_v3 = vmin.f32 %v11832_v55, %v5955_v17  ;;  %v6560_v14 = vmin.f32 %v11834_v8, %v5956_v11  ;;  %v6267_v5 = vmin.f32 %v5954_v59, %v5955_v17  ;;  %v13239_v47 = vld [vmem:[#allocation8_spill] sm:$0xff] }
 0x754   : > { %v6629_v48 = vmin.f32 %v11836_v35, %v5957_v50  ;;  %v4404_v18 = vsub.f32 %v13236_v41, %v9862_v7  ;;  %v4405_v63 = vsub.f32 %v13236_v41, %v9864_v62  ;;  %v4670_v30 = vsub.f32 %v13237_v44, %v9868_v6 }
 0x755   : > { %v6268_v0 = vmin.f32 %v6267_v5, %v5956_v11  ;;  %v4671_v15 = vsub.f32 %v13237_v44, %v9870_v21  ;;  %v4672_v55 = vsub.f32 %v13237_v44, %v13018_v49  ;;  %v4673_v8 = vsub.f32 %v13237_v44, %v9880_v27  ;;  %v13240_v11 = vld [vmem:[#allocation77_spill] sm:$0xff]  ;;  %v13241_v44 = vld [vmem:[#allocation136_spill] sm:$0xff] }
 0x756   : > { %v4926_v35 = vmul.f32 %v4134_v1, %v4134_v1  ;;  %v4927_v9 = vmul.f32 %v4135_v13, %v4135_v13  ;;  %v4928_v32 = vmul.f32 %v4136_v54, %v4136_v54  ;;  %v4929_v39 = vmul.f32 %v4137_v26, %v4137_v26 }
 0x757   : > { %v6269_v33 = vmin.f32 %v6268_v0, %v5957_v50  ;;  %v5182_v34 = vmul.f32 %v4402_v12, %v4402_v12  ;;  %v5183_v46 = vmul.f32 %v4403_v61, %v4403_v61  ;;  %v5184_v57 = vmul.f32 %v4404_v18, %v4404_v18 }
 0x758   : > { %v5185_v2 = vmul.f32 %v4405_v63, %v4405_v63  ;;  %v5694_v37 = vmul.f32 %v4670_v30, %v4670_v30  ;;  %v5695_v56 = vmul.f32 %v4671_v15, %v4671_v15  ;;  %v5696_v23 = vmul.f32 %v4672_v55, %v4672_v55  ;;  %v13242_v15 = vld [vmem:[#allocation184_spill] sm:$0xff] }
 0x759   : > { %6270 = vmin.xlane.f32.xlu1 %v6269_v33  ;;  %v5438_v42 = vadd.f32 %v5182_v34, %v4926_v35  ;;  %v5439_v53 = vadd.f32 %v5183_v46, %v4927_v9  ;;  %v5440_v38 = vadd.f32 %v5184_v57, %v4928_v32  ;;  %v5697_v58 = vmul.f32 %v4673_v8, %v4673_v8 }
 0x75a   : > { %v5441_v31 = vadd.f32 %v5185_v2, %v4929_v39  ;;  %v6318_v19 = vmin.f32 %v10786_v60, %v6066_v45  ;;  %v6317_v28 = vmin.f32 %v13238_v29, %v6061_v52  ;;  %v6316_v1 = vmin.f32 %v13239_v47, %v6056_v40 }
 0x75b   : > { %v5950_v13 = vadd.f32 %v5694_v37, %v5438_v42  ;;  %v5951_v59 = vadd.f32 %v5695_v56, %v5439_v53  ;;  %v5952_v17 = vadd.f32 %v5696_v23, %v5440_v38  ;;  %v4154_v54 = vsub.f32 %v13240_v11, %v9833_v16 }
 0x75c   : > { %v5953_v50 = vadd.f32 %v5697_v58, %v5441_v31  ;;  %6674 = vst.msk [vmem:[%s7123_s11 + $0x80] sm:$0xff] %vm6657_vm5, %v6318_v19  ;;  %v4155_v26 = vsub.f32 %v13240_v11, %v9835_v36  ;;  %v4156_v60 = vsub.f32 %v13240_v11, %v9841_v24  ;;  %v4157_v41 = vsub.f32 %v13240_v11, %v9847_v51  ;;  %v13243_v58 = vld [vmem:[#allocation78_spill] sm:$0xff] }
 0x75d   : > { %v11887_v12 = vmin.f32 %v6422_v22, %v5950_v13  ;;  %v11889_v61 = vmin.f32 %v6491_v3, %v5951_v59  ;;  %v11891_v5 = vmin.f32 %v6560_v14, %v5952_v17  ;;  %v6262_v18 = vmin.f32 %v5950_v13, %v5951_v59  ;;  %6673 = vst.msk [vmem:[%s7123_s11 + $0x78] sm:$0xff] %vm6657_vm5, %v6317_v28 }
 0x75e   : > { %v11895_v63 = vmin.f32 %v6629_v48, %v5953_v50  ;;  %6672 = vst.msk [vmem:[%s7123_s11 + $0x70] sm:$0xff] %vm6657_vm5, %v6316_v1  ;;  %v4422_v30 = vsub.f32 %v13241_v44, %v9858_v43  ;;  %v4423_v0 = vsub.f32 %v13241_v44, %v9860_v4  ;;  %v4424_v22 = vsub.f32 %v13241_v44, %v9862_v7 }
 0x75f   : > { %v6263_v3 = vmin.f32 %v6262_v18, %v5952_v17  ;;  %v4425_v14 = vsub.f32 %v13241_v44, %v9864_v62  ;;  %v4690_v55 = vsub.f32 %v13242_v15, %v9868_v6  ;;  %v4691_v48 = vsub.f32 %v13242_v15, %v9870_v21  ;;  %v13244_v17 = vld [vmem:[#allocation126_spill] sm:$0xff] }
 0x760   : > { %v4692_v8 = vsub.f32 %v13242_v15, %v13018_v49  ;;  %v4693_v35 = vsub.f32 %v13242_v15, %v9880_v27  ;;  %v4946_v9 = vmul.f32 %v4154_v54, %v4154_v54  ;;  %v4947_v32 = vmul.f32 %v4155_v26, %v4155_v26 }
 0x761   : > { %v6264_v39 = vmin.f32 %v6263_v3, %v5953_v50  ;;  %v4948_v45 = vmul.f32 %v4156_v60, %v4156_v60  ;;  %v4949_v33 = vmul.f32 %v4157_v41, %v4157_v41  ;;  %v5202_v34 = vmul.f32 %v4422_v30, %v4422_v30 }
 0x762   : > { %v5203_v46 = vmul.f32 %v4423_v0, %v4423_v0  ;;  %v5204_v57 = vmul.f32 %v4424_v22, %v4424_v22  ;;  %v5205_v52 = vmul.f32 %v4425_v14, %v4425_v14  ;;  %v5714_v40 = vmul.f32 %v4690_v55, %v4690_v55  ;;  %v13245_v0 = vld [vmem:[#allocation191_spill] sm:$0xff] }
 0x763   : > { %6265 = vmin.xlane.f32.xlu0 %v6264_v39  ;;  %v5458_v2 = vadd.f32 %v5202_v34, %v4946_v9  ;;  %v5715_v37 = vmul.f32 %v4691_v48, %v4691_v48  ;;  %v5716_v56 = vmul.f32 %v4692_v8, %v4692_v8  ;;  %v5717_v23 = vmul.f32 %v4693_v35, %v4693_v35 }
 0x764   : > { %v5459_v42 = vadd.f32 %v5203_v46, %v4947_v32  ;;  %v5460_v53 = vadd.f32 %v5204_v57, %v4948_v45  ;;  %v5461_v38 = vadd.f32 %v5205_v52, %v4949_v33  ;;  %v4150_v31 = vsub.f32 %v13243_v58, %v9833_v16 }
 0x765   : > { %v5970_v19 = vadd.f32 %v5714_v40, %v5458_v2  ;;  %v4151_v29 = vsub.f32 %v13243_v58, %v9835_v36  ;;  %v4152_v28 = vsub.f32 %v13243_v58, %v9841_v24  ;;  %v4153_v47 = vsub.f32 %v13243_v58, %v9847_v51  ;;  %v13246_v2 = vld [vmem:[#allocation65_spill] sm:$0xff] }
 0x766   : > { %v5971_v1 = vadd.f32 %v5715_v37, %v5459_v42  ;;  %v5972_v13 = vadd.f32 %v5716_v56, %v5460_v53  ;;  %v5973_v59 = vadd.f32 %v5717_v23, %v5461_v38  ;;  %v4418_v11 = vsub.f32 %v13244_v17, %v9858_v43  ;;  %v6081_v23 = vpop.xlane.xlu2 %6080  ;;  %v6076_v42 = vpop.xlane.xlu1 %6075 }
 0x767   : > { %v6424_v54 = vmin.f32 %v11887_v12, %v5970_v19  ;;  %v4419_v50 = vsub.f32 %v13244_v17, %v9860_v4  ;;  %v4420_v26 = vsub.f32 %v13244_v17, %v9862_v7  ;;  %v4421_v60 = vsub.f32 %v13244_v17, %v9864_v62 }
 0x768   : > { %v6493_v41 = vmin.f32 %v11889_v61, %v5971_v1  ;;  %v6562_v18 = vmin.f32 %v11891_v5, %v5972_v13  ;;  %v6631_v44 = vmin.f32 %v11895_v63, %v5973_v59  ;;  %v6287_v30 = vmin.f32 %v5970_v19, %v5971_v1  ;;  %v6071_v19 = vpop.xlane.xlu0 %6070 }
 0x769   : > { %v4686_v22 = vsub.f32 %v13245_v0, %v9868_v6  ;;  %v4687_v12 = vsub.f32 %v13245_v0, %v9870_v21  ;;  %v4688_v3 = vsub.f32 %v13245_v0, %v13018_v49  ;;  %v4689_v14 = vsub.f32 %v13245_v0, %v9880_v27  ;;  %v13248_v0 = vld [vmem:[#allocation188_spill] sm:$0xff] }
 0x76a   : > { %v6288_v15 = vmin.f32 %v6287_v30, %v5972_v13  ;;  %v4942_v55 = vmul.f32 %v4150_v31, %v4150_v31  ;;  %v4943_v61 = vmul.f32 %v4151_v29, %v4151_v29  ;;  %v4944_v48 = vmul.f32 %v4152_v28, %v4152_v28 }
 0x76b   : > { %v4945_v5 = vmul.f32 %v4153_v47, %v4153_v47  ;;  %v5198_v8 = vmul.f32 %v4418_v11, %v4418_v11  ;;  %v5199_v63 = vmul.f32 %v4419_v50, %v4419_v50  ;;  %v5200_v35 = vmul.f32 %v4420_v26, %v4420_v26  ;;  %v13247_v47 = vld [vmem:[#allocation135_spill] sm:$0xff] }
 0x76c   : > { %v6289_v9 = vmin.f32 %v6288_v15, %v5973_v59  ;;  %v5201_v32 = vmul.f32 %v4421_v60, %v4421_v60  ;;  %v5710_v39 = vmul.f32 %v4686_v22, %v4686_v22  ;;  %v5711_v45 = vmul.f32 %v4687_v12, %v4687_v12 }
 0x76d   : > { %v5454_v33 = vadd.f32 %v5198_v8, %v4942_v55  ;;  %v5455_v34 = vadd.f32 %v5199_v63, %v4943_v61  ;;  %v5456_v46 = vadd.f32 %v5200_v35, %v4944_v48  ;;  %v5712_v57 = vmul.f32 %v4688_v3, %v4688_v3 }
 0x76e   : > { %6290 = vmin.xlane.f32.xlu2 %v6289_v9  ;;  %v5457_v52 = vadd.f32 %v5201_v32, %v4945_v5  ;;  %v5713_v40 = vmul.f32 %v4689_v14, %v4689_v14  ;;  %v4146_v37 = vsub.f32 %v13246_v2, %v9833_v16  ;;  %v4147_v56 = vsub.f32 %v13246_v2, %v9835_v36 }
 0x76f   : > { %v5966_v53 = vadd.f32 %v5710_v39, %v5454_v33  ;;  %v5967_v38 = vadd.f32 %v5711_v45, %v5455_v34  ;;  %v5968_v58 = vadd.f32 %v5712_v57, %v5456_v46  ;;  %v4148_v31 = vsub.f32 %v13246_v2, %v9841_v24  ;;  %v13249_v46 = vld [vmem:[#allocation3_spill] sm:$0xff] }
 0x770   : > { %v5969_v29 = vadd.f32 %v5713_v40, %v5457_v52  ;;  %v4149_v28 = vsub.f32 %v13246_v2, %v9847_v51  ;;  %v4414_v1 = vsub.f32 %v13247_v47, %v9858_v43  ;;  %v4415_v13 = vsub.f32 %v13247_v47, %v9860_v4  ;;  %v13250_v52 = vld [vmem:[#allocation10_spill] sm:$0xff] }
 0x771   : > { %v11955_v59 = vmin.f32 %v6424_v54, %v5966_v53  ;;  %v11957_v17 = vmin.f32 %v6493_v41, %v5967_v38  ;;  %v11959_v11 = vmin.f32 %v6562_v18, %v5968_v58  ;;  %v6282_v50 = vmin.f32 %v5966_v53, %v5967_v38  ;;  %v13251_v2 = vld [vmem:[#allocation82_spill] sm:$0xff]  ;;  %v11980_v53 = vpop.xlane.xlu1 %6090 }
 0x772   : > { %v11961_v26 = vmin.f32 %v6631_v44, %v5969_v29  ;;  %v4416_v60 = vsub.f32 %v13247_v47, %v9862_v7  ;;  %v4417_v30 = vsub.f32 %v13247_v47, %v9864_v62  ;;  %v4682_v22 = vsub.f32 %v13248_v0, %v9868_v6  ;;  %v11984_v47 = vpop.xlane.xlu0 %6085 }
 0x773   : > { %v6283_v12 = vmin.f32 %v6282_v50, %v5968_v58  ;;  %v4683_v54 = vsub.f32 %v13248_v0, %v9870_v21  ;;  %v4684_v41 = vsub.f32 %v13248_v0, %v13018_v49  ;;  %v4685_v18 = vsub.f32 %v13248_v0, %v9880_v27 }
 0x774   : > { %v4938_v44 = vmul.f32 %v4146_v37, %v4146_v37  ;;  %v4939_v3 = vmul.f32 %v4147_v56, %v4147_v56  ;;  %v4940_v14 = vmul.f32 %v4148_v31, %v4148_v31  ;;  %v4941_v15 = vmul.f32 %v4149_v28, %v4149_v28  ;;  %v11978_v56 = vpop.xlane.xlu2 %6095 }
 0x775   : > { %v6284_v55 = vmin.f32 %v6283_v12, %v5969_v29  ;;  %v5194_v61 = vmul.f32 %v4414_v1, %v4414_v1  ;;  %v5195_v48 = vmul.f32 %v4415_v13, %v4415_v13  ;;  %v5196_v5 = vmul.f32 %v4416_v60, %v4416_v60  ;;  %v13252_v29 = vld [vmem:[#allocation80_spill] sm:$0xff] }
 0x776   : > { %v5197_v8 = vmul.f32 %v4417_v30, %v4417_v30  ;;  %v5706_v63 = vmul.f32 %v4682_v22, %v4682_v22  ;;  %v5707_v35 = vmul.f32 %v4683_v54, %v4683_v54  ;;  %v5708_v9 = vmul.f32 %v4684_v41, %v4684_v41  ;;  %v13253_v22 = vld [vmem:[#allocation129_spill] sm:$0xff] }
 0x777   : > { %6285 = vmin.xlane.f32.xlu1 %v6284_v55  ;;  %v5450_v32 = vadd.f32 %v5194_v61, %v4938_v44  ;;  %v5451_v39 = vadd.f32 %v5195_v48, %v4939_v3  ;;  %v5452_v45 = vadd.f32 %v5196_v5, %v4940_v14  ;;  %v5709_v33 = vmul.f32 %v4685_v18, %v4685_v18 }
 0x778   : > { %v5453_v34 = vadd.f32 %v5197_v8, %v4941_v15  ;;  %v6321_v57 = vmin.f32 %v13249_v46, %v6081_v23  ;;  %v6320_v40 = vmin.f32 %v13250_v52, %v6076_v42  ;;  %v6319_v37 = vmin.f32 %v13251_v2, %v6071_v19 }
 0x779   : > { %v5962_v38 = vadd.f32 %v5706_v63, %v5450_v32  ;;  %v5963_v58 = vadd.f32 %v5707_v35, %v5451_v39  ;;  %v5964_v31 = vadd.f32 %v5708_v9, %v5452_v45  ;;  %v4162_v28 = vsub.f32 %v13252_v29, %v9833_v16  ;;  %v12020_v39 = vpop.xlane.xlu1 %6105 }
 0x77a   : > { %v5965_v1 = vadd.f32 %v5709_v33, %v5453_v34  ;;  %6677 = vst.msk [vmem:[%s7123_s11 + $0x98] sm:$0xff] %vm6657_vm5, %v6321_v57  ;;  %v4163_v23 = vsub.f32 %v13252_v29, %v9835_v36  ;;  %v4164_v42 = vsub.f32 %v13252_v29, %v9841_v24  ;;  %v4165_v19 = vsub.f32 %v13252_v29, %v9847_v51  ;;  %v12022_v57 = vpop.xlane.xlu0 %6100 }
 0x77b   : > { %v6426_v13 = vmin.f32 %v11955_v59, %v5962_v38  ;;  %v6495_v50 = vmin.f32 %v11957_v17, %v5963_v58  ;;  %v6564_v60 = vmin.f32 %v11959_v11, %v5964_v31  ;;  %v6277_v30 = vmin.f32 %v5962_v38, %v5963_v58  ;;  %6676 = vst.msk [vmem:[%s7123_s11 + $0x90] sm:$0xff] %vm6657_vm5, %v6320_v40  ;;  %v13254_v11 = vld [vmem:[#allocation192_spill] sm:$0xff] }
 0x77c   : > { %v6633_v0 = vmin.f32 %v11961_v26, %v5965_v1  ;;  %6675 = vst.msk [vmem:[%s7123_s11 + $0x88] sm:$0xff] %vm6657_vm5, %v6319_v37  ;;  %v4430_v12 = vsub.f32 %v13253_v22, %v9858_v43  ;;  %v4431_v54 = vsub.f32 %v13253_v22, %v9860_v4  ;;  %v4432_v59 = vsub.f32 %v13253_v22, %v9862_v7  ;;  %v12018_v32 = vpop.xlane.xlu2 %6110  ;;  %v13255_v37 = vld [vmem:[#allocation68_spill] sm:$0xff] }
 0x77d   : > { %v6278_v41 = vmin.f32 %v6277_v30, %v5964_v31  ;;  %v4433_v17 = vsub.f32 %v13253_v22, %v9864_v62  ;;  %v4698_v18 = vsub.f32 %v13254_v11, %v9868_v6  ;;  %v4699_v26 = vsub.f32 %v13254_v11, %v9870_v21 }
 0x77e   : > { %v4700_v44 = vsub.f32 %v13254_v11, %v13018_v49  ;;  %v4701_v3 = vsub.f32 %v13254_v11, %v9880_v27  ;;  %v4954_v14 = vmul.f32 %v4162_v28, %v4162_v28  ;;  %v4955_v15 = vmul.f32 %v4163_v23, %v4163_v23 }
 0x77f   : > { %v6279_v55 = vmin.f32 %v6278_v41, %v5965_v1  ;;  %v4956_v61 = vmul.f32 %v4164_v42, %v4164_v42  ;;  %v4957_v48 = vmul.f32 %v4165_v19, %v4165_v19  ;;  %v5210_v5 = vmul.f32 %v4430_v12, %v4430_v12  ;;  %v13256_v19 = vld [vmem:[#allocation138_spill] sm:$0xff] }
 0x780   : > { %v5211_v8 = vmul.f32 %v4431_v54, %v4431_v54  ;;  %v5212_v63 = vmul.f32 %v4432_v59, %v4432_v59  ;;  %v5213_v35 = vmul.f32 %v4433_v17, %v4433_v17  ;;  %v5722_v9 = vmul.f32 %v4698_v18, %v4698_v18  ;;  %v13257_v41 = vld [vmem:[#allocation190_spill] sm:$0xff] }
 0x781   : > { %6280 = vmin.xlane.f32.xlu0 %v6279_v55  ;;  %v5466_v45 = vadd.f32 %v5210_v5, %v4954_v14  ;;  %v5723_v33 = vmul.f32 %v4699_v26, %v4699_v26  ;;  %v5724_v34 = vmul.f32 %v4700_v44, %v4700_v44  ;;  %v5725_v46 = vmul.f32 %v4701_v3, %v4701_v3 }
 0x782   : > { %v5467_v52 = vadd.f32 %v5211_v8, %v4955_v15  ;;  %v5468_v40 = vadd.f32 %v5212_v63, %v4956_v61  ;;  %v5469_v2 = vadd.f32 %v5213_v35, %v4957_v48  ;;  %v4158_v38 = vsub.f32 %v13255_v37, %v9833_v16  ;;  %v13258_v63 = vld [vmem:[#allocation11_spill] sm:$0xff] }
 0x783   : > { %v5978_v58 = vadd.f32 %v5722_v9, %v5466_v45  ;;  %v4159_v31 = vsub.f32 %v13255_v37, %v9835_v36  ;;  %v4160_v29 = vsub.f32 %v13255_v37, %v9841_v24  ;;  %v4161_v28 = vsub.f32 %v13255_v37, %v9847_v51  ;;  %v13259_v9 = vld [vmem:[#allocation7_spill] sm:$0xff]  ;;  %v13261_v37 = vld [vmem:[#allocation144_spill] sm:$0xff] }
 0x784   : > { %v5979_v1 = vadd.f32 %v5723_v33, %v5467_v52  ;;  %v5980_v23 = vadd.f32 %v5724_v34, %v5468_v40  ;;  %v5981_v42 = vadd.f32 %v5725_v46, %v5469_v2  ;;  %v4426_v30 = vsub.f32 %v13256_v19, %v9858_v43  ;;  %v13260_v52 = vld [vmem:[#allocation140_spill] sm:$0xff] }
 0x785   : > { %v6427_v22 = vmin.f32 %v6426_v13, %v5978_v58  ;;  %v4427_v16 = vsub.f32 %v13256_v19, %v9860_v4  ;;  %v4428_v12 = vsub.f32 %v13256_v19, %v9862_v7  ;;  %v4429_v36 = vsub.f32 %v13256_v19, %v9864_v62 }
 0x786   : > { %v6496_v24 = vmin.f32 %v6495_v50, %v5979_v1  ;;  %v6565_v54 = vmin.f32 %v6564_v60, %v5980_v23  ;;  %v6634_v59 = vmin.f32 %v6633_v0, %v5981_v42  ;;  %v6297_v51 = vmin.f32 %v5978_v58, %v5979_v1  ;;  %v6126_v50 = vpop.xlane.xlu2 %6125  ;;  %v6121_v60 = vpop.xlane.xlu1 %6120  ;;  %v13262_v58 = vld [vmem:[#allocation13_spill] sm:$0xff] }
 0x787   : > { %v4694_v17 = vsub.f32 %v13257_v41, %v9868_v6  ;;  %v4695_v43 = vsub.f32 %v13257_v41, %v9870_v21  ;;  %v4696_v13 = vsub.f32 %v13257_v41, %v13018_v49  ;;  %v4697_v4 = vsub.f32 %v13257_v41, %v9880_v27  ;;  %v6116_v6 = vpop.xlane.xlu0 %6115  ;;  %v13267_v41 = vld [vmem:[#allocation139_spill] sm:$0xff] }
 0x788   : > { %v6298_v7 = vmin.f32 %v6297_v51, %v5980_v23  ;;  %v4950_v11 = vmul.f32 %v4158_v38, %v4158_v38  ;;  %v4951_v18 = vmul.f32 %v4159_v31, %v4159_v31  ;;  %v4952_v62 = vmul.f32 %v4160_v29, %v4160_v29 }
 0x789   : > { %v4953_v0 = vmul.f32 %v4161_v28, %v4161_v28  ;;  %v5206_v26 = vmul.f32 %v4426_v30, %v4426_v30  ;;  %v5207_v44 = vmul.f32 %v4427_v16, %v4427_v16  ;;  %v5208_v3 = vmul.f32 %v4428_v12, %v4428_v12 }
 0x78a   : > { %v6299_v14 = vmin.f32 %v6298_v7, %v5981_v42  ;;  %v5209_v15 = vmul.f32 %v4429_v36, %v4429_v36  ;;  %v5718_v21 = vmul.f32 %v4694_v17, %v4694_v17  ;;  %v5719_v55 = vmul.f32 %v4695_v43, %v4695_v43  ;;  %v13264_v42 = vld [vmem:[#allocation134_spill] sm:$0xff] }
 0x78b   : > { %v5462_v49 = vadd.f32 %v5206_v26, %v4950_v11  ;;  %v5463_v61 = vadd.f32 %v5207_v44, %v4951_v18  ;;  %v5464_v48 = vadd.f32 %v5208_v3, %v4952_v62  ;;  %v5720_v27 = vmul.f32 %v4696_v13, %v4696_v13  ;;  %v13268_v18 = vld [vmem:[#allocation4_spill] sm:$0xff]  ;;  %v13269_v26 = vld [vmem:[#allocation85_spill] sm:$0xff] }
 0x78c   : > { %6300 = vmin.xlane.f32.xlu1 %v6299_v14  ;;  %v5465_v5 = vadd.f32 %v5209_v15, %v4953_v0  ;;  %v5721_v8 = vmul.f32 %v4697_v4, %v4697_v4  ;;  %v6324_v35 = vmin.f32 %v13258_v63, %v11978_v56  ;;  %v6323_v45 = vmin.f32 %v13259_v9, %v11980_v53  ;;  %v13263_v56 = vld [vmem:[#allocation137_spill] sm:$0xff] }
 0x78d   : > { %v5974_v33 = vadd.f32 %v5718_v21, %v5462_v49  ;;  %v5975_v34 = vadd.f32 %v5719_v55, %v5463_v61  ;;  %v5976_v46 = vadd.f32 %v5720_v27, %v5464_v48  ;;  %v6322_v40 = vmin.f32 %v13260_v52, %v11984_v47  ;;  %v13271_v9 = vld [vmem:[#allocation17_spill] sm:$0xff] }
 0x78e   : > { %v5977_v2 = vadd.f32 %v5721_v8, %v5465_v5  ;;  %6680 = vst.msk [vmem:[%s7123_s11 + $0xb0] sm:$0xff] %vm6657_vm5, %v6324_v35  ;;  %v6327_v38 = vmin.f32 %v13261_v37, %v12018_v32  ;;  %v6326_v31 = vmin.f32 %v13262_v58, %v12020_v39  ;;  %v6325_v29 = vmin.f32 %v13263_v56, %v12022_v57  ;;  %v13265_v32 = vld [vmem:[#allocation14_spill] sm:$0xff]  ;;  %v6141_v16 = vpop.xlane.xlu2 %6140  ;;  %v6136_v39 = vpop.xlane.xlu1 %6135  ;;  %v13270_v5 = vld [vmem:[#allocation147_spill] sm:$0xff] }
 0x78f   : > { %v6428_v53 = vmin.f32 %v6427_v22, %v5974_v33  ;;  %v6497_v28 = vmin.f32 %v6496_v24, %v5975_v34  ;;  %v6566_v1 = vmin.f32 %v6565_v54, %v5976_v46  ;;  %v6292_v23 = vmin.f32 %v5974_v33, %v5975_v34  ;;  %6679 = vst.msk [vmem:[%s7123_s11 + $0xa8] sm:$0xff] %vm6657_vm5, %v6323_v45  ;;  %v6131_v24 = vpop.xlane.xlu0 %6130  ;;  %v13272_v33 = vld [vmem:[#allocation88_spill] sm:$0xff] }
 0x790   : > { %v6635_v47 = vmin.f32 %v6634_v59, %v5977_v2  ;;  %6678 = vst.msk [vmem:[%s7123_s11 + $0xa0] sm:$0xff] %vm6657_vm5, %v6322_v40  ;;  %v6330_v19 = vmin.f32 %v13264_v42, %v6126_v50  ;;  %v6329_v30 = vmin.f32 %v13265_v32, %v6121_v60  ;;  %v13266_v59 = vld [vmem:[#allocation84_spill] sm:$0xff]  ;;  %v6333_v17 = vmin.f32 %v13267_v41, %v6141_v16  ;;  %v13274_v42 = vld [vmem:[#allocation18_spill] sm:$0xff]  ;;  %v13275_v16 = vld [vmem:[#allocation79_spill] sm:$0xff] }
 0x791   : > { %v6293_v12 = vmin.f32 %v6292_v23, %v5976_v46  ;;  %v6429_v57 = vrot.slane %v6428_v53, 4  ;;  %v6498_v22 = vrot.slane %v6497_v28, 4  ;;  %v6567_v36 = vrot.slane %v6566_v1, 4  ;;  %6683 = vst.msk [vmem:[%s7123_s11 + $0xc8] sm:$0xff] %vm6657_vm5, %v6327_v38  ;;  %v13273_v23 = vld [vmem:[#allocation142_spill] sm:$0xff] }
 0x792   : > { %v6636_v54 = vrot.slane %v6635_v47, 4  ;;  %6682 = vst.msk [vmem:[%s7123_s11 + $0xc0] sm:$0xff] %vm6657_vm5, %v6326_v31  ;;  %v6328_v51 = vmin.f32 %v13266_v59, %v6116_v6  ;;  %v6332_v62 = vmin.f32 %v13268_v18, %v6136_v39  ;;  %v6331_v44 = vmin.f32 %v13269_v26, %v6131_v24  ;;  %v6907_v31 = vld [vmem:[%s7141_s25 + $0x4] sm:$0xf] }
 0x793   : > { %v6294_v43 = vmin.f32 %v6293_v12, %v5977_v2  ;;  %v6430_v13 = vmin.f32 %v6428_v53, %v6429_v57  ;;  %v6499_v4 = vmin.f32 %v6497_v28, %v6498_v22  ;;  %v6568_v7 = vmin.f32 %v6566_v1, %v6567_v36  ;;  %6681 = vst.msk [vmem:[%s7123_s11 + $0xb8] sm:$0xff] %vm6657_vm5, %v6325_v29  ;;  %v13277_v36 = vld [vmem:[#allocation141_spill] sm:$0xff] }
 0x794   : > { %v6637_v11 = vmin.f32 %v6635_v47, %v6636_v54  ;;  %6686 = vst.msk [vmem:[%s7123_s11 + $0xe0] sm:$0xff] %vm6657_vm5, %v6330_v19 }
 0x795   : > { %v6431_v50 = vrot.slane %v6430_v13, 2  ;;  %v6500_v60 = vrot.slane %v6499_v4, 2  ;;  %v6569_v0 = vrot.slane %v6568_v7, 2  ;;  %6295 = vmin.xlane.f32.xlu0 %v6294_v43  ;;  %6685 = vst.msk [vmem:[%s7123_s11 + $0xd8] sm:$0xff] %vm6657_vm5, %v6329_v30 }
 0x796   : > { %v6638_v3 = vrot.slane %v6637_v11, 2  ;;  %6684 = vst.msk [vmem:[%s7123_s11 + $0xd0] sm:$0xff] %vm6657_vm5, %v6328_v51  ;;  %v6156_v55 = vpop.xlane.xlu2 %6155  ;;  %v6151_v49 = vpop.xlane.xlu1 %6150  ;;  %v13278_v51 = vld [vmem:[#allocation87_spill] sm:$0xff] }
 0x797   : > { %v6432_v6 = vmin.f32 %v6430_v13, %v6431_v50  ;;  %v6501_v14 = vmin.f32 %v6499_v4, %v6500_v60  ;;  %v6570_v15 = vmin.f32 %v6568_v7, %v6569_v0  ;;  %6689 = vst.msk [vmem:[%s7123_s11 + $0xf8] sm:$0xff] %vm6657_vm5, %v6333_v17  ;;  %v6336_v8 = vmin.f32 %v13270_v5, %v6156_v55  ;;  %v6146_v63 = vpop.xlane.xlu0 %6145  ;;  %v13279_v13 = vld [vmem:[#allocation149_spill] sm:$0xff]  ;;  %v13282_v0 = vld [vmem:[#allocation90_spill] sm:$0xff] }
 0x798   : > { %v6639_v21 = vmin.f32 %v6637_v11, %v6638_v3  ;;  %6688 = vst.msk [vmem:[%s7123_s11 + $0xf0] sm:$0xff] %vm6657_vm5, %v6332_v62  ;;  %v6335_v45 = vmin.f32 %v13271_v9, %v6151_v49  ;;  %v6334_v34 = vmin.f32 %v13272_v33, %v6146_v63  ;;  %v13280_v7 = vld [vmem:[#allocation145_spill] sm:$0xff]  ;;  %v13285_v49 = vld [vmem:[#allocation94_spill] sm:$0xff] }
 0x799   : > { %v6433_v61 = vrot.slane %v6432_v6, 1  ;;  %v6502_v48 = vrot.slane %v6501_v14, 1  ;;  %v6571_v27 = vrot.slane %v6570_v15, 1  ;;  %6687 = vst.msk [vmem:[%s7123_s11 + $0xe8] sm:$0xff] %vm6657_vm5, %v6331_v44  ;;  %v13283_v44 = vld [vmem:[#allocation143_spill] sm:$0xff] }
 0x79a   : > { %v6640_v35 = vrot.slane %v6639_v21, 1  ;;  %6692 = vst.msk [vmem:[%s7123_s11 + $0x110] sm:$0xff] %vm6657_vm5, %v6336_v8  ;;  %v13287_v8 = vld [vmem:[#allocation5_spill] sm:$0xff] }
 0x79b   : > { %v6434_v46 = vmin.f32 %v6432_v6, %v6433_v61  ;;  %v6503_v52 = vmin.f32 %v6501_v14, %v6502_v48  ;;  %v6572_v40 = vmin.f32 %v6570_v15, %v6571_v27  ;;  %6691 = vst.msk [vmem:[%s7123_s11 + $0x108] sm:$0xff] %vm6657_vm5, %v6335_v45  ;;  %v13284_v14 = vld [vmem:[#allocation81_spill] sm:$0xff]  ;;  %v13288_v45 = vld [vmem:[#allocation83_spill] sm:$0xff] }
 0x79c   : > { %v6641_v2 = vmin.f32 %v6639_v21, %v6640_v35  ;;  %6690 = vst.msk [vmem:[%s7123_s11 + $0x100] sm:$0xff] %vm6657_vm5, %v6334_v34  ;;  %v13286_v48 = vld [vmem:[#allocation21_spill] sm:$0xff]  ;;  %v13289_v34 = vld [vmem:[#allocation148_spill] sm:$0xff] }
 0x79d   : > { %v6648_v37 = vrot.slane %v6503_v52, 7  ;;  %v6649_v38 = vrot.slane %v6572_v40, 6  ;;  %v13290_v40 = vld [vmem:[#allocation23_spill] sm:$0xff] }
 0x79e   : > { %v6650_v58 = vrot.slane %v6641_v2, 5  ;;  %v6171_v53 = vpop.xlane.xlu2 %6170  ;;  %v6166_v28 = vpop.xlane.xlu1 %6165 }
 0x79f   : > { %v6651_v56 = vsel %vm3880_vm1, %v6434_v46, %v6648_v37  ;;  %v6339_v47 = vmin.f32 %v13273_v23, %v6171_v53  ;;  %v6338_v19 = vmin.f32 %v13274_v42, %v6166_v28  ;;  %v6161_v32 = vpop.xlane.xlu0 %6160  ;;  %v13293_v28 = vld [vmem:[#allocation24_spill] sm:$0xff] }
 0x7a0   : > { %v6652_v29 = vsel %vm3882_vm2, %v6649_v38, %v6650_v58  ;;  %v6337_v39 = vmin.f32 %v13275_v16, %v6161_v32  ;;  %v13291_v58 = vld [vmem:[#allocation93_spill] sm:$0xff]  ;;  %v13294_v42 = vld [vmem:[#allocation96_spill] sm:$0xff]  ;;  %v13295_v32 = vld [vmem:[#allocation27_spill] sm:$0xff] }
 0x7a1   : > { %v6653_v1 = vsel %vm3884_vm3, %v6651_v56, %v6652_v29  ;;  %6695 = vst.msk [vmem:[%s7123_s11 + $0x128] sm:$0xff] %vm6657_vm5, %v6339_v47  ;;  %v13292_v56 = vld [vmem:[#allocation146_spill] sm:$0xff] }
 0x7a2   : > { %v6655_v30 = vmin.f32 %v6907_v31, %v6653_v1  ;;  %6694 = vst.msk [vmem:[%s7123_s11 + $0x120] sm:$0xff] %vm6657_vm5, %v6338_v19 }
 0x7a3   : > { %6693 = vst.msk [vmem:[%s7123_s11 + $0x118] sm:$0xff] %vm6657_vm5, %v6337_v39  ;;  %v13296_v39 = vld [vmem:[#allocation6_spill] sm:$0xff] }
 0x7a4   : > { %6908 = vst.msk [vmem:[%s7141_s25 + $0x4] sm:$0xf] %vm10001_vm4, %v6655_v30 }
 0x7a6   : > { %v6186_v57 = vpop.xlane.xlu2 %6185  ;;  %v6181_v22 = vpop.xlane.xlu1 %6180 }
 0x7a7   : > { %v6342_v24 = vmin.f32 %v13277_v36, %v6186_v57  ;;  %v6341_v54 = vmin.f32 %v11152_v10, %v6181_v22  ;;  %v6176_v59 = vpop.xlane.xlu0 %6175  ;;  %v13281_v10 = vld [vmem:[#allocation91_spill] sm:$0xff]  ;;  %v13297_v22 = vld [vmem:[#allocation86_spill] sm:$0xff] }
 0x7a8   : > { %v6340_v41 = vmin.f32 %v13278_v51, %v6176_v59  ;;  %v13298_v51 = vld [vmem:[#allocation29_spill] sm:$0xff] }
 0x7a9   : > { %6698 = vst.msk [vmem:[%s7123_s11 + $0x140] sm:$0xff] %vm6657_vm5, %v6342_v24 }
 0x7aa   : > { %6697 = vst.msk [vmem:[%s7123_s11 + $0x138] sm:$0xff] %vm6657_vm5, %v6341_v54 }
 0x7ab   : > { %6696 = vst.msk [vmem:[%s7123_s11 + $0x130] sm:$0xff] %vm6657_vm5, %v6340_v41 }
 0x7ae   : > { %v6201_v17 = vpop.xlane.xlu2 %6200  ;;  %v6196_v43 = vpop.xlane.xlu1 %6195 }
 0x7af   : > { %v6345_v4 = vmin.f32 %v13279_v13, %v6201_v17  ;;  %v6344_v11 = vmin.f32 %v13280_v7, %v6196_v43  ;;  %v6191_v18 = vpop.xlane.xlu0 %6190 }
 0x7b0   : > { %v6343_v62 = vmin.f32 %v13281_v10, %v6191_v18 }
 0x7b1   : > { %6701 = vst.msk [vmem:[%s7123_s11 + $0x158] sm:$0xff] %vm6657_vm5, %v6345_v4  ;;  %v13299_v4 = vld [vmem:[#allocation30_spill] sm:$0xff] }
 0x7b2   : > { %6700 = vst.msk [vmem:[%s7123_s11 + $0x150] sm:$0xff] %vm6657_vm5, %v6344_v11 }
 0x7b3   : > { %6699 = vst.msk [vmem:[%s7123_s11 + $0x148] sm:$0xff] %vm6657_vm5, %v6343_v62 }
 0x7b6   : > { %v6216_v50 = vpop.xlane.xlu2 %6215  ;;  %v6211_v60 = vpop.xlane.xlu1 %6210 }
 0x7b7   : > { %v6348_v26 = vmin.f32 %v13282_v0, %v6216_v50  ;;  %v6347_v3 = vmin.f32 %v13283_v44, %v6211_v60  ;;  %v6206_v6 = vpop.xlane.xlu0 %6205 }
 0x7b8   : > { %v6346_v15 = vmin.f32 %v13284_v14, %v6206_v6 }
 0x7b9   : > { %6704 = vst.msk [vmem:[%s7123_s11 + $0x170] sm:$0xff] %vm6657_vm5, %v6348_v26 }
 0x7ba   : > { %6703 = vst.msk [vmem:[%s7123_s11 + $0x168] sm:$0xff] %vm6657_vm5, %v6347_v3 }
 0x7bb   : > { %6702 = vst.msk [vmem:[%s7123_s11 + $0x160] sm:$0xff] %vm6657_vm5, %v6346_v15 }
 0x7be   : > { %v6231_v21 = vpop.xlane.xlu2 %6230  ;;  %v6226_v55 = vpop.xlane.xlu1 %6225 }
 0x7bf   : > { %v6351_v61 = vmin.f32 %v13285_v49, %v6231_v21  ;;  %v6350_v27 = vmin.f32 %v13286_v48, %v6226_v55  ;;  %v6221_v5 = vpop.xlane.xlu0 %6220 }
 0x7c0   : > { %v6349_v63 = vmin.f32 %v13287_v8, %v6221_v5 }
 0x7c1   : > { %6707 = vst.msk [vmem:[%s7123_s11 + $0x188] sm:$0xff] %vm6657_vm5, %v6351_v61 }
 0x7c2   : > { %6706 = vst.msk [vmem:[%s7123_s11 + $0x180] sm:$0xff] %vm6657_vm5, %v6350_v27 }
 0x7c3   : > { %6705 = vst.msk [vmem:[%s7123_s11 + $0x178] sm:$0xff] %vm6657_vm5, %v6349_v63 }
 0x7c6   : > { %v6246_v35 = vpop.xlane.xlu2 %6245  ;;  %v6241_v9 = vpop.xlane.xlu1 %6240 }
 0x7c7   : > { %v6354_v33 = vmin.f32 %v13288_v45, %v6246_v35  ;;  %v6353_v46 = vmin.f32 %v13289_v34, %v6241_v9  ;;  %v6236_v52 = vpop.xlane.xlu0 %6235 }
 0x7c8   : > { %v6352_v2 = vmin.f32 %v13290_v40, %v6236_v52 }
 0x7c9   : > { %6710 = vst.msk [vmem:[%s7123_s11 + $0x1a0] sm:$0xff] %vm6657_vm5, %v6354_v33 }
 0x7ca   : > { %6709 = vst.msk [vmem:[%s7123_s11 + $0x198] sm:$0xff] %vm6657_vm5, %v6353_v46 }
 0x7cb   : > { %6708 = vst.msk [vmem:[%s7123_s11 + $0x190] sm:$0xff] %vm6657_vm5, %v6352_v2 }
 0x7ce   : > { %v6261_v37 = vpop.xlane.xlu2 %6260  ;;  %v6256_v38 = vpop.xlane.xlu1 %6255 }
 0x7cf   : > { %v6357_v31 = vmin.f32 %v13291_v58, %v6261_v37  ;;  %v6356_v29 = vmin.f32 %v13292_v56, %v6256_v38  ;;  %v6251_v53 = vpop.xlane.xlu0 %6250 }
 0x7d0   : > { %v6355_v1 = vmin.f32 %v13293_v28, %v6251_v53 }
 0x7d1   : > { %6713 = vst.msk [vmem:[%s7123_s11 + $0x1b8] sm:$0xff] %vm6657_vm5, %v6357_v31 }
 0x7d2   : > { %6712 = vst.msk [vmem:[%s7123_s11 + $0x1b0] sm:$0xff] %vm6657_vm5, %v6356_v29 }
 0x7d3   : > { %6711 = vst.msk [vmem:[%s7123_s11 + $0x1a8] sm:$0xff] %vm6657_vm5, %v6355_v1 }
 0x7d6   : > { %v6276_v23 = vpop.xlane.xlu2 %6275  ;;  %v6271_v47 = vpop.xlane.xlu1 %6270 }
 0x7d7   : > { %v6360_v19 = vmin.f32 %v13294_v42, %v6276_v23  ;;  %v6359_v30 = vmin.f32 %v13295_v32, %v6271_v47  ;;  %v6266_v16 = vpop.xlane.xlu0 %6265 }
 0x7d8   : > { %v6358_v12 = vmin.f32 %v13296_v39, %v6266_v16 }
 0x7d9   : > { %6716 = vst.msk [vmem:[%s7123_s11 + $0x1d0] sm:$0xff] %vm6657_vm5, %v6360_v19 }
 0x7da   : > { %6715 = vst.msk [vmem:[%s7123_s11 + $0x1c8] sm:$0xff] %vm6657_vm5, %v6359_v30 }
 0x7db   : > { %6714 = vst.msk [vmem:[%s7123_s11 + $0x1c0] sm:$0xff] %vm6657_vm5, %v6358_v12 }
 0x7e1   : > { %v6291_v57 = vpop.xlane.xlu2 %6290 }
 0x7e2   : > { %v6363_v36 = vmin.f32 %v13297_v22, %v6291_v57 }
 0x7e4   : > { %6719 = vst.msk [vmem:[%s7123_s11 + $0x1e8] sm:$0xff] %vm6657_vm5, %v6363_v36 }
 0x7ea   : > { %v6286_v24 = vpop.xlane.xlu1 %6285 }
 0x7eb   : > { %v6362_v54 = vmin.f32 %v11414_v25, %v6286_v24 }
 0x7ed   : > { %6718 = vst.msk [vmem:[%s7123_s11 + $0x1e0] sm:$0xff] %vm6657_vm5, %v6362_v54 }
 0x7f4   : > { %v6281_v59 = vpop.xlane.xlu0 %6280 }
 0x7f5   : > { %v6361_v41 = vmin.f32 %v13298_v51, %v6281_v59 }
 0x7f7   : > { %6717 = vst.msk [vmem:[%s7123_s11 + $0x1d8] sm:$0xff] %vm6657_vm5, %v6361_v41 }
 0x7ff   : > { %v6301_v17 = vpop.xlane.xlu1 %6300 }
 0x800   : > { %v6365_v43 = vmin.f32 %v11448_v20, %v6301_v17 }
 0x802   : > { %6721 = vst.msk [vmem:[%s7123_s11 + $0x1f8] sm:$0xff] %vm6657_vm5, %v6365_v43 }
 0x808   : > { %v6296_v13 = vpop.xlane.xlu0 %6295 }
 0x809   : > { %v6364_v7 = vmin.f32 %v13299_v4, %v6296_v13 }
 0x80b   : > { %6720 = vst.msk [vmem:[%s7123_s11 + $0x1f0] sm:$0xff] %vm6657_vm5, %v6364_v7 }
 0x80c PF: > { %s14_s18 = sadd.s32 1, %s7035_s18   ;;  %s13300_s12 = smov %s7023_s15 }
 0x80d   : > { %p11_p10 = scmp.ge.s32.totalorder %s14_s18, 10   ;;  %s13301_s13 = smov %s7027_s16 }
 0x80e   : > { %s13302_s14 = smov %s7031_s17  ;;  %s13303_s15 = smov %s13307_s19 }
 0x80f   : > { %s13304_s16 = smov %s13311_s20  ;;  %s13305_s17 = smov %s13315_s21 }
 0x810   :  { %13 = sbr.rel (!%p11_p10) target bundleno = 4 (0x4), region = 79 }

</bundles_post_ra>
